<compile_context>
chip_gen: v7x
topology: tpu7x:2x2x1
jax: 0.10.0
libtpu: 0.0.40
codegen_flags: <defaults>
</compile_context>

<pallas_src>
import functools

import jax
import jax.numpy as jnp
from jax.experimental import pallas as pl
from jax.experimental.pallas import tpu as pltpu


_LANES = 128


def _round_up(x, m):
    return (x + m - 1) // m * m


def _pick_divisor_tile(total, candidates):
    """Largest candidate that divides `total`, else the full extent."""
    for t in candidates:
        if total >= t and total % t == 0:
            return t
    return total


@functools.lru_cache(maxsize=1)
def _vmem_limit_bytes():
    # Generation-aware scoped-VMEM limit: ~3/4 of physical, capped at 96 MiB.
    #   v7x:   64 MiB physical -> 48 MiB
    #   v5e/6e: 128 MiB physical -> 96 MiB
    try:
        cap = int(pltpu.get_tpu_info().vmem_capacity_bytes)
        if cap > 0:
            return max(32 * 1024 * 1024, min(cap * 3 // 4, 96 * 1024 * 1024))
    except Exception:
        pass
    return 48 * 1024 * 1024


# ----------------------------------------------------------------------------
# Kernel 1: conv GEMM (bf16 x bf16 -> f32 accumulate on the MXU) with the
# BatchNorm batch-statistics reduction fused into the epilogue.
# ----------------------------------------------------------------------------
def _gemm_stats_kernel(a_ref, b_ref, y_ref, sum_ref, ssq_ref):
    y = jnp.dot(a_ref[...], b_ref[...], preferred_element_type=jnp.float32)
    y_ref[...] = y.astype(y_ref.dtype)
    # Per-tile column statistics, computed from the f32 accumulator (exact
    # regardless of the y storage dtype).
    s = jnp.sum(y, axis=0, keepdims=True)        # [1, Cp]
    q = jnp.sum(y * y, axis=0, keepdims=True)    # [1, Cp]
    # (8, Cp) stats block: row 0 carries the value, rows 1..7 are broadcast
    # copies (full-block store keeps the write unmasked on the sublane dim).
    sum_ref[...] = jnp.broadcast_to(s, sum_ref.shape)
    ssq_ref[...] = jnp.broadcast_to(q, ssq_ref.shape)


def pallas_gemm_with_stats(a, b, *, tm, y_dtype):
    """a: [Mp, Kp] bf16, b: [Kp, Cp] bf16 -> (y, per-tile col sums, sumsq)."""
    Mp, K = a.shape
    K2, Cp = b.shape
    assert K == K2 and Mp % tm == 0, (a.shape, b.shape, tm)
    n_mt = Mp // tm
    return pl.pallas_call(
        _gemm_stats_kernel,
        out_shape=(
            jax.ShapeDtypeStruct((Mp, Cp), y_dtype),
            jax.ShapeDtypeStruct((n_mt * 8, Cp), jnp.float32),
            jax.ShapeDtypeStruct((n_mt * 8, Cp), jnp.float32),
        ),
        grid=(n_mt,),
        in_specs=[
            # full-K A tile (K is never tiled, so no accumulator phases)
            pl.BlockSpec((tm, K), lambda i: (i, 0)),
            # whole weight, resident and single-buffered (constant index_map)
            pl.BlockSpec((K, Cp), lambda i: (0, 0),
                         pipeline_mode=pl.Buffered(1)),
        ],
        out_specs=(
            pl.BlockSpec((tm, Cp), lambda i: (i, 0)),
            pl.BlockSpec((8, Cp), lambda i: (i, 0)),
            pl.BlockSpec((8, Cp), lambda i: (i, 0)),
        ),
        compiler_params=pltpu.CompilerParams(
            dimension_semantics=("parallel",),
            vmem_limit_bytes=_vmem_limit_bytes(),
        ),
    )(a, b)


# ----------------------------------------------------------------------------
# Kernel 2: BatchNorm scale/shift + ReLU (lane-dense full-extent C block).
# ----------------------------------------------------------------------------
def _bn_relu_kernel(y_ref, scale_ref, shift_ref, o_ref):
    y = y_ref[...].astype(jnp.float32)
    z = jnp.maximum(y * scale_ref[...] + shift_ref[...], 0.0)
    o_ref[...] = z.astype(o_ref.dtype)


def pallas_bn_relu(y, scale, shift, *, out_dtype):
    """y: [Mp, Cp], scale/shift: [Cp] -> relu(y*scale + shift) in out_dtype."""
    Mp, Cp = y.shape
    tm = _pick_divisor_tile(Mp, (2048, 1024, 512, 256))
    return pl.pallas_call(
        _bn_relu_kernel,
        out_shape=jax.ShapeDtypeStruct((Mp, Cp), out_dtype),
        grid=(Mp // tm,),
        in_specs=[
            pl.BlockSpec((tm, Cp), lambda i: (i, 0)),
            pl.BlockSpec((1, Cp), lambda i: (0, 0)),
            pl.BlockSpec((1, Cp), lambda i: (0, 0)),
        ],
        out_specs=pl.BlockSpec((tm, Cp), lambda i: (i, 0)),
        compiler_params=pltpu.CompilerParams(
            dimension_semantics=("parallel",),
            vmem_limit_bytes=_vmem_limit_bytes(),
        ),
    )(y,
      scale.reshape(1, Cp).astype(jnp.float32),
      shift.reshape(1, Cp).astype(jnp.float32))


# ----------------------------------------------------------------------------
# Kernel 3: MaxPool2d(3, stride=2) as a 9-way elementwise max (VPU only).
# The 9 stride-2 taps are passed as 9 separate lane-dense [rows, 128] inputs,
# tiled over rows (no 9x staging stack, no cross-sublane reduce).
# ----------------------------------------------------------------------------
def _max9_kernel(t0_ref, t1_ref, t2_ref, t3_ref, t4_ref, t5_ref, t6_ref,
                 t7_ref, t8_ref, o_ref):
    m = jnp.maximum(t0_ref[...], t1_ref[...])
    m = jnp.maximum(m, t2_ref[...])
    m = jnp.maximum(m, t3_ref[...])
    m = jnp.maximum(m, t4_ref[...])
    m = jnp.maximum(m, t5_ref[...])
    m = jnp.maximum(m, t6_ref[...])
    m = jnp.maximum(m, t7_ref[...])
    m = jnp.maximum(m, t8_ref[...])
    o_ref[...] = m


def maxpool3x3_stride2_nhwc(x):
    """x: [N, H, W, C] -> [N, OH, OW, C] with OH = (H-3)//2 + 1."""
    N, H, W, C = x.shape
    OH = (H - 3) // 2 + 1
    OW = (W - 3) // 2 + 1
    P = N * OH * OW * C
    rows = _round_up(pl.cdiv(P, _LANES), 8)
    Pp = rows * _LANES
    tr = _pick_divisor_tile(rows, (2048, 1024, 512, 256, 128, 64, 32, 16, 8))

    taps = []
    for kh in range(3):
        for kw in range(3):
            t = x[:, kh:kh + 2 * OH - 1:2, kw:kw + 2 * OW - 1:2, :].reshape(-1)
            taps.append(jnp.pad(t, (0, Pp - P)).reshape(rows, _LANES))

    out = pl.pallas_call(
        _max9_kernel,
        out_shape=jax.ShapeDtypeStruct((rows, _LANES), x.dtype),
        grid=(rows // tr,),
        in_specs=[pl.BlockSpec((tr, _LANES), lambda i: (i, 0))
                  for _ in range(9)],
        out_specs=pl.BlockSpec((tr, _LANES), lambda i: (i, 0)),
        compiler_params=pltpu.CompilerParams(
            dimension_semantics=("parallel",),
            vmem_limit_bytes=_vmem_limit_bytes(),
        ),
    )(*taps)
    return out.reshape(-1)[:P].reshape(N, OH, OW, C)


# ----------------------------------------------------------------------------
# im2col in NHWC (K ordering = (kh, kw, cin), cin fastest).
# ----------------------------------------------------------------------------
def _im2col_nhwc(x, kh, kw, stride, padding):
    N, H, W, C = x.shape
    ph, pw = padding if isinstance(padding, tuple) else (padding, padding)
    OH = (H - kh + 2 * ph) // stride + 1
    OW = (W - kw + 2 * pw) // stride + 1
    if kh == 1 and kw == 1 and stride == 1 and ph == 0 and pw == 0:
        return x.reshape(N * OH * OW, C), (N, OH, OW)   # 1x1 conv: pure reshape
    xp = jnp.pad(x, ((0, 0), (ph, ph), (pw, pw), (0, 0)))
    taps = []
    for i in range(kh):
        for j in range(kw):
            taps.append(xp[:, i:i + stride * (OH - 1) + 1:stride,
                           j:j + stride * (OW - 1) + 1:stride, :])
    patches = jnp.stack(taps, axis=3)                   # [N, OH, OW, kh*kw, C]
    return patches.reshape(N * OH * OW, kh * kw * C), (N, OH, OW)


# ----------------------------------------------------------------------------
# BasicConv2d: conv (no bias) -> BatchNorm2d (batch stats, eps=1e-3) -> ReLU
# ----------------------------------------------------------------------------
def basic_conv2d_nhwc(x, b_packed, gamma, beta, *, kernel_size, stride=1,
                      padding=0, eps=1e-3, out_dtype=jnp.float32):
    """x: NHWC (any float dtype); b_packed: pre-packed bf16 [Kp, Cout_p] weight
    (K ordered (kh, kw, cin), K and Cout zero-padded to multiples of 128);
    gamma/beta: [Cout_p] (zero in the padded channels).
    Returns NHWC with Cout_p channels; the padded channels are exactly zero.
    """
    kh, kw = (kernel_size if isinstance(kernel_size, tuple)
              else (kernel_size, kernel_size))
    Kp, Cp = b_packed.shape
    C_in = x.shape[-1]
    K = kh * kw * C_in
    assert Kp == _round_up(K, _LANES), (Kp, K)

    # Cast once, BEFORE im2col, so the expanded patch matrix is bf16.
    a, (N, OH, OW) = _im2col_nhwc(x.astype(jnp.bfloat16), kh, kw, stride, padding)
    M = a.shape[0]

    # M tiling: tm=512 for big M; n_mt >= 2 whenever Mp >= 512 so the
    # "parallel" grid axis can shard across v7x's two TensorCores; single
    # full-extent block only for small M.
    M8 = _round_up(M, 8)
    if M8 >= 1024:
        tm = 512
    elif M8 >= 512:
        tm = 256
    else:
        tm = M8
    Mp = _round_up(M, tm)

    # Single pad for M rows and K columns (zeros are exact for GEMM + stats).
    if (Mp, Kp) != (M, K):
        a = jnp.pad(a, ((0, Mp - M), (0, Kp - K)))

    y_dtype = jnp.bfloat16 if out_dtype == jnp.bfloat16 else jnp.float32
    y, sums, ssqs = pallas_gemm_with_stats(a, b_packed, tm=tm, y_dtype=y_dtype)

    # Training-mode BatchNorm batch statistics from the fused per-tile partial
    # sums (padded rows / channels contribute exactly zero; divide by real M).
    n_mt = Mp // tm
    col_sum = sums.reshape(n_mt, 8, Cp)[:, 0, :].sum(axis=0)
    col_ssq = ssqs.reshape(n_mt, 8, Cp)[:, 0, :].sum(axis=0)
    mean = col_sum / M
    var = jnp.maximum(col_ssq / M - mean * mean, 0.0)   # biased (batch) variance
    scale = gamma * jax.lax.rsqrt(var + eps)
    shift = beta - mean * scale

    z = pallas_bn_relu(y, scale, shift, out_dtype=out_dtype)
    if Mp != M:
        z = z[:M]
    return z.reshape(N, OH, OW, Cp)


# ----------------------------------------------------------------------------
# Parameter init (mirrors the PyTorch module) + one-time weight repack.
# ----------------------------------------------------------------------------
def init_reduction_a_params(key, in_channels):
    def conv_params(k, cout, cin, kh, kw):
        w = jax.random.normal(k, (cout, cin, kh, kw), jnp.float32)
        return {"w": w,
                "gamma": jnp.ones((cout,), jnp.float32),   # BatchNorm2d default
                "beta": jnp.zeros((cout,), jnp.float32)}

    ks = jax.random.split(key, 4)
    return {
        "b1_0": conv_params(ks[0], 384, in_channels, 3, 3),
        "b2_0": conv_params(ks[1], 192, in_channels, 1, 1),
        "b2_1": conv_params(ks[2], 224, 192, 3, 3),
        "b2_2": conv_params(ks[3], 256, 224, 3, 3),
    }


def pack_reduction_a_params(params, in_channels):
    """One-time (hoisted) weight/BN re-layout into lane-dense bf16 GEMM
    operands.  cin_in is the channel count of the tensor actually fed to the
    layer (already lane-padded for the inner branch-2 layers); the extra
    weight rows / gamma / beta entries are zero, so results are exact."""
    def pack(p, cin_in, cout_pad):
        w = p["w"]
        cout, cin, kh, kw = w.shape
        wp = jnp.pad(w, ((0, cout_pad - cout), (0, cin_in - cin), (0, 0), (0, 0)))
        b = wp.transpose(2, 3, 1, 0).reshape(kh * kw * cin_in, cout_pad)
        k = b.shape[0]
        kp = _round_up(k, _LANES)
        b = jnp.pad(b, ((0, kp - k), (0, 0))).astype(jnp.bfloat16)
        gamma = jnp.pad(p["gamma"], (0, cout_pad - cout))
        beta = jnp.pad(p["beta"], (0, cout_pad - cout))
        return {"b": b, "gamma": gamma, "beta": beta}

    c0 = in_channels
    c192p = _round_up(192, _LANES)   # 256
    c224p = _round_up(224, _LANES)   # 256
    return {
        "b1_0": pack(params["b1_0"], c0, _round_up(384, _LANES)),   # 384
        "b2_0": pack(params["b2_0"], c0, c192p),                    # 192 -> 256
        "b2_1": pack(params["b2_1"], c192p, c224p),                 # 224 -> 256
        "b2_2": pack(params["b2_2"], c224p, _round_up(256, _LANES)),
    }


# ----------------------------------------------------------------------------
# ReductionA forward
# ----------------------------------------------------------------------------
def reduction_a_forward(packed, x_nchw):
    # NHWC inside the block; one transpose in, one out.
    x = jnp.transpose(x_nchw, (0, 2, 3, 1))
    x_bf16 = x.astype(jnp.bfloat16)    # single bf16 cast shared by both branches

    def bc(name, inp, kernel_size, stride, padding, out_dtype):
        p = packed[name]
        return basic_conv2d_nhwc(inp, p["b"], p["gamma"], p["beta"],
                                 kernel_size=kernel_size, stride=stride,
                                 padding=padding, out_dtype=out_dtype)

    # branch1: 3x3 stride 2 (final output -> f32; Cout=384 needs no padding)
    x1 = bc("b1_0", x_bf16, 3, 2, 0, jnp.float32)[..., :384]

    # branch2: 1x1 -> 3x3 pad 1 -> 3x3 stride 2.  Intermediate layers emit
    # bf16 (next conv consumes bf16 anyway); their zero-padded channels feed
    # straight into the next layer's zero-padded weight rows.
    # TODO(synk): fuse the stride-1 3x3 im2col of b2_1 into the GEMM grid
    # (9-tap accumulation) so its 9x patch matrix is never materialized.
    x2 = bc("b2_0", x_bf16, 1, 1, 0, jnp.bfloat16)
    x2 = bc("b2_1", x2, 3, 1, 1, jnp.bfloat16)
    x2 = bc("b2_2", x2, 3, 2, 0, jnp.float32)[..., :256]

    # branch3: MaxPool2d(3, stride=2) on the original f32 activations
    x3 = maxpool3x3_stride2_nhwc(x)

    out = jnp.concatenate((x1, x2, x3), axis=-1)       # NHWC channel concat
    return jnp.transpose(out, (0, 3, 1, 2))            # back to NCHW


if __name__ == "__main__":
    key = jax.random.PRNGKey(0)
    k_x, k_p = jax.random.split(key)

    N, C_in, H, W = 2, 8, 16, 16
    x = jax.random.normal(k_x, (N, C_in, H, W), jnp.float32)
    params = init_reduction_a_params(k_p, C_in)
    packed = pack_reduction_a_params(params, C_in)     # one-time weight repack

    fwd = jax.jit(reduction_a_forward)
    out = fwd(packed, x)
    jax.block_until_ready(out)

    expected = (N, 384 + 256 + C_in, (H - 3) // 2 + 1, (W - 3) // 2 + 1)
    assert out.shape == expected, (out.shape, expected)
    print("KERNEL_OK")
</pallas_src>

<mosaic_0001>
module attributes {stable_mosaic.version = 11 : i64} {
  func.func @_gemm_stats_kernel(%arg0: i32, %arg1: memref<256x128xbf16, #tpu.memory_space<vmem>>, %arg2: memref<128x256xbf16, #tpu.memory_space<vmem>>, %arg3: memref<256x256xbf16, #tpu.memory_space<vmem>>, %arg4: memref<8x256xf32, #tpu.memory_space<vmem>>, %arg5: memref<8x256xf32, #tpu.memory_space<vmem>>) attributes {dimension_semantics = [#tpu.dimension_semantics<parallel>], iteration_bounds = array<i64: 2>, scalar_prefetch = 0 : i64, scratch_operands = 0 : i64, tpu.core_type = #tpu.core_type<tc>, window_params = [{transform_indices = @transform_0, window_bounds = array<i64: 256, 128>}, {pipeline_mode = #tpu.pipeline_mode<synchronous>, transform_indices = @transform_1, window_bounds = array<i64: 128, 256>}, {transform_indices = @transform_2, window_bounds = array<i64: 256, 256>}, {transform_indices = @transform_3, window_bounds = array<i64: 8, 256>}, {transform_indices = @transform_4, window_bounds = array<i64: 8, 256>}]} {
    %c0 = arith.constant 0 : index
    %c0_0 = arith.constant 0 : index
    %0 = vector.load %arg1[%c0, %c0_0] : memref<256x128xbf16, #tpu.memory_space<vmem>>, vector<256x128xbf16>
    %c0_1 = arith.constant 0 : index
    %c0_2 = arith.constant 0 : index
    %1 = vector.load %arg2[%c0_1, %c0_2] : memref<128x256xbf16, #tpu.memory_space<vmem>>, vector<128x256xbf16>
    %cst = arith.constant dense<0.000000e+00> : vector<256x256xf32>
    %2 = tpu.matmul %0, %1, %cst {dimension_numbers = #tpu.dot_dimension_numbers<[1], [0], [0], [1], [0, 0, 1, 1], [], []>} : vector<256x128xbf16>, vector<128x256xbf16>, vector<256x256xf32> -> vector<256x256xf32>
    %3 = arith.truncf %2 : vector<256x256xf32> to vector<256x256xbf16>
    %c0_3 = arith.constant 0 : index
    %c0_4 = arith.constant 0 : index
    %4 = vector.load %arg3[%c0_3, %c0_4] : memref<256x256xbf16, #tpu.memory_space<vmem>>, vector<256x256xbf16>
    tpu.vector_store %arg3[%c0_3, %c0_4], %3 {strides = array<i32>} : memref<256x256xbf16, #tpu.memory_space<vmem>>, vector<256x256xbf16>,
    %cst_5 = arith.constant dense<0.000000e+00> : vector<256xf32>
    %5 = vector.multi_reduction <add>, %2, %cst_5 [0] : vector<256x256xf32> to vector<256xf32>
    %6 = vector.shape_cast %5 : vector<256xf32> to vector<1x256xf32>
    %7 = arith.mulf %2, %2 : vector<256x256xf32>
    %cst_6 = arith.constant dense<0.000000e+00> : vector<256xf32>
    %8 = vector.multi_reduction <add>, %7, %cst_6 [0] : vector<256x256xf32> to vector<256xf32>
    %9 = vector.shape_cast %8 : vector<256xf32> to vector<1x256xf32>
    %10 = vector.shape_cast %6 : vector<1x256xf32> to vector<1x256xf32>
    %11 = vector.broadcast %10 : vector<1x256xf32> to vector<8x256xf32>
    %c0_7 = arith.constant 0 : index
    %c0_8 = arith.constant 0 : index
    %12 = vector.load %arg4[%c0_7, %c0_8] : memref<8x256xf32, #tpu.memory_space<vmem>>, vector<8x256xf32>
    tpu.vector_store %arg4[%c0_7, %c0_8], %11 {strides = array<i32>} : memref<8x256xf32, #tpu.memory_space<vmem>>, vector<8x256xf32>,
    %13 = vector.shape_cast %9 : vector<1x256xf32> to vector<1x256xf32>
    %14 = vector.broadcast %13 : vector<1x256xf32> to vector<8x256xf32>
    %c0_9 = arith.constant 0 : index
    %c0_10 = arith.constant 0 : index
    %15 = vector.load %arg5[%c0_9, %c0_10] : memref<8x256xf32, #tpu.memory_space<vmem>>, vector<8x256xf32>
    tpu.vector_store %arg5[%c0_9, %c0_10], %14 {strides = array<i32>} : memref<8x256xf32, #tpu.memory_space<vmem>>, vector<8x256xf32>,
    return
  }
  func.func @transform_0(%arg0: i32) -> (i32, i32) {
    %c0_i32 = arith.constant 0 : i32
    %c0_i32_0 = arith.constant 0 : i32
    return %arg0, %c0_i32 : i32, i32
  }
  func.func @transform_1(%arg0: i32) -> (i32, i32) {
    %c0_i32 = arith.constant 0 : i32
    %c0_i32_0 = arith.constant 0 : i32
    %c0_i32_1 = arith.constant 0 : i32
    return %c0_i32, %c0_i32_0 : i32, i32
  }
  func.func @transform_2(%arg0: i32) -> (i32, i32) {
    %c0_i32 = arith.constant 0 : i32
    %c0_i32_0 = arith.constant 0 : i32
    return %arg0, %c0_i32 : i32, i32
  }
  func.func @transform_3(%arg0: i32) -> (i32, i32) {
    %c0_i32 = arith.constant 0 : i32
    %c0_i32_0 = arith.constant 0 : i32
    return %arg0, %c0_i32 : i32, i32
  }
  func.func @transform_4(%arg0: i32) -> (i32, i32) {
    %c0_i32 = arith.constant 0 : i32
    %c0_i32_0 = arith.constant 0 : i32
    return %arg0, %c0_i32 : i32, i32
  }
}

module attributes {stable_mosaic.version = 11 : i64} {
  func.func @_bn_relu_kernel(%arg0: i32, %arg1: memref<512x256xbf16, #tpu.memory_space<vmem>>, %arg2: memref<1x256xf32, #tpu.memory_space<vmem>>, %arg3: memref<1x256xf32, #tpu.memory_space<vmem>>, %arg4: memref<512x256xbf16, #tpu.memory_space<vmem>>) attributes {dimension_semantics = [#tpu.dimension_semantics<parallel>], iteration_bounds = array<i64: 1>, scalar_prefetch = 0 : i64, scratch_operands = 0 : i64, tpu.core_type = #tpu.core_type<tc>, window_params = [{transform_indices = @transform_0, window_bounds = array<i64: 512, 256>}, {pipeline_mode = #tpu.pipeline_mode<synchronous>, transform_indices = @transform_1, window_bounds = array<i64: 1, 256>}, {pipeline_mode = #tpu.pipeline_mode<synchronous>, transform_indices = @transform_2, window_bounds = array<i64: 1, 256>}, {transform_indices = @transform_3, window_bounds = array<i64: 512, 256>}]} {
    %c0 = arith.constant 0 : index
    %c0_0 = arith.constant 0 : index
    %0 = vector.load %arg1[%c0, %c0_0] : memref<512x256xbf16, #tpu.memory_space<vmem>>, vector<512x256xbf16>
    %1 = arith.extf %0 : vector<512x256xbf16> to vector<512x256xf32>
    %c0_1 = arith.constant 0 : index
    %c0_2 = arith.constant 0 : index
    %2 = vector.load %arg2[%c0_1, %c0_2] : memref<1x256xf32, #tpu.memory_space<vmem>>, vector<1x256xf32>
    %3 = vector.broadcast %2 : vector<1x256xf32> to vector<512x256xf32>
    %4 = arith.mulf %1, %3 : vector<512x256xf32>
    %c0_3 = arith.constant 0 : index
    %c0_4 = arith.constant 0 : index
    %5 = vector.load %arg3[%c0_3, %c0_4] : memref<1x256xf32, #tpu.memory_space<vmem>>, vector<1x256xf32>
    %6 = vector.broadcast %5 : vector<1x256xf32> to vector<512x256xf32>
    %7 = arith.addf %4, %6 : vector<512x256xf32>
    %cst = arith.constant 0.000000e+00 : f32
    %8 = vector.broadcast %cst : f32 to vector<512x256xf32>
    %9 = arith.maximumf %7, %8 : vector<512x256xf32>
    %10 = arith.truncf %9 : vector<512x256xf32> to vector<512x256xbf16>
    %c0_5 = arith.constant 0 : index
    %c0_6 = arith.constant 0 : index
    %11 = vector.load %arg4[%c0_5, %c0_6] : memref<512x256xbf16, #tpu.memory_space<vmem>>, vector<512x256xbf16>
    tpu.vector_store %arg4[%c0_5, %c0_6], %10 {strides = array<i32>} : memref<512x256xbf16, #tpu.memory_space<vmem>>, vector<512x256xbf16>,
    return
  }
  func.func @transform_0(%arg0: i32) -> (i32, i32) {
    %c0_i32 = arith.constant 0 : i32
    %c0_i32_0 = arith.constant 0 : i32
    return %arg0, %c0_i32 : i32, i32
  }
  func.func @transform_1(%arg0: i32) -> (i32, i32) {
    %c0_i32 = arith.constant 0 : i32
    %c0_i32_0 = arith.constant 0 : i32
    %c0_i32_1 = arith.constant 0 : i32
    return %c0_i32, %c0_i32_0 : i32, i32
  }
  func.func @transform_2(%arg0: i32) -> (i32, i32) {
    %c0_i32 = arith.constant 0 : i32
    %c0_i32_0 = arith.constant 0 : i32
    %c0_i32_1 = arith.constant 0 : i32
    return %c0_i32, %c0_i32_0 : i32, i32
  }
  func.func @transform_3(%arg0: i32) -> (i32, i32) {
    %c0_i32 = arith.constant 0 : i32
    %c0_i32_0 = arith.constant 0 : i32
    return %arg0, %c0_i32 : i32, i32
  }
}

module attributes {stable_mosaic.version = 11 : i64} {
  func.func @_gemm_stats_kernel(%arg0: i32, %arg1: memref<256x2304xbf16, #tpu.memory_space<vmem>>, %arg2: memref<2304x256xbf16, #tpu.memory_space<vmem>>, %arg3: memref<256x256xbf16, #tpu.memory_space<vmem>>, %arg4: memref<8x256xf32, #tpu.memory_space<vmem>>, %arg5: memref<8x256xf32, #tpu.memory_space<vmem>>) attributes {dimension_semantics = [#tpu.dimension_semantics<parallel>], iteration_bounds = array<i64: 2>, scalar_prefetch = 0 : i64, scratch_operands = 0 : i64, tpu.core_type = #tpu.core_type<tc>, window_params = [{transform_indices = @transform_0, window_bounds = array<i64: 256, 2304>}, {pipeline_mode = #tpu.pipeline_mode<synchronous>, transform_indices = @transform_1, window_bounds = array<i64: 2304, 256>}, {transform_indices = @transform_2, window_bounds = array<i64: 256, 256>}, {transform_indices = @transform_3, window_bounds = array<i64: 8, 256>}, {transform_indices = @transform_4, window_bounds = array<i64: 8, 256>}]} {
    %c0 = arith.constant 0 : index
    %c0_0 = arith.constant 0 : index
    %0 = vector.load %arg1[%c0, %c0_0] : memref<256x2304xbf16, #tpu.memory_space<vmem>>, vector<256x2304xbf16>
    %c0_1 = arith.constant 0 : index
    %c0_2 = arith.constant 0 : index
    %1 = vector.load %arg2[%c0_1, %c0_2] : memref<2304x256xbf16, #tpu.memory_space<vmem>>, vector<2304x256xbf16>
    %cst = arith.constant dense<0.000000e+00> : vector<256x256xf32>
    %2 = tpu.matmul %0, %1, %cst {dimension_numbers = #tpu.dot_dimension_numbers<[1], [0], [0], [1], [0, 0, 1, 1], [], []>} : vector<256x2304xbf16>, vector<2304x256xbf16>, vector<256x256xf32> -> vector<256x256xf32>
    %3 = arith.truncf %2 : vector<256x256xf32> to vector<256x256xbf16>
    %c0_3 = arith.constant 0 : index
    %c0_4 = arith.constant 0 : index
    %4 = vector.load %arg3[%c0_3, %c0_4] : memref<256x256xbf16, #tpu.memory_space<vmem>>, vector<256x256xbf16>
    tpu.vector_store %arg3[%c0_3, %c0_4], %3 {strides = array<i32>} : memref<256x256xbf16, #tpu.memory_space<vmem>>, vector<256x256xbf16>,
    %cst_5 = arith.constant dense<0.000000e+00> : vector<256xf32>
    %5 = vector.multi_reduction <add>, %2, %cst_5 [0] : vector<256x256xf32> to vector<256xf32>
    %6 = vector.shape_cast %5 : vector<256xf32> to vector<1x256xf32>
    %7 = arith.mulf %2, %2 : vector<256x256xf32>
    %cst_6 = arith.constant dense<0.000000e+00> : vector<256xf32>
    %8 = vector.multi_reduction <add>, %7, %cst_6 [0] : vector<256x256xf32> to vector<256xf32>
    %9 = vector.shape_cast %8 : vector<256xf32> to vector<1x256xf32>
    %10 = vector.shape_cast %6 : vector<1x256xf32> to vector<1x256xf32>
    %11 = vector.broadcast %10 : vector<1x256xf32> to vector<8x256xf32>
    %c0_7 = arith.constant 0 : index
    %c0_8 = arith.constant 0 : index
    %12 = vector.load %arg4[%c0_7, %c0_8] : memref<8x256xf32, #tpu.memory_space<vmem>>, vector<8x256xf32>
    tpu.vector_store %arg4[%c0_7, %c0_8], %11 {strides = array<i32>} : memref<8x256xf32, #tpu.memory_space<vmem>>, vector<8x256xf32>,
    %13 = vector.shape_cast %9 : vector<1x256xf32> to vector<1x256xf32>
    %14 = vector.broadcast %13 : vector<1x256xf32> to vector<8x256xf32>
    %c0_9 = arith.constant 0 : index
    %c0_10 = arith.constant 0 : index
    %15 = vector.load %arg5[%c0_9, %c0_10] : memref<8x256xf32, #tpu.memory_space<vmem>>, vector<8x256xf32>
    tpu.vector_store %arg5[%c0_9, %c0_10], %14 {strides = array<i32>} : memref<8x256xf32, #tpu.memory_space<vmem>>, vector<8x256xf32>,
    return
  }
  func.func @transform_0(%arg0: i32) -> (i32, i32) {
    %c0_i32 = arith.constant 0 : i32
    %c0_i32_0 = arith.constant 0 : i32
    return %arg0, %c0_i32 : i32, i32
  }
  func.func @transform_1(%arg0: i32) -> (i32, i32) {
    %c0_i32 = arith.constant 0 : i32
    %c0_i32_0 = arith.constant 0 : i32
    %c0_i32_1 = arith.constant 0 : i32
    return %c0_i32, %c0_i32_0 : i32, i32
  }
  func.func @transform_2(%arg0: i32) -> (i32, i32) {
    %c0_i32 = arith.constant 0 : i32
    %c0_i32_0 = arith.constant 0 : i32
    return %arg0, %c0_i32 : i32, i32
  }
  func.func @transform_3(%arg0: i32) -> (i32, i32) {
    %c0_i32 = arith.constant 0 : i32
    %c0_i32_0 = arith.constant 0 : i32
    return %arg0, %c0_i32 : i32, i32
  }
  func.func @transform_4(%arg0: i32) -> (i32, i32) {
    %c0_i32 = arith.constant 0 : i32
    %c0_i32_0 = arith.constant 0 : i32
    return %arg0, %c0_i32 : i32, i32
  }
}

module attributes {stable_mosaic.version = 11 : i64} {
  func.func @_gemm_stats_kernel(%arg0: i32, %arg1: memref<104x2304xbf16, #tpu.memory_space<vmem>>, %arg2: memref<2304x256xbf16, #tpu.memory_space<vmem>>, %arg3: memref<104x256xf32, #tpu.memory_space<vmem>>, %arg4: memref<8x256xf32, #tpu.memory_space<vmem>>, %arg5: memref<8x256xf32, #tpu.memory_space<vmem>>) attributes {dimension_semantics = [#tpu.dimension_semantics<parallel>], iteration_bounds = array<i64: 1>, scalar_prefetch = 0 : i64, scratch_operands = 0 : i64, tpu.core_type = #tpu.core_type<tc>, window_params = [{transform_indices = @transform_0, window_bounds = array<i64: 104, 2304>}, {pipeline_mode = #tpu.pipeline_mode<synchronous>, transform_indices = @transform_1, window_bounds = array<i64: 2304, 256>}, {transform_indices = @transform_2, window_bounds = array<i64: 104, 256>}, {transform_indices = @transform_3, window_bounds = array<i64: 8, 256>}, {transform_indices = @transform_4, window_bounds = array<i64: 8, 256>}]} {
    %c0 = arith.constant 0 : index
    %c0_0 = arith.constant 0 : index
    %0 = vector.load %arg1[%c0, %c0_0] : memref<104x2304xbf16, #tpu.memory_space<vmem>>, vector<104x2304xbf16>
    %c0_1 = arith.constant 0 : index
    %c0_2 = arith.constant 0 : index
    %1 = vector.load %arg2[%c0_1, %c0_2] : memref<2304x256xbf16, #tpu.memory_space<vmem>>, vector<2304x256xbf16>
    %cst = arith.constant dense<0.000000e+00> : vector<104x256xf32>
    %2 = tpu.matmul %0, %1, %cst {dimension_numbers = #tpu.dot_dimension_numbers<[1], [0], [0], [1], [0, 0, 1, 1], [], []>} : vector<104x2304xbf16>, vector<2304x256xbf16>, vector<104x256xf32> -> vector<104x256xf32>
    %c0_3 = arith.constant 0 : index
    %c0_4 = arith.constant 0 : index
    %3 = vector.load %arg3[%c0_3, %c0_4] : memref<104x256xf32, #tpu.memory_space<vmem>>, vector<104x256xf32>
    tpu.vector_store %arg3[%c0_3, %c0_4], %2 {strides = array<i32>} : memref<104x256xf32, #tpu.memory_space<vmem>>, vector<104x256xf32>,
    %cst_5 = arith.constant dense<0.000000e+00> : vector<256xf32>
    %4 = vector.multi_reduction <add>, %2, %cst_5 [0] : vector<104x256xf32> to vector<256xf32>
    %5 = vector.shape_cast %4 : vector<256xf32> to vector<1x256xf32>
    %6 = arith.mulf %2, %2 : vector<104x256xf32>
    %cst_6 = arith.constant dense<0.000000e+00> : vector<256xf32>
    %7 = vector.multi_reduction <add>, %6, %cst_6 [0] : vector<104x256xf32> to vector<256xf32>
    %8 = vector.shape_cast %7 : vector<256xf32> to vector<1x256xf32>
    %9 = vector.shape_cast %5 : vector<1x256xf32> to vector<1x256xf32>
    %10 = vector.broadcast %9 : vector<1x256xf32> to vector<8x256xf32>
    %c0_7 = arith.constant 0 : index
    %c0_8 = arith.constant 0 : index
    %11 = vector.load %arg4[%c0_7, %c0_8] : memref<8x256xf32, #tpu.memory_space<vmem>>, vector<8x256xf32>
    tpu.vector_store %arg4[%c0_7, %c0_8], %10 {strides = array<i32>} : memref<8x256xf32, #tpu.memory_space<vmem>>, vector<8x256xf32>,
    %12 = vector.shape_cast %8 : vector<1x256xf32> to vector<1x256xf32>
    %13 = vector.broadcast %12 : vector<1x256xf32> to vector<8x256xf32>
    %c0_9 = arith.constant 0 : index
    %c0_10 = arith.constant 0 : index
    %14 = vector.load %arg5[%c0_9, %c0_10] : memref<8x256xf32, #tpu.memory_space<vmem>>, vector<8x256xf32>
    tpu.vector_store %arg5[%c0_9, %c0_10], %13 {strides = array<i32>} : memref<8x256xf32, #tpu.memory_space<vmem>>, vector<8x256xf32>,
    return
  }
  func.func @transform_0(%arg0: i32) -> (i32, i32) {
    %c0_i32 = arith.constant 0 : i32
    %c0_i32_0 = arith.constant 0 : i32
    return %arg0, %c0_i32 : i32, i32
  }
  func.func @transform_1(%arg0: i32) -> (i32, i32) {
    %c0_i32 = arith.constant 0 : i32
    %c0_i32_0 = arith.constant 0 : i32
    %c0_i32_1 = arith.constant 0 : i32
    return %c0_i32, %c0_i32_0 : i32, i32
  }
  func.func @transform_2(%arg0: i32) -> (i32, i32) {
    %c0_i32 = arith.constant 0 : i32
    %c0_i32_0 = arith.constant 0 : i32
    return %arg0, %c0_i32 : i32, i32
  }
  func.func @transform_3(%arg0: i32) -> (i32, i32) {
    %c0_i32 = arith.constant 0 : i32
    %c0_i32_0 = arith.constant 0 : i32
    return %arg0, %c0_i32 : i32, i32
  }
  func.func @transform_4(%arg0: i32) -> (i32, i32) {
    %c0_i32 = arith.constant 0 : i32
    %c0_i32_0 = arith.constant 0 : i32
    return %arg0, %c0_i32 : i32, i32
  }
}

module attributes {stable_mosaic.version = 11 : i64} {
  func.func @_bn_relu_kernel(%arg0: i32, %arg1: memref<104x256xf32, #tpu.memory_space<vmem>>, %arg2: memref<1x256xf32, #tpu.memory_space<vmem>>, %arg3: memref<1x256xf32, #tpu.memory_space<vmem>>, %arg4: memref<104x256xf32, #tpu.memory_space<vmem>>) attributes {dimension_semantics = [#tpu.dimension_semantics<parallel>], iteration_bounds = array<i64: 1>, scalar_prefetch = 0 : i64, scratch_operands = 0 : i64, tpu.core_type = #tpu.core_type<tc>, window_params = [{transform_indices = @transform_0, window_bounds = array<i64: 104, 256>}, {pipeline_mode = #tpu.pipeline_mode<synchronous>, transform_indices = @transform_1, window_bounds = array<i64: 1, 256>}, {pipeline_mode = #tpu.pipeline_mode<synchronous>, transform_indices = @transform_2, window_bounds = array<i64: 1, 256>}, {transform_indices = @transform_3, window_bounds = array<i64: 104, 256>}]} {
    %c0 = arith.constant 0 : index
    %c0_0 = arith.constant 0 : index
    %0 = vector.load %arg1[%c0, %c0_0] : memref<104x256xf32, #tpu.memory_space<vmem>>, vector<104x256xf32>
    %c0_1 = arith.constant 0 : index
    %c0_2 = arith.constant 0 : index
    %1 = vector.load %arg2[%c0_1, %c0_2] : memref<1x256xf32, #tpu.memory_space<vmem>>, vector<1x256xf32>
    %2 = vector.broadcast %1 : vector<1x256xf32> to vector<104x256xf32>
    %3 = arith.mulf %0, %2 : vector<104x256xf32>
    %c0_3 = arith.constant 0 : index
    %c0_4 = arith.constant 0 : index
    %4 = vector.load %arg3[%c0_3, %c0_4] : memref<1x256xf32, #tpu.memory_space<vmem>>, vector<1x256xf32>
    %5 = vector.broadcast %4 : vector<1x256xf32> to vector<104x256xf32>
    %6 = arith.addf %3, %5 : vector<104x256xf32>
    %cst = arith.constant 0.000000e+00 : f32
    %7 = vector.broadcast %cst : f32 to vector<104x256xf32>
    %8 = arith.maximumf %6, %7 : vector<104x256xf32>
    %c0_5 = arith.constant 0 : index
    %c0_6 = arith.constant 0 : index
    %9 = vector.load %arg4[%c0_5, %c0_6] : memref<104x256xf32, #tpu.memory_space<vmem>>, vector<104x256xf32>
    tpu.vector_store %arg4[%c0_5, %c0_6], %8 {strides = array<i32>} : memref<104x256xf32, #tpu.memory_space<vmem>>, vector<104x256xf32>,
    return
  }
  func.func @transform_0(%arg0: i32) -> (i32, i32) {
    %c0_i32 = arith.constant 0 : i32
    %c0_i32_0 = arith.constant 0 : i32
    return %arg0, %c0_i32 : i32, i32
  }
  func.func @transform_1(%arg0: i32) -> (i32, i32) {
    %c0_i32 = arith.constant 0 : i32
    %c0_i32_0 = arith.constant 0 : i32
    %c0_i32_1 = arith.constant 0 : i32
    return %c0_i32, %c0_i32_0 : i32, i32
  }
  func.func @transform_2(%arg0: i32) -> (i32, i32) {
    %c0_i32 = arith.constant 0 : i32
    %c0_i32_0 = arith.constant 0 : i32
    %c0_i32_1 = arith.constant 0 : i32
    return %c0_i32, %c0_i32_0 : i32, i32
  }
  func.func @transform_3(%arg0: i32) -> (i32, i32) {
    %c0_i32 = arith.constant 0 : i32
    %c0_i32_0 = arith.constant 0 : i32
    return %arg0, %c0_i32 : i32, i32
  }
}

module attributes {stable_mosaic.version = 11 : i64} {
  func.func @_gemm_stats_kernel(%arg0: i32, %arg1: memref<104x128xbf16, #tpu.memory_space<vmem>>, %arg2: memref<128x384xbf16, #tpu.memory_space<vmem>>, %arg3: memref<104x384xf32, #tpu.memory_space<vmem>>, %arg4: memref<8x384xf32, #tpu.memory_space<vmem>>, %arg5: memref<8x384xf32, #tpu.memory_space<vmem>>) attributes {dimension_semantics = [#tpu.dimension_semantics<parallel>], iteration_bounds = array<i64: 1>, scalar_prefetch = 0 : i64, scratch_operands = 0 : i64, tpu.core_type = #tpu.core_type<tc>, window_params = [{transform_indices = @transform_0, window_bounds = array<i64: 104, 128>}, {pipeline_mode = #tpu.pipeline_mode<synchronous>, transform_indices = @transform_1, window_bounds = array<i64: 128, 384>}, {transform_indices = @transform_2, window_bounds = array<i64: 104, 384>}, {transform_indices = @transform_3, window_bounds = array<i64: 8, 384>}, {transform_indices = @transform_4, window_bounds = array<i64: 8, 384>}]} {
    %c0 = arith.constant 0 : index
    %c0_0 = arith.constant 0 : index
    %0 = vector.load %arg1[%c0, %c0_0] : memref<104x128xbf16, #tpu.memory_space<vmem>>, vector<104x128xbf16>
    %c0_1 = arith.constant 0 : index
    %c0_2 = arith.constant 0 : index
    %1 = vector.load %arg2[%c0_1, %c0_2] : memref<128x384xbf16, #tpu.memory_space<vmem>>, vector<128x384xbf16>
    %cst = arith.constant dense<0.000000e+00> : vector<104x384xf32>
    %2 = tpu.matmul %0, %1, %cst {dimension_numbers = #tpu.dot_dimension_numbers<[1], [0], [0], [1], [0, 0, 1, 1], [], []>} : vector<104x128xbf16>, vector<128x384xbf16>, vector<104x384xf32> -> vector<104x384xf32>
    %c0_3 = arith.constant 0 : index
    %c0_4 = arith.constant 0 : index
    %3 = vector.load %arg3[%c0_3, %c0_4] : memref<104x384xf32, #tpu.memory_space<vmem>>, vector<104x384xf32>
    tpu.vector_store %arg3[%c0_3, %c0_4], %2 {strides = array<i32>} : memref<104x384xf32, #tpu.memory_space<vmem>>, vector<104x384xf32>,
    %cst_5 = arith.constant dense<0.000000e+00> : vector<384xf32>
    %4 = vector.multi_reduction <add>, %2, %cst_5 [0] : vector<104x384xf32> to vector<384xf32>
    %5 = vector.shape_cast %4 : vector<384xf32> to vector<1x384xf32>
    %6 = arith.mulf %2, %2 : vector<104x384xf32>
    %cst_6 = arith.constant dense<0.000000e+00> : vector<384xf32>
    %7 = vector.multi_reduction <add>, %6, %cst_6 [0] : vector<104x384xf32> to vector<384xf32>
    %8 = vector.shape_cast %7 : vector<384xf32> to vector<1x384xf32>
    %9 = vector.shape_cast %5 : vector<1x384xf32> to vector<1x384xf32>
    %10 = vector.broadcast %9 : vector<1x384xf32> to vector<8x384xf32>
    %c0_7 = arith.constant 0 : index
    %c0_8 = arith.constant 0 : index
    %11 = vector.load %arg4[%c0_7, %c0_8] : memref<8x384xf32, #tpu.memory_space<vmem>>, vector<8x384xf32>
    tpu.vector_store %arg4[%c0_7, %c0_8], %10 {strides = array<i32>} : memref<8x384xf32, #tpu.memory_space<vmem>>, vector<8x384xf32>,
    %12 = vector.shape_cast %8 : vector<1x384xf32> to vector<1x384xf32>
    %13 = vector.broadcast %12 : vector<1x384xf32> to vector<8x384xf32>
    %c0_9 = arith.constant 0 : index
    %c0_10 = arith.constant 0 : index
    %14 = vector.load %arg5[%c0_9, %c0_10] : memref<8x384xf32, #tpu.memory_space<vmem>>, vector<8x384xf32>
    tpu.vector_store %arg5[%c0_9, %c0_10], %13 {strides = array<i32>} : memref<8x384xf32, #tpu.memory_space<vmem>>, vector<8x384xf32>,
    return
  }
  func.func @transform_0(%arg0: i32) -> (i32, i32) {
    %c0_i32 = arith.constant 0 : i32
    %c0_i32_0 = arith.constant 0 : i32
    return %arg0, %c0_i32 : i32, i32
  }
  func.func @transform_1(%arg0: i32) -> (i32, i32) {
    %c0_i32 = arith.constant 0 : i32
    %c0_i32_0 = arith.constant 0 : i32
    %c0_i32_1 = arith.constant 0 : i32
    return %c0_i32, %c0_i32_0 : i32, i32
  }
  func.func @transform_2(%arg0: i32) -> (i32, i32) {
    %c0_i32 = arith.constant 0 : i32
    %c0_i32_0 = arith.constant 0 : i32
    return %arg0, %c0_i32 : i32, i32
  }
  func.func @transform_3(%arg0: i32) -> (i32, i32) {
    %c0_i32 = arith.constant 0 : i32
    %c0_i32_0 = arith.constant 0 : i32
    return %arg0, %c0_i32 : i32, i32
  }
  func.func @transform_4(%arg0: i32) -> (i32, i32) {
    %c0_i32 = arith.constant 0 : i32
    %c0_i32_0 = arith.constant 0 : i32
    return %arg0, %c0_i32 : i32, i32
  }
}

module attributes {stable_mosaic.version = 11 : i64} {
  func.func @_bn_relu_kernel(%arg0: i32, %arg1: memref<104x384xf32, #tpu.memory_space<vmem>>, %arg2: memref<1x384xf32, #tpu.memory_space<vmem>>, %arg3: memref<1x384xf32, #tpu.memory_space<vmem>>, %arg4: memref<104x384xf32, #tpu.memory_space<vmem>>) attributes {dimension_semantics = [#tpu.dimension_semantics<parallel>], iteration_bounds = array<i64: 1>, scalar_prefetch = 0 : i64, scratch_operands = 0 : i64, tpu.core_type = #tpu.core_type<tc>, window_params = [{transform_indices = @transform_0, window_bounds = array<i64: 104, 384>}, {pipeline_mode = #tpu.pipeline_mode<synchronous>, transform_indices = @transform_1, window_bounds = array<i64: 1, 384>}, {pipeline_mode = #tpu.pipeline_mode<synchronous>, transform_indices = @transform_2, window_bounds = array<i64: 1, 384>}, {transform_indices = @transform_3, window_bounds = array<i64: 104, 384>}]} {
    %c0 = arith.constant 0 : index
    %c0_0 = arith.constant 0 : index
    %0 = vector.load %arg1[%c0, %c0_0] : memref<104x384xf32, #tpu.memory_space<vmem>>, vector<104x384xf32>
    %c0_1 = arith.constant 0 : index
    %c0_2 = arith.constant 0 : index
    %1 = vector.load %arg2[%c0_1, %c0_2] : memref<1x384xf32, #tpu.memory_space<vmem>>, vector<1x384xf32>
    %2 = vector.broadcast %1 : vector<1x384xf32> to vector<104x384xf32>
    %3 = arith.mulf %0, %2 : vector<104x384xf32>
    %c0_3 = arith.constant 0 : index
    %c0_4 = arith.constant 0 : index
    %4 = vector.load %arg3[%c0_3, %c0_4] : memref<1x384xf32, #tpu.memory_space<vmem>>, vector<1x384xf32>
    %5 = vector.broadcast %4 : vector<1x384xf32> to vector<104x384xf32>
    %6 = arith.addf %3, %5 : vector<104x384xf32>
    %cst = arith.constant 0.000000e+00 : f32
    %7 = vector.broadcast %cst : f32 to vector<104x384xf32>
    %8 = arith.maximumf %6, %7 : vector<104x384xf32>
    %c0_5 = arith.constant 0 : index
    %c0_6 = arith.constant 0 : index
    %9 = vector.load %arg4[%c0_5, %c0_6] : memref<104x384xf32, #tpu.memory_space<vmem>>, vector<104x384xf32>
    tpu.vector_store %arg4[%c0_5, %c0_6], %8 {strides = array<i32>} : memref<104x384xf32, #tpu.memory_space<vmem>>, vector<104x384xf32>,
    return
  }
  func.func @transform_0(%arg0: i32) -> (i32, i32) {
    %c0_i32 = arith.constant 0 : i32
    %c0_i32_0 = arith.constant 0 : i32
    return %arg0, %c0_i32 : i32, i32
  }
  func.func @transform_1(%arg0: i32) -> (i32, i32) {
    %c0_i32 = arith.constant 0 : i32
    %c0_i32_0 = arith.constant 0 : i32
    %c0_i32_1 = arith.constant 0 : i32
    return %c0_i32, %c0_i32_0 : i32, i32
  }
  func.func @transform_2(%arg0: i32) -> (i32, i32) {
    %c0_i32 = arith.constant 0 : i32
    %c0_i32_0 = arith.constant 0 : i32
    %c0_i32_1 = arith.constant 0 : i32
    return %c0_i32, %c0_i32_0 : i32, i32
  }
  func.func @transform_3(%arg0: i32) -> (i32, i32) {
    %c0_i32 = arith.constant 0 : i32
    %c0_i32_0 = arith.constant 0 : i32
    return %arg0, %c0_i32 : i32, i32
  }
}

module attributes {stable_mosaic.version = 11 : i64} {
  func.func @_max9_kernel(%arg0: i32, %arg1: memref<8x128xf32, #tpu.memory_space<vmem>>, %arg2: memref<8x128xf32, #tpu.memory_space<vmem>>, %arg3: memref<8x128xf32, #tpu.memory_space<vmem>>, %arg4: memref<8x128xf32, #tpu.memory_space<vmem>>, %arg5: memref<8x128xf32, #tpu.memory_space<vmem>>, %arg6: memref<8x128xf32, #tpu.memory_space<vmem>>, %arg7: memref<8x128xf32, #tpu.memory_space<vmem>>, %arg8: memref<8x128xf32, #tpu.memory_space<vmem>>, %arg9: memref<8x128xf32, #tpu.memory_space<vmem>>, %arg10: memref<8x128xf32, #tpu.memory_space<vmem>>) attributes {dimension_semantics = [#tpu.dimension_semantics<parallel>], iteration_bounds = array<i64: 1>, scalar_prefetch = 0 : i64, scratch_operands = 0 : i64, tpu.core_type = #tpu.core_type<tc>, window_params = [{transform_indices = @transform_0, window_bounds = array<i64: 8, 128>}, {transform_indices = @transform_1, window_bounds = array<i64: 8, 128>}, {transform_indices = @transform_2, window_bounds = array<i64: 8, 128>}, {transform_indices = @transform_3, window_bounds = array<i64: 8, 128>}, {transform_indices = @transform_4, window_bounds = array<i64: 8, 128>}, {transform_indices = @transform_5, window_bounds = array<i64: 8, 128>}, {transform_indices = @transform_6, window_bounds = array<i64: 8, 128>}, {transform_indices = @transform_7, window_bounds = array<i64: 8, 128>}, {transform_indices = @transform_8, window_bounds = array<i64: 8, 128>}, {transform_indices = @transform_9, window_bounds = array<i64: 8, 128>}]} {
    %c0 = arith.constant 0 : index
    %c0_0 = arith.constant 0 : index
    %0 = vector.load %arg1[%c0, %c0_0] : memref<8x128xf32, #tpu.memory_space<vmem>>, vector<8x128xf32>
    %c0_1 = arith.constant 0 : index
    %c0_2 = arith.constant 0 : index
    %1 = vector.load %arg2[%c0_1, %c0_2] : memref<8x128xf32, #tpu.memory_space<vmem>>, vector<8x128xf32>
    %2 = arith.maximumf %0, %1 : vector<8x128xf32>
    %c0_3 = arith.constant 0 : index
    %c0_4 = arith.constant 0 : index
    %3 = vector.load %arg3[%c0_3, %c0_4] : memref<8x128xf32, #tpu.memory_space<vmem>>, vector<8x128xf32>
    %4 = arith.maximumf %2, %3 : vector<8x128xf32>
    %c0_5 = arith.constant 0 : index
    %c0_6 = arith.constant 0 : index
    %5 = vector.load %arg4[%c0_5, %c0_6] : memref<8x128xf32, #tpu.memory_space<vmem>>, vector<8x128xf32>
    %6 = arith.maximumf %4, %5 : vector<8x128xf32>
    %c0_7 = arith.constant 0 : index
    %c0_8 = arith.constant 0 : index
    %7 = vector.load %arg5[%c0_7, %c0_8] : memref<8x128xf32, #tpu.memory_space<vmem>>, vector<8x128xf32>
    %8 = arith.maximumf %6, %7 : vector<8x128xf32>
    %c0_9 = arith.constant 0 : index
    %c0_10 = arith.constant 0 : index
    %9 = vector.load %arg6[%c0_9, %c0_10] : memref<8x128xf32, #tpu.memory_space<vmem>>, vector<8x128xf32>
    %10 = arith.maximumf %8, %9 : vector<8x128xf32>
    %c0_11 = arith.constant 0 : index
    %c0_12 = arith.constant 0 : index
    %11 = vector.load %arg7[%c0_11, %c0_12] : memref<8x128xf32, #tpu.memory_space<vmem>>, vector<8x128xf32>
    %12 = arith.maximumf %10, %11 : vector<8x128xf32>
    %c0_13 = arith.constant 0 : index
    %c0_14 = arith.constant 0 : index
    %13 = vector.load %arg8[%c0_13, %c0_14] : memref<8x128xf32, #tpu.memory_space<vmem>>, vector<8x128xf32>
    %14 = arith.maximumf %12, %13 : vector<8x128xf32>
    %c0_15 = arith.constant 0 : index
    %c0_16 = arith.constant 0 : index
    %15 = vector.load %arg9[%c0_15, %c0_16] : memref<8x128xf32, #tpu.memory_space<vmem>>, vector<8x128xf32>
    %16 = arith.maximumf %14, %15 : vector<8x128xf32>
    %c0_17 = arith.constant 0 : index
    %c0_18 = arith.constant 0 : index
    %17 = vector.load %arg10[%c0_17, %c0_18] : memref<8x128xf32, #tpu.memory_space<vmem>>, vector<8x128xf32>
    tpu.vector_store %arg10[%c0_17, %c0_18], %16 {strides = array<i32>} : memref<8x128xf32, #tpu.memory_space<vmem>>, vector<8x128xf32>,
    return
  }
  func.func @transform_0(%arg0: i32) -> (i32, i32) {
    %c0_i32 = arith.constant 0 : i32
    %c0_i32_0 = arith.constant 0 : i32
    return %arg0, %c0_i32 : i32, i32
  }
  func.func @transform_1(%arg0: i32) -> (i32, i32) {
    %c0_i32 = arith.constant 0 : i32
    %c0_i32_0 = arith.constant 0 : i32
    return %arg0, %c0_i32 : i32, i32
  }
  func.func @transform_2(%arg0: i32) -> (i32, i32) {
    %c0_i32 = arith.constant 0 : i32
    %c0_i32_0 = arith.constant 0 : i32
    return %arg0, %c0_i32 : i32, i32
  }
  func.func @transform_3(%arg0: i32) -> (i32, i32) {
    %c0_i32 = arith.constant 0 : i32
    %c0_i32_0 = arith.constant 0 : i32
    return %arg0, %c0_i32 : i32, i32
  }
  func.func @transform_4(%arg0: i32) -> (i32, i32) {
    %c0_i32 = arith.constant 0 : i32
    %c0_i32_0 = arith.constant 0 : i32
    return %arg0, %c0_i32 : i32, i32
  }
  func.func @transform_5(%arg0: i32) -> (i32, i32) {
    %c0_i32 = arith.constant 0 : i32
    %c0_i32_0 = arith.constant 0 : i32
    return %arg0, %c0_i32 : i32, i32
  }
  func.func @transform_6(%arg0: i32) -> (i32, i32) {
    %c0_i32 = arith.constant 0 : i32
    %c0_i32_0 = arith.constant 0 : i32
    return %arg0, %c0_i32 : i32, i32
  }
  func.func @transform_7(%arg0: i32) -> (i32, i32) {
    %c0_i32 = arith.constant 0 : i32
    %c0_i32_0 = arith.constant 0 : i32
    return %arg0, %c0_i32 : i32, i32
  }
  func.func @transform_8(%arg0: i32) -> (i32, i32) {
    %c0_i32 = arith.constant 0 : i32
    %c0_i32_0 = arith.constant 0 : i32
    return %arg0, %c0_i32 : i32, i32
  }
  func.func @transform_9(%arg0: i32) -> (i32, i32) {
    %c0_i32 = arith.constant 0 : i32
    %c0_i32_0 = arith.constant 0 : i32
    return %arg0, %c0_i32 : i32, i32
  }
}

</mosaic_0001>

<bundles_post_ra>
// kernel: reduction_a_forward.11
= control target key start
LH: loop header
LB: loop body
LE: loop exit
PB: predicated region body
PF: predicated region fallthrough
CT: control target
= control target key end

     0   :  { %10 = vsyncpa [#allocation3], 0  ;;  %s1501_s15 = smov 0   ;;  %s1828_s0 = inlined_call_operand.vmem [shape: bf16[512,128], index: 0, kind: input, shape index: {}]   ;;  %s1829_s1 = inlined_call_operand.hbm [shape: bf16[128,256], index: 1, kind: input, shape index: {}]   ;;  %s1830_s2 = inlined_call_operand.vmem [shape: bf16[512,256], index: 2, kind: output, shape index: {0}]   ;;  %s1831_s3 = inlined_call_operand.vmem [shape: f32[16,256], index: 3, kind: output, shape index: {1}]   ;;  %s1832_s4 = inlined_call_operand.vmem [shape: f32[16,256], index: 4, kind: output, shape index: {2}]  }
   0x1 LB: > { %s1507_s16 = sadd.s32 4294967295, %s1470_s15   ;;  %p1239_p0 = scmp.ge.s32.totalorder %s1470_s15, 1  ;;  %s1470_s15 = sphi %s1501_s15, %s16_s15  }
   0x2   : > { %p146_p1 = scmp.lt.s32.totalorder %s1470_s15, 3  ;;  %s1472_s17 = smov [#allocation2]  }
   0x3   : > { %s158_s18 = sshll.u32 %s1472_s17, 4  ;;  %p1833_p3 = scmp.eq.s32.totalorder %s1507_s16, 0  ;;  %s159_s18 = int_to_ptr.vmem [resolvable:$true] %s158_s18 }
   0x4   : > { %p1511_p2 = pnand %p1239_p0, %p146_p1  ;;  %s1432_s23 = scalar_lea.hbm %s1829_s1, 2048 }
   0x5   : > { %p1433_p6 = scmp.ne.s32.totalorder %s1829_s1, %s1432_s23  ;;  %p1439_p10 = scmp.lt.u32.totalorder %s1432_s23, %s1829_s1 }
   0x6   : > { %s1835_s19 = scalar_select %p1511_p2, 1, 0 }
   0x7   : > { %p1374_p4 = pneg %p1511_p2 }
   0x9   : > { %p1520_p5 = pnand %p1833_p3, %p1374_p4 }
   0xb   : > { %p1434_p7 = pneg %p1520_p5 }
   0xd   : > { %p1435_p8 = pnand %p1434_p7, %p1433_p6 }
   0xf   : > { %p1436_p9 = pneg %p1435_p8 }
  0x11   : > { %p1441_p11 = pnand %p1439_p10, %p1436_p9 }
  0x13   : > { %1444 = shalt.err (!%p1441_p11)
}
  0x14   : > { %s1445_s28 = scalar_lea.vmem %s159_s18, 2048  ;;  %p1453_p1 = scmp.lt.s32.totalorder %s159_s18, %s159_s18 }
  0x15   : > { %p1446_p12 = scmp.ne.s32.totalorder %s159_s18, %s1445_s28  ;;  %p1454_p4 = scmp.lt.s32.totalorder %s1445_s28, %s1445_s28 }
  0x17   : > { %p1448_p13 = pnand %p1446_p12, %p1434_p7  ;;  %p1455_p3 = por %p1454_p4, %p1453_p1 }
  0x19   : > { %p1449_p0 = pneg %p1448_p13 }
  0x1b   : > { %p1456_p2 = pnand %p1455_p3, %p1449_p0 }
  0x1d   : > { %1459 = shalt.err (!%p1456_p2)
}
  0x1e   : > { %s1473_s29 = smov 128   ;;  %s1474_s30 = smov 8  }
  0x1f   : > { %1377 = dma.hbm_to_vmem [thread:$0]  (!%p1520_p5), %s1829_s1, 2048, %s159_s18, [#allocation3], %s1473_s29, %s1473_s29, %s1474_s30  }
  0x20   : > { %p1837_p6 = scmp.ne.s32.totalorder %s1835_s19, 0 }
  0x21   : > { %p1838_p8 = scmp.eq.s32.totalorder (!%p1837_p6), %s1507_s16, 0 }
  0x22   : > { %183 = sbr.rel (%p1837_p6) target bundleno = 396 (0x18c), region = 28 }
  0x29   : > { %1465 = dma.done.wait (%p1838_p8), [#allocation3], 2048   ;;  %p1839_p7 = pmov %p1838_p8 }
  0x2a   : > { %v1475_v0 = vmov 0   ;;  %s1244_s7 = sshll.u32 %s1507_s16, 5  ;;  %v1392_v1 = vld [vmem:[#allocation2 + $0x4] ss:$8 sps:$4 sm:$0xff]   ;;  %v1394_v2 = vld [vmem:[#allocation2] ss:$8 sps:$4 sm:$0xff]  }
  0x2b   : > { %1467 = vsyncadd (%p1839_p7), [#allocation3], 4294965248  ;;  %500 = vmatprep.mubr.bf16.mxu0 %v1475_v0  ;;  %580 = vmatprep.mubr.bf16.mxu1 %v1475_v0  ;;  %p221_p2 = scmp.lt.s32.totalorder %s1244_s7, 63  ;;  %v1395_v3 = vld [vmem:[#allocation2 + $0x14] ss:$8 sps:$4 sm:$0xff]   ;;  %p233_p3 = scmp.lt.s32.totalorder %s1507_s16, 1 }
  0x2c   : > { %468 = vmatprep.subr.bf16.mxu0 %v1392_v1  ;;  %1354 = vmatprep.subr.bf16.mxu1 %v1392_v1  ;;  %v1397_v4 = vld [vmem:[#allocation2 + $0x10] ss:$8 sps:$4 sm:$0xff]   ;;  %v1398_v5 = vld [vmem:[#allocation2 + $0x24] ss:$8 sps:$4 sm:$0xff]   ;;  %v1400_v6 = vld [vmem:[#allocation2 + $0x20] ss:$8 sps:$4 sm:$0xff]  }
  0x2d   : > { %s1841_s7 = smov (!%p221_p2, %s1244_s7), 63  ;;  %469 = vmatpush1.bf16.msra.mxu0 %v1394_v2  ;;  %1362 = vmatpush1.bf16.msra.mxu1 %v1394_v2  ;;  %v1401_v7 = vld [vmem:[#allocation2 + $0x34] ss:$8 sps:$4 sm:$0xff]   ;;  %v1403_v8 = vld [vmem:[#allocation2 + $0x30] ss:$8 sps:$4 sm:$0xff]   ;;  %s1843_s16 = smov (!%p233_p3, %s1507_s16), 1 }
  0x2e   : > { %470 = vmatprep.subr.bf16.mxu0 %v1395_v3  ;;  %1355 = vmatprep.subr.bf16.mxu1 %v1395_v3  ;;  %s1245_s8 = sshll.u32 %s1841_s7, 2  ;;  %v1404_v9 = vld [vmem:[#allocation2 + $0x44] ss:$8 sps:$4 sm:$0xff]   ;;  %v1406_v10 = vld [vmem:[#allocation2 + $0x40] ss:$8 sps:$4 sm:$0xff]   ;;  %s1319_s12 = sshll.u32 %s1841_s7, 3 }
  0x2f   : > { %s1555_s11 = scalar_lea.vmem %s1828_s0, %s1245_s8  ;;  %v1407_v11 = vld [vmem:[#allocation2 + $0x54] ss:$8 sps:$4 sm:$0xff]   ;;  %v1409_v12 = vld [vmem:[#allocation2 + $0x50] ss:$8 sps:$4 sm:$0xff]   ;;  %v1410_v13 = vld [vmem:[#allocation2 + $0x64] ss:$8 sps:$4 sm:$0xff]   ;;  %s1593_s17 = scalar_lea.vmem %s1830_s2, %s1319_s12 }
  0x30   : > { %v1412_v14 = vld [vmem:[#allocation2 + $0x60] ss:$8 sps:$4 sm:$0xff]   ;;  %v1413_v15 = vld [vmem:[#allocation2 + $0x74] ss:$8 sps:$4 sm:$0xff]   ;;  %v1415_v16 = vld [vmem:[#allocation2 + $0x70] ss:$8 sps:$4 sm:$0xff]  }
  0x31   : > { %471 = vmatpush1.bf16.msra.mxu0 %v1397_v4  ;;  %1363 = vmatpush1.bf16.msra.mxu1 %v1397_v4  ;;  %v1416_v17 = vld [vmem:[%s1555_s11] sm:$0xff]   ;;  %v1417_v19 = vld [vmem:[%s1555_s11 + $0x8] sm:$0xff]   ;;  %v1418_v21 = vld [vmem:[%s1555_s11 + $0x10] sm:$0xff]   ;;  %s1320_s18 = sshll.u32 %s1843_s16, 4 }
  0x32   : > { %472 = vmatprep.subr.bf16.mxu0 %v1398_v5  ;;  %1356 = vmatprep.subr.bf16.mxu1 %v1398_v5  ;;  %v1420_v18 = vld [vmem:[%s1555_s11 + $0x40] sm:$0xff]   ;;  %v1422_v20 = vld [vmem:[%s1555_s11 + $0x48] sm:$0xff]   ;;  %v1424_v22 = vld [vmem:[%s1555_s11 + $0x50] sm:$0xff]   ;;  %s237_s21 = scalar_lea.vmem %s1831_s3, %s1320_s18  ;;  %s242_s24 = scalar_lea.vmem %s1832_s4, %s1320_s18 }
  0x33   : > { %v1419_v23 = vld [vmem:[%s1555_s11 + $0x18] sm:$0xff]   ;;  %v1421_v25 = vld [vmem:[%s1555_s11 + $0x20] sm:$0xff]   ;;  %v1423_v27 = vld [vmem:[%s1555_s11 + $0x28] sm:$0xff]  }
  0x34   : > { %v1426_v24 = vld [vmem:[%s1555_s11 + $0x58] sm:$0xff]   ;;  %v1428_v26 = vld [vmem:[%s1555_s11 + $0x60] sm:$0xff]   ;;  %v1429_v28 = vld [vmem:[%s1555_s11 + $0x68] sm:$0xff]  }
  0x35   : > { %473 = vmatpush1.bf16.msra.mxu0 %v1400_v6  ;;  %1364 = vmatpush1.bf16.msra.mxu1 %v1400_v6  ;;  %v1425_v29 = vld [vmem:[%s1555_s11 + $0x30] sm:$0xff]   ;;  %v1427_v31 = vld [vmem:[%s1555_s11 + $0x38] sm:$0xff]  }
  0x36   : > { %474 = vmatprep.subr.bf16.mxu0 %v1401_v7  ;;  %1357 = vmatprep.subr.bf16.mxu1 %v1401_v7  ;;  %v1430_v30 = vld [vmem:[%s1555_s11 + $0x70] sm:$0xff]   ;;  %v1431_v32 = vld [vmem:[%s1555_s11 + $0x78] sm:$0xff]  }
  0x39   : > { %475 = vmatpush1.bf16.msra.mxu0 %v1403_v8  ;;  %1365 = vmatpush1.bf16.msra.mxu1 %v1403_v8 }
  0x3a   : > { %476 = vmatprep.subr.bf16.mxu0 %v1404_v9  ;;  %1358 = vmatprep.subr.bf16.mxu1 %v1404_v9 }
  0x3d   : > { %477 = vmatpush1.bf16.msra.mxu0 %v1406_v10  ;;  %1366 = vmatpush1.bf16.msra.mxu1 %v1406_v10 }
  0x3e   : > { %478 = vmatprep.subr.bf16.mxu0 %v1407_v11  ;;  %1359 = vmatprep.subr.bf16.mxu1 %v1407_v11 }
  0x41   : > { %479 = vmatpush1.bf16.msra.mxu0 %v1409_v12  ;;  %1367 = vmatpush1.bf16.msra.mxu1 %v1409_v12 }
  0x42   : > { %480 = vmatprep.subr.bf16.mxu0 %v1410_v13  ;;  %1360 = vmatprep.subr.bf16.mxu1 %v1410_v13 }
  0x45   : > { %481 = vmatpush1.bf16.msra.mxu0 %v1412_v14  ;;  %1368 = vmatpush1.bf16.msra.mxu1 %v1412_v14 }
  0x46   : > { %482 = vmatprep.subr.bf16.mxu0 %v1413_v15  ;;  %1361 = vmatprep.subr.bf16.mxu1 %v1413_v15 }
  0x49   : > { %483 = vmatpush1.bf16.msra.mxu0 %v1415_v16  ;;  %1369 = vmatpush1.bf16.msra.mxu1 %v1415_v16 }
  0x4c   : > { %501 = vmatmul.mubr.bf16.vlgmr.msra.gmra.mrb[0].mxu0 %v1416_v17  ;;  %581 = vmatmul.mubr.bf16.vlgmr.msra.gmra.mrb[0].mxu1 %v1420_v18 }
  0x4d   : > { %510 = vmatprep.mubr.bf16.mxu0 %v1475_v0  ;;  %590 = vmatprep.mubr.bf16.mxu1 %v1475_v0 }
  0x54   : > { %511 = vmatmul.mubr.bf16.gmra.mrb[4].mxu0 %v1417_v19  ;;  %591 = vmatmul.mubr.bf16.gmra.mrb[4].mxu1 %v1422_v20 }
  0x55   : > { %520 = vmatprep.mubr.bf16.mxu0 %v1475_v0  ;;  %600 = vmatprep.mubr.bf16.mxu1 %v1475_v0 }
  0x5c   : > { %521 = vmatmul.mubr.bf16.gmra.mrb[8].mxu0 %v1418_v21  ;;  %601 = vmatmul.mubr.bf16.gmra.mrb[8].mxu1 %v1424_v22 }
  0x5d   : > { %530 = vmatprep.mubr.bf16.mxu0 %v1475_v0  ;;  %610 = vmatprep.mubr.bf16.mxu1 %v1475_v0 }
  0x64   : > { %531 = vmatmul.mubr.bf16.gmra.mrb[12].mxu0 %v1419_v23  ;;  %611 = vmatmul.mubr.bf16.gmra.mrb[12].mxu1 %v1426_v24 }
  0x65   : > { %540 = vmatprep.mubr.bf16.mxu0 %v1475_v0  ;;  %620 = vmatprep.mubr.bf16.mxu1 %v1475_v0 }
  0x6c   : > { %541 = vmatmul.mubr.bf16.gmra.mrb[16].mxu0 %v1421_v25  ;;  %621 = vmatmul.mubr.bf16.gmra.mrb[16].mxu1 %v1428_v26 }
  0x6d   : > { %550 = vmatprep.mubr.bf16.mxu0 %v1475_v0  ;;  %630 = vmatprep.mubr.bf16.mxu1 %v1475_v0 }
  0x74   : > { %551 = vmatmul.mubr.bf16.gmra.mrb[20].mxu0 %v1423_v27  ;;  %631 = vmatmul.mubr.bf16.gmra.mrb[20].mxu1 %v1429_v28 }
  0x75   : > { %560 = vmatprep.mubr.bf16.mxu0 %v1475_v0  ;;  %640 = vmatprep.mubr.bf16.mxu1 %v1475_v0 }
  0x7c   : > { %561 = vmatmul.mubr.bf16.gmra.mrb[24].mxu0 %v1425_v29  ;;  %641 = vmatmul.mubr.bf16.gmra.mrb[24].mxu1 %v1430_v30 }
  0x7d   : > { %570 = vmatprep.mubr.bf16.mxu0 %v1475_v0  ;;  %650 = vmatprep.mubr.bf16.mxu1 %v1475_v0 }
  0x84   : > { %571 = vmatmul.mubr.bf16.gmra.mrb[28].mxu0 %v1427_v31  ;;  %651 = vmatmul.mubr.bf16.gmra.mrb[28].mxu1 %v1431_v32 }
 0x11f   : > { %v502_v33 = vpop.f32.mrb[0].mxu0  ;;  %v1588_v34 = vpop.f32.mrb[0].mxu1 }
 0x120   : > { %v504_v35 = vpop.f32.mrb[1].mxu0  ;;  %v1595_v36 = vpop.f32.mrb[1].mxu1  ;;  %v959_v41 = vmul.f32 %v502_v33, %v502_v33 }
 0x121   : > { %v1322_v37 = vpack.c.bf16 %v504_v35, %v502_v33  ;;  %v506_v38 = vpop.f32.mrb[2].mxu0  ;;  %v1338_v39 = vpack.c.bf16 %v1595_v36, %v1588_v34  ;;  %v1599_v40 = vpop.f32.mrb[2].mxu1  ;;  %v960_v42 = vmul.f32 %v504_v35, %v504_v35 }
 0x122   : > { %v885_v43 = vadd.f32 %v506_v38, %v502_v33  ;;  %v961_v44 = vmul.f32 %v506_v38, %v506_v38  ;;  %v508_v45 = vpop.f32.mrb[3].mxu0  ;;  %v1601_v46 = vpop.f32.mrb[3].mxu1 }
 0x123   : > { %853 = vst [vmem:[%s1593_s17] sm:$0xff] %v1322_v37  ;;  %v1323_v47 = vpack.c.bf16 %v508_v45, %v506_v38  ;;  %v922_v48 = vadd.f32 %v508_v45, %v504_v35  ;;  %v962_v49 = vmul.f32 %v508_v45, %v508_v45  ;;  %869 = vst [vmem:[%s1593_s17 + $0x80] sm:$0xff] %v1338_v39 }
 0x124   : > { %v1339_v50 = vpack.c.bf16 %v1601_v46, %v1599_v40  ;;  %v1023_v51 = vadd.f32 %v961_v44, %v959_v41 }
 0x125   : > { %854 = vst [vmem:[%s1593_s17 + $0x8] sm:$0xff] %v1323_v47  ;;  %v1060_v52 = vadd.f32 %v962_v49, %v960_v42 }
 0x126   : > { %870 = vst [vmem:[%s1593_s17 + $0x88] sm:$0xff] %v1339_v50 }
 0x127   : > { %v512_v53 = vpop.f32.mrb[4].mxu0  ;;  %v1609_v54 = vpop.f32.mrb[4].mxu1 }
 0x128   : > { %v886_v55 = vadd.f32 %v885_v43, %v512_v53  ;;  %v963_v56 = vmul.f32 %v512_v53, %v512_v53  ;;  %v514_v57 = vpop.f32.mrb[5].mxu0  ;;  %v1611_v58 = vpop.f32.mrb[5].mxu1 }
 0x129   : > { %v1324_v59 = vpack.c.bf16 %v514_v57, %v512_v53  ;;  %v923_v60 = vadd.f32 %v922_v48, %v514_v57  ;;  %v964_v61 = vmul.f32 %v514_v57, %v514_v57  ;;  %v516_v62 = vpop.f32.mrb[6].mxu0  ;;  %v1340_v63 = vpack.c.bf16 %v1611_v58, %v1609_v54  ;;  %v1615_v0 = vpop.f32.mrb[6].mxu1 }
 0x12a   : > { %v1024_v1 = vadd.f32 %v1023_v51, %v963_v56  ;;  %v887_v2 = vadd.f32 %v886_v55, %v516_v62  ;;  %v965_v3 = vmul.f32 %v516_v62, %v516_v62  ;;  %v518_v4 = vpop.f32.mrb[7].mxu0  ;;  %v1617_v5 = vpop.f32.mrb[7].mxu1 }
 0x12b   : > { %855 = vst [vmem:[%s1593_s17 + $0x10] sm:$0xff] %v1324_v59  ;;  %v1061_v6 = vadd.f32 %v1060_v52, %v964_v61  ;;  %v1325_v7 = vpack.c.bf16 %v518_v4, %v516_v62  ;;  %v924_v8 = vadd.f32 %v923_v60, %v518_v4  ;;  %v966_v9 = vmul.f32 %v518_v4, %v518_v4 }
 0x12c   : > { %871 = vst [vmem:[%s1593_s17 + $0x90] sm:$0xff] %v1340_v63  ;;  %v1025_v10 = vadd.f32 %v1024_v1, %v965_v3  ;;  %v1341_v11 = vpack.c.bf16 %v1617_v5, %v1615_v0 }
 0x12d   : > { %856 = vst [vmem:[%s1593_s17 + $0x18] sm:$0xff] %v1325_v7  ;;  %v1062_v12 = vadd.f32 %v1061_v6, %v966_v9 }
 0x12e   : > { %872 = vst [vmem:[%s1593_s17 + $0x98] sm:$0xff] %v1341_v11 }
 0x12f   : > { %v522_v13 = vpop.f32.mrb[8].mxu0  ;;  %v1625_v14 = vpop.f32.mrb[8].mxu1 }
 0x130   : > { %v888_v15 = vadd.f32 %v887_v2, %v522_v13  ;;  %v967_v16 = vmul.f32 %v522_v13, %v522_v13  ;;  %v524_v17 = vpop.f32.mrb[9].mxu0  ;;  %v1627_v18 = vpop.f32.mrb[9].mxu1 }
 0x131   : > { %v1326_v19 = vpack.c.bf16 %v524_v17, %v522_v13  ;;  %v925_v20 = vadd.f32 %v924_v8, %v524_v17  ;;  %v968_v21 = vmul.f32 %v524_v17, %v524_v17  ;;  %v526_v22 = vpop.f32.mrb[10].mxu0  ;;  %v1342_v23 = vpack.c.bf16 %v1627_v18, %v1625_v14  ;;  %v1631_v24 = vpop.f32.mrb[10].mxu1 }
 0x132   : > { %v1026_v25 = vadd.f32 %v1025_v10, %v967_v16  ;;  %v889_v26 = vadd.f32 %v888_v15, %v526_v22  ;;  %v969_v27 = vmul.f32 %v526_v22, %v526_v22  ;;  %v528_v28 = vpop.f32.mrb[11].mxu0  ;;  %v1633_v29 = vpop.f32.mrb[11].mxu1 }
 0x133   : > { %857 = vst [vmem:[%s1593_s17 + $0x20] sm:$0xff] %v1326_v19  ;;  %v1063_v30 = vadd.f32 %v1062_v12, %v968_v21  ;;  %v1327_v31 = vpack.c.bf16 %v528_v28, %v526_v22  ;;  %v926_v32 = vadd.f32 %v925_v20, %v528_v28  ;;  %v970_v33 = vmul.f32 %v528_v28, %v528_v28 }
 0x134   : > { %873 = vst [vmem:[%s1593_s17 + $0xa0] sm:$0xff] %v1342_v23  ;;  %v1027_v35 = vadd.f32 %v1026_v25, %v969_v27  ;;  %v1343_v37 = vpack.c.bf16 %v1633_v29, %v1631_v24 }
 0x135   : > { %858 = vst [vmem:[%s1593_s17 + $0x28] sm:$0xff] %v1327_v31  ;;  %v1064_v38 = vadd.f32 %v1063_v30, %v970_v33 }
 0x136   : > { %874 = vst [vmem:[%s1593_s17 + $0xa8] sm:$0xff] %v1343_v37 }
 0x137   : > { %v532_v39 = vpop.f32.mrb[12].mxu0  ;;  %v1641_v41 = vpop.f32.mrb[12].mxu1 }
 0x138   : > { %v890_v42 = vadd.f32 %v889_v26, %v532_v39  ;;  %v971_v43 = vmul.f32 %v532_v39, %v532_v39  ;;  %v534_v44 = vpop.f32.mrb[13].mxu0  ;;  %v1643_v45 = vpop.f32.mrb[13].mxu1 }
 0x139   : > { %v1328_v47 = vpack.c.bf16 %v534_v44, %v532_v39  ;;  %v927_v48 = vadd.f32 %v926_v32, %v534_v44  ;;  %v972_v49 = vmul.f32 %v534_v44, %v534_v44  ;;  %v536_v50 = vpop.f32.mrb[14].mxu0  ;;  %v1344_v51 = vpack.c.bf16 %v1643_v45, %v1641_v41  ;;  %v1647_v52 = vpop.f32.mrb[14].mxu1 }
 0x13a   : > { %v1028_v53 = vadd.f32 %v1027_v35, %v971_v43  ;;  %v891_v55 = vadd.f32 %v890_v42, %v536_v50  ;;  %v973_v56 = vmul.f32 %v536_v50, %v536_v50  ;;  %v538_v57 = vpop.f32.mrb[15].mxu0  ;;  %v1649_v59 = vpop.f32.mrb[15].mxu1 }
 0x13b   : > { %859 = vst [vmem:[%s1593_s17 + $0x30] sm:$0xff] %v1328_v47  ;;  %v1065_v60 = vadd.f32 %v1064_v38, %v972_v49  ;;  %v1329_v61 = vpack.c.bf16 %v538_v57, %v536_v50  ;;  %v928_v62 = vadd.f32 %v927_v48, %v538_v57  ;;  %v974_v63 = vmul.f32 %v538_v57, %v538_v57 }
 0x13c   : > { %875 = vst [vmem:[%s1593_s17 + $0xb0] sm:$0xff] %v1344_v51  ;;  %v1029_v1 = vadd.f32 %v1028_v53, %v973_v56  ;;  %v1345_v2 = vpack.c.bf16 %v1649_v59, %v1647_v52 }
 0x13d   : > { %860 = vst [vmem:[%s1593_s17 + $0x38] sm:$0xff] %v1329_v61  ;;  %v1066_v3 = vadd.f32 %v1065_v60, %v974_v63 }
 0x13e   : > { %876 = vst [vmem:[%s1593_s17 + $0xb8] sm:$0xff] %v1345_v2 }
 0x13f   : > { %v542_v4 = vpop.f32.mrb[16].mxu0  ;;  %v1657_v6 = vpop.f32.mrb[16].mxu1 }
 0x140   : > { %v892_v7 = vadd.f32 %v891_v55, %v542_v4  ;;  %v975_v8 = vmul.f32 %v542_v4, %v542_v4  ;;  %v544_v9 = vpop.f32.mrb[17].mxu0  ;;  %v1659_v10 = vpop.f32.mrb[17].mxu1 }
 0x141   : > { %v1330_v11 = vpack.c.bf16 %v544_v9, %v542_v4  ;;  %v929_v12 = vadd.f32 %v928_v62, %v544_v9  ;;  %v976_v13 = vmul.f32 %v544_v9, %v544_v9  ;;  %v546_v15 = vpop.f32.mrb[18].mxu0  ;;  %v1346_v16 = vpack.c.bf16 %v1659_v10, %v1657_v6  ;;  %v1663_v17 = vpop.f32.mrb[18].mxu1 }
 0x142   : > { %v1030_v19 = vadd.f32 %v1029_v1, %v975_v8  ;;  %v893_v20 = vadd.f32 %v892_v7, %v546_v15  ;;  %v977_v21 = vmul.f32 %v546_v15, %v546_v15  ;;  %v548_v22 = vpop.f32.mrb[19].mxu0  ;;  %v1665_v23 = vpop.f32.mrb[19].mxu1 }
 0x143   : > { %861 = vst [vmem:[%s1593_s17 + $0x40] sm:$0xff] %v1330_v11  ;;  %v1067_v25 = vadd.f32 %v1066_v3, %v976_v13  ;;  %v1331_v26 = vpack.c.bf16 %v548_v22, %v546_v15  ;;  %v930_v27 = vadd.f32 %v929_v12, %v548_v22  ;;  %v978_v28 = vmul.f32 %v548_v22, %v548_v22 }
 0x144   : > { %877 = vst [vmem:[%s1593_s17 + $0xc0] sm:$0xff] %v1346_v16  ;;  %v1031_v30 = vadd.f32 %v1030_v19, %v977_v21  ;;  %v1347_v31 = vpack.c.bf16 %v1665_v23, %v1663_v17 }
 0x145   : > { %862 = vst [vmem:[%s1593_s17 + $0x48] sm:$0xff] %v1331_v26  ;;  %v1068_v32 = vadd.f32 %v1067_v25, %v978_v28 }
 0x146   : > { %878 = vst [vmem:[%s1593_s17 + $0xc8] sm:$0xff] %v1347_v31 }
 0x147   : > { %v552_v33 = vpop.f32.mrb[20].mxu0  ;;  %v1673_v35 = vpop.f32.mrb[20].mxu1 }
 0x148   : > { %v894_v37 = vadd.f32 %v893_v20, %v552_v33  ;;  %v979_v38 = vmul.f32 %v552_v33, %v552_v33  ;;  %v554_v39 = vpop.f32.mrb[21].mxu0  ;;  %v1675_v42 = vpop.f32.mrb[21].mxu1 }
 0x149   : > { %v1332_v43 = vpack.c.bf16 %v554_v39, %v552_v33  ;;  %v931_v44 = vadd.f32 %v930_v27, %v554_v39  ;;  %v980_v47 = vmul.f32 %v554_v39, %v554_v39  ;;  %v556_v48 = vpop.f32.mrb[22].mxu0  ;;  %v1348_v49 = vpack.c.bf16 %v1675_v42, %v1673_v35  ;;  %v1679_v50 = vpop.f32.mrb[22].mxu1 }
 0x14a   : > { %v1032_v51 = vadd.f32 %v1031_v30, %v979_v38  ;;  %v895_v53 = vadd.f32 %v894_v37, %v556_v48  ;;  %v981_v55 = vmul.f32 %v556_v48, %v556_v48  ;;  %v558_v56 = vpop.f32.mrb[23].mxu0  ;;  %v1681_v57 = vpop.f32.mrb[23].mxu1 }
 0x14b   : > { %863 = vst [vmem:[%s1593_s17 + $0x50] sm:$0xff] %v1332_v43  ;;  %v1069_v60 = vadd.f32 %v1068_v32, %v980_v47  ;;  %v1333_v61 = vpack.c.bf16 %v558_v56, %v556_v48  ;;  %v932_v62 = vadd.f32 %v931_v44, %v558_v56  ;;  %v982_v63 = vmul.f32 %v558_v56, %v558_v56 }
 0x14c   : > { %879 = vst [vmem:[%s1593_s17 + $0xd0] sm:$0xff] %v1348_v49  ;;  %v1033_v1 = vadd.f32 %v1032_v51, %v981_v55  ;;  %v1349_v2 = vpack.c.bf16 %v1681_v57, %v1679_v50 }
 0x14d   : > { %864 = vst [vmem:[%s1593_s17 + $0x58] sm:$0xff] %v1333_v61  ;;  %v1070_v3 = vadd.f32 %v1069_v60, %v982_v63 }
 0x14e   : > { %880 = vst [vmem:[%s1593_s17 + $0xd8] sm:$0xff] %v1349_v2 }
 0x14f   : > { %v562_v4 = vpop.f32.mrb[24].mxu0  ;;  %v1689_v7 = vpop.f32.mrb[24].mxu1 }
 0x150   : > { %v896_v8 = vadd.f32 %v895_v53, %v562_v4  ;;  %v983_v9 = vmul.f32 %v562_v4, %v562_v4  ;;  %v564_v11 = vpop.f32.mrb[25].mxu0  ;;  %v1691_v12 = vpop.f32.mrb[25].mxu1 }
 0x151   : > { %v1334_v13 = vpack.c.bf16 %v564_v11, %v562_v4  ;;  %v933_v15 = vadd.f32 %v932_v62, %v564_v11  ;;  %v984_v16 = vmul.f32 %v564_v11, %v564_v11  ;;  %v566_v19 = vpop.f32.mrb[26].mxu0  ;;  %v1350_v20 = vpack.c.bf16 %v1691_v12, %v1689_v7  ;;  %v1695_v21 = vpop.f32.mrb[26].mxu1 }
 0x152   : > { %v1034_v22 = vadd.f32 %v1033_v1, %v983_v9  ;;  %v897_v25 = vadd.f32 %v896_v8, %v566_v19  ;;  %v985_v26 = vmul.f32 %v566_v19, %v566_v19  ;;  %v568_v27 = vpop.f32.mrb[27].mxu0  ;;  %v1697_v28 = vpop.f32.mrb[27].mxu1 }
 0x153   : > { %865 = vst [vmem:[%s1593_s17 + $0x60] sm:$0xff] %v1334_v13  ;;  %v1071_v30 = vadd.f32 %v1070_v3, %v984_v16  ;;  %v1335_v31 = vpack.c.bf16 %v568_v27, %v566_v19  ;;  %v934_v32 = vadd.f32 %v933_v15, %v568_v27  ;;  %v986_v33 = vmul.f32 %v568_v27, %v568_v27 }
 0x154   : > { %881 = vst [vmem:[%s1593_s17 + $0xe0] sm:$0xff] %v1350_v20  ;;  %v1035_v37 = vadd.f32 %v1034_v22, %v985_v26  ;;  %v1351_v38 = vpack.c.bf16 %v1697_v28, %v1695_v21  ;;  %v991_v15 = vmul.f32 %v1588_v34, %v1588_v34  ;;  %v992_v22 = vmul.f32 %v1595_v36, %v1595_v36 }
 0x155   : > { %866 = vst [vmem:[%s1593_s17 + $0x68] sm:$0xff] %v1335_v31  ;;  %v1072_v39 = vadd.f32 %v1071_v30, %v986_v33  ;;  %v993_v27 = vmul.f32 %v1599_v40, %v1599_v40 }
 0x156   : > { %882 = vst [vmem:[%s1593_s17 + $0xe8] sm:$0xff] %v1351_v38 }
 0x157   : > { %v572_v43 = vpop.f32.mrb[28].mxu0  ;;  %v1705_v44 = vpop.f32.mrb[28].mxu1 }
 0x158   : > { %v898_v47 = vadd.f32 %v897_v25, %v572_v43  ;;  %v987_v48 = vmul.f32 %v572_v43, %v572_v43  ;;  %v574_v49 = vpop.f32.mrb[29].mxu0  ;;  %v1707_v51 = vpop.f32.mrb[29].mxu1 }
 0x159   : > { %v1336_v53 = vpack.c.bf16 %v574_v49, %v572_v43  ;;  %v935_v55 = vadd.f32 %v934_v32, %v574_v49  ;;  %v988_v56 = vmul.f32 %v574_v49, %v574_v49  ;;  %v576_v60 = vpop.f32.mrb[30].mxu0  ;;  %v1352_v61 = vpack.c.bf16 %v1707_v51, %v1705_v44  ;;  %v1711_v62 = vpop.f32.mrb[30].mxu1 }
 0x15a   : > { %v1036_v63 = vadd.f32 %v1035_v37, %v987_v48  ;;  %v899_v1 = vadd.f32 %v898_v47, %v576_v60  ;;  %v989_v2 = vmul.f32 %v576_v60, %v576_v60  ;;  %v578_v3 = vpop.f32.mrb[31].mxu0  ;;  %v1713_v4 = vpop.f32.mrb[31].mxu1  ;;  %v995_v37 = vmul.f32 %v1609_v54, %v1609_v54 }
 0x15b   : > { %867 = vst [vmem:[%s1593_s17 + $0x70] sm:$0xff] %v1336_v53  ;;  %v1073_v8 = vadd.f32 %v1072_v39, %v988_v56  ;;  %v1337_v9 = vpack.c.bf16 %v578_v3, %v576_v60  ;;  %v936_v11 = vadd.f32 %v935_v55, %v578_v3  ;;  %v990_v13 = vmul.f32 %v578_v3, %v578_v3 }
 0x15c   : > { %883 = vst [vmem:[%s1593_s17 + $0xf0] sm:$0xff] %v1352_v61  ;;  %v900_v16 = vadd.f32 %v899_v1, %v1588_v34  ;;  %v1037_v19 = vadd.f32 %v1036_v63, %v989_v2  ;;  %v1353_v20 = vpack.c.bf16 %v1713_v4, %v1711_v62  ;;  %v994_v34 = vmul.f32 %v1601_v46, %v1601_v46 }
 0x15d   : > { %868 = vst [vmem:[%s1593_s17 + $0x78] sm:$0xff] %v1337_v9  ;;  %v937_v25 = vadd.f32 %v936_v11, %v1595_v36  ;;  %v1074_v26 = vadd.f32 %v1073_v8, %v990_v13  ;;  %v996_v39 = vmul.f32 %v1611_v58, %v1611_v58  ;;  %v997_v47 = vmul.f32 %v1615_v0, %v1615_v0 }
 0x15e   : > { %v901_v30 = vadd.f32 %v900_v16, %v1599_v40  ;;  %v1038_v31 = vadd.f32 %v1037_v19, %v991_v15  ;;  %884 = vst [vmem:[%s1593_s17 + $0xf8] sm:$0xff] %v1353_v20 }
 0x15f   : > { %v938_v32 = vadd.f32 %v937_v25, %v1601_v46  ;;  %v1075_v33 = vadd.f32 %v1074_v26, %v992_v22  ;;  %v998_v46 = vmul.f32 %v1617_v5, %v1617_v5  ;;  %v1007_v25 = vmul.f32 %v1657_v6, %v1657_v6 }
 0x160   : > { %v902_v38 = vadd.f32 %v901_v30, %v1609_v54  ;;  %v1039_v36 = vadd.f32 %v1038_v31, %v993_v27  ;;  %v999_v54 = vmul.f32 %v1625_v14, %v1625_v14  ;;  %v1008_v27 = vmul.f32 %v1659_v10, %v1659_v10 }
 0x161   : > { %v939_v43 = vadd.f32 %v938_v32, %v1611_v58  ;;  %v1076_v40 = vadd.f32 %v1075_v33, %v994_v34  ;;  %v1000_v58 = vmul.f32 %v1627_v18, %v1627_v18  ;;  %v1009_v34 = vmul.f32 %v1663_v17, %v1663_v17 }
 0x162   : > { %v903_v48 = vadd.f32 %v902_v38, %v1615_v0  ;;  %v1040_v49 = vadd.f32 %v1039_v36, %v995_v37  ;;  %v1001_v0 = vmul.f32 %v1631_v24, %v1631_v24  ;;  %v1010_v33 = vmul.f32 %v1665_v23, %v1665_v23 }
 0x163   : > { %v940_v53 = vadd.f32 %v939_v43, %v1617_v5  ;;  %v1077_v55 = vadd.f32 %v1076_v40, %v996_v39  ;;  %v1002_v5 = vmul.f32 %v1633_v29, %v1633_v29  ;;  %v1011_v38 = vmul.f32 %v1673_v35, %v1673_v35 }
 0x164   : > { %v1041_v56 = vadd.f32 %v1040_v49, %v997_v47  ;;  %v904_v60 = vadd.f32 %v903_v48, %v1625_v14  ;;  %v1003_v14 = vmul.f32 %v1641_v41, %v1641_v41  ;;  %v1012_v39 = vmul.f32 %v1675_v42, %v1675_v42 }
 0x165   : > { %v1078_v61 = vadd.f32 %v1077_v55, %v998_v46  ;;  %v941_v63 = vadd.f32 %v940_v53, %v1627_v18  ;;  %v1004_v18 = vmul.f32 %v1643_v45, %v1643_v45  ;;  %v1013_v40 = vmul.f32 %v1679_v50, %v1679_v50 }
 0x166   : > { %v905_v1 = vadd.f32 %v904_v60, %v1631_v24  ;;  %v1042_v2 = vadd.f32 %v1041_v56, %v999_v54  ;;  %v1005_v24 = vmul.f32 %v1647_v52, %v1647_v52  ;;  %v1014_v48 = vmul.f32 %v1681_v57, %v1681_v57 }
 0x167   : > { %v942_v3 = vadd.f32 %v941_v63, %v1633_v29  ;;  %v1079_v8 = vadd.f32 %v1078_v61, %v1000_v58  ;;  %v1006_v29 = vmul.f32 %v1649_v59, %v1649_v59  ;;  %v1015_v46 = vmul.f32 %v1689_v7, %v1689_v7 }
 0x168   : > { %v906_v9 = vadd.f32 %v905_v1, %v1641_v41  ;;  %v1043_v11 = vadd.f32 %v1042_v2, %v1001_v0  ;;  %v1016_v55 = vmul.f32 %v1691_v12, %v1691_v12  ;;  %v1017_v56 = vmul.f32 %v1695_v21, %v1695_v21 }
 0x169   : > { %v943_v13 = vadd.f32 %v942_v3, %v1643_v45  ;;  %v1080_v15 = vadd.f32 %v1079_v8, %v1002_v5  ;;  %v1020_v61 = vmul.f32 %v1707_v51, %v1707_v51  ;;  %v1021_v5 = vmul.f32 %v1711_v62, %v1711_v62 }
 0x16a   : > { %v907_v16 = vadd.f32 %v906_v9, %v1647_v52  ;;  %v1044_v19 = vadd.f32 %v1043_v11, %v1003_v14  ;;  %v1022_v8 = vmul.f32 %v1713_v4, %v1713_v4 }
 0x16b   : > { %v944_v20 = vadd.f32 %v943_v13, %v1649_v59  ;;  %v1081_v22 = vadd.f32 %v1080_v15, %v1004_v18 }
 0x16c   : > { %v908_v41 = vadd.f32 %v907_v16, %v1657_v6  ;;  %v1045_v26 = vadd.f32 %v1044_v19, %v1005_v24 }
 0x16d   : > { %v945_v45 = vadd.f32 %v944_v20, %v1659_v10  ;;  %v1082_v30 = vadd.f32 %v1081_v22, %v1006_v29 }
 0x16e   : > { %v1046_v52 = vadd.f32 %v1045_v26, %v1007_v25  ;;  %v909_v31 = vadd.f32 %v908_v41, %v1663_v17 }
 0x16f   : > { %v1083_v59 = vadd.f32 %v1082_v30, %v1008_v27  ;;  %v946_v32 = vadd.f32 %v945_v45, %v1665_v23 }
 0x170   : > { %v1047_v6 = vadd.f32 %v1046_v52, %v1009_v34  ;;  %v910_v37 = vadd.f32 %v909_v31, %v1673_v35 }
 0x171   : > { %v1084_v10 = vadd.f32 %v1083_v59, %v1010_v33  ;;  %v947_v36 = vadd.f32 %v946_v32, %v1675_v42 }
 0x172   : > { %v1048_v43 = vadd.f32 %v1047_v6, %v1011_v38  ;;  %v911_v17 = vadd.f32 %v910_v37, %v1679_v50 }
 0x173   : > { %v1085_v47 = vadd.f32 %v1084_v10, %v1012_v39  ;;  %v948_v23 = vadd.f32 %v947_v36, %v1681_v57  ;;  %v1019_v57 = vmul.f32 %v1705_v44, %v1705_v44 }
 0x174   : > { %v1049_v49 = vadd.f32 %v1048_v43, %v1013_v40  ;;  %v912_v35 = vadd.f32 %v911_v17, %v1689_v7  ;;  %v1018_v7 = vmul.f32 %v1697_v28, %v1697_v28 }
 0x175   : > { %v1086_v53 = vadd.f32 %v1085_v47, %v1014_v48  ;;  %v949_v42 = vadd.f32 %v948_v23, %v1691_v12 }
 0x176   : > { %v1050_v50 = vadd.f32 %v1049_v49, %v1015_v46  ;;  %v913_v54 = vadd.f32 %v912_v35, %v1695_v21 }
 0x177   : > { %v1087_v60 = vadd.f32 %v1086_v53, %v1016_v55  ;;  %v950_v58 = vadd.f32 %v949_v42, %v1697_v28 }
 0x178   : > { %v1051_v12 = vadd.f32 %v1050_v50, %v1017_v56  ;;  %v914_v63 = vadd.f32 %v913_v54, %v1705_v44 }
 0x179   : > { %v1088_v0 = vadd.f32 %v1087_v60, %v1018_v7  ;;  %v951_v1 = vadd.f32 %v950_v58, %v1707_v51 }
 0x17a   : > { %v1052_v21 = vadd.f32 %v1051_v12, %v1019_v57  ;;  %v915_v2 = vadd.f32 %v914_v63, %v1711_v62 }
 0x17b   : > { %v1089_v3 = vadd.f32 %v1088_v0, %v1020_v61  ;;  %v952_v28 = vadd.f32 %v951_v1, %v1713_v4 }
 0x17c   : > { %v916_v14 = vrot.slane %v915_v2, 4  ;;  %v1053_v9 = vadd.f32 %v1052_v21, %v1021_v5 }
 0x17d   : > { %v953_v11 = vrot.slane %v952_v28, 4  ;;  %v1090_v44 = vadd.f32 %v1089_v3, %v1022_v8 }
 0x17e   : > { %v917_v18 = vadd.f32 %v916_v14, %v915_v2  ;;  %v1054_v51 = vrot.slane %v1053_v9, 4 }
 0x17f   : > { %v954_v13 = vadd.f32 %v953_v11, %v952_v28  ;;  %v1091_v15 = vrot.slane %v1090_v44, 4 }
 0x180   : > { %v918_v24 = vrot.slane %v917_v18, 2  ;;  %v1055_v16 = vadd.f32 %v1054_v51, %v1053_v9 }
 0x181   : > { %v955_v19 = vrot.slane %v954_v13, 2  ;;  %v1092_v29 = vadd.f32 %v1091_v15, %v1090_v44 }
 0x182   : > { %v919_v62 = vadd.f32 %v918_v24, %v917_v18  ;;  %v1056_v20 = vrot.slane %v1055_v16, 2 }
 0x183   : > { %v956_v22 = vadd.f32 %v955_v19, %v954_v13  ;;  %v1093_v41 = vrot.slane %v1092_v29, 2 }
 0x184   : > { %v920_v25 = vrot.slane %v919_v62, 1  ;;  %v1057_v4 = vadd.f32 %v1056_v20, %v1055_v16 }
 0x185   : > { %v957_v26 = vrot.slane %v956_v22, 1  ;;  %v1094_v45 = vadd.f32 %v1093_v41, %v1092_v29 }
 0x186   : > { %v921_v27 = vadd.f32 %v920_v25, %v919_v62  ;;  %v1058_v30 = vrot.slane %v1057_v4, 1 }
 0x187   : > { %v958_v52 = vadd.f32 %v957_v26, %v956_v22  ;;  %v1095_v31 = vrot.slane %v1094_v45, 1 }
 0x188   : > { %v1059_v34 = vadd.f32 %v1058_v30, %v1057_v4  ;;  %1097 = vst [vmem:[%s237_s21] sm:$0xff] %v921_v27 }
 0x189   : > { %v1096_v59 = vadd.f32 %v1095_v31, %v1094_v45  ;;  %1098 = vst [vmem:[%s237_s21 + $0x8] sm:$0xff] %v958_v52 }
 0x18a   : > { %1099 = vst [vmem:[%s242_s24] sm:$0xff] %v1059_v34 }
 0x18b   : > { %1100 = vst [vmem:[%s242_s24 + $0x8] sm:$0xff] %v1096_v59 }
 0x18c PF: > { %s16_s15 = sadd.s32 1, %s1470_s15  }
 0x18d   : > { %p13_p5 = scmp.ge.s32.totalorder %s16_s15, 4  }
 0x18f   :  { %15 = sbr.rel (!%p13_p5) target bundleno = 1 (0x1), region = 87 }
 0x196   :  { %1157 = vsyncpa [#allocation3], 1 }
 0x197   :  { %1159 = vsyncpa [#allocation3 + $0x1], 1 }

// kernel: reduction_a_forward.12
= control target key start
LH: loop header
LB: loop body
LE: loop exit
PB: predicated region body
PF: predicated region fallthrough
CT: control target
= control target key end

     0   :  { %v208_v0 = vlaneseq  ;;  %s1868_s0 = inlined_call_operand.vmem [shape: bf16[512,256], index: 0, kind: input, shape index: {}]   ;;  %s1869_s1 = inlined_call_operand.vmem [shape: f32[1,256], index: 1, kind: input, shape index: {}]   ;;  %s1870_s2 = inlined_call_operand.vmem [shape: f32[1,256], index: 2, kind: input, shape index: {}]   ;;  %s1871_s3 = inlined_call_operand.vmem [shape: bf16[512,256], index: 3, kind: output, shape index: {}]  }
   0x1   :  { %v14_v1 = vld [vmem:[%s1868_s0] sm:$0xff]  ;;  %v15_v6 = vld [vmem:[%s1868_s0 + $0x8] sm:$0xff]  ;;  %v16_v7 = vld [vmem:[%s1868_s0 + $0x10] sm:$0xff] }
   0x2   :  { %v206_v2 = vld [vmem:[%s1869_s1] sm:$0x3]  ;;  %v78_v3 = vunpack.c.l.bf16 %v14_v1  ;;  %v79_v4 = vunpack.c.h.bf16 %v14_v1  ;;  %v209_v5 = vshrl.u32 %v208_v0, 7  ;;  %v17_v8 = vld [vmem:[%s1868_s0 + $0x18] sm:$0xff]  ;;  %v80_v10 = vunpack.c.l.bf16 %v15_v6  ;;  %v19_v15 = vld [vmem:[%s1868_s0 + $0x28] sm:$0xff] }
   0x3   :  { %v346_v9 = vld [vmem:[%s1870_s2] sm:$0x3]  ;;  %v81_v11 = vunpack.c.h.bf16 %v15_v6  ;;  %v82_v12 = vunpack.c.l.bf16 %v16_v7  ;;  %v83_v13 = vunpack.c.h.bf16 %v16_v7  ;;  %v84_v18 = vunpack.c.l.bf16 %v17_v8  ;;  %v20_v20 = vld [vmem:[%s1868_s0 + $0x30] sm:$0xff]  ;;  %v21_v21 = vld [vmem:[%s1868_s0 + $0x38] sm:$0xff] }
   0x4   :  { %v18_v14 = vld [vmem:[%s1868_s0 + $0x20] sm:$0xff]  ;;  %v210_v16 = vsub.s32 0, %v209_v5  ;;  %v214_v17 = vsub.s32 1, %v209_v5  ;;  %v85_v19 = vunpack.c.h.bf16 %v17_v8  ;;  %v88_v24 = vunpack.c.l.bf16 %v19_v15 }
   0x5   :  { %v86_v22 = vunpack.c.l.bf16 %v18_v14  ;;  %v87_v23 = vunpack.c.h.bf16 %v18_v14  ;;  %v89_v25 = vunpack.c.h.bf16 %v19_v15  ;;  %v90_v30 = vunpack.c.l.bf16 %v20_v20 }
   0x6   :  { %v1244_v26 = vrot.slane %v206_v2, %v210_v16  ;;  %v1246_v27 = vrot.slane %v206_v2, %v214_v17  ;;  %v1248_v28 = vrot.slane %v346_v9, %v210_v16  ;;  %v1250_v29 = vrot.slane %v346_v9, %v214_v17 }
   0x7   :  { %v91_v31 = vunpack.c.h.bf16 %v20_v20  ;;  %v92_v32 = vunpack.c.l.bf16 %v21_v21  ;;  %v93_v33 = vunpack.c.h.bf16 %v21_v21 }
   0x8   :  { %v218_v34 = vmul.f32 %v1244_v26, %v78_v3  ;;  %v219_v35 = vmul.f32 %v1246_v27, %v79_v4  ;;  %v220_v36 = vmul.f32 %v1244_v26, %v80_v10  ;;  %v221_v37 = vmul.f32 %v1246_v27, %v81_v11  ;;  %v22_v10 = vld [vmem:[%s1868_s0 + $0x40] sm:$0xff] }
   0x9   :  { %v222_v38 = vmul.f32 %v1244_v26, %v82_v12  ;;  %v223_v39 = vmul.f32 %v1246_v27, %v83_v13  ;;  %v224_v40 = vmul.f32 %v1244_v26, %v84_v18  ;;  %v225_v41 = vmul.f32 %v1246_v27, %v85_v19  ;;  %v23_v19 = vld [vmem:[%s1868_s0 + $0x48] sm:$0xff] }
   0xa   :  { %v358_v42 = vadd.f32 %v1248_v28, %v218_v34  ;;  %v359_v43 = vadd.f32 %v1250_v29, %v219_v35  ;;  %v360_v44 = vadd.f32 %v1248_v28, %v220_v36  ;;  %v361_v45 = vadd.f32 %v1250_v29, %v221_v37 }
   0xb   :  { %v362_v46 = vadd.f32 %v1248_v28, %v222_v38  ;;  %v363_v47 = vadd.f32 %v1250_v29, %v223_v39  ;;  %v364_v48 = vadd.f32 %v1248_v28, %v224_v40  ;;  %v365_v49 = vadd.f32 %v1250_v29, %v225_v41 }
   0xc   :  { %v486_v50 = vmax.f32 %v358_v42, 0.0  ;;  %v487_v51 = vmax.f32 %v359_v43, 0.0  ;;  %v488_v52 = vmax.f32 %v360_v44, 0.0  ;;  %v489_v53 = vmax.f32 %v361_v45, 0.0 }
   0xd   :  { %v490_v54 = vmax.f32 %v362_v46, 0.0  ;;  %v491_v55 = vmax.f32 %v363_v47, 0.0  ;;  %v492_v56 = vmax.f32 %v364_v48, 0.0  ;;  %v493_v57 = vmax.f32 %v365_v49, 0.0 }
   0xe   :  { %v1130_v58 = vpack.c.bf16 %v487_v51, %v486_v50  ;;  %v1131_v59 = vpack.c.bf16 %v489_v53, %v488_v52  ;;  %v226_v60 = vmul.f32 %v1244_v26, %v86_v22  ;;  %v227_v61 = vmul.f32 %v1246_v27, %v87_v23  ;;  %v26_v50 = vld [vmem:[%s1868_s0 + $0x60] sm:$0xff] }
   0xf   :  { %v1132_v62 = vpack.c.bf16 %v491_v55, %v490_v54  ;;  %v1133_v63 = vpack.c.bf16 %v493_v57, %v492_v56  ;;  %v228_v0 = vmul.f32 %v1244_v26, %v88_v24  ;;  %v229_v1 = vmul.f32 %v1246_v27, %v89_v25  ;;  %v24_v24 = vld [vmem:[%s1868_s0 + $0x50] sm:$0xff] }
  0x10   :  { %998 = vst [vmem:[%s1871_s3] sm:$0xff] %v1130_v58  ;;  %999 = vst [vmem:[%s1871_s3 + $0x8] sm:$0xff] %v1131_v59  ;;  %v366_v2 = vadd.f32 %v1248_v28, %v226_v60  ;;  %v367_v3 = vadd.f32 %v1250_v29, %v227_v61  ;;  %v230_v4 = vmul.f32 %v1244_v26, %v90_v30  ;;  %v94_v23 = vunpack.c.l.bf16 %v22_v10 }
  0x11   :  { %v231_v5 = vmul.f32 %v1246_v27, %v91_v31  ;;  %1000 = vst [vmem:[%s1871_s3 + $0x10] sm:$0xff] %v1132_v62  ;;  %1001 = vst [vmem:[%s1871_s3 + $0x18] sm:$0xff] %v1133_v63  ;;  %v368_v6 = vadd.f32 %v1248_v28, %v228_v0  ;;  %v369_v7 = vadd.f32 %v1250_v29, %v229_v1  ;;  %v96_v36 = vunpack.c.l.bf16 %v23_v19  ;;  %v27_v63 = vld [vmem:[%s1868_s0 + $0x68] sm:$0xff] }
  0x12   :  { %v232_v8 = vmul.f32 %v1244_v26, %v92_v32  ;;  %v233_v9 = vmul.f32 %v1246_v27, %v93_v33  ;;  %v494_v11 = vmax.f32 %v366_v2, 0.0  ;;  %v495_v12 = vmax.f32 %v367_v3, 0.0  ;;  %v25_v33 = vld [vmem:[%s1868_s0 + $0x58] sm:$0xff] }
  0x13   :  { %v370_v13 = vadd.f32 %v1248_v28, %v230_v4  ;;  %v371_v14 = vadd.f32 %v1250_v29, %v231_v5  ;;  %v496_v15 = vmax.f32 %v368_v6, 0.0  ;;  %v497_v16 = vmax.f32 %v369_v7, 0.0  ;;  %v28_v4 = vld [vmem:[%s1868_s0 + $0x70] sm:$0xff] }
  0x14   :  { %v372_v17 = vadd.f32 %v1248_v28, %v232_v8  ;;  %v373_v18 = vadd.f32 %v1250_v29, %v233_v9  ;;  %v1134_v20 = vpack.c.bf16 %v495_v12, %v494_v11  ;;  %v95_v32 = vunpack.c.h.bf16 %v22_v10  ;;  %v29_v9 = vld [vmem:[%s1868_s0 + $0x78] sm:$0xff] }
  0x15   :  { %v498_v21 = vmax.f32 %v370_v13, 0.0  ;;  %v499_v22 = vmax.f32 %v371_v14, 0.0  ;;  %v1135_v25 = vpack.c.bf16 %v497_v16, %v496_v15  ;;  %v234_v35 = vmul.f32 %v1244_v26, %v94_v23 }
  0x16   :  { %v500_v30 = vmax.f32 %v372_v17, 0.0  ;;  %v501_v31 = vmax.f32 %v373_v18, 0.0  ;;  %1002 = vst [vmem:[%s1871_s3 + $0x20] sm:$0xff] %v1134_v20  ;;  %v97_v37 = vunpack.c.h.bf16 %v23_v19  ;;  %v235_v39 = vmul.f32 %v1246_v27, %v95_v32 }
  0x17   :  { %v1136_v34 = vpack.c.bf16 %v499_v22, %v498_v21  ;;  %1003 = vst [vmem:[%s1871_s3 + $0x28] sm:$0xff] %v1135_v25  ;;  %v98_v40 = vunpack.c.l.bf16 %v24_v24  ;;  %v99_v41 = vunpack.c.h.bf16 %v24_v24  ;;  %v374_v42 = vadd.f32 %v1248_v28, %v234_v35  ;;  %v30_v22 = vld [vmem:[%s1868_s0 + $0x80] sm:$0xff] }
  0x18   :  { %v1137_v38 = vpack.c.bf16 %v501_v31, %v500_v30  ;;  %v236_v43 = vmul.f32 %v1244_v26, %v96_v36  ;;  %v237_v44 = vmul.f32 %v1246_v27, %v97_v37  ;;  %v100_v45 = vunpack.c.l.bf16 %v25_v33 }
  0x19   :  { %1004 = vst [vmem:[%s1871_s3 + $0x30] sm:$0xff] %v1136_v34  ;;  %v375_v46 = vadd.f32 %v1250_v29, %v235_v39  ;;  %v238_v47 = vmul.f32 %v1244_v26, %v98_v40  ;;  %v239_v48 = vmul.f32 %v1246_v27, %v99_v41  ;;  %v101_v49 = vunpack.c.h.bf16 %v25_v33 }
  0x1a   :  { %1005 = vst [vmem:[%s1871_s3 + $0x38] sm:$0xff] %v1137_v38  ;;  %v502_v51 = vmax.f32 %v374_v42, 0.0  ;;  %v376_v52 = vadd.f32 %v1248_v28, %v236_v43  ;;  %v377_v53 = vadd.f32 %v1250_v29, %v237_v44  ;;  %v240_v54 = vmul.f32 %v1244_v26, %v100_v45  ;;  %v31_v43 = vld [vmem:[%s1868_s0 + $0x88] sm:$0xff] }
  0x1b   :  { %v503_v55 = vmax.f32 %v375_v46, 0.0  ;;  %v378_v56 = vadd.f32 %v1248_v28, %v238_v47  ;;  %v379_v57 = vadd.f32 %v1250_v29, %v239_v48  ;;  %v241_v58 = vmul.f32 %v1246_v27, %v101_v49  ;;  %v32_v48 = vld [vmem:[%s1868_s0 + $0x90] sm:$0xff] }
  0x1c   :  { %v504_v59 = vmax.f32 %v376_v52, 0.0  ;;  %v505_v60 = vmax.f32 %v377_v53, 0.0  ;;  %v380_v61 = vadd.f32 %v1248_v28, %v240_v54  ;;  %v102_v62 = vunpack.c.l.bf16 %v26_v50  ;;  %v33_v53 = vld [vmem:[%s1868_s0 + $0x98] sm:$0xff] }
  0x1d   :  { %v1138_v0 = vpack.c.bf16 %v503_v55, %v502_v51  ;;  %v506_v1 = vmax.f32 %v378_v56, 0.0  ;;  %v507_v2 = vmax.f32 %v379_v57, 0.0  ;;  %v381_v3 = vadd.f32 %v1250_v29, %v241_v58 }
  0x1e   :  { %v1139_v5 = vpack.c.bf16 %v505_v60, %v504_v59  ;;  %v508_v6 = vmax.f32 %v380_v61, 0.0  ;;  %v103_v7 = vunpack.c.h.bf16 %v26_v50  ;;  %v242_v8 = vmul.f32 %v1244_v26, %v102_v62 }
  0x1f   :  { %1006 = vst [vmem:[%s1871_s3 + $0x40] sm:$0xff] %v1138_v0  ;;  %v1140_v10 = vpack.c.bf16 %v507_v2, %v506_v1  ;;  %v509_v11 = vmax.f32 %v381_v3, 0.0  ;;  %v104_v12 = vunpack.c.l.bf16 %v27_v63  ;;  %v105_v13 = vunpack.c.h.bf16 %v27_v63  ;;  %v34_v2 = vld [vmem:[%s1868_s0 + $0xa0] sm:$0xff] }
  0x20   :  { %1007 = vst [vmem:[%s1871_s3 + $0x48] sm:$0xff] %v1139_v5  ;;  %v243_v14 = vmul.f32 %v1246_v27, %v103_v7  ;;  %v382_v15 = vadd.f32 %v1248_v28, %v242_v8  ;;  %v106_v16 = vunpack.c.l.bf16 %v28_v4  ;;  %v107_v17 = vunpack.c.h.bf16 %v28_v4 }
  0x21   :  { %1008 = vst [vmem:[%s1871_s3 + $0x50] sm:$0xff] %v1140_v10  ;;  %v1141_v18 = vpack.c.bf16 %v509_v11, %v508_v6  ;;  %v244_v19 = vmul.f32 %v1244_v26, %v104_v12  ;;  %v245_v20 = vmul.f32 %v1246_v27, %v105_v13  ;;  %v108_v21 = vunpack.c.l.bf16 %v29_v9 }
  0x22   :  { %v383_v23 = vadd.f32 %v1250_v29, %v243_v14  ;;  %v510_v24 = vmax.f32 %v382_v15, 0.0  ;;  %v246_v25 = vmul.f32 %v1244_v26, %v106_v16  ;;  %v247_v30 = vmul.f32 %v1246_v27, %v107_v17  ;;  %v35_v15 = vld [vmem:[%s1868_s0 + $0xa8] sm:$0xff] }
  0x23   :  { %1009 = vst [vmem:[%s1871_s3 + $0x58] sm:$0xff] %v1141_v18  ;;  %v384_v31 = vadd.f32 %v1248_v28, %v244_v19  ;;  %v385_v32 = vadd.f32 %v1250_v29, %v245_v20  ;;  %v109_v33 = vunpack.c.h.bf16 %v29_v9  ;;  %v248_v34 = vmul.f32 %v1244_v26, %v108_v21 }
  0x24   :  { %v511_v35 = vmax.f32 %v383_v23, 0.0  ;;  %v386_v36 = vadd.f32 %v1248_v28, %v246_v25  ;;  %v387_v37 = vadd.f32 %v1250_v29, %v247_v30  ;;  %v110_v38 = vunpack.c.l.bf16 %v30_v22 }
  0x25   :  { %v512_v39 = vmax.f32 %v384_v31, 0.0  ;;  %v513_v40 = vmax.f32 %v385_v32, 0.0  ;;  %v249_v41 = vmul.f32 %v1246_v27, %v109_v33  ;;  %v388_v42 = vadd.f32 %v1248_v28, %v248_v34  ;;  %v37_v33 = vld [vmem:[%s1868_s0 + $0xb8] sm:$0xff] }
  0x26   :  { %v1142_v44 = vpack.c.bf16 %v511_v35, %v510_v24  ;;  %v514_v45 = vmax.f32 %v386_v36, 0.0  ;;  %v515_v46 = vmax.f32 %v387_v37, 0.0  ;;  %v111_v47 = vunpack.c.h.bf16 %v30_v22  ;;  %v36_v24 = vld [vmem:[%s1868_s0 + $0xb0] sm:$0xff] }
  0x27   :  { %v1143_v49 = vpack.c.bf16 %v513_v40, %v512_v39  ;;  %v389_v50 = vadd.f32 %v1250_v29, %v249_v41  ;;  %v516_v51 = vmax.f32 %v388_v42, 0.0  ;;  %v250_v52 = vmul.f32 %v1244_v26, %v110_v38 }
  0x28   :  { %1010 = vst [vmem:[%s1871_s3 + $0x60] sm:$0xff] %v1142_v44  ;;  %v1144_v54 = vpack.c.bf16 %v515_v46, %v514_v45  ;;  %v251_v55 = vmul.f32 %v1246_v27, %v111_v47  ;;  %v112_v56 = vunpack.c.l.bf16 %v31_v43  ;;  %v113_v57 = vunpack.c.h.bf16 %v31_v43  ;;  %v38_v46 = vld [vmem:[%s1868_s0 + $0xc0] sm:$0xff] }
  0x29   :  { %1011 = vst [vmem:[%s1871_s3 + $0x68] sm:$0xff] %v1143_v49  ;;  %v517_v58 = vmax.f32 %v389_v50, 0.0  ;;  %v390_v59 = vadd.f32 %v1248_v28, %v250_v52  ;;  %v114_v60 = vunpack.c.l.bf16 %v32_v48  ;;  %v115_v61 = vunpack.c.h.bf16 %v32_v48 }
  0x2a   :  { %1012 = vst [vmem:[%s1871_s3 + $0x70] sm:$0xff] %v1144_v54  ;;  %v391_v62 = vadd.f32 %v1250_v29, %v251_v55  ;;  %v252_v63 = vmul.f32 %v1244_v26, %v112_v56  ;;  %v253_v0 = vmul.f32 %v1246_v27, %v113_v57  ;;  %v116_v1 = vunpack.c.l.bf16 %v33_v53 }
  0x2b   :  { %v1145_v3 = vpack.c.bf16 %v517_v58, %v516_v51  ;;  %v518_v4 = vmax.f32 %v390_v59, 0.0  ;;  %v254_v5 = vmul.f32 %v1244_v26, %v114_v60  ;;  %v255_v6 = vmul.f32 %v1246_v27, %v115_v61  ;;  %v39_v59 = vld [vmem:[%s1868_s0 + $0xc8] sm:$0xff] }
  0x2c   :  { %v519_v7 = vmax.f32 %v391_v62, 0.0  ;;  %v392_v8 = vadd.f32 %v1248_v28, %v252_v63  ;;  %v393_v9 = vadd.f32 %v1250_v29, %v253_v0  ;;  %v117_v10 = vunpack.c.h.bf16 %v33_v53 }
  0x2d   :  { %1013 = vst [vmem:[%s1871_s3 + $0x78] sm:$0xff] %v1145_v3  ;;  %v394_v11 = vadd.f32 %v1248_v28, %v254_v5  ;;  %v395_v12 = vadd.f32 %v1250_v29, %v255_v6  ;;  %v256_v13 = vmul.f32 %v1244_v26, %v116_v1  ;;  %v118_v14 = vunpack.c.l.bf16 %v34_v2 }
  0x2e   :  { %v1146_v16 = vpack.c.bf16 %v519_v7, %v518_v4  ;;  %v520_v17 = vmax.f32 %v392_v8, 0.0  ;;  %v521_v18 = vmax.f32 %v393_v9, 0.0  ;;  %v257_v19 = vmul.f32 %v1246_v27, %v117_v10  ;;  %v40_v4 = vld [vmem:[%s1868_s0 + $0xd0] sm:$0xff] }
  0x2f   :  { %v522_v20 = vmax.f32 %v394_v11, 0.0  ;;  %v523_v21 = vmax.f32 %v395_v12, 0.0  ;;  %v396_v22 = vadd.f32 %v1248_v28, %v256_v13  ;;  %v119_v23 = vunpack.c.h.bf16 %v34_v2  ;;  %v41_v13 = vld [vmem:[%s1868_s0 + $0xd8] sm:$0xff] }
  0x30   :  { %1014 = vst [vmem:[%s1871_s3 + $0x80] sm:$0xff] %v1146_v16  ;;  %v1147_v25 = vpack.c.bf16 %v521_v18, %v520_v17  ;;  %v397_v30 = vadd.f32 %v1250_v29, %v257_v19  ;;  %v258_v31 = vmul.f32 %v1244_v26, %v118_v14  ;;  %v120_v32 = vunpack.c.l.bf16 %v35_v15 }
  0x31   :  { %v1148_v34 = vpack.c.bf16 %v523_v21, %v522_v20  ;;  %v524_v35 = vmax.f32 %v396_v22, 0.0  ;;  %v259_v36 = vmul.f32 %v1246_v27, %v119_v23  ;;  %v121_v37 = vunpack.c.h.bf16 %v35_v15  ;;  %v42_v22 = vld [vmem:[%s1868_s0 + $0xe0] sm:$0xff] }
  0x32   :  { %1015 = vst [vmem:[%s1871_s3 + $0x88] sm:$0xff] %v1147_v25  ;;  %v525_v38 = vmax.f32 %v397_v30, 0.0  ;;  %v398_v39 = vadd.f32 %v1248_v28, %v258_v31  ;;  %v260_v40 = vmul.f32 %v1244_v26, %v120_v32  ;;  %v122_v41 = vunpack.c.l.bf16 %v36_v24 }
  0x33   :  { %1016 = vst [vmem:[%s1871_s3 + $0x90] sm:$0xff] %v1148_v34  ;;  %v399_v42 = vadd.f32 %v1250_v29, %v259_v36  ;;  %v261_v43 = vmul.f32 %v1246_v27, %v121_v37  ;;  %v123_v44 = vunpack.c.h.bf16 %v36_v24  ;;  %v124_v45 = vunpack.c.l.bf16 %v37_v33 }
  0x34   :  { %v1149_v47 = vpack.c.bf16 %v525_v38, %v524_v35  ;;  %v526_v48 = vmax.f32 %v398_v39, 0.0  ;;  %v400_v49 = vadd.f32 %v1248_v28, %v260_v40  ;;  %v262_v50 = vmul.f32 %v1244_v26, %v122_v41  ;;  %v43_v39 = vld [vmem:[%s1868_s0 + $0xe8] sm:$0xff] }
  0x35   :  { %v527_v51 = vmax.f32 %v399_v42, 0.0  ;;  %v401_v52 = vadd.f32 %v1250_v29, %v261_v43  ;;  %v263_v53 = vmul.f32 %v1246_v27, %v123_v44  ;;  %v125_v54 = vunpack.c.h.bf16 %v37_v33 }
  0x36   :  { %1017 = vst [vmem:[%s1871_s3 + $0x98] sm:$0xff] %v1149_v47  ;;  %v528_v55 = vmax.f32 %v400_v49, 0.0  ;;  %v402_v56 = vadd.f32 %v1248_v28, %v262_v50  ;;  %v264_v57 = vmul.f32 %v1244_v26, %v124_v45  ;;  %v126_v58 = vunpack.c.l.bf16 %v38_v46 }
  0x37   :  { %v1150_v60 = vpack.c.bf16 %v527_v51, %v526_v48  ;;  %v529_v61 = vmax.f32 %v401_v52, 0.0  ;;  %v403_v62 = vadd.f32 %v1250_v29, %v263_v53  ;;  %v265_v63 = vmul.f32 %v1246_v27, %v125_v54  ;;  %v44_v48 = vld [vmem:[%s1868_s0 + $0xf0] sm:$0xff] }
  0x38   :  { %v530_v0 = vmax.f32 %v402_v56, 0.0  ;;  %v404_v1 = vadd.f32 %v1248_v28, %v264_v57  ;;  %v127_v2 = vunpack.c.h.bf16 %v38_v46  ;;  %v266_v3 = vmul.f32 %v1244_v26, %v126_v58  ;;  %v45_v57 = vld [vmem:[%s1868_s0 + $0xf8] sm:$0xff] }
  0x39   :  { %1018 = vst [vmem:[%s1871_s3 + $0xa0] sm:$0xff] %v1150_v60  ;;  %v1151_v5 = vpack.c.bf16 %v529_v61, %v528_v55  ;;  %v531_v6 = vmax.f32 %v403_v62, 0.0  ;;  %v405_v7 = vadd.f32 %v1250_v29, %v265_v63  ;;  %v128_v8 = vunpack.c.l.bf16 %v39_v59 }
  0x3a   :  { %v532_v9 = vmax.f32 %v404_v1, 0.0  ;;  %v267_v10 = vmul.f32 %v1246_v27, %v127_v2  ;;  %v406_v11 = vadd.f32 %v1248_v28, %v266_v3  ;;  %v129_v12 = vunpack.c.h.bf16 %v39_v59  ;;  %v46_v2 = vld [vmem:[%s1868_s0 + $0x100] sm:$0xff] }
  0x3b   :  { %1019 = vst [vmem:[%s1871_s3 + $0xa8] sm:$0xff] %v1151_v5  ;;  %v1152_v14 = vpack.c.bf16 %v531_v6, %v530_v0  ;;  %v533_v15 = vmax.f32 %v405_v7, 0.0  ;;  %v268_v16 = vmul.f32 %v1244_v26, %v128_v8  ;;  %v130_v17 = vunpack.c.l.bf16 %v40_v4 }
  0x3c   :  { %v407_v18 = vadd.f32 %v1250_v29, %v267_v10  ;;  %v534_v19 = vmax.f32 %v406_v11, 0.0  ;;  %v269_v20 = vmul.f32 %v1246_v27, %v129_v12  ;;  %v131_v21 = vunpack.c.h.bf16 %v40_v4 }
  0x3d   :  { %1020 = vst [vmem:[%s1871_s3 + $0xb0] sm:$0xff] %v1152_v14  ;;  %v1153_v23 = vpack.c.bf16 %v533_v15, %v532_v9  ;;  %v408_v24 = vadd.f32 %v1248_v28, %v268_v16  ;;  %v270_v25 = vmul.f32 %v1244_v26, %v130_v17  ;;  %v132_v30 = vunpack.c.l.bf16 %v41_v13  ;;  %v47_v15 = vld [vmem:[%s1868_s0 + $0x108] sm:$0xff] }
  0x3e   :  { %v535_v31 = vmax.f32 %v407_v18, 0.0  ;;  %v409_v32 = vadd.f32 %v1250_v29, %v269_v20  ;;  %v271_v33 = vmul.f32 %v1246_v27, %v131_v21  ;;  %v133_v34 = vunpack.c.h.bf16 %v41_v13 }
  0x3f   :  { %1021 = vst [vmem:[%s1871_s3 + $0xb8] sm:$0xff] %v1153_v23  ;;  %v536_v35 = vmax.f32 %v408_v24, 0.0  ;;  %v410_v36 = vadd.f32 %v1248_v28, %v270_v25  ;;  %v272_v37 = vmul.f32 %v1244_v26, %v132_v30  ;;  %v134_v38 = vunpack.c.l.bf16 %v42_v22  ;;  %v48_v24 = vld [vmem:[%s1868_s0 + $0x110] sm:$0xff] }
  0x40   :  { %v1154_v40 = vpack.c.bf16 %v535_v31, %v534_v19  ;;  %v537_v41 = vmax.f32 %v409_v32, 0.0  ;;  %v411_v42 = vadd.f32 %v1250_v29, %v271_v33  ;;  %v273_v43 = vmul.f32 %v1246_v27, %v133_v34 }
  0x41   :  { %v538_v44 = vmax.f32 %v410_v36, 0.0  ;;  %v412_v45 = vadd.f32 %v1248_v28, %v272_v37  ;;  %v135_v46 = vunpack.c.h.bf16 %v42_v22  ;;  %v274_v47 = vmul.f32 %v1244_v26, %v134_v38  ;;  %v49_v37 = vld [vmem:[%s1868_s0 + $0x118] sm:$0xff] }
  0x42   :  { %1022 = vst [vmem:[%s1871_s3 + $0xc0] sm:$0xff] %v1154_v40  ;;  %v1155_v49 = vpack.c.bf16 %v537_v41, %v536_v35  ;;  %v539_v50 = vmax.f32 %v411_v42, 0.0  ;;  %v413_v51 = vadd.f32 %v1250_v29, %v273_v43  ;;  %v136_v52 = vunpack.c.l.bf16 %v43_v39 }
  0x43   :  { %v540_v53 = vmax.f32 %v412_v45, 0.0  ;;  %v275_v54 = vmul.f32 %v1246_v27, %v135_v46  ;;  %v414_v55 = vadd.f32 %v1248_v28, %v274_v47  ;;  %v137_v56 = vunpack.c.h.bf16 %v43_v39  ;;  %v50_v46 = vld [vmem:[%s1868_s0 + $0x120] sm:$0xff] }
  0x44   :  { %1023 = vst [vmem:[%s1871_s3 + $0xc8] sm:$0xff] %v1155_v49  ;;  %v1156_v58 = vpack.c.bf16 %v539_v50, %v538_v44  ;;  %v541_v59 = vmax.f32 %v413_v51, 0.0  ;;  %v276_v60 = vmul.f32 %v1244_v26, %v136_v52  ;;  %v138_v61 = vunpack.c.l.bf16 %v44_v48 }
  0x45   :  { %v415_v62 = vadd.f32 %v1250_v29, %v275_v54  ;;  %v542_v63 = vmax.f32 %v414_v55, 0.0  ;;  %v277_v0 = vmul.f32 %v1246_v27, %v137_v56  ;;  %v139_v1 = vunpack.c.h.bf16 %v44_v48 }
  0x46   :  { %1024 = vst [vmem:[%s1871_s3 + $0xd0] sm:$0xff] %v1156_v58  ;;  %v1157_v3 = vpack.c.bf16 %v541_v59, %v540_v53  ;;  %v416_v4 = vadd.f32 %v1248_v28, %v276_v60  ;;  %v278_v5 = vmul.f32 %v1244_v26, %v138_v61  ;;  %v140_v6 = vunpack.c.l.bf16 %v45_v57  ;;  %v51_v59 = vld [vmem:[%s1868_s0 + $0x128] sm:$0xff] }
  0x47   :  { %v543_v7 = vmax.f32 %v415_v62, 0.0  ;;  %v417_v8 = vadd.f32 %v1250_v29, %v277_v0  ;;  %v279_v9 = vmul.f32 %v1246_v27, %v139_v1  ;;  %v141_v10 = vunpack.c.h.bf16 %v45_v57 }
  0x48   :  { %1025 = vst [vmem:[%s1871_s3 + $0xd8] sm:$0xff] %v1157_v3  ;;  %v544_v11 = vmax.f32 %v416_v4, 0.0  ;;  %v418_v12 = vadd.f32 %v1248_v28, %v278_v5  ;;  %v280_v13 = vmul.f32 %v1244_v26, %v140_v6  ;;  %v142_v14 = vunpack.c.l.bf16 %v46_v2  ;;  %v52_v4 = vld [vmem:[%s1868_s0 + $0x130] sm:$0xff] }
  0x49   :  { %v1158_v16 = vpack.c.bf16 %v543_v7, %v542_v63  ;;  %v545_v17 = vmax.f32 %v417_v8, 0.0  ;;  %v419_v18 = vadd.f32 %v1250_v29, %v279_v9  ;;  %v281_v19 = vmul.f32 %v1246_v27, %v141_v10 }
  0x4a   :  { %v546_v20 = vmax.f32 %v418_v12, 0.0  ;;  %v420_v21 = vadd.f32 %v1248_v28, %v280_v13  ;;  %v143_v22 = vunpack.c.h.bf16 %v46_v2  ;;  %v282_v23 = vmul.f32 %v1244_v26, %v142_v14  ;;  %v53_v13 = vld [vmem:[%s1868_s0 + $0x138] sm:$0xff] }
  0x4b   :  { %1026 = vst [vmem:[%s1871_s3 + $0xe0] sm:$0xff] %v1158_v16  ;;  %v1159_v25 = vpack.c.bf16 %v545_v17, %v544_v11  ;;  %v547_v30 = vmax.f32 %v419_v18, 0.0  ;;  %v421_v31 = vadd.f32 %v1250_v29, %v281_v19  ;;  %v144_v32 = vunpack.c.l.bf16 %v47_v15 }
  0x4c   :  { %v548_v33 = vmax.f32 %v420_v21, 0.0  ;;  %v283_v34 = vmul.f32 %v1246_v27, %v143_v22  ;;  %v422_v35 = vadd.f32 %v1248_v28, %v282_v23  ;;  %v145_v36 = vunpack.c.h.bf16 %v47_v15  ;;  %v54_v22 = vld [vmem:[%s1868_s0 + $0x140] sm:$0xff] }
  0x4d   :  { %1027 = vst [vmem:[%s1871_s3 + $0xe8] sm:$0xff] %v1159_v25  ;;  %v1160_v38 = vpack.c.bf16 %v547_v30, %v546_v20  ;;  %v549_v39 = vmax.f32 %v421_v31, 0.0  ;;  %v284_v40 = vmul.f32 %v1244_v26, %v144_v32  ;;  %v146_v41 = vunpack.c.l.bf16 %v48_v24 }
  0x4e   :  { %v423_v42 = vadd.f32 %v1250_v29, %v283_v34  ;;  %v550_v43 = vmax.f32 %v422_v35, 0.0  ;;  %v285_v44 = vmul.f32 %v1246_v27, %v145_v36  ;;  %v147_v45 = vunpack.c.h.bf16 %v48_v24 }
  0x4f   :  { %1028 = vst [vmem:[%s1871_s3 + $0xf0] sm:$0xff] %v1160_v38  ;;  %v1161_v47 = vpack.c.bf16 %v549_v39, %v548_v33  ;;  %v424_v48 = vadd.f32 %v1248_v28, %v284_v40  ;;  %v286_v49 = vmul.f32 %v1244_v26, %v146_v41  ;;  %v148_v50 = vunpack.c.l.bf16 %v49_v37  ;;  %v55_v39 = vld [vmem:[%s1868_s0 + $0x148] sm:$0xff] }
  0x50   :  { %v551_v51 = vmax.f32 %v423_v42, 0.0  ;;  %v425_v52 = vadd.f32 %v1250_v29, %v285_v44  ;;  %v287_v53 = vmul.f32 %v1246_v27, %v147_v45  ;;  %v149_v54 = vunpack.c.h.bf16 %v49_v37 }
  0x51   :  { %1029 = vst [vmem:[%s1871_s3 + $0xf8] sm:$0xff] %v1161_v47  ;;  %v552_v55 = vmax.f32 %v424_v48, 0.0  ;;  %v426_v56 = vadd.f32 %v1248_v28, %v286_v49  ;;  %v288_v57 = vmul.f32 %v1244_v26, %v148_v50  ;;  %v150_v58 = vunpack.c.l.bf16 %v50_v46  ;;  %v56_v48 = vld [vmem:[%s1868_s0 + $0x150] sm:$0xff] }
  0x52   :  { %v1162_v60 = vpack.c.bf16 %v551_v51, %v550_v43  ;;  %v553_v61 = vmax.f32 %v425_v52, 0.0  ;;  %v427_v62 = vadd.f32 %v1250_v29, %v287_v53  ;;  %v289_v63 = vmul.f32 %v1246_v27, %v149_v54 }
  0x53   :  { %v554_v0 = vmax.f32 %v426_v56, 0.0  ;;  %v428_v1 = vadd.f32 %v1248_v28, %v288_v57  ;;  %v151_v2 = vunpack.c.h.bf16 %v50_v46  ;;  %v290_v3 = vmul.f32 %v1244_v26, %v150_v58  ;;  %v57_v57 = vld [vmem:[%s1868_s0 + $0x158] sm:$0xff] }
  0x54   :  { %1030 = vst [vmem:[%s1871_s3 + $0x100] sm:$0xff] %v1162_v60  ;;  %v1163_v5 = vpack.c.bf16 %v553_v61, %v552_v55  ;;  %v555_v6 = vmax.f32 %v427_v62, 0.0  ;;  %v429_v7 = vadd.f32 %v1250_v29, %v289_v63  ;;  %v152_v8 = vunpack.c.l.bf16 %v51_v59 }
  0x55   :  { %v556_v9 = vmax.f32 %v428_v1, 0.0  ;;  %v291_v10 = vmul.f32 %v1246_v27, %v151_v2  ;;  %v430_v11 = vadd.f32 %v1248_v28, %v290_v3  ;;  %v153_v12 = vunpack.c.h.bf16 %v51_v59  ;;  %v58_v2 = vld [vmem:[%s1868_s0 + $0x160] sm:$0xff] }
  0x56   :  { %1031 = vst [vmem:[%s1871_s3 + $0x108] sm:$0xff] %v1163_v5  ;;  %v1164_v14 = vpack.c.bf16 %v555_v6, %v554_v0  ;;  %v557_v15 = vmax.f32 %v429_v7, 0.0  ;;  %v292_v16 = vmul.f32 %v1244_v26, %v152_v8  ;;  %v154_v17 = vunpack.c.l.bf16 %v52_v4 }
  0x57   :  { %v431_v18 = vadd.f32 %v1250_v29, %v291_v10  ;;  %v558_v19 = vmax.f32 %v430_v11, 0.0  ;;  %v293_v20 = vmul.f32 %v1246_v27, %v153_v12  ;;  %v155_v21 = vunpack.c.h.bf16 %v52_v4 }
  0x58   :  { %1032 = vst [vmem:[%s1871_s3 + $0x110] sm:$0xff] %v1164_v14  ;;  %v1165_v23 = vpack.c.bf16 %v557_v15, %v556_v9  ;;  %v432_v24 = vadd.f32 %v1248_v28, %v292_v16  ;;  %v294_v25 = vmul.f32 %v1244_v26, %v154_v17  ;;  %v156_v30 = vunpack.c.l.bf16 %v53_v13  ;;  %v59_v15 = vld [vmem:[%s1868_s0 + $0x168] sm:$0xff] }
  0x59   :  { %v559_v31 = vmax.f32 %v431_v18, 0.0  ;;  %v433_v32 = vadd.f32 %v1250_v29, %v293_v20  ;;  %v295_v33 = vmul.f32 %v1246_v27, %v155_v21  ;;  %v157_v34 = vunpack.c.h.bf16 %v53_v13 }
  0x5a   :  { %1033 = vst [vmem:[%s1871_s3 + $0x118] sm:$0xff] %v1165_v23  ;;  %v560_v35 = vmax.f32 %v432_v24, 0.0  ;;  %v434_v36 = vadd.f32 %v1248_v28, %v294_v25  ;;  %v296_v37 = vmul.f32 %v1244_v26, %v156_v30  ;;  %v158_v38 = vunpack.c.l.bf16 %v54_v22  ;;  %v60_v24 = vld [vmem:[%s1868_s0 + $0x170] sm:$0xff] }
  0x5b   :  { %v1166_v40 = vpack.c.bf16 %v559_v31, %v558_v19  ;;  %v561_v41 = vmax.f32 %v433_v32, 0.0  ;;  %v435_v42 = vadd.f32 %v1250_v29, %v295_v33  ;;  %v297_v43 = vmul.f32 %v1246_v27, %v157_v34 }
  0x5c   :  { %v562_v44 = vmax.f32 %v434_v36, 0.0  ;;  %v436_v45 = vadd.f32 %v1248_v28, %v296_v37  ;;  %v159_v46 = vunpack.c.h.bf16 %v54_v22  ;;  %v298_v47 = vmul.f32 %v1244_v26, %v158_v38  ;;  %v61_v37 = vld [vmem:[%s1868_s0 + $0x178] sm:$0xff] }
  0x5d   :  { %1034 = vst [vmem:[%s1871_s3 + $0x120] sm:$0xff] %v1166_v40  ;;  %v1167_v49 = vpack.c.bf16 %v561_v41, %v560_v35  ;;  %v563_v50 = vmax.f32 %v435_v42, 0.0  ;;  %v437_v51 = vadd.f32 %v1250_v29, %v297_v43  ;;  %v160_v52 = vunpack.c.l.bf16 %v55_v39 }
  0x5e   :  { %v564_v53 = vmax.f32 %v436_v45, 0.0  ;;  %v299_v54 = vmul.f32 %v1246_v27, %v159_v46  ;;  %v438_v55 = vadd.f32 %v1248_v28, %v298_v47  ;;  %v161_v56 = vunpack.c.h.bf16 %v55_v39  ;;  %v62_v46 = vld [vmem:[%s1868_s0 + $0x180] sm:$0xff] }
  0x5f   :  { %1035 = vst [vmem:[%s1871_s3 + $0x128] sm:$0xff] %v1167_v49  ;;  %v1168_v58 = vpack.c.bf16 %v563_v50, %v562_v44  ;;  %v565_v59 = vmax.f32 %v437_v51, 0.0  ;;  %v300_v60 = vmul.f32 %v1244_v26, %v160_v52  ;;  %v162_v61 = vunpack.c.l.bf16 %v56_v48 }
  0x60   :  { %v439_v62 = vadd.f32 %v1250_v29, %v299_v54  ;;  %v566_v63 = vmax.f32 %v438_v55, 0.0  ;;  %v301_v0 = vmul.f32 %v1246_v27, %v161_v56  ;;  %v163_v1 = vunpack.c.h.bf16 %v56_v48 }
  0x61   :  { %1036 = vst [vmem:[%s1871_s3 + $0x130] sm:$0xff] %v1168_v58  ;;  %v1169_v3 = vpack.c.bf16 %v565_v59, %v564_v53  ;;  %v440_v4 = vadd.f32 %v1248_v28, %v300_v60  ;;  %v302_v5 = vmul.f32 %v1244_v26, %v162_v61  ;;  %v164_v6 = vunpack.c.l.bf16 %v57_v57  ;;  %v63_v59 = vld [vmem:[%s1868_s0 + $0x188] sm:$0xff] }
  0x62   :  { %v567_v7 = vmax.f32 %v439_v62, 0.0  ;;  %v441_v8 = vadd.f32 %v1250_v29, %v301_v0  ;;  %v303_v9 = vmul.f32 %v1246_v27, %v163_v1  ;;  %v165_v10 = vunpack.c.h.bf16 %v57_v57 }
  0x63   :  { %1037 = vst [vmem:[%s1871_s3 + $0x138] sm:$0xff] %v1169_v3  ;;  %v568_v11 = vmax.f32 %v440_v4, 0.0  ;;  %v442_v12 = vadd.f32 %v1248_v28, %v302_v5  ;;  %v304_v13 = vmul.f32 %v1244_v26, %v164_v6  ;;  %v166_v14 = vunpack.c.l.bf16 %v58_v2  ;;  %v64_v4 = vld [vmem:[%s1868_s0 + $0x190] sm:$0xff] }
  0x64   :  { %v1170_v16 = vpack.c.bf16 %v567_v7, %v566_v63  ;;  %v569_v17 = vmax.f32 %v441_v8, 0.0  ;;  %v443_v18 = vadd.f32 %v1250_v29, %v303_v9  ;;  %v305_v19 = vmul.f32 %v1246_v27, %v165_v10 }
  0x65   :  { %v570_v20 = vmax.f32 %v442_v12, 0.0  ;;  %v444_v21 = vadd.f32 %v1248_v28, %v304_v13  ;;  %v167_v22 = vunpack.c.h.bf16 %v58_v2  ;;  %v306_v23 = vmul.f32 %v1244_v26, %v166_v14  ;;  %v65_v13 = vld [vmem:[%s1868_s0 + $0x198] sm:$0xff] }
  0x66   :  { %1038 = vst [vmem:[%s1871_s3 + $0x140] sm:$0xff] %v1170_v16  ;;  %v1171_v25 = vpack.c.bf16 %v569_v17, %v568_v11  ;;  %v571_v30 = vmax.f32 %v443_v18, 0.0  ;;  %v445_v31 = vadd.f32 %v1250_v29, %v305_v19  ;;  %v168_v32 = vunpack.c.l.bf16 %v59_v15 }
  0x67   :  { %v572_v33 = vmax.f32 %v444_v21, 0.0  ;;  %v307_v34 = vmul.f32 %v1246_v27, %v167_v22  ;;  %v446_v35 = vadd.f32 %v1248_v28, %v306_v23  ;;  %v169_v36 = vunpack.c.h.bf16 %v59_v15  ;;  %v66_v22 = vld [vmem:[%s1868_s0 + $0x1a0] sm:$0xff] }
  0x68   :  { %1039 = vst [vmem:[%s1871_s3 + $0x148] sm:$0xff] %v1171_v25  ;;  %v1172_v38 = vpack.c.bf16 %v571_v30, %v570_v20  ;;  %v573_v39 = vmax.f32 %v445_v31, 0.0  ;;  %v308_v40 = vmul.f32 %v1244_v26, %v168_v32  ;;  %v170_v41 = vunpack.c.l.bf16 %v60_v24 }
  0x69   :  { %v447_v42 = vadd.f32 %v1250_v29, %v307_v34  ;;  %v574_v43 = vmax.f32 %v446_v35, 0.0  ;;  %v309_v44 = vmul.f32 %v1246_v27, %v169_v36  ;;  %v171_v45 = vunpack.c.h.bf16 %v60_v24 }
  0x6a   :  { %1040 = vst [vmem:[%s1871_s3 + $0x150] sm:$0xff] %v1172_v38  ;;  %v1173_v47 = vpack.c.bf16 %v573_v39, %v572_v33  ;;  %v448_v48 = vadd.f32 %v1248_v28, %v308_v40  ;;  %v310_v49 = vmul.f32 %v1244_v26, %v170_v41  ;;  %v172_v50 = vunpack.c.l.bf16 %v61_v37  ;;  %v67_v39 = vld [vmem:[%s1868_s0 + $0x1a8] sm:$0xff] }
  0x6b   :  { %v575_v51 = vmax.f32 %v447_v42, 0.0  ;;  %v449_v52 = vadd.f32 %v1250_v29, %v309_v44  ;;  %v311_v53 = vmul.f32 %v1246_v27, %v171_v45  ;;  %v173_v54 = vunpack.c.h.bf16 %v61_v37 }
  0x6c   :  { %1041 = vst [vmem:[%s1871_s3 + $0x158] sm:$0xff] %v1173_v47  ;;  %v576_v55 = vmax.f32 %v448_v48, 0.0  ;;  %v450_v56 = vadd.f32 %v1248_v28, %v310_v49  ;;  %v312_v57 = vmul.f32 %v1244_v26, %v172_v50  ;;  %v174_v58 = vunpack.c.l.bf16 %v62_v46  ;;  %v68_v48 = vld [vmem:[%s1868_s0 + $0x1b0] sm:$0xff] }
  0x6d   :  { %v1174_v60 = vpack.c.bf16 %v575_v51, %v574_v43  ;;  %v577_v61 = vmax.f32 %v449_v52, 0.0  ;;  %v451_v62 = vadd.f32 %v1250_v29, %v311_v53  ;;  %v313_v63 = vmul.f32 %v1246_v27, %v173_v54 }
  0x6e   :  { %v578_v0 = vmax.f32 %v450_v56, 0.0  ;;  %v452_v1 = vadd.f32 %v1248_v28, %v312_v57  ;;  %v175_v2 = vunpack.c.h.bf16 %v62_v46  ;;  %v314_v3 = vmul.f32 %v1244_v26, %v174_v58  ;;  %v69_v57 = vld [vmem:[%s1868_s0 + $0x1b8] sm:$0xff] }
  0x6f   :  { %1042 = vst [vmem:[%s1871_s3 + $0x160] sm:$0xff] %v1174_v60  ;;  %v1175_v5 = vpack.c.bf16 %v577_v61, %v576_v55  ;;  %v579_v6 = vmax.f32 %v451_v62, 0.0  ;;  %v453_v7 = vadd.f32 %v1250_v29, %v313_v63  ;;  %v176_v8 = vunpack.c.l.bf16 %v63_v59 }
  0x70   :  { %v580_v9 = vmax.f32 %v452_v1, 0.0  ;;  %v315_v10 = vmul.f32 %v1246_v27, %v175_v2  ;;  %v454_v11 = vadd.f32 %v1248_v28, %v314_v3  ;;  %v177_v12 = vunpack.c.h.bf16 %v63_v59  ;;  %v70_v2 = vld [vmem:[%s1868_s0 + $0x1c0] sm:$0xff] }
  0x71   :  { %1043 = vst [vmem:[%s1871_s3 + $0x168] sm:$0xff] %v1175_v5  ;;  %v1176_v14 = vpack.c.bf16 %v579_v6, %v578_v0  ;;  %v581_v15 = vmax.f32 %v453_v7, 0.0  ;;  %v316_v16 = vmul.f32 %v1244_v26, %v176_v8  ;;  %v178_v17 = vunpack.c.l.bf16 %v64_v4 }
  0x72   :  { %v455_v18 = vadd.f32 %v1250_v29, %v315_v10  ;;  %v582_v19 = vmax.f32 %v454_v11, 0.0  ;;  %v317_v20 = vmul.f32 %v1246_v27, %v177_v12  ;;  %v179_v21 = vunpack.c.h.bf16 %v64_v4 }
  0x73   :  { %1044 = vst [vmem:[%s1871_s3 + $0x170] sm:$0xff] %v1176_v14  ;;  %v1177_v23 = vpack.c.bf16 %v581_v15, %v580_v9  ;;  %v456_v24 = vadd.f32 %v1248_v28, %v316_v16  ;;  %v318_v25 = vmul.f32 %v1244_v26, %v178_v17  ;;  %v180_v30 = vunpack.c.l.bf16 %v65_v13  ;;  %v71_v15 = vld [vmem:[%s1868_s0 + $0x1c8] sm:$0xff] }
  0x74   :  { %v583_v31 = vmax.f32 %v455_v18, 0.0  ;;  %v457_v32 = vadd.f32 %v1250_v29, %v317_v20  ;;  %v319_v33 = vmul.f32 %v1246_v27, %v179_v21  ;;  %v181_v34 = vunpack.c.h.bf16 %v65_v13 }
  0x75   :  { %1045 = vst [vmem:[%s1871_s3 + $0x178] sm:$0xff] %v1177_v23  ;;  %v584_v35 = vmax.f32 %v456_v24, 0.0  ;;  %v458_v36 = vadd.f32 %v1248_v28, %v318_v25  ;;  %v320_v37 = vmul.f32 %v1244_v26, %v180_v30  ;;  %v182_v38 = vunpack.c.l.bf16 %v66_v22  ;;  %v72_v24 = vld [vmem:[%s1868_s0 + $0x1d0] sm:$0xff] }
  0x76   :  { %v1178_v40 = vpack.c.bf16 %v583_v31, %v582_v19  ;;  %v585_v41 = vmax.f32 %v457_v32, 0.0  ;;  %v459_v42 = vadd.f32 %v1250_v29, %v319_v33  ;;  %v321_v43 = vmul.f32 %v1246_v27, %v181_v34 }
  0x77   :  { %v586_v44 = vmax.f32 %v458_v36, 0.0  ;;  %v460_v45 = vadd.f32 %v1248_v28, %v320_v37  ;;  %v183_v46 = vunpack.c.h.bf16 %v66_v22  ;;  %v322_v47 = vmul.f32 %v1244_v26, %v182_v38  ;;  %v73_v37 = vld [vmem:[%s1868_s0 + $0x1d8] sm:$0xff] }
  0x78   :  { %1046 = vst [vmem:[%s1871_s3 + $0x180] sm:$0xff] %v1178_v40  ;;  %v1179_v49 = vpack.c.bf16 %v585_v41, %v584_v35  ;;  %v587_v50 = vmax.f32 %v459_v42, 0.0  ;;  %v461_v51 = vadd.f32 %v1250_v29, %v321_v43  ;;  %v184_v52 = vunpack.c.l.bf16 %v67_v39 }
  0x79   :  { %v588_v53 = vmax.f32 %v460_v45, 0.0  ;;  %v323_v54 = vmul.f32 %v1246_v27, %v183_v46  ;;  %v462_v55 = vadd.f32 %v1248_v28, %v322_v47  ;;  %v185_v56 = vunpack.c.h.bf16 %v67_v39  ;;  %v74_v46 = vld [vmem:[%s1868_s0 + $0x1e0] sm:$0xff] }
  0x7a   :  { %1047 = vst [vmem:[%s1871_s3 + $0x188] sm:$0xff] %v1179_v49  ;;  %v1180_v58 = vpack.c.bf16 %v587_v50, %v586_v44  ;;  %v589_v59 = vmax.f32 %v461_v51, 0.0  ;;  %v324_v60 = vmul.f32 %v1244_v26, %v184_v52  ;;  %v186_v61 = vunpack.c.l.bf16 %v68_v48 }
  0x7b   :  { %v463_v62 = vadd.f32 %v1250_v29, %v323_v54  ;;  %v590_v63 = vmax.f32 %v462_v55, 0.0  ;;  %v325_v0 = vmul.f32 %v1246_v27, %v185_v56  ;;  %v187_v1 = vunpack.c.h.bf16 %v68_v48 }
  0x7c   :  { %1048 = vst [vmem:[%s1871_s3 + $0x190] sm:$0xff] %v1180_v58  ;;  %v1181_v3 = vpack.c.bf16 %v589_v59, %v588_v53  ;;  %v464_v4 = vadd.f32 %v1248_v28, %v324_v60  ;;  %v326_v5 = vmul.f32 %v1244_v26, %v186_v61  ;;  %v188_v6 = vunpack.c.l.bf16 %v69_v57  ;;  %v75_v59 = vld [vmem:[%s1868_s0 + $0x1e8] sm:$0xff] }
  0x7d   :  { %v591_v7 = vmax.f32 %v463_v62, 0.0  ;;  %v465_v8 = vadd.f32 %v1250_v29, %v325_v0  ;;  %v327_v9 = vmul.f32 %v1246_v27, %v187_v1  ;;  %v189_v10 = vunpack.c.h.bf16 %v69_v57 }
  0x7e   :  { %1049 = vst [vmem:[%s1871_s3 + $0x198] sm:$0xff] %v1181_v3  ;;  %v592_v11 = vmax.f32 %v464_v4, 0.0  ;;  %v466_v12 = vadd.f32 %v1248_v28, %v326_v5  ;;  %v328_v13 = vmul.f32 %v1244_v26, %v188_v6  ;;  %v190_v14 = vunpack.c.l.bf16 %v70_v2  ;;  %v76_v4 = vld [vmem:[%s1868_s0 + $0x1f0] sm:$0xff] }
  0x7f   :  { %v1182_v16 = vpack.c.bf16 %v591_v7, %v590_v63  ;;  %v593_v17 = vmax.f32 %v465_v8, 0.0  ;;  %v467_v18 = vadd.f32 %v1250_v29, %v327_v9  ;;  %v329_v19 = vmul.f32 %v1246_v27, %v189_v10 }
  0x80   :  { %v594_v20 = vmax.f32 %v466_v12, 0.0  ;;  %v468_v21 = vadd.f32 %v1248_v28, %v328_v13  ;;  %v191_v22 = vunpack.c.h.bf16 %v70_v2  ;;  %v330_v23 = vmul.f32 %v1244_v26, %v190_v14  ;;  %v77_v13 = vld [vmem:[%s1868_s0 + $0x1f8] sm:$0xff] }
  0x81   :  { %1050 = vst [vmem:[%s1871_s3 + $0x1a0] sm:$0xff] %v1182_v16  ;;  %v1183_v25 = vpack.c.bf16 %v593_v17, %v592_v11  ;;  %v595_v30 = vmax.f32 %v467_v18, 0.0  ;;  %v469_v31 = vadd.f32 %v1250_v29, %v329_v19  ;;  %v192_v32 = vunpack.c.l.bf16 %v71_v15 }
  0x82   :  { %v596_v33 = vmax.f32 %v468_v21, 0.0  ;;  %v331_v34 = vmul.f32 %v1246_v27, %v191_v22  ;;  %v470_v35 = vadd.f32 %v1248_v28, %v330_v23  ;;  %v193_v36 = vunpack.c.h.bf16 %v71_v15 }
  0x83   :  { %1051 = vst [vmem:[%s1871_s3 + $0x1a8] sm:$0xff] %v1183_v25  ;;  %v1184_v38 = vpack.c.bf16 %v595_v30, %v594_v20  ;;  %v597_v39 = vmax.f32 %v469_v31, 0.0  ;;  %v332_v40 = vmul.f32 %v1244_v26, %v192_v32  ;;  %v194_v41 = vunpack.c.l.bf16 %v72_v24 }
  0x84   :  { %v471_v42 = vadd.f32 %v1250_v29, %v331_v34  ;;  %v598_v43 = vmax.f32 %v470_v35, 0.0  ;;  %v333_v44 = vmul.f32 %v1246_v27, %v193_v36  ;;  %v195_v45 = vunpack.c.h.bf16 %v72_v24 }
  0x85   :  { %1052 = vst [vmem:[%s1871_s3 + $0x1b0] sm:$0xff] %v1184_v38  ;;  %v1185_v47 = vpack.c.bf16 %v597_v39, %v596_v33  ;;  %v472_v48 = vadd.f32 %v1248_v28, %v332_v40  ;;  %v334_v49 = vmul.f32 %v1244_v26, %v194_v41  ;;  %v196_v50 = vunpack.c.l.bf16 %v73_v37 }
  0x86   :  { %v599_v51 = vmax.f32 %v471_v42, 0.0  ;;  %v473_v52 = vadd.f32 %v1250_v29, %v333_v44  ;;  %v335_v53 = vmul.f32 %v1246_v27, %v195_v45  ;;  %v197_v54 = vunpack.c.h.bf16 %v73_v37 }
  0x87   :  { %1053 = vst [vmem:[%s1871_s3 + $0x1b8] sm:$0xff] %v1185_v47  ;;  %v600_v55 = vmax.f32 %v472_v48, 0.0  ;;  %v474_v56 = vadd.f32 %v1248_v28, %v334_v49  ;;  %v336_v57 = vmul.f32 %v1244_v26, %v196_v50  ;;  %v198_v58 = vunpack.c.l.bf16 %v74_v46 }
  0x88   :  { %v1186_v60 = vpack.c.bf16 %v599_v51, %v598_v43  ;;  %v601_v61 = vmax.f32 %v473_v52, 0.0  ;;  %v475_v62 = vadd.f32 %v1250_v29, %v335_v53  ;;  %v337_v63 = vmul.f32 %v1246_v27, %v197_v54 }
  0x89   :  { %v602_v0 = vmax.f32 %v474_v56, 0.0  ;;  %v476_v1 = vadd.f32 %v1248_v28, %v336_v57  ;;  %v199_v2 = vunpack.c.h.bf16 %v74_v46  ;;  %v338_v3 = vmul.f32 %v1244_v26, %v198_v58 }
  0x8a   :  { %1054 = vst [vmem:[%s1871_s3 + $0x1c0] sm:$0xff] %v1186_v60  ;;  %v1187_v5 = vpack.c.bf16 %v601_v61, %v600_v55  ;;  %v603_v6 = vmax.f32 %v475_v62, 0.0  ;;  %v477_v7 = vadd.f32 %v1250_v29, %v337_v63  ;;  %v200_v8 = vunpack.c.l.bf16 %v75_v59 }
  0x8b   :  { %v604_v9 = vmax.f32 %v476_v1, 0.0  ;;  %v339_v10 = vmul.f32 %v1246_v27, %v199_v2  ;;  %v478_v11 = vadd.f32 %v1248_v28, %v338_v3  ;;  %v201_v12 = vunpack.c.h.bf16 %v75_v59 }
  0x8c   :  { %1055 = vst [vmem:[%s1871_s3 + $0x1c8] sm:$0xff] %v1187_v5  ;;  %v1188_v14 = vpack.c.bf16 %v603_v6, %v602_v0  ;;  %v605_v15 = vmax.f32 %v477_v7, 0.0  ;;  %v340_v16 = vmul.f32 %v1244_v26, %v200_v8  ;;  %v202_v17 = vunpack.c.l.bf16 %v76_v4 }
  0x8d   :  { %v479_v18 = vadd.f32 %v1250_v29, %v339_v10  ;;  %v606_v19 = vmax.f32 %v478_v11, 0.0  ;;  %v341_v20 = vmul.f32 %v1246_v27, %v201_v12  ;;  %v203_v21 = vunpack.c.h.bf16 %v76_v4 }
  0x8e   :  { %1056 = vst [vmem:[%s1871_s3 + $0x1d0] sm:$0xff] %v1188_v14  ;;  %v1189_v22 = vpack.c.bf16 %v605_v15, %v604_v9  ;;  %v480_v23 = vadd.f32 %v1248_v28, %v340_v16  ;;  %v342_v24 = vmul.f32 %v1244_v26, %v202_v17  ;;  %v204_v25 = vunpack.c.l.bf16 %v77_v13 }
  0x8f   :  { %v607_v30 = vmax.f32 %v479_v18, 0.0  ;;  %v481_v31 = vadd.f32 %v1250_v29, %v341_v20  ;;  %v343_v32 = vmul.f32 %v1246_v27, %v203_v21  ;;  %v205_v33 = vunpack.c.h.bf16 %v77_v13 }
  0x90   :  { %1057 = vst [vmem:[%s1871_s3 + $0x1d8] sm:$0xff] %v1189_v22  ;;  %v608_v34 = vmax.f32 %v480_v23, 0.0  ;;  %v482_v35 = vadd.f32 %v1248_v28, %v342_v24  ;;  %v344_v36 = vmul.f32 %v1244_v26, %v204_v25 }
  0x91   :  { %v1190_v37 = vpack.c.bf16 %v607_v30, %v606_v19  ;;  %v609_v38 = vmax.f32 %v481_v31, 0.0  ;;  %v483_v39 = vadd.f32 %v1250_v29, %v343_v32  ;;  %v345_v40 = vmul.f32 %v1246_v27, %v205_v33 }
  0x92   :  { %v610_v41 = vmax.f32 %v482_v35, 0.0  ;;  %v484_v42 = vadd.f32 %v1248_v28, %v344_v36 }
  0x93   :  { %1058 = vst [vmem:[%s1871_s3 + $0x1e0] sm:$0xff] %v1190_v37  ;;  %v1191_v43 = vpack.c.bf16 %v609_v38, %v608_v34  ;;  %v611_v44 = vmax.f32 %v483_v39, 0.0  ;;  %v485_v45 = vadd.f32 %v1250_v29, %v345_v40 }
  0x94   :  { %v612_v46 = vmax.f32 %v484_v42, 0.0 }
  0x95   :  { %1059 = vst [vmem:[%s1871_s3 + $0x1e8] sm:$0xff] %v1191_v43  ;;  %v1192_v26 = vpack.c.bf16 %v611_v44, %v610_v41  ;;  %v613_v47 = vmax.f32 %v485_v45, 0.0 }
  0x97   :  { %1060 = vst [vmem:[%s1871_s3 + $0x1f0] sm:$0xff] %v1192_v26  ;;  %v1193_v27 = vpack.c.bf16 %v613_v47, %v612_v46 }
  0x99   :  { %1061 = vst [vmem:[%s1871_s3 + $0x1f8] sm:$0xff] %v1193_v27 }

// kernel: reduction_a_forward.13
= control target key start
LH: loop header
LB: loop body
LE: loop exit
PB: predicated region body
PF: predicated region fallthrough
CT: control target
= control target key end

     0   :  { %s8129_s15 = smov 0   ;;  %s9517_s0 = inlined_call_operand.vmem [shape: bf16[512,2304], index: 0, kind: input, shape index: {}]   ;;  %s9518_s1 = inlined_call_operand.vmem [shape: bf16[2304,256], index: 1, kind: input, shape index: {}]   ;;  %s9519_s2 = inlined_call_operand.vmem [shape: bf16[512,256], index: 2, kind: output, shape index: {0}]   ;;  %s9520_s3 = inlined_call_operand.vmem [shape: f32[16,256], index: 3, kind: output, shape index: {1}]   ;;  %s9521_s4 = inlined_call_operand.vmem [shape: f32[16,256], index: 4, kind: output, shape index: {2}]  }
   0x1 LB: > { %s8135_s16 = sadd.s32 4294967295, %s8102_s15   ;;  %p5992_p0 = scmp.ge.s32.totalorder %s8102_s15, 1  ;;  %s8102_s15 = sphi %s8129_s15, %s15_s15  }
   0x2   : > { %p169_p1 = scmp.lt.s32.totalorder %s8102_s15, 3 }
   0x4   : > { %p170_p2 = pnand %p5992_p0, %p169_p1 }
   0x5   : > { %v7200_v0 = vld [vmem:[%s9518_s1 + $0x4] ss:$8 sps:$4 sm:$0xff] (!%p170_p2)   ;;  %v7204_v2 = vld [vmem:[%s9518_s1] ss:$8 sps:$4 sm:$0xff] (!%p170_p2)   ;;  %v7206_v4 = vld [vmem:[%s9518_s1 + $0x14] ss:$8 sps:$4 sm:$0xff] (!%p170_p2)  }
   0x6   : > { %173 = sbr.rel (%p170_p2) target bundleno = 873 (0x369), region = 28  ;;  %v7202_v1 = vld [vmem:[%s9518_s1 + $0x404] ss:$8 sps:$4 sm:$0xff] (!%p170_p2)   ;;  %3687 = vmatprep.subr.bf16.mxu1 (!%p170_p2), %v7200_v0  ;;  %v7205_v3 = vld [vmem:[%s9518_s1 + $0x400] ss:$8 sps:$4 sm:$0xff] (!%p170_p2)   ;;  %s5993_s29 = sshll.u32 (!%p170_p2), %s8135_s16, 5 }
   0x7   : > { %4459 = vmatprep.subr.bf16.mxu0 (!%p170_p2), %v7202_v1  ;;  %3688 = vmatpush1.bf16.msra.mxu1 (!%p170_p2), %v7204_v2  ;;  %v7208_v5 = vld [vmem:[%s9518_s1 + $0x414] ss:$8 sps:$4 sm:$0xff] (!%p170_p2)   ;;  %v7210_v6 = vld [vmem:[%s9518_s1 + $0x10] ss:$8 sps:$4 sm:$0xff] (!%p170_p2)   ;;  %v7212_v8 = vld [vmem:[%s9518_s1 + $0x24] ss:$8 sps:$4 sm:$0xff] (!%p170_p2)  }
   0x8   : > { %4460 = vmatpush1.bf16.msra.mxu0 (!%p170_p2), %v7205_v3  ;;  %3689 = vmatprep.subr.bf16.mxu1 (!%p170_p2), %v7206_v4  ;;  %v7211_v7 = vld [vmem:[%s9518_s1 + $0x410] ss:$8 sps:$4 sm:$0xff] (!%p170_p2)   ;;  %v7214_v9 = vld [vmem:[%s9518_s1 + $0x424] ss:$8 sps:$4 sm:$0xff] (!%p170_p2)   ;;  %v7216_v10 = vld [vmem:[%s9518_s1 + $0x20] ss:$8 sps:$4 sm:$0xff] (!%p170_p2)  }
   0x9   : > { %4461 = vmatprep.subr.bf16.mxu0 (!%p170_p2), %v7208_v5  ;;  %v7217_v11 = vld [vmem:[%s9518_s1 + $0x420] ss:$8 sps:$4 sm:$0xff] (!%p170_p2)   ;;  %v7218_v12 = vld [vmem:[%s9518_s1 + $0x34] ss:$8 sps:$4 sm:$0xff] (!%p170_p2)   ;;  %v7222_v14 = vld [vmem:[%s9518_s1 + $0x30] ss:$8 sps:$4 sm:$0xff] (!%p170_p2)  }
   0xa   : > { %v7220_v13 = vld [vmem:[%s9518_s1 + $0x434] ss:$8 sps:$4 sm:$0xff] (!%p170_p2)   ;;  %v7223_v15 = vld [vmem:[%s9518_s1 + $0x430] ss:$8 sps:$4 sm:$0xff] (!%p170_p2)   ;;  %v7224_v16 = vld [vmem:[%s9518_s1 + $0x44] ss:$8 sps:$4 sm:$0xff] (!%p170_p2)  }
   0xb   : > { %3690 = vmatpush1.bf16.msra.mxu1 (!%p170_p2), %v7210_v6  ;;  %v7226_v17 = vld [vmem:[%s9518_s1 + $0x444] ss:$8 sps:$4 sm:$0xff] (!%p170_p2)   ;;  %v7228_v18 = vld [vmem:[%s9518_s1 + $0x40] ss:$8 sps:$4 sm:$0xff] (!%p170_p2)   ;;  %v7230_v20 = vld [vmem:[%s9518_s1 + $0x54] ss:$8 sps:$4 sm:$0xff] (!%p170_p2)  }
   0xc   : > { %4462 = vmatpush1.bf16.msra.mxu0 (!%p170_p2), %v7211_v7  ;;  %3691 = vmatprep.subr.bf16.mxu1 (!%p170_p2), %v7212_v8  ;;  %v7229_v19 = vld [vmem:[%s9518_s1 + $0x440] ss:$8 sps:$4 sm:$0xff] (!%p170_p2)   ;;  %v7232_v21 = vld [vmem:[%s9518_s1 + $0x454] ss:$8 sps:$4 sm:$0xff] (!%p170_p2)   ;;  %v7234_v22 = vld [vmem:[%s9518_s1 + $0x50] ss:$8 sps:$4 sm:$0xff] (!%p170_p2)  }
   0xd   : > { %4463 = vmatprep.subr.bf16.mxu0 %v7214_v9  ;;  %v7235_v23 = vld [vmem:[%s9518_s1 + $0x450] ss:$8 sps:$4 sm:$0xff]   ;;  %v7236_v24 = vld [vmem:[%s9518_s1 + $0x64] ss:$8 sps:$4 sm:$0xff]   ;;  %v7240_v26 = vld [vmem:[%s9518_s1 + $0x60] ss:$8 sps:$4 sm:$0xff]  }
   0xe   : > { %v7238_v25 = vld [vmem:[%s9518_s1 + $0x464] ss:$8 sps:$4 sm:$0xff]   ;;  %v7241_v27 = vld [vmem:[%s9518_s1 + $0x460] ss:$8 sps:$4 sm:$0xff]   ;;  %v7242_v28 = vld [vmem:[%s9518_s1 + $0x74] ss:$8 sps:$4 sm:$0xff]  }
   0xf   : > { %3692 = vmatpush1.bf16.msra.mxu1 %v7216_v10  ;;  %v7244_v29 = vld [vmem:[%s9518_s1 + $0x474] ss:$8 sps:$4 sm:$0xff]   ;;  %v7246_v30 = vld [vmem:[%s9518_s1 + $0x70] ss:$8 sps:$4 sm:$0xff]   ;;  %v7248_v32 = vld [vmem:[%s9518_s1 + $0x84] ss:$8 sps:$4 sm:$0xff]  }
  0x10   : > { %4464 = vmatpush1.bf16.msra.mxu0 %v7217_v11  ;;  %3693 = vmatprep.subr.bf16.mxu1 %v7218_v12  ;;  %v7247_v31 = vld [vmem:[%s9518_s1 + $0x470] ss:$8 sps:$4 sm:$0xff]   ;;  %p208_p3 = scmp.lt.s32.totalorder %s5993_s29, 63  ;;  %v7250_v33 = vld [vmem:[%s9518_s1 + $0x484] ss:$8 sps:$4 sm:$0xff]   ;;  %p221_p4 = scmp.lt.s32.totalorder %s8135_s16, 1 }
  0x11   : > { %4465 = vmatprep.subr.bf16.mxu0 %v7220_v13  ;;  %v7252_v34 = vld [vmem:[%s9518_s1 + $0x80] ss:$8 sps:$4 sm:$0xff]   ;;  %v7254_v36 = vld [vmem:[%s9518_s1 + $0x94] ss:$8 sps:$4 sm:$0xff]   ;;  %v7258_v38 = vld [vmem:[%s9518_s1 + $0x90] ss:$8 sps:$4 sm:$0xff]  }
  0x12   : > { %v7253_v35 = vld [vmem:[%s9518_s1 + $0x480] ss:$8 sps:$4 sm:$0xff]   ;;  %s9523_s29 = smov (!%p208_p3, %s5993_s29), 63  ;;  %v7256_v37 = vld [vmem:[%s9518_s1 + $0x494] ss:$8 sps:$4 sm:$0xff]   ;;  %s9525_s16 = smov (!%p221_p4, %s8135_s16), 1 }
  0x13   : > { %3694 = vmatpush1.bf16.msra.mxu1 %v7222_v14  ;;  %v7259_v39 = vld [vmem:[%s9518_s1 + $0x490] ss:$8 sps:$4 sm:$0xff]   ;;  %v7260_v40 = vld [vmem:[%s9518_s1 + $0xa4] ss:$8 sps:$4 sm:$0xff]   ;;  %s7191_s28 = smul.u32 72, %s9523_s29 }
  0x14   : > { %4466 = vmatpush1.bf16.msra.mxu0 %v7223_v15  ;;  %3695 = vmatprep.subr.bf16.mxu1 %v7224_v16  ;;  %v7262_v41 = vld [vmem:[%s9518_s1 + $0x4a4] ss:$8 sps:$4 sm:$0xff]   ;;  %v7264_v42 = vld [vmem:[%s9518_s1 + $0xa0] ss:$8 sps:$4 sm:$0xff]   ;;  %v7266_v44 = vld [vmem:[%s9518_s1 + $0xb4] ss:$8 sps:$4 sm:$0xff]  }
  0x15   : > { %4467 = vmatprep.subr.bf16.mxu0 %v7226_v17  ;;  %v7265_v43 = vld [vmem:[%s9518_s1 + $0x4a0] ss:$8 sps:$4 sm:$0xff]   ;;  %s8281_s14 = scalar_lea.vmem %s9517_s0, %s7191_s28  ;;  %v7268_v45 = vld [vmem:[%s9518_s1 + $0x4b4] ss:$8 sps:$4 sm:$0xff]   ;;  %v7270_v46 = vld [vmem:[%s9518_s1 + $0xb0] ss:$8 sps:$4 sm:$0xff]  }
  0x16   : > { %v7271_v47 = vld [vmem:[%s9518_s1 + $0x4b0] ss:$8 sps:$4 sm:$0xff]   ;;  %v7272_v48 = vld [vmem:[%s9518_s1 + $0xc4] ss:$8 sps:$4 sm:$0xff]   ;;  %v7276_v52 = vld [vmem:[%s9518_s1 + $0xc0] ss:$8 sps:$4 sm:$0xff]  }
  0x17   : > { %3696 = vmatpush1.bf16.msra.mxu1 %v7228_v18  ;;  %v7298_v49 = vld [vmem:[%s8281_s14 + $0x4] ss:$72 sps:$4 sm:$0xff]   ;;  %v7277_v53 = vld [vmem:[%s9518_s1 + $0x4c0] ss:$8 sps:$4 sm:$0xff]   ;;  %v7278_v54 = vld [vmem:[%s9518_s1 + $0xd4] ss:$8 sps:$4 sm:$0xff]  }
  0x18   : > { %4468 = vmatpush1.bf16.msra.mxu0 %v7229_v19  ;;  %3697 = vmatprep.subr.bf16.mxu1 %v7230_v20  ;;  %v7274_v50 = vld [vmem:[%s9518_s1 + $0x4c4] ss:$8 sps:$4 sm:$0xff]   ;;  %v7280_v55 = vld [vmem:[%s9518_s1 + $0x4d4] ss:$8 sps:$4 sm:$0xff]   ;;  %v7282_v56 = vld [vmem:[%s9518_s1 + $0xd0] ss:$8 sps:$4 sm:$0xff]  }
  0x19   : > { %4469 = vmatprep.subr.bf16.mxu0 %v7232_v21  ;;  %v7301_v51 = vld [vmem:[%s8281_s14 + $0x24] ss:$72 sps:$4 sm:$0xff]   ;;  %3719 = vmatprep.mubr.bf16.mxu1 %v7298_v49  ;;  %v7283_v57 = vld [vmem:[%s9518_s1 + $0x4d0] ss:$8 sps:$4 sm:$0xff]   ;;  %v7288_v60 = vld [vmem:[%s9518_s1 + $0xe0] ss:$8 sps:$4 sm:$0xff]  }
  0x1a   : > { %4491 = vmatprep.mubr.bf16.mxu0 %v7301_v51  ;;  %v7284_v58 = vld [vmem:[%s9518_s1 + $0xe4] ss:$8 sps:$4 sm:$0xff]   ;;  %v7289_v61 = vld [vmem:[%s9518_s1 + $0x4e0] ss:$8 sps:$4 sm:$0xff]   ;;  %v7290_v62 = vld [vmem:[%s9518_s1 + $0xf4] ss:$8 sps:$4 sm:$0xff]  }
  0x1b   : > { %3698 = vmatpush1.bf16.msra.mxu1 %v7234_v22  ;;  %v7286_v59 = vld [vmem:[%s9518_s1 + $0x4e4] ss:$8 sps:$4 sm:$0xff]   ;;  %v7292_v63 = vld [vmem:[%s9518_s1 + $0x4f4] ss:$8 sps:$4 sm:$0xff]   ;;  %v7294_v0 = vld [vmem:[%s9518_s1 + $0xf0] ss:$8 sps:$4 sm:$0xff]  }
  0x1c   : > { %4470 = vmatpush1.bf16.msra.mxu0 %v7235_v23  ;;  %3699 = vmatprep.subr.bf16.mxu1 %v7236_v24  ;;  %v7295_v1 = vld [vmem:[%s9518_s1 + $0x4f0] ss:$8 sps:$4 sm:$0xff]   ;;  %v7304_v2 = vld [vmem:[%s9518_s1 + $0x104] ss:$8 sps:$4 sm:$0xff]   ;;  %v7296_v4 = vld [vmem:[%s8281_s14] ss:$72 sps:$4 sm:$0xff]  }
  0x1d   : > { %4471 = vmatprep.subr.bf16.mxu0 %v7238_v25  ;;  %v7307_v3 = vld [vmem:[%s9518_s1 + $0x504] ss:$8 sps:$4 sm:$0xff]   ;;  %v7299_v5 = vld [vmem:[%s8281_s14 + $0x20] ss:$72 sps:$4 sm:$0xff]   ;;  %v7310_v8 = vld [vmem:[%s9518_s1 + $0x514] ss:$8 sps:$4 sm:$0xff]  }
  0x1e   : > { %v7302_v6 = vld [vmem:[%s9518_s1 + $0x100] ss:$8 sps:$4 sm:$0xff]   ;;  %v7311_v9 = vld [vmem:[%s8281_s14 + $0x94] ss:$72 sps:$4 sm:$0xff]   ;;  %v7308_v12 = vld [vmem:[%s9518_s1 + $0x510] ss:$8 sps:$4 sm:$0xff]  }
  0x1f   : > { %3700 = vmatpush1.bf16.msra.mxu1 %v7240_v26  ;;  %v7305_v7 = vld [vmem:[%s9518_s1 + $0x500] ss:$8 sps:$4 sm:$0xff]   ;;  %v7313_v10 = vld [vmem:[%s8281_s14 + $0xb4] ss:$72 sps:$4 sm:$0xff]   ;;  %v7316_v13 = vld [vmem:[%s9518_s1 + $0x110] ss:$8 sps:$4 sm:$0xff]  }
  0x20   : > { %4472 = vmatpush1.bf16.msra.mxu0 %v7241_v27  ;;  %3701 = vmatprep.subr.bf16.mxu1 %v7242_v28  ;;  %v7318_v11 = vld [vmem:[%s9518_s1 + $0x114] ss:$8 sps:$4 sm:$0xff]   ;;  %v7322_v14 = vld [vmem:[%s9518_s1 + $0x524] ss:$8 sps:$4 sm:$0xff]   ;;  %v7315_v16 = vld [vmem:[%s8281_s14 + $0x90] ss:$72 sps:$4 sm:$0xff]  }
  0x21   : > { %4473 = vmatprep.subr.bf16.mxu0 %v7244_v29  ;;  %v7333_v15 = vld [vmem:[%s9518_s1 + $0x124] ss:$8 sps:$4 sm:$0xff]   ;;  %v7319_v17 = vld [vmem:[%s8281_s14 + $0xb0] ss:$72 sps:$4 sm:$0xff]   ;;  %v7320_v18 = vld [vmem:[%s9518_s1 + $0x520] ss:$8 sps:$4 sm:$0xff]  }
  0x22   : > { %v7325_v19 = vld [vmem:[%s9518_s1 + $0x534] ss:$8 sps:$4 sm:$0xff]   ;;  %v7326_v20 = vld [vmem:[%s8281_s14 + $0x124] ss:$72 sps:$4 sm:$0xff]   ;;  %v7331_v22 = vld [vmem:[%s9518_s1 + $0x120] ss:$8 sps:$4 sm:$0xff]  }
  0x23   : > { %3702 = vmatpush1.bf16.msra.mxu1 %v7246_v30  ;;  %v7328_v21 = vld [vmem:[%s8281_s14 + $0x144] ss:$72 sps:$4 sm:$0xff]   ;;  %v7348_v23 = vld [vmem:[%s9518_s1 + $0x134] ss:$8 sps:$4 sm:$0xff]   ;;  %v7323_v24 = vld [vmem:[%s9518_s1 + $0x530] ss:$8 sps:$4 sm:$0xff]  }
  0x24   : > { %4474 = vmatpush1.bf16.msra.mxu0 %v7247_v31  ;;  %3703 = vmatprep.subr.bf16.mxu1 %v7248_v32  ;;  %v7330_v25 = vld [vmem:[%s8281_s14 + $0x120] ss:$72 sps:$4 sm:$0xff]   ;;  %v7337_v26 = vld [vmem:[%s9518_s1 + $0x544] ss:$8 sps:$4 sm:$0xff]   ;;  %v7346_v27 = vld [vmem:[%s9518_s1 + $0x130] ss:$8 sps:$4 sm:$0xff]  }
  0x25   : > { %4475 = vmatprep.subr.bf16.mxu0 %v7250_v33  ;;  %v7334_v28 = vld [vmem:[%s8281_s14 + $0x140] ss:$72 sps:$4 sm:$0xff]   ;;  %v7340_v30 = vld [vmem:[%s9518_s1 + $0x554] ss:$8 sps:$4 sm:$0xff]   ;;  %v7363_v33 = vld [vmem:[%s9518_s1 + $0x144] ss:$8 sps:$4 sm:$0xff]  }
  0x26   : > { %v7335_v29 = vld [vmem:[%s9518_s1 + $0x540] ss:$8 sps:$4 sm:$0xff]   ;;  %v7341_v31 = vld [vmem:[%s8281_s14 + $0x1b4] ss:$72 sps:$4 sm:$0xff]  }
  0x27   : > { %3704 = vmatpush1.bf16.msra.mxu1 %v7252_v34  ;;  %v7343_v32 = vld [vmem:[%s8281_s14 + $0x1d4] ss:$72 sps:$4 sm:$0xff]   ;;  %v7361_v34 = vld [vmem:[%s9518_s1 + $0x140] ss:$8 sps:$4 sm:$0xff]  }
  0x28   : > { %4476 = vmatpush1.bf16.msra.mxu0 %v7253_v35  ;;  %3705 = vmatprep.subr.bf16.mxu1 %v7254_v36  ;;  %v7338_v35 = vld [vmem:[%s9518_s1 + $0x550] ss:$8 sps:$4 sm:$0xff]   ;;  %v7378_v36 = vld [vmem:[%s9518_s1 + $0x154] ss:$8 sps:$4 sm:$0xff]   ;;  %v7364_v49 = vld [vmem:[%s8281_s14 + $0x260] ss:$72 sps:$4 sm:$0xff]  }
  0x29   : > { %4477 = vmatprep.subr.bf16.mxu0 %v7256_v37  ;;  %v7352_v37 = vld [vmem:[%s9518_s1 + $0x564] ss:$8 sps:$4 sm:$0xff]   ;;  %v7365_v51 = vld [vmem:[%s9518_s1 + $0x580] ss:$8 sps:$4 sm:$0xff]  }
  0x2b   : > { %3706 = vmatpush1.bf16.msra.mxu1 %v7258_v38  ;;  %v7345_v38 = vld [vmem:[%s8281_s14 + $0x1b0] ss:$72 sps:$4 sm:$0xff]  }
  0x2c   : > { %4478 = vmatpush1.bf16.msra.mxu0 %v7259_v39  ;;  %3707 = vmatprep.subr.bf16.mxu1 %v7260_v40  ;;  %v7349_v39 = vld [vmem:[%s8281_s14 + $0x1d0] ss:$72 sps:$4 sm:$0xff]   ;;  %v7350_v40 = vld [vmem:[%s9518_s1 + $0x560] ss:$8 sps:$4 sm:$0xff]  }
  0x2d   : > { %4479 = vmatprep.subr.bf16.mxu0 %v7262_v41  ;;  %v7355_v41 = vld [vmem:[%s9518_s1 + $0x574] ss:$8 sps:$4 sm:$0xff]  }
  0x2f   : > { %3708 = vmatpush1.bf16.msra.mxu1 %v7264_v42  ;;  %v7356_v42 = vld [vmem:[%s8281_s14 + $0x244] ss:$72 sps:$4 sm:$0xff]  }
  0x30   : > { %4480 = vmatpush1.bf16.msra.mxu0 %v7265_v43  ;;  %3709 = vmatprep.subr.bf16.mxu1 %v7266_v44  ;;  %v7358_v43 = vld [vmem:[%s8281_s14 + $0x264] ss:$72 sps:$4 sm:$0xff]   ;;  %v7376_v44 = vld [vmem:[%s9518_s1 + $0x150] ss:$8 sps:$4 sm:$0xff]  }
  0x31   : > { %4481 = vmatprep.subr.bf16.mxu0 %v7268_v45  ;;  %v7393_v45 = vld [vmem:[%s9518_s1 + $0x164] ss:$8 sps:$4 sm:$0xff]  }
  0x33   : > { %3710 = vmatpush1.bf16.msra.mxu1 %v7270_v46  ;;  %v7353_v46 = vld [vmem:[%s9518_s1 + $0x570] ss:$8 sps:$4 sm:$0xff]  }
  0x34   : > { %4482 = vmatpush1.bf16.msra.mxu0 %v7271_v47  ;;  %3711 = vmatprep.subr.bf16.mxu1 %v7272_v48  ;;  %v7360_v47 = vld [vmem:[%s8281_s14 + $0x240] ss:$72 sps:$4 sm:$0xff]   ;;  %v7367_v48 = vld [vmem:[%s9518_s1 + $0x584] ss:$8 sps:$4 sm:$0xff]  }
  0x35   : > { %4483 = vmatprep.subr.bf16.mxu0 %v7274_v50  ;;  %v7391_v50 = vld [vmem:[%s9518_s1 + $0x160] ss:$8 sps:$4 sm:$0xff]  }
  0x37   : > { %3712 = vmatpush1.bf16.msra.mxu1 %v7276_v52  ;;  %v7370_v52 = vld [vmem:[%s9518_s1 + $0x594] ss:$8 sps:$4 sm:$0xff]  }
  0x38   : > { %4484 = vmatpush1.bf16.msra.mxu0 %v7277_v53  ;;  %3713 = vmatprep.subr.bf16.mxu1 %v7278_v54  ;;  %v7371_v53 = vld [vmem:[%s8281_s14 + $0x2d4] ss:$72 sps:$4 sm:$0xff]  }
  0x39   : > { %4485 = vmatprep.subr.bf16.mxu0 %v7280_v55  ;;  %v7373_v54 = vld [vmem:[%s8281_s14 + $0x2f4] ss:$72 sps:$4 sm:$0xff]  }
  0x3a   : > { %v7408_v55 = vld [vmem:[%s9518_s1 + $0x174] ss:$8 sps:$4 sm:$0xff]  }
  0x3b   : > { %3714 = vmatpush1.bf16.msra.mxu1 %v7282_v56  ;;  %v7368_v56 = vld [vmem:[%s9518_s1 + $0x590] ss:$8 sps:$4 sm:$0xff]  }
  0x3c   : > { %4486 = vmatpush1.bf16.msra.mxu0 %v7283_v57  ;;  %3715 = vmatprep.subr.bf16.mxu1 %v7284_v58  ;;  %v7406_v57 = vld [vmem:[%s9518_s1 + $0x170] ss:$8 sps:$4 sm:$0xff]   ;;  %v7424_v58 = vld [vmem:[%s9518_s1 + $0x184] ss:$8 sps:$4 sm:$0xff]  }
  0x3d   : > { %4487 = vmatprep.subr.bf16.mxu0 %v7286_v59  ;;  %v7382_v59 = vld [vmem:[%s9518_s1 + $0x5a4] ss:$8 sps:$4 sm:$0xff]  }
  0x3f   : > { %3716 = vmatpush1.bf16.msra.mxu1 %v7288_v60  ;;  %v7375_v60 = vld [vmem:[%s8281_s14 + $0x2d0] ss:$72 sps:$4 sm:$0xff]  }
  0x40   : > { %4488 = vmatpush1.bf16.msra.mxu0 %v7289_v61  ;;  %3717 = vmatprep.subr.bf16.mxu1 %v7290_v62  ;;  %v7379_v61 = vld [vmem:[%s8281_s14 + $0x2f0] ss:$72 sps:$4 sm:$0xff]   ;;  %v7380_v62 = vld [vmem:[%s9518_s1 + $0x5a0] ss:$8 sps:$4 sm:$0xff]  }
  0x41   : > { %4489 = vmatprep.subr.bf16.mxu0 %v7292_v63  ;;  %v7385_v63 = vld [vmem:[%s9518_s1 + $0x5b4] ss:$8 sps:$4 sm:$0xff]  }
  0x43   : > { %3718 = vmatpush1.bf16.msra.mxu1 %v7294_v0  ;;  %v7386_v0 = vld [vmem:[%s8281_s14 + $0x364] ss:$72 sps:$4 sm:$0xff]  }
  0x44   : > { %4490 = vmatpush1.bf16.msra.mxu0 %v7295_v1  ;;  %3880 = vmatprep.subr.bf16.mxu1 %v7304_v2  ;;  %v7388_v1 = vld [vmem:[%s8281_s14 + $0x384] ss:$72 sps:$4 sm:$0xff]   ;;  %v7422_v2 = vld [vmem:[%s9518_s1 + $0x180] ss:$8 sps:$4 sm:$0xff]  }
  0x45   : > { %4652 = vmatprep.subr.bf16.mxu0 %v7307_v3  ;;  %v7435_v3 = vld [vmem:[%s9518_s1 + $0x194] ss:$8 sps:$4 sm:$0xff]  }
  0x46   : > { %3720 = vmatmul.mubr.bf16.vlgmr.msra.gmra.mrb[0].mxu1 %v7296_v4  ;;  %v7383_v4 = vld [vmem:[%s9518_s1 + $0x5b0] ss:$8 sps:$4 sm:$0xff]  }
  0x47   : > { %4492 = vmatmul.mubr.bf16.vlgmr.msra.gmra.mrb[0].mxu0 %v7299_v5  ;;  %3881 = vmatpush1.bf16.msra.mxu1 %v7302_v6  ;;  %v7390_v5 = vld [vmem:[%s8281_s14 + $0x360] ss:$72 sps:$4 sm:$0xff]   ;;  %v7397_v6 = vld [vmem:[%s9518_s1 + $0x5c4] ss:$8 sps:$4 sm:$0xff]  }
  0x48   : > { %4653 = vmatpush1.bf16.msra.mxu0 %v7305_v7  ;;  %3729 = vmatprep.mubr.bf16.mxu1 %v7311_v9  ;;  %v7394_v7 = vld [vmem:[%s8281_s14 + $0x380] ss:$72 sps:$4 sm:$0xff]  }
  0x49   : > { %4654 = vmatprep.subr.bf16.mxu0 %v7310_v8  ;;  %4501 = vmatprep.mubr.bf16.mxu0 %v7313_v10  ;;  %v7433_v8 = vld [vmem:[%s9518_s1 + $0x190] ss:$8 sps:$4 sm:$0xff]   ;;  %v7395_v9 = vld [vmem:[%s9518_s1 + $0x5c0] ss:$8 sps:$4 sm:$0xff]   ;;  %v7400_v10 = vld [vmem:[%s9518_s1 + $0x5d4] ss:$8 sps:$4 sm:$0xff]  }
  0x4a   : > { %3882 = vmatprep.subr.bf16.mxu1 %v7318_v11  ;;  %v7401_v11 = vld [vmem:[%s8281_s14 + $0x3f4] ss:$72 sps:$4 sm:$0xff]  }
  0x4b   : > { %3883 = vmatpush1.bf16.msra.mxu1 %v7316_v13  ;;  %v7447_v13 = vld [vmem:[%s9518_s1 + $0x1a4] ss:$8 sps:$4 sm:$0xff]  }
  0x4c   : > { %4655 = vmatpush1.bf16.msra.mxu0 %v7308_v12  ;;  %3884 = vmatprep.subr.bf16.mxu1 %v7333_v15  ;;  %v7403_v12 = vld [vmem:[%s8281_s14 + $0x414] ss:$72 sps:$4 sm:$0xff]   ;;  %v7445_v15 = vld [vmem:[%s9518_s1 + $0x1a0] ss:$8 sps:$4 sm:$0xff]  }
  0x4d   : > { %4656 = vmatprep.subr.bf16.mxu0 %v7322_v14  ;;  %v7398_v14 = vld [vmem:[%s9518_s1 + $0x5d0] ss:$8 sps:$4 sm:$0xff]  }
  0x4e   : > { %3730 = vmatmul.mubr.bf16.gmra.mrb[4].mxu1 %v7315_v16  ;;  %v7459_v16 = vld [vmem:[%s9518_s1 + $0x1b4] ss:$8 sps:$4 sm:$0xff]  }
  0x4f   : > { %4502 = vmatmul.mubr.bf16.gmra.mrb[4].mxu0 %v7319_v17  ;;  %3739 = vmatprep.mubr.bf16.mxu1 %v7326_v20  ;;  %v7412_v17 = vld [vmem:[%s9518_s1 + $0x5e4] ss:$8 sps:$4 sm:$0xff]   ;;  %v7410_v20 = vld [vmem:[%s9518_s1 + $0x5e0] ss:$8 sps:$4 sm:$0xff]  }
  0x50   : > { %4657 = vmatpush1.bf16.msra.mxu0 %v7320_v18  ;;  %4511 = vmatprep.mubr.bf16.mxu0 %v7328_v21  ;;  %v7405_v18 = vld [vmem:[%s8281_s14 + $0x3f0] ss:$72 sps:$4 sm:$0xff]   ;;  %v7415_v21 = vld [vmem:[%s9518_s1 + $0x5f4] ss:$8 sps:$4 sm:$0xff]  }
  0x51   : > { %4658 = vmatprep.subr.bf16.mxu0 %v7325_v19  ;;  %3885 = vmatpush1.bf16.msra.mxu1 %v7331_v22  ;;  %v7409_v19 = vld [vmem:[%s8281_s14 + $0x410] ss:$72 sps:$4 sm:$0xff]   ;;  %v7416_v22 = vld [vmem:[%s8281_s14 + $0x484] ss:$72 sps:$4 sm:$0xff]  }
  0x52   : > { %3886 = vmatprep.subr.bf16.mxu1 %v7348_v23  ;;  %v7420_v23 = vld [vmem:[%s8281_s14 + $0x2c] ss:$72 sps:$4 sm:$0xff]  }
  0x54   : > { %4659 = vmatpush1.bf16.msra.mxu0 %v7323_v24  ;;  %v7457_v24 = vld [vmem:[%s9518_s1 + $0x1b0] ss:$8 sps:$4 sm:$0xff]  }
  0x55   : > { %4660 = vmatprep.subr.bf16.mxu0 %v7337_v26  ;;  %3887 = vmatpush1.bf16.msra.mxu1 %v7346_v27  ;;  %v7413_v26 = vld [vmem:[%s9518_s1 + $0x5f0] ss:$8 sps:$4 sm:$0xff]  }
  0x56   : > { %3740 = vmatmul.mubr.bf16.gmra.mrb[8].mxu1 %v7330_v25  ;;  %3888 = vmatprep.subr.bf16.mxu1 %v7363_v33  ;;  %v7471_v25 = vld [vmem:[%s9518_s1 + $0x1c4] ss:$8 sps:$4 sm:$0xff]   ;;  %v7418_v27 = vld [vmem:[%s8281_s14 + $0x28] ss:$72 sps:$4 sm:$0xff]  }
  0x57   : > { %4512 = vmatmul.mubr.bf16.gmra.mrb[8].mxu0 %v7334_v28  ;;  %3749 = vmatprep.mubr.bf16.mxu1 %v7341_v31  ;;  %v7427_v28 = vld [vmem:[%s9518_s1 + $0x604] ss:$8 sps:$4 sm:$0xff]   ;;  %v7425_v31 = vld [vmem:[%s9518_s1 + $0x600] ss:$8 sps:$4 sm:$0xff]  }
  0x58   : > { %4661 = vmatpush1.bf16.msra.mxu0 %v7335_v29  ;;  %4521 = vmatprep.mubr.bf16.mxu0 %v7343_v32  ;;  %v7421_v29 = vld [vmem:[%s8281_s14 + $0x480] ss:$72 sps:$4 sm:$0xff]   ;;  %v7428_v32 = vld [vmem:[%s8281_s14 + $0x514] ss:$72 sps:$4 sm:$0xff]  }
  0x59   : > { %4662 = vmatprep.subr.bf16.mxu0 %v7340_v30  ;;  %3889 = vmatpush1.bf16.msra.mxu1 %v7361_v34  ;;  %v7469_v30 = vld [vmem:[%s9518_s1 + $0x1c0] ss:$8 sps:$4 sm:$0xff]   ;;  %v7430_v33 = vld [vmem:[%s8281_s14 + $0xbc] ss:$72 sps:$4 sm:$0xff]  }
  0x5a   : > { %3890 = vmatprep.subr.bf16.mxu1 %v7378_v36  ;;  %v7439_v34 = vld [vmem:[%s9518_s1 + $0x614] ss:$8 sps:$4 sm:$0xff]   ;;  %v7437_v36 = vld [vmem:[%s9518_s1 + $0x610] ss:$8 sps:$4 sm:$0xff]  }
  0x5c   : > { %4663 = vmatpush1.bf16.msra.mxu0 %v7338_v35  ;;  %v7483_v35 = vld [vmem:[%s9518_s1 + $0x1d4] ss:$8 sps:$4 sm:$0xff]  }
  0x5d   : > { %4664 = vmatprep.subr.bf16.mxu0 %v7352_v37  ;;  %3891 = vmatpush1.bf16.msra.mxu1 %v7376_v44  ;;  %v7481_v37 = vld [vmem:[%s9518_s1 + $0x1d0] ss:$8 sps:$4 sm:$0xff]   ;;  %v7449_v44 = vld [vmem:[%s9518_s1 + $0x620] ss:$8 sps:$4 sm:$0xff]  }
  0x5e   : > { %3750 = vmatmul.mubr.bf16.gmra.mrb[12].mxu1 %v7345_v38  ;;  %3892 = vmatprep.subr.bf16.mxu1 %v7393_v45  ;;  %v7495_v38 = vld [vmem:[%s9518_s1 + $0x1e4] ss:$8 sps:$4 sm:$0xff]   ;;  %v7493_v45 = vld [vmem:[%s9518_s1 + $0x1e0] ss:$8 sps:$4 sm:$0xff]  }
  0x5f   : > { %4522 = vmatmul.mubr.bf16.gmra.mrb[12].mxu0 %v7349_v39  ;;  %3759 = vmatprep.mubr.bf16.mxu1 %v7356_v42  ;;  %v7451_v39 = vld [vmem:[%s9518_s1 + $0x624] ss:$8 sps:$4 sm:$0xff]  }
  0x60   : > { %4665 = vmatpush1.bf16.msra.mxu0 %v7350_v40  ;;  %4531 = vmatprep.mubr.bf16.mxu0 %v7358_v43  ;;  %v7432_v40 = vld [vmem:[%s8281_s14 + $0x510] ss:$72 sps:$4 sm:$0xff]   ;;  %v7440_v42 = vld [vmem:[%s8281_s14 + $0x5a4] ss:$72 sps:$4 sm:$0xff]  }
  0x61   : > { %4666 = vmatprep.subr.bf16.mxu0 %v7355_v41  ;;  %3893 = vmatpush1.bf16.msra.mxu1 %v7391_v50  ;;  %v7436_v41 = vld [vmem:[%s8281_s14 + $0xb8] ss:$72 sps:$4 sm:$0xff]   ;;  %v7442_v43 = vld [vmem:[%s8281_s14 + $0x14c] ss:$72 sps:$4 sm:$0xff]  }
  0x62   : > { %3894 = vmatprep.subr.bf16.mxu1 %v7408_v55  ;;  %v7505_v50 = vld [vmem:[%s9518_s1 + $0x1f0] ss:$8 sps:$4 sm:$0xff]   ;;  %v7454_v55 = vld [vmem:[%s8281_s14 + $0x1dc] ss:$72 sps:$4 sm:$0xff]  }
  0x64   : > { %4667 = vmatpush1.bf16.msra.mxu0 %v7353_v46  ;;  %v7463_v46 = vld [vmem:[%s9518_s1 + $0x634] ss:$8 sps:$4 sm:$0xff]  }
  0x65   : > { %4668 = vmatprep.subr.bf16.mxu0 %v7367_v48  ;;  %3895 = vmatpush1.bf16.msra.mxu1 %v7406_v57  ;;  %v7461_v48 = vld [vmem:[%s9518_s1 + $0x630] ss:$8 sps:$4 sm:$0xff]   ;;  %v7487_v57 = vld [vmem:[%s9518_s1 + $0x654] ss:$8 sps:$4 sm:$0xff]  }
  0x66   : > { %3760 = vmatmul.mubr.bf16.gmra.mrb[16].mxu1 %v7360_v47  ;;  %3896 = vmatprep.subr.bf16.mxu1 %v7424_v58  ;;  %v7507_v47 = vld [vmem:[%s9518_s1 + $0x1f4] ss:$8 sps:$4 sm:$0xff]   ;;  %v7485_v58 = vld [vmem:[%s9518_s1 + $0x650] ss:$8 sps:$4 sm:$0xff]  }
  0x67   : > { %4532 = vmatmul.mubr.bf16.gmra.mrb[16].mxu0 %v7364_v49  ;;  %3769 = vmatprep.mubr.bf16.mxu1 %v7371_v53  ;;  %v7444_v49 = vld [vmem:[%s8281_s14 + $0x5a0] ss:$72 sps:$4 sm:$0xff]  }
  0x68   : > { %4669 = vmatpush1.bf16.msra.mxu0 %v7365_v51  ;;  %4541 = vmatprep.mubr.bf16.mxu0 %v7373_v54  ;;  %v7475_v51 = vld [vmem:[%s9518_s1 + $0x644] ss:$8 sps:$4 sm:$0xff]   ;;  %v7448_v53 = vld [vmem:[%s8281_s14 + $0x148] ss:$72 sps:$4 sm:$0xff]   ;;  %v7452_v54 = vld [vmem:[%s8281_s14 + $0x634] ss:$72 sps:$4 sm:$0xff]  }
  0x69   : > { %4670 = vmatprep.subr.bf16.mxu0 %v7370_v52  ;;  %3897 = vmatpush1.bf16.msra.mxu1 %v7422_v2  ;;  %v7519_v52 = vld [vmem:[%s9518_s1 + $0x204] ss:$8 sps:$4 sm:$0xff]   ;;  %v7509_v2 = vld [vmem:[%s9518_s1 + $0x670] ss:$8 sps:$4 sm:$0xff]  }
  0x6a   : > { %3898 = vmatprep.subr.bf16.mxu1 %v7435_v3  ;;  %v7468_v3 = vld [vmem:[%s8281_s14 + $0x6c0] ss:$72 sps:$4 sm:$0xff]  }
  0x6c   : > { %4671 = vmatpush1.bf16.msra.mxu0 %v7368_v56  ;;  %v7473_v56 = vld [vmem:[%s9518_s1 + $0x640] ss:$8 sps:$4 sm:$0xff]  }
  0x6d   : > { %4672 = vmatprep.subr.bf16.mxu0 %v7382_v59  ;;  %3899 = vmatpush1.bf16.msra.mxu1 %v7433_v8  ;;  %v7499_v59 = vld [vmem:[%s9518_s1 + $0x664] ss:$8 sps:$4 sm:$0xff]   ;;  %v7521_v8 = vld [vmem:[%s9518_s1 + $0x680] ss:$8 sps:$4 sm:$0xff]  }
  0x6e   : > { %3770 = vmatmul.mubr.bf16.gmra.mrb[20].mxu1 %v7375_v60  ;;  %3900 = vmatprep.subr.bf16.mxu1 %v7447_v13  ;;  %v7456_v60 = vld [vmem:[%s8281_s14 + $0x630] ss:$72 sps:$4 sm:$0xff]  }
  0x6f   : > { %4542 = vmatmul.mubr.bf16.gmra.mrb[20].mxu0 %v7379_v61  ;;  %3779 = vmatprep.mubr.bf16.mxu1 %v7386_v0  ;;  %v7460_v61 = vld [vmem:[%s8281_s14 + $0x1d8] ss:$72 sps:$4 sm:$0xff]  }
  0x70   : > { %4673 = vmatpush1.bf16.msra.mxu0 %v7380_v62  ;;  %4551 = vmatprep.mubr.bf16.mxu0 %v7388_v1  ;;  %v7464_v62 = vld [vmem:[%s8281_s14 + $0x6c4] ss:$72 sps:$4 sm:$0xff]   ;;  %v7497_v0 = vld [vmem:[%s9518_s1 + $0x660] ss:$8 sps:$4 sm:$0xff]   ;;  %v7511_v1 = vld [vmem:[%s9518_s1 + $0x674] ss:$8 sps:$4 sm:$0xff]  }
  0x71   : > { %4674 = vmatprep.subr.bf16.mxu0 %v7385_v63  ;;  %3901 = vmatpush1.bf16.msra.mxu1 %v7445_v15  ;;  %v7466_v63 = vld [vmem:[%s8281_s14 + $0x26c] ss:$72 sps:$4 sm:$0xff]   ;;  %v7484_v13 = vld [vmem:[%s8281_s14 + $0x2f8] ss:$72 sps:$4 sm:$0xff]  }
  0x72   : > { %3902 = vmatprep.subr.bf16.mxu1 %v7459_v16  ;;  %v7490_v15 = vld [vmem:[%s8281_s14 + $0x38c] ss:$72 sps:$4 sm:$0xff]   ;;  %v7545_v16 = vld [vmem:[%s9518_s1 + $0x6a0] ss:$8 sps:$4 sm:$0xff]  }
  0x74   : > { %4675 = vmatpush1.bf16.msra.mxu0 %v7383_v4  ;;  %v7523_v4 = vld [vmem:[%s9518_s1 + $0x684] ss:$8 sps:$4 sm:$0xff]  }
  0x75   : > { %4676 = vmatprep.subr.bf16.mxu0 %v7397_v6  ;;  %3903 = vmatpush1.bf16.msra.mxu1 %v7457_v24  ;;  %v7476_v6 = vld [vmem:[%s8281_s14 + $0x754] ss:$72 sps:$4 sm:$0xff]   ;;  %v7569_v24 = vld [vmem:[%s9518_s1 + $0x6c0] ss:$8 sps:$4 sm:$0xff]  }
  0x76   : > { %3780 = vmatmul.mubr.bf16.gmra.mrb[24].mxu1 %v7390_v5  ;;  %3904 = vmatprep.subr.bf16.mxu1 %v7471_v25  ;;  %v7472_v5 = vld [vmem:[%s8281_s14 + $0x268] ss:$72 sps:$4 sm:$0xff]   ;;  %v7583_v25 = vld [vmem:[%s9518_s1 + $0x6d4] ss:$8 sps:$4 sm:$0xff]  }
  0x77   : > { %4552 = vmatmul.mubr.bf16.gmra.mrb[24].mxu0 %v7394_v7  ;;  %3789 = vmatprep.mubr.bf16.mxu1 %v7401_v11  ;;  %v7478_v7 = vld [vmem:[%s8281_s14 + $0x2fc] ss:$72 sps:$4 sm:$0xff]  }
  0x78   : > { %4677 = vmatpush1.bf16.msra.mxu0 %v7395_v9  ;;  %4561 = vmatprep.mubr.bf16.mxu0 %v7403_v12  ;;  %v7535_v9 = vld [vmem:[%s9518_s1 + $0x694] ss:$8 sps:$4 sm:$0xff]   ;;  %v7547_v11 = vld [vmem:[%s9518_s1 + $0x6a4] ss:$8 sps:$4 sm:$0xff]   ;;  %v7480_v12 = vld [vmem:[%s8281_s14 + $0x750] ss:$72 sps:$4 sm:$0xff]  }
  0x79   : > { %4678 = vmatprep.subr.bf16.mxu0 %v7400_v10  ;;  %3905 = vmatpush1.bf16.msra.mxu1 %v7469_v30  ;;  %v7533_v10 = vld [vmem:[%s9518_s1 + $0x690] ss:$8 sps:$4 sm:$0xff]   ;;  %v7514_v30 = vld [vmem:[%s8281_s14 + $0xc] ss:$72 sps:$4 sm:$0xff]  }
  0x7a   : > { %3906 = vmatprep.subr.bf16.mxu1 %v7483_v35  ;;  %v7605_v35 = vld [vmem:[%s9518_s1 + $0x6f0] ss:$8 sps:$4 sm:$0xff]  }
  0x7c   : > { %4679 = vmatpush1.bf16.msra.mxu0 %v7398_v14  ;;  %v7488_v14 = vld [vmem:[%s8281_s14 + $0x7e4] ss:$72 sps:$4 sm:$0xff]  }
  0x7d   : > { %4680 = vmatprep.subr.bf16.mxu0 %v7412_v17  ;;  %3907 = vmatpush1.bf16.msra.mxu1 %v7481_v37  ;;  %v7559_v17 = vld [vmem:[%s9518_s1 + $0x6b4] ss:$8 sps:$4 sm:$0xff]   ;;  %v7619_v37 = vld [vmem:[%s9518_s1 + $0x704] ss:$8 sps:$4 sm:$0xff]  }
  0x7e   : > { %3790 = vmatmul.mubr.bf16.gmra.mrb[28].mxu1 %v7405_v18  ;;  %3908 = vmatprep.subr.bf16.mxu1 %v7495_v38  ;;  %v7557_v18 = vld [vmem:[%s9518_s1 + $0x6b0] ss:$8 sps:$4 sm:$0xff]  }
  0x7f   : > { %4562 = vmatmul.mubr.bf16.gmra.mrb[28].mxu0 %v7409_v19  ;;  %3799 = vmatprep.mubr.bf16.mxu1 %v7416_v22  ;;  %v7492_v19 = vld [vmem:[%s8281_s14 + $0x7e0] ss:$72 sps:$4 sm:$0xff]   ;;  %v7500_v22 = vld [vmem:[%s8281_s14 + $0x874] ss:$72 sps:$4 sm:$0xff]  }
  0x80   : > { %4681 = vmatpush1.bf16.msra.mxu0 %v7410_v20  ;;  %4684 = vmatprep.mubr.bf16.mxu0 %v7420_v23  ;;  %v7571_v20 = vld [vmem:[%s9518_s1 + $0x6c4] ss:$8 sps:$4 sm:$0xff]   ;;  %v7520_v38 = vld [vmem:[%s8281_s14 + $0x4a8] ss:$72 sps:$4 sm:$0xff]  }
  0x81   : > { %4682 = vmatprep.subr.bf16.mxu0 %v7415_v21  ;;  %3909 = vmatpush1.bf16.msra.mxu1 %v7493_v45  ;;  %v7496_v21 = vld [vmem:[%s8281_s14 + $0x388] ss:$72 sps:$4 sm:$0xff]   ;;  %v7502_v23 = vld [vmem:[%s8281_s14 + $0x41c] ss:$72 sps:$4 sm:$0xff]   ;;  %v7532_v45 = vld [vmem:[%s8281_s14 + $0x538] ss:$72 sps:$4 sm:$0xff]  }
  0x82   : > { %3910 = vmatprep.subr.bf16.mxu1 %v7507_v47  ;;  %v7538_v47 = vld [vmem:[%s8281_s14 + $0x5cc] ss:$72 sps:$4 sm:$0xff]  }
  0x84   : > { %4683 = vmatpush1.bf16.msra.mxu0 %v7413_v26  ;;  %v7581_v26 = vld [vmem:[%s9518_s1 + $0x6d0] ss:$8 sps:$4 sm:$0xff]  }
  0x85   : > { %4845 = vmatprep.subr.bf16.mxu0 %v7427_v28  ;;  %3911 = vmatpush1.bf16.msra.mxu1 %v7505_v50  ;;  %v7504_v28 = vld [vmem:[%s8281_s14 + $0x870] ss:$72 sps:$4 sm:$0xff]  }
  0x86   : > { %3800 = vmatmul.mubr.bf16.gmra.mrb[32].mxu1 %v7421_v29  ;;  %4073 = vmatprep.subr.bf16.mxu1 %v7519_v52  ;;  %v7508_v29 = vld [vmem:[%s8281_s14 + $0x418] ss:$72 sps:$4 sm:$0xff]   ;;  %v7567_v52 = vld [vmem:[%s9518_s1 + $0x244] ss:$8 sps:$4 sm:$0xff]  }
  0x87   : > { %4685 = vmatmul.mubr.bf16.vlgmr.msra.gmra.mrb[0].mxu0 %v7418_v27  ;;  %3809 = vmatprep.mubr.bf16.mxu1 %v7428_v32  ;;  %v7595_v27 = vld [vmem:[%s9518_s1 + $0x6e4] ss:$8 sps:$4 sm:$0xff]   ;;  %v7593_v32 = vld [vmem:[%s9518_s1 + $0x6e0] ss:$8 sps:$4 sm:$0xff]   ;;  %v7553_v50 = vld [vmem:[%s9518_s1 + $0x230] ss:$8 sps:$4 sm:$0xff]  }
  0x88   : > { %4846 = vmatpush1.bf16.msra.mxu0 %v7425_v31  ;;  %4694 = vmatprep.mubr.bf16.mxu0 %v7430_v33  ;;  %v7515_v31 = vld [vmem:[%s8281_s14 + $0x4ac] ss:$72 sps:$4 sm:$0xff]  }
  0x89   : > { %4847 = vmatprep.subr.bf16.mxu0 %v7439_v34  ;;  %v7607_v33 = vld [vmem:[%s9518_s1 + $0x6f4] ss:$8 sps:$4 sm:$0xff]   ;;  %v7512_v34 = vld [vmem:[%s8281_s14 + $0x8] ss:$72 sps:$4 sm:$0xff]  }
  0x8c   : > { %4848 = vmatpush1.bf16.msra.mxu0 %v7437_v36  ;;  %v7517_v36 = vld [vmem:[%s9518_s1 + $0x200] ss:$8 sps:$4 sm:$0xff]  }
  0x8d   : > { %4849 = vmatprep.subr.bf16.mxu0 %v7451_v39  ;;  %v7524_v39 = vld [vmem:[%s8281_s14 + $0x9c] ss:$72 sps:$4 sm:$0xff]  }
  0x8e   : > { %3810 = vmatmul.mubr.bf16.gmra.mrb[36].mxu1 %v7432_v40  ;;  %v7526_v40 = vld [vmem:[%s8281_s14 + $0x53c] ss:$72 sps:$4 sm:$0xff]  }
  0x8f   : > { %4695 = vmatmul.mubr.bf16.gmra.mrb[4].mxu0 %v7436_v41  ;;  %3819 = vmatprep.mubr.bf16.mxu1 %v7440_v42  ;;  %v7531_v41 = vld [vmem:[%s9518_s1 + $0x214] ss:$8 sps:$4 sm:$0xff]   ;;  %v7529_v42 = vld [vmem:[%s9518_s1 + $0x210] ss:$8 sps:$4 sm:$0xff]  }
  0x90   : > { %4704 = vmatprep.mubr.bf16.mxu0 %v7442_v43  ;;  %4850 = vmatpush1.bf16.msra.mxu0 %v7449_v44  ;;  %v7543_v43 = vld [vmem:[%s9518_s1 + $0x224] ss:$8 sps:$4 sm:$0xff]   ;;  %v7528_v44 = vld [vmem:[%s8281_s14 + $0x98] ss:$72 sps:$4 sm:$0xff]  }
  0x91   : > { %4851 = vmatprep.subr.bf16.mxu0 %v7463_v46  ;;  %v7536_v46 = vld [vmem:[%s8281_s14 + $0x12c] ss:$72 sps:$4 sm:$0xff]  }
  0x94   : > { %4852 = vmatpush1.bf16.msra.mxu0 %v7461_v48  ;;  %v7541_v48 = vld [vmem:[%s9518_s1 + $0x220] ss:$8 sps:$4 sm:$0xff]  }
  0x95   : > { %4853 = vmatprep.subr.bf16.mxu0 %v7475_v51  ;;  %v7540_v51 = vld [vmem:[%s8281_s14 + $0x128] ss:$72 sps:$4 sm:$0xff]  }
  0x96   : > { %3820 = vmatmul.mubr.bf16.gmra.mrb[40].mxu1 %v7444_v49  ;;  %v7555_v49 = vld [vmem:[%s9518_s1 + $0x234] ss:$8 sps:$4 sm:$0xff]  }
  0x97   : > { %4705 = vmatmul.mubr.bf16.gmra.mrb[8].mxu0 %v7448_v53  ;;  %3829 = vmatprep.mubr.bf16.mxu1 %v7452_v54  ;;  %v7544_v53 = vld [vmem:[%s8281_s14 + $0x5c8] ss:$72 sps:$4 sm:$0xff]   ;;  %v7548_v54 = vld [vmem:[%s8281_s14 + $0x1bc] ss:$72 sps:$4 sm:$0xff]  }
  0x98   : > { %4714 = vmatprep.mubr.bf16.mxu0 %v7454_v55  ;;  %4854 = vmatpush1.bf16.msra.mxu0 %v7473_v56  ;;  %v7550_v55 = vld [vmem:[%s8281_s14 + $0x65c] ss:$72 sps:$4 sm:$0xff]   ;;  %v7565_v56 = vld [vmem:[%s9518_s1 + $0x240] ss:$8 sps:$4 sm:$0xff]  }
  0x99   : > { %4855 = vmatprep.subr.bf16.mxu0 %v7487_v57  ;;  %v7579_v57 = vld [vmem:[%s9518_s1 + $0x254] ss:$8 sps:$4 sm:$0xff]  }
  0x9c   : > { %4856 = vmatpush1.bf16.msra.mxu0 %v7485_v58  ;;  %v7577_v58 = vld [vmem:[%s9518_s1 + $0x250] ss:$8 sps:$4 sm:$0xff]  }
  0x9d   : > { %4857 = vmatprep.subr.bf16.mxu0 %v7499_v59  ;;  %v7591_v59 = vld [vmem:[%s9518_s1 + $0x264] ss:$8 sps:$4 sm:$0xff]  }
  0x9e   : > { %3830 = vmatmul.mubr.bf16.gmra.mrb[44].mxu1 %v7456_v60  ;;  %v7552_v60 = vld [vmem:[%s8281_s14 + $0x1b8] ss:$72 sps:$4 sm:$0xff]  }
  0x9f   : > { %4715 = vmatmul.mubr.bf16.gmra.mrb[12].mxu0 %v7460_v61  ;;  %3839 = vmatprep.mubr.bf16.mxu1 %v7464_v62  ;;  %v7556_v61 = vld [vmem:[%s8281_s14 + $0x658] ss:$72 sps:$4 sm:$0xff]   ;;  %v7560_v62 = vld [vmem:[%s8281_s14 + $0x24c] ss:$72 sps:$4 sm:$0xff]  }
  0xa0   : > { %4724 = vmatprep.mubr.bf16.mxu0 %v7466_v63  ;;  %4858 = vmatpush1.bf16.msra.mxu0 %v7497_v0  ;;  %v7562_v63 = vld [vmem:[%s8281_s14 + $0x6ec] ss:$72 sps:$4 sm:$0xff]   ;;  %v7589_v0 = vld [vmem:[%s9518_s1 + $0x260] ss:$8 sps:$4 sm:$0xff]  }
  0xa1   : > { %4859 = vmatprep.subr.bf16.mxu0 %v7511_v1  ;;  %v7603_v1 = vld [vmem:[%s9518_s1 + $0x274] ss:$8 sps:$4 sm:$0xff]  }
  0xa4   : > { %4860 = vmatpush1.bf16.msra.mxu0 %v7509_v2  ;;  %v7601_v2 = vld [vmem:[%s9518_s1 + $0x270] ss:$8 sps:$4 sm:$0xff]  }
  0xa5   : > { %4861 = vmatprep.subr.bf16.mxu0 %v7523_v4  ;;  %v7616_v4 = vld [vmem:[%s9518_s1 + $0x284] ss:$8 sps:$4 sm:$0xff]  }
  0xa6   : > { %3840 = vmatmul.mubr.bf16.gmra.mrb[48].mxu1 %v7468_v3  ;;  %v7564_v3 = vld [vmem:[%s8281_s14 + $0x248] ss:$72 sps:$4 sm:$0xff]  }
  0xa7   : > { %4725 = vmatmul.mubr.bf16.gmra.mrb[16].mxu0 %v7472_v5  ;;  %3849 = vmatprep.mubr.bf16.mxu1 %v7476_v6  ;;  %v7568_v5 = vld [vmem:[%s8281_s14 + $0x6e8] ss:$72 sps:$4 sm:$0xff]   ;;  %v7572_v6 = vld [vmem:[%s8281_s14 + $0x2dc] ss:$72 sps:$4 sm:$0xff]  }
  0xa8   : > { %4734 = vmatprep.mubr.bf16.mxu0 %v7478_v7  ;;  %4862 = vmatpush1.bf16.msra.mxu0 %v7521_v8  ;;  %v7574_v7 = vld [vmem:[%s8281_s14 + $0x77c] ss:$72 sps:$4 sm:$0xff]   ;;  %v7614_v8 = vld [vmem:[%s9518_s1 + $0x280] ss:$8 sps:$4 sm:$0xff]  }
  0xa9   : > { %4863 = vmatprep.subr.bf16.mxu0 %v7535_v9  ;;  %v7627_v9 = vld [vmem:[%s9518_s1 + $0x294] ss:$8 sps:$4 sm:$0xff]  }
  0xac   : > { %4864 = vmatpush1.bf16.msra.mxu0 %v7533_v10  ;;  %v7625_v10 = vld [vmem:[%s9518_s1 + $0x290] ss:$8 sps:$4 sm:$0xff]  }
  0xad   : > { %4865 = vmatprep.subr.bf16.mxu0 %v7547_v11  ;;  %v7639_v11 = vld [vmem:[%s9518_s1 + $0x2a4] ss:$8 sps:$4 sm:$0xff]  }
  0xae   : > { %3850 = vmatmul.mubr.bf16.gmra.mrb[52].mxu1 %v7480_v12  ;;  %v7576_v12 = vld [vmem:[%s8281_s14 + $0x2d8] ss:$72 sps:$4 sm:$0xff]  }
  0xaf   : > { %4735 = vmatmul.mubr.bf16.gmra.mrb[20].mxu0 %v7484_v13  ;;  %3859 = vmatprep.mubr.bf16.mxu1 %v7488_v14  ;;  %v7580_v13 = vld [vmem:[%s8281_s14 + $0x778] ss:$72 sps:$4 sm:$0xff]   ;;  %v7584_v14 = vld [vmem:[%s8281_s14 + $0x36c] ss:$72 sps:$4 sm:$0xff]  }
  0xb0   : > { %4744 = vmatprep.mubr.bf16.mxu0 %v7490_v15  ;;  %4866 = vmatpush1.bf16.msra.mxu0 %v7545_v16  ;;  %v7586_v15 = vld [vmem:[%s8281_s14 + $0x80c] ss:$72 sps:$4 sm:$0xff]   ;;  %v7637_v16 = vld [vmem:[%s9518_s1 + $0x2a0] ss:$8 sps:$4 sm:$0xff]  }
  0xb1   : > { %4867 = vmatprep.subr.bf16.mxu0 %v7559_v17  ;;  %v7651_v17 = vld [vmem:[%s9518_s1 + $0x2b4] ss:$8 sps:$4 sm:$0xff]  }
  0xb4   : > { %4868 = vmatpush1.bf16.msra.mxu0 %v7557_v18  ;;  %v7649_v18 = vld [vmem:[%s9518_s1 + $0x2b0] ss:$8 sps:$4 sm:$0xff]  }
  0xb5   : > { %4869 = vmatprep.subr.bf16.mxu0 %v7571_v20  ;;  %v7663_v20 = vld [vmem:[%s9518_s1 + $0x2c4] ss:$8 sps:$4 sm:$0xff]  }
  0xb6   : > { %3860 = vmatmul.mubr.bf16.gmra.mrb[56].mxu1 %v7492_v19  ;;  %v7588_v19 = vld [vmem:[%s8281_s14 + $0x368] ss:$72 sps:$4 sm:$0xff]  }
  0xb7   : > { %4745 = vmatmul.mubr.bf16.gmra.mrb[24].mxu0 %v7496_v21  ;;  %3869 = vmatprep.mubr.bf16.mxu1 %v7500_v22  ;;  %v7592_v21 = vld [vmem:[%s8281_s14 + $0x808] ss:$72 sps:$4 sm:$0xff]   ;;  %v7596_v22 = vld [vmem:[%s8281_s14 + $0x3fc] ss:$72 sps:$4 sm:$0xff]  }
  0xb8   : > { %4754 = vmatprep.mubr.bf16.mxu0 %v7502_v23  ;;  %4870 = vmatpush1.bf16.msra.mxu0 %v7569_v24  ;;  %v7598_v23 = vld [vmem:[%s8281_s14 + $0x89c] ss:$72 sps:$4 sm:$0xff]   ;;  %v7661_v24 = vld [vmem:[%s9518_s1 + $0x2c0] ss:$8 sps:$4 sm:$0xff]  }
  0xb9   : > { %4871 = vmatprep.subr.bf16.mxu0 %v7583_v25  ;;  %v7675_v25 = vld [vmem:[%s9518_s1 + $0x2d4] ss:$8 sps:$4 sm:$0xff]  }
  0xbc   : > { %4872 = vmatpush1.bf16.msra.mxu0 %v7581_v26  ;;  %v7673_v26 = vld [vmem:[%s9518_s1 + $0x2d0] ss:$8 sps:$4 sm:$0xff]  }
  0xbd   : > { %4873 = vmatprep.subr.bf16.mxu0 %v7595_v27  ;;  %v7687_v27 = vld [vmem:[%s9518_s1 + $0x2e4] ss:$8 sps:$4 sm:$0xff]  }
  0xbe   : > { %3870 = vmatmul.mubr.bf16.gmra.mrb[60].mxu1 %v7504_v28  ;;  %v7600_v28 = vld [vmem:[%s8281_s14 + $0x3f8] ss:$72 sps:$4 sm:$0xff]  }
  0xbf   : > { %4755 = vmatmul.mubr.bf16.gmra.mrb[28].mxu0 %v7508_v29  ;;  %3912 = vmatprep.mubr.bf16.mxu1 %v7514_v30  ;;  %v7604_v29 = vld [vmem:[%s8281_s14 + $0x898] ss:$72 sps:$4 sm:$0xff]   ;;  %v7608_v30 = vld [vmem:[%s8281_s14 + $0x48c] ss:$72 sps:$4 sm:$0xff]  }
  0xc0   : > { %4764 = vmatprep.mubr.bf16.mxu0 %v7515_v31  ;;  %4874 = vmatpush1.bf16.msra.mxu0 %v7593_v32  ;;  %v7612_v31 = vld [vmem:[%s8281_s14 + $0x34] ss:$72 sps:$4 sm:$0xff]   ;;  %v7685_v32 = vld [vmem:[%s9518_s1 + $0x2e0] ss:$8 sps:$4 sm:$0xff]  }
  0xc1   : > { %4875 = vmatprep.subr.bf16.mxu0 %v7607_v33  ;;  %v7699_v33 = vld [vmem:[%s9518_s1 + $0x2f4] ss:$8 sps:$4 sm:$0xff]  }
  0xc4   : > { %4876 = vmatpush1.bf16.msra.mxu0 %v7605_v35  ;;  %v7697_v35 = vld [vmem:[%s9518_s1 + $0x2f0] ss:$8 sps:$4 sm:$0xff]  }
  0xc5   : > { %5038 = vmatprep.subr.bf16.mxu0 %v7619_v37  ;;  %v7711_v37 = vld [vmem:[%s9518_s1 + $0x304] ss:$8 sps:$4 sm:$0xff]  }
  0xc6   : > { %3913 = vmatmul.mubr.bf16.vlgmr.msra.gmra.mrb[0].mxu1 %v7512_v34  ;;  %v7610_v34 = vld [vmem:[%s8281_s14 + $0x30] ss:$72 sps:$4 sm:$0xff]  }
  0xc7   : > { %4765 = vmatmul.mubr.bf16.gmra.mrb[32].mxu0 %v7520_v38  ;;  %4074 = vmatpush1.bf16.msra.mxu1 %v7517_v36  ;;  %v7613_v36 = vld [vmem:[%s8281_s14 + $0x488] ss:$72 sps:$4 sm:$0xff]  }
  0xc8   : > { %3922 = vmatprep.mubr.bf16.mxu1 %v7524_v39  ;;  %4774 = vmatprep.mubr.bf16.mxu0 %v7526_v40  ;;  %v7617_v38 = vld [vmem:[%s9518_s1 + $0x700] ss:$8 sps:$4 sm:$0xff]   ;;  %v7620_v39 = vld [vmem:[%s8281_s14 + $0x51c] ss:$72 sps:$4 sm:$0xff]  }
  0xc9   : > { %4075 = vmatprep.subr.bf16.mxu1 %v7531_v41  ;;  %v7622_v40 = vld [vmem:[%s8281_s14 + $0xc4] ss:$72 sps:$4 sm:$0xff]   ;;  %v7631_v41 = vld [vmem:[%s9518_s1 + $0x714] ss:$8 sps:$4 sm:$0xff]  }
  0xcb   : > { %4076 = vmatpush1.bf16.msra.mxu1 %v7529_v42  ;;  %v7629_v42 = vld [vmem:[%s9518_s1 + $0x710] ss:$8 sps:$4 sm:$0xff]  }
  0xcc   : > { %4077 = vmatprep.subr.bf16.mxu1 %v7543_v43  ;;  %v7643_v43 = vld [vmem:[%s9518_s1 + $0x724] ss:$8 sps:$4 sm:$0xff]  }
  0xce   : > { %3923 = vmatmul.mubr.bf16.gmra.mrb[4].mxu1 %v7528_v44  ;;  %v7624_v44 = vld [vmem:[%s8281_s14 + $0x518] ss:$72 sps:$4 sm:$0xff]  }
  0xcf   : > { %4775 = vmatmul.mubr.bf16.gmra.mrb[36].mxu0 %v7532_v45  ;;  %3932 = vmatprep.mubr.bf16.mxu1 %v7536_v46  ;;  %v7628_v45 = vld [vmem:[%s8281_s14 + $0xc0] ss:$72 sps:$4 sm:$0xff]   ;;  %v7632_v46 = vld [vmem:[%s8281_s14 + $0x5ac] ss:$72 sps:$4 sm:$0xff]  }
  0xd0   : > { %4784 = vmatprep.mubr.bf16.mxu0 %v7538_v47  ;;  %4078 = vmatpush1.bf16.msra.mxu1 %v7541_v48  ;;  %v7634_v47 = vld [vmem:[%s8281_s14 + $0x154] ss:$72 sps:$4 sm:$0xff]   ;;  %v7641_v48 = vld [vmem:[%s9518_s1 + $0x720] ss:$8 sps:$4 sm:$0xff]  }
  0xd1   : > { %4079 = vmatprep.subr.bf16.mxu1 %v7555_v49  ;;  %v7655_v49 = vld [vmem:[%s9518_s1 + $0x734] ss:$8 sps:$4 sm:$0xff]  }
  0xd4   : > { %4080 = vmatpush1.bf16.msra.mxu1 %v7553_v50  ;;  %v7653_v50 = vld [vmem:[%s9518_s1 + $0x730] ss:$8 sps:$4 sm:$0xff]  }
  0xd5   : > { %4081 = vmatprep.subr.bf16.mxu1 %v7567_v52  ;;  %v7667_v52 = vld [vmem:[%s9518_s1 + $0x744] ss:$8 sps:$4 sm:$0xff]  }
  0xd6   : > { %3933 = vmatmul.mubr.bf16.gmra.mrb[8].mxu1 %v7540_v51  ;;  %v7636_v51 = vld [vmem:[%s8281_s14 + $0x5a8] ss:$72 sps:$4 sm:$0xff]  }
  0xd7   : > { %4785 = vmatmul.mubr.bf16.gmra.mrb[40].mxu0 %v7544_v53  ;;  %3942 = vmatprep.mubr.bf16.mxu1 %v7548_v54  ;;  %v7640_v53 = vld [vmem:[%s8281_s14 + $0x150] ss:$72 sps:$4 sm:$0xff]   ;;  %v7644_v54 = vld [vmem:[%s8281_s14 + $0x63c] ss:$72 sps:$4 sm:$0xff]  }
  0xd8   : > { %4794 = vmatprep.mubr.bf16.mxu0 %v7550_v55  ;;  %4082 = vmatpush1.bf16.msra.mxu1 %v7565_v56  ;;  %v7646_v55 = vld [vmem:[%s8281_s14 + $0x1e4] ss:$72 sps:$4 sm:$0xff]   ;;  %v7665_v56 = vld [vmem:[%s9518_s1 + $0x740] ss:$8 sps:$4 sm:$0xff]  }
  0xd9   : > { %4083 = vmatprep.subr.bf16.mxu1 %v7579_v57  ;;  %v7679_v57 = vld [vmem:[%s9518_s1 + $0x754] ss:$8 sps:$4 sm:$0xff]  }
  0xdc   : > { %4084 = vmatpush1.bf16.msra.mxu1 %v7577_v58  ;;  %v7677_v58 = vld [vmem:[%s9518_s1 + $0x750] ss:$8 sps:$4 sm:$0xff]  }
  0xdd   : > { %4085 = vmatprep.subr.bf16.mxu1 %v7591_v59  ;;  %v7691_v59 = vld [vmem:[%s9518_s1 + $0x764] ss:$8 sps:$4 sm:$0xff]  }
  0xde   : > { %3943 = vmatmul.mubr.bf16.gmra.mrb[12].mxu1 %v7552_v60  ;;  %v7648_v60 = vld [vmem:[%s8281_s14 + $0x638] ss:$72 sps:$4 sm:$0xff]  }
  0xdf   : > { %4795 = vmatmul.mubr.bf16.gmra.mrb[44].mxu0 %v7556_v61  ;;  %3952 = vmatprep.mubr.bf16.mxu1 %v7560_v62  ;;  %v7652_v61 = vld [vmem:[%s8281_s14 + $0x1e0] ss:$72 sps:$4 sm:$0xff]   ;;  %v7656_v62 = vld [vmem:[%s8281_s14 + $0x6cc] ss:$72 sps:$4 sm:$0xff]  }
  0xe0   : > { %4804 = vmatprep.mubr.bf16.mxu0 %v7562_v63  ;;  %4086 = vmatpush1.bf16.msra.mxu1 %v7589_v0  ;;  %v7658_v63 = vld [vmem:[%s8281_s14 + $0x274] ss:$72 sps:$4 sm:$0xff]   ;;  %v7689_v0 = vld [vmem:[%s9518_s1 + $0x760] ss:$8 sps:$4 sm:$0xff]  }
  0xe1   : > { %4087 = vmatprep.subr.bf16.mxu1 %v7603_v1  ;;  %v7703_v1 = vld [vmem:[%s9518_s1 + $0x774] ss:$8 sps:$4 sm:$0xff]  }
  0xe4   : > { %4088 = vmatpush1.bf16.msra.mxu1 %v7601_v2  ;;  %v7701_v2 = vld [vmem:[%s9518_s1 + $0x770] ss:$8 sps:$4 sm:$0xff]  }
  0xe5   : > { %4089 = vmatprep.subr.bf16.mxu1 %v7616_v4  ;;  %v7715_v4 = vld [vmem:[%s9518_s1 + $0x784] ss:$8 sps:$4 sm:$0xff]  }
  0xe6   : > { %3953 = vmatmul.mubr.bf16.gmra.mrb[16].mxu1 %v7564_v3  ;;  %v7660_v3 = vld [vmem:[%s8281_s14 + $0x6c8] ss:$72 sps:$4 sm:$0xff]  }
  0xe7   : > { %4805 = vmatmul.mubr.bf16.gmra.mrb[48].mxu0 %v7568_v5  ;;  %3962 = vmatprep.mubr.bf16.mxu1 %v7572_v6  ;;  %v7664_v5 = vld [vmem:[%s8281_s14 + $0x270] ss:$72 sps:$4 sm:$0xff]   ;;  %v7668_v6 = vld [vmem:[%s8281_s14 + $0x75c] ss:$72 sps:$4 sm:$0xff]  }
  0xe8   : > { %4814 = vmatprep.mubr.bf16.mxu0 %v7574_v7  ;;  %4090 = vmatpush1.bf16.msra.mxu1 %v7614_v8  ;;  %v7670_v7 = vld [vmem:[%s8281_s14 + $0x304] ss:$72 sps:$4 sm:$0xff]   ;;  %v7713_v8 = vld [vmem:[%s9518_s1 + $0x780] ss:$8 sps:$4 sm:$0xff]  }
  0xe9   : > { %4091 = vmatprep.subr.bf16.mxu1 %v7627_v9  ;;  %v7727_v9 = vld [vmem:[%s9518_s1 + $0x794] ss:$8 sps:$4 sm:$0xff]  }
  0xec   : > { %4092 = vmatpush1.bf16.msra.mxu1 %v7625_v10  ;;  %v7672_v10 = vld [vmem:[%s8281_s14 + $0x758] ss:$72 sps:$4 sm:$0xff]  }
  0xed   : > { %4093 = vmatprep.subr.bf16.mxu1 %v7639_v11  ;;  %v7676_v11 = vld [vmem:[%s8281_s14 + $0x300] ss:$72 sps:$4 sm:$0xff]  }
  0xee   : > { %3963 = vmatmul.mubr.bf16.gmra.mrb[20].mxu1 %v7576_v12  ;;  %v7725_v12 = vld [vmem:[%s9518_s1 + $0x790] ss:$8 sps:$4 sm:$0xff]  }
  0xef   : > { %4815 = vmatmul.mubr.bf16.gmra.mrb[52].mxu0 %v7580_v13  ;;  %3972 = vmatprep.mubr.bf16.mxu1 %v7584_v14  ;;  %v7680_v13 = vld [vmem:[%s8281_s14 + $0x7ec] ss:$72 sps:$4 sm:$0xff]  }
  0xf0   : > { %4824 = vmatprep.mubr.bf16.mxu0 %v7586_v15  ;;  %4094 = vmatpush1.bf16.msra.mxu1 %v7637_v16  ;;  %v7739_v14 = vld [vmem:[%s9518_s1 + $0x7a4] ss:$8 sps:$4 sm:$0xff]   ;;  %v7682_v15 = vld [vmem:[%s8281_s14 + $0x394] ss:$72 sps:$4 sm:$0xff]   ;;  %v7737_v16 = vld [vmem:[%s9518_s1 + $0x7a0] ss:$8 sps:$4 sm:$0xff]  }
  0xf1   : > { %4095 = vmatprep.subr.bf16.mxu1 %v7651_v17  ;;  %v7751_v17 = vld [vmem:[%s9518_s1 + $0x7b4] ss:$8 sps:$4 sm:$0xff]  }
  0xf4   : > { %4096 = vmatpush1.bf16.msra.mxu1 %v7649_v18  ;;  %v7749_v18 = vld [vmem:[%s9518_s1 + $0x7b0] ss:$8 sps:$4 sm:$0xff]  }
  0xf5   : > { %4097 = vmatprep.subr.bf16.mxu1 %v7663_v20  ;;  %v7688_v20 = vld [vmem:[%s8281_s14 + $0x390] ss:$72 sps:$4 sm:$0xff]  }
  0xf6   : > { %3973 = vmatmul.mubr.bf16.gmra.mrb[24].mxu1 %v7588_v19  ;;  %v7684_v19 = vld [vmem:[%s8281_s14 + $0x7e8] ss:$72 sps:$4 sm:$0xff]  }
  0xf7   : > { %4825 = vmatmul.mubr.bf16.gmra.mrb[56].mxu0 %v7592_v21  ;;  %3982 = vmatprep.mubr.bf16.mxu1 %v7596_v22  ;;  %v7763_v21 = vld [vmem:[%s9518_s1 + $0x7c4] ss:$8 sps:$4 sm:$0xff]  }
  0xf8   : > { %4834 = vmatprep.mubr.bf16.mxu0 %v7598_v23  ;;  %4098 = vmatpush1.bf16.msra.mxu1 %v7661_v24  ;;  %v7692_v22 = vld [vmem:[%s8281_s14 + $0x87c] ss:$72 sps:$4 sm:$0xff]   ;;  %v7761_v24 = vld [vmem:[%s9518_s1 + $0x7c0] ss:$8 sps:$4 sm:$0xff]  }
  0xf9   : > { %4099 = vmatprep.subr.bf16.mxu1 %v7675_v25  ;;  %v7694_v23 = vld [vmem:[%s8281_s14 + $0x424] ss:$72 sps:$4 sm:$0xff]   ;;  %v7775_v25 = vld [vmem:[%s9518_s1 + $0x7d4] ss:$8 sps:$4 sm:$0xff]  }
  0xfc   : > { %4100 = vmatpush1.bf16.msra.mxu1 %v7673_v26  ;;  %v7773_v26 = vld [vmem:[%s9518_s1 + $0x7d0] ss:$8 sps:$4 sm:$0xff]  }
  0xfd   : > { %4101 = vmatprep.subr.bf16.mxu1 %v7687_v27  ;;  %v7696_v27 = vld [vmem:[%s8281_s14 + $0x878] ss:$72 sps:$4 sm:$0xff]  }
  0xfe   : > { %3983 = vmatmul.mubr.bf16.gmra.mrb[28].mxu1 %v7600_v28  ;;  %v7700_v28 = vld [vmem:[%s8281_s14 + $0x420] ss:$72 sps:$4 sm:$0xff]  }
  0xff   : > { %4835 = vmatmul.mubr.bf16.gmra.mrb[60].mxu0 %v7604_v29  ;;  %3992 = vmatprep.mubr.bf16.mxu1 %v7608_v30  ;;  %v7787_v29 = vld [vmem:[%s9518_s1 + $0x7e4] ss:$8 sps:$4 sm:$0xff]   ;;  %v7706_v30 = vld [vmem:[%s8281_s14 + $0x14] ss:$72 sps:$4 sm:$0xff]  }
 0x100   : > { %4877 = vmatprep.mubr.bf16.mxu0 %v7612_v31  ;;  %4102 = vmatpush1.bf16.msra.mxu1 %v7685_v32  ;;  %v7707_v31 = vld [vmem:[%s8281_s14 + $0x4b4] ss:$72 sps:$4 sm:$0xff]   ;;  %v7785_v32 = vld [vmem:[%s9518_s1 + $0x7e0] ss:$8 sps:$4 sm:$0xff]  }
 0x101   : > { %4103 = vmatprep.subr.bf16.mxu1 %v7699_v33  ;;  %v7799_v33 = vld [vmem:[%s9518_s1 + $0x7f4] ss:$8 sps:$4 sm:$0xff]  }
 0x104   : > { %4104 = vmatpush1.bf16.msra.mxu1 %v7697_v35  ;;  %v7704_v35 = vld [vmem:[%s8281_s14 + $0x10] ss:$72 sps:$4 sm:$0xff]  }
 0x105   : > { %4266 = vmatprep.subr.bf16.mxu1 %v7711_v37  ;;  %v7811_v37 = vld [vmem:[%s9518_s1 + $0x804] ss:$8 sps:$4 sm:$0xff]  }
 0x106   : > { %3993 = vmatmul.mubr.bf16.gmra.mrb[32].mxu1 %v7613_v36  ;;  %v7712_v36 = vld [vmem:[%s8281_s14 + $0x4b0] ss:$72 sps:$4 sm:$0xff]  }
 0x107   : > { %4878 = vmatmul.mubr.bf16.vlgmr.msra.gmra.mrb[0].mxu0 %v7610_v34  ;;  %4002 = vmatprep.mubr.bf16.mxu1 %v7620_v39  ;;  %v7797_v34 = vld [vmem:[%s9518_s1 + $0x7f0] ss:$8 sps:$4 sm:$0xff]   ;;  %v7716_v39 = vld [vmem:[%s8281_s14 + $0xa4] ss:$72 sps:$4 sm:$0xff]  }
 0x108   : > { %5039 = vmatpush1.bf16.msra.mxu0 %v7617_v38  ;;  %4887 = vmatprep.mubr.bf16.mxu0 %v7622_v40  ;;  %v7709_v38 = vld [vmem:[%s9518_s1 + $0x300] ss:$8 sps:$4 sm:$0xff]   ;;  %v7718_v40 = vld [vmem:[%s8281_s14 + $0x544] ss:$72 sps:$4 sm:$0xff]  }
 0x109   : > { %5040 = vmatprep.subr.bf16.mxu0 %v7631_v41  ;;  %v7723_v41 = vld [vmem:[%s9518_s1 + $0x314] ss:$8 sps:$4 sm:$0xff]  }
 0x10c   : > { %5041 = vmatpush1.bf16.msra.mxu0 %v7629_v42  ;;  %v7721_v42 = vld [vmem:[%s9518_s1 + $0x310] ss:$8 sps:$4 sm:$0xff]  }
 0x10d   : > { %5042 = vmatprep.subr.bf16.mxu0 %v7643_v43  ;;  %v7720_v43 = vld [vmem:[%s8281_s14 + $0xa0] ss:$72 sps:$4 sm:$0xff]  }
 0x10e   : > { %4003 = vmatmul.mubr.bf16.gmra.mrb[36].mxu1 %v7624_v44  ;;  %v7724_v44 = vld [vmem:[%s8281_s14 + $0x540] ss:$72 sps:$4 sm:$0xff]  }
 0x10f   : > { %4888 = vmatmul.mubr.bf16.gmra.mrb[4].mxu0 %v7628_v45  ;;  %4012 = vmatprep.mubr.bf16.mxu1 %v7632_v46  ;;  %v7735_v45 = vld [vmem:[%s9518_s1 + $0x324] ss:$8 sps:$4 sm:$0xff]   ;;  %v7728_v46 = vld [vmem:[%s8281_s14 + $0x134] ss:$72 sps:$4 sm:$0xff]  }
 0x110   : > { %4897 = vmatprep.mubr.bf16.mxu0 %v7634_v47  ;;  %5043 = vmatpush1.bf16.msra.mxu0 %v7641_v48  ;;  %v7730_v47 = vld [vmem:[%s8281_s14 + $0x5d4] ss:$72 sps:$4 sm:$0xff]   ;;  %v7733_v48 = vld [vmem:[%s9518_s1 + $0x320] ss:$8 sps:$4 sm:$0xff]  }
 0x111   : > { %5044 = vmatprep.subr.bf16.mxu0 %v7655_v49  ;;  %v7747_v49 = vld [vmem:[%s9518_s1 + $0x334] ss:$8 sps:$4 sm:$0xff]  }
 0x114   : > { %5045 = vmatpush1.bf16.msra.mxu0 %v7653_v50  ;;  %v7745_v50 = vld [vmem:[%s9518_s1 + $0x330] ss:$8 sps:$4 sm:$0xff]  }
 0x115   : > { %5046 = vmatprep.subr.bf16.mxu0 %v7667_v52  ;;  %v7732_v52 = vld [vmem:[%s8281_s14 + $0x130] ss:$72 sps:$4 sm:$0xff]  }
 0x116   : > { %4013 = vmatmul.mubr.bf16.gmra.mrb[40].mxu1 %v7636_v51  ;;  %v7759_v51 = vld [vmem:[%s9518_s1 + $0x344] ss:$8 sps:$4 sm:$0xff]  }
 0x117   : > { %4898 = vmatmul.mubr.bf16.gmra.mrb[8].mxu0 %v7640_v53  ;;  %4022 = vmatprep.mubr.bf16.mxu1 %v7644_v54  ;;  %v7736_v53 = vld [vmem:[%s8281_s14 + $0x5d0] ss:$72 sps:$4 sm:$0xff]   ;;  %v7740_v54 = vld [vmem:[%s8281_s14 + $0x1c4] ss:$72 sps:$4 sm:$0xff]  }
 0x118   : > { %4907 = vmatprep.mubr.bf16.mxu0 %v7646_v55  ;;  %5047 = vmatpush1.bf16.msra.mxu0 %v7665_v56  ;;  %v7742_v55 = vld [vmem:[%s8281_s14 + $0x664] ss:$72 sps:$4 sm:$0xff]   ;;  %v7757_v56 = vld [vmem:[%s9518_s1 + $0x340] ss:$8 sps:$4 sm:$0xff]  }
 0x119   : > { %5048 = vmatprep.subr.bf16.mxu0 %v7679_v57  ;;  %v7771_v57 = vld [vmem:[%s9518_s1 + $0x354] ss:$8 sps:$4 sm:$0xff]  }
 0x11c   : > { %5049 = vmatpush1.bf16.msra.mxu0 %v7677_v58  ;;  %v7769_v58 = vld [vmem:[%s9518_s1 + $0x350] ss:$8 sps:$4 sm:$0xff]  }
 0x11d   : > { %5050 = vmatprep.subr.bf16.mxu0 %v7691_v59  ;;  %v7783_v59 = vld [vmem:[%s9518_s1 + $0x364] ss:$8 sps:$4 sm:$0xff]  }
 0x11e   : > { %4023 = vmatmul.mubr.bf16.gmra.mrb[44].mxu1 %v7648_v60  ;;  %v7744_v60 = vld [vmem:[%s8281_s14 + $0x1c0] ss:$72 sps:$4 sm:$0xff]  }
 0x11f   : > { %4908 = vmatmul.mubr.bf16.gmra.mrb[12].mxu0 %v7652_v61  ;;  %4032 = vmatprep.mubr.bf16.mxu1 %v7656_v62  ;;  %v7748_v61 = vld [vmem:[%s8281_s14 + $0x660] ss:$72 sps:$4 sm:$0xff]   ;;  %v7752_v62 = vld [vmem:[%s8281_s14 + $0x254] ss:$72 sps:$4 sm:$0xff]  }
 0x120   : > { %4917 = vmatprep.mubr.bf16.mxu0 %v7658_v63  ;;  %5051 = vmatpush1.bf16.msra.mxu0 %v7689_v0  ;;  %v7754_v63 = vld [vmem:[%s8281_s14 + $0x6f4] ss:$72 sps:$4 sm:$0xff]   ;;  %v7781_v0 = vld [vmem:[%s9518_s1 + $0x360] ss:$8 sps:$4 sm:$0xff]  }
 0x121   : > { %5052 = vmatprep.subr.bf16.mxu0 %v7703_v1  ;;  %v7795_v1 = vld [vmem:[%s9518_s1 + $0x374] ss:$8 sps:$4 sm:$0xff]  }
 0x124   : > { %5053 = vmatpush1.bf16.msra.mxu0 %v7701_v2  ;;  %v7793_v2 = vld [vmem:[%s9518_s1 + $0x370] ss:$8 sps:$4 sm:$0xff]  }
 0x125   : > { %5054 = vmatprep.subr.bf16.mxu0 %v7715_v4  ;;  %v7756_v4 = vld [vmem:[%s8281_s14 + $0x250] ss:$72 sps:$4 sm:$0xff]  }
 0x126   : > { %4033 = vmatmul.mubr.bf16.gmra.mrb[48].mxu1 %v7660_v3  ;;  %v7808_v3 = vld [vmem:[%s9518_s1 + $0x384] ss:$8 sps:$4 sm:$0xff]  }
 0x127   : > { %4918 = vmatmul.mubr.bf16.gmra.mrb[16].mxu0 %v7664_v5  ;;  %4042 = vmatprep.mubr.bf16.mxu1 %v7668_v6  ;;  %v7760_v5 = vld [vmem:[%s8281_s14 + $0x6f0] ss:$72 sps:$4 sm:$0xff]   ;;  %v7764_v6 = vld [vmem:[%s8281_s14 + $0x2e4] ss:$72 sps:$4 sm:$0xff]  }
 0x128   : > { %4927 = vmatprep.mubr.bf16.mxu0 %v7670_v7  ;;  %5055 = vmatpush1.bf16.msra.mxu0 %v7713_v8  ;;  %v7766_v7 = vld [vmem:[%s8281_s14 + $0x784] ss:$72 sps:$4 sm:$0xff]   ;;  %v7806_v8 = vld [vmem:[%s9518_s1 + $0x380] ss:$8 sps:$4 sm:$0xff]  }
 0x129   : > { %5056 = vmatprep.subr.bf16.mxu0 %v7727_v9  ;;  %v7819_v9 = vld [vmem:[%s9518_s1 + $0x394] ss:$8 sps:$4 sm:$0xff]  }
 0x12c   : > { %5057 = vmatpush1.bf16.msra.mxu0 %v7725_v12  ;;  %v7768_v12 = vld [vmem:[%s8281_s14 + $0x2e0] ss:$72 sps:$4 sm:$0xff]  }
 0x12d   : > { %5058 = vmatprep.subr.bf16.mxu0 %v7739_v14  ;;  %v7776_v14 = vld [vmem:[%s8281_s14 + $0x374] ss:$72 sps:$4 sm:$0xff]  }
 0x12e   : > { %4043 = vmatmul.mubr.bf16.gmra.mrb[52].mxu1 %v7672_v10  ;;  %v7817_v10 = vld [vmem:[%s9518_s1 + $0x390] ss:$8 sps:$4 sm:$0xff]  }
 0x12f   : > { %4928 = vmatmul.mubr.bf16.gmra.mrb[20].mxu0 %v7676_v11  ;;  %4052 = vmatprep.mubr.bf16.mxu1 %v7680_v13  ;;  %v7831_v11 = vld [vmem:[%s9518_s1 + $0x3a4] ss:$8 sps:$4 sm:$0xff]   ;;  %v7772_v13 = vld [vmem:[%s8281_s14 + $0x780] ss:$72 sps:$4 sm:$0xff]  }
 0x130   : > { %4937 = vmatprep.mubr.bf16.mxu0 %v7682_v15  ;;  %5059 = vmatpush1.bf16.msra.mxu0 %v7737_v16  ;;  %v7778_v15 = vld [vmem:[%s8281_s14 + $0x814] ss:$72 sps:$4 sm:$0xff]   ;;  %v7829_v16 = vld [vmem:[%s9518_s1 + $0x3a0] ss:$8 sps:$4 sm:$0xff]  }
 0x131   : > { %5060 = vmatprep.subr.bf16.mxu0 %v7751_v17  ;;  %v7843_v17 = vld [vmem:[%s9518_s1 + $0x3b4] ss:$8 sps:$4 sm:$0xff]  }
 0x134   : > { %5061 = vmatpush1.bf16.msra.mxu0 %v7749_v18  ;;  %v7841_v18 = vld [vmem:[%s9518_s1 + $0x3b0] ss:$8 sps:$4 sm:$0xff]  }
 0x135   : > { %5062 = vmatprep.subr.bf16.mxu0 %v7763_v21  ;;  %v7784_v21 = vld [vmem:[%s8281_s14 + $0x810] ss:$72 sps:$4 sm:$0xff]  }
 0x136   : > { %4053 = vmatmul.mubr.bf16.gmra.mrb[56].mxu1 %v7684_v19  ;;  %v7855_v19 = vld [vmem:[%s9518_s1 + $0x3c4] ss:$8 sps:$4 sm:$0xff]  }
 0x137   : > { %4938 = vmatmul.mubr.bf16.gmra.mrb[24].mxu0 %v7688_v20  ;;  %4062 = vmatprep.mubr.bf16.mxu1 %v7692_v22  ;;  %v7780_v20 = vld [vmem:[%s8281_s14 + $0x370] ss:$72 sps:$4 sm:$0xff]   ;;  %v7788_v22 = vld [vmem:[%s8281_s14 + $0x404] ss:$72 sps:$4 sm:$0xff]  }
 0x138   : > { %4947 = vmatprep.mubr.bf16.mxu0 %v7694_v23  ;;  %5063 = vmatpush1.bf16.msra.mxu0 %v7761_v24  ;;  %v7790_v23 = vld [vmem:[%s8281_s14 + $0x8a4] ss:$72 sps:$4 sm:$0xff]   ;;  %v7853_v24 = vld [vmem:[%s9518_s1 + $0x3c0] ss:$8 sps:$4 sm:$0xff]  }
 0x139   : > { %5064 = vmatprep.subr.bf16.mxu0 %v7775_v25  ;;  %v7867_v25 = vld [vmem:[%s9518_s1 + $0x3d4] ss:$8 sps:$4 sm:$0xff]  }
 0x13c   : > { %5065 = vmatpush1.bf16.msra.mxu0 %v7773_v26  ;;  %v7865_v26 = vld [vmem:[%s9518_s1 + $0x3d0] ss:$8 sps:$4 sm:$0xff]  }
 0x13d   : > { %5066 = vmatprep.subr.bf16.mxu0 %v7787_v29  ;;  %v7796_v29 = vld [vmem:[%s8281_s14 + $0x8a0] ss:$72 sps:$4 sm:$0xff]  }
 0x13e   : > { %4063 = vmatmul.mubr.bf16.gmra.mrb[60].mxu1 %v7696_v27  ;;  %v7879_v27 = vld [vmem:[%s9518_s1 + $0x3e4] ss:$8 sps:$4 sm:$0xff]  }
 0x13f   : > { %4948 = vmatmul.mubr.bf16.gmra.mrb[28].mxu0 %v7700_v28  ;;  %4105 = vmatprep.mubr.bf16.mxu1 %v7706_v30  ;;  %v7792_v28 = vld [vmem:[%s8281_s14 + $0x400] ss:$72 sps:$4 sm:$0xff]   ;;  %v7800_v30 = vld [vmem:[%s8281_s14 + $0x494] ss:$72 sps:$4 sm:$0xff]  }
 0x140   : > { %4957 = vmatprep.mubr.bf16.mxu0 %v7707_v31  ;;  %5067 = vmatpush1.bf16.msra.mxu0 %v7785_v32  ;;  %v7804_v31 = vld [vmem:[%s8281_s14 + $0x3c] ss:$72 sps:$4 sm:$0xff]   ;;  %v7877_v32 = vld [vmem:[%s9518_s1 + $0x3e0] ss:$8 sps:$4 sm:$0xff]  }
 0x141   : > { %5068 = vmatprep.subr.bf16.mxu0 %v7799_v33  ;;  %v7891_v33 = vld [vmem:[%s9518_s1 + $0x3f4] ss:$8 sps:$4 sm:$0xff]  }
 0x144   : > { %5069 = vmatpush1.bf16.msra.mxu0 %v7797_v34  ;;  %v7889_v34 = vld [vmem:[%s9518_s1 + $0x3f0] ss:$8 sps:$4 sm:$0xff]  }
 0x145   : > { %5231 = vmatprep.subr.bf16.mxu0 %v7811_v37  ;;  %v7809_v37 = vld [vmem:[%s9518_s1 + $0x800] ss:$8 sps:$4 sm:$0xff]  }
 0x146   : > { %4106 = vmatmul.mubr.bf16.vlgmr.msra.gmra.mrb[0].mxu1 %v7704_v35  ;;  %v7802_v35 = vld [vmem:[%s8281_s14 + $0x38] ss:$72 sps:$4 sm:$0xff]  }
 0x147   : > { %4958 = vmatmul.mubr.bf16.gmra.mrb[32].mxu0 %v7712_v36  ;;  %4267 = vmatpush1.bf16.msra.mxu1 %v7709_v38  ;;  %v7805_v36 = vld [vmem:[%s8281_s14 + $0x490] ss:$72 sps:$4 sm:$0xff]   ;;  %v7812_v38 = vld [vmem:[%s8281_s14 + $0x524] ss:$72 sps:$4 sm:$0xff]  }
 0x148   : > { %4115 = vmatprep.mubr.bf16.mxu1 %v7716_v39  ;;  %4967 = vmatprep.mubr.bf16.mxu0 %v7718_v40  ;;  %v7814_v39 = vld [vmem:[%s8281_s14 + $0xcc] ss:$72 sps:$4 sm:$0xff]  }
 0x149   : > { %4268 = vmatprep.subr.bf16.mxu1 %v7723_v41  ;;  %v7823_v40 = vld [vmem:[%s9518_s1 + $0x814] ss:$8 sps:$4 sm:$0xff]   ;;  %v8064_v41 = vld [vmem:[%s9518_s1 + $0x404] ss:$8 sps:$4 sm:$0xff]  }
 0x14b   : > { %4269 = vmatpush1.bf16.msra.mxu1 %v7721_v42  ;;  %v7821_v42 = vld [vmem:[%s9518_s1 + $0x810] ss:$8 sps:$4 sm:$0xff]  }
 0x14c   : > { %4270 = vmatprep.subr.bf16.mxu1 %v7735_v45  ;;  %v7820_v45 = vld [vmem:[%s8281_s14 + $0xc8] ss:$72 sps:$4 sm:$0xff]  }
 0x14e   : > { %4116 = vmatmul.mubr.bf16.gmra.mrb[4].mxu1 %v7720_v43  ;;  %v7835_v43 = vld [vmem:[%s9518_s1 + $0x824] ss:$8 sps:$4 sm:$0xff]  }
 0x14f   : > { %4968 = vmatmul.mubr.bf16.gmra.mrb[36].mxu0 %v7724_v44  ;;  %4125 = vmatprep.mubr.bf16.mxu1 %v7728_v46  ;;  %v7816_v44 = vld [vmem:[%s8281_s14 + $0x520] ss:$72 sps:$4 sm:$0xff]   ;;  %v7824_v46 = vld [vmem:[%s8281_s14 + $0x5b4] ss:$72 sps:$4 sm:$0xff]  }
 0x150   : > { %4977 = vmatprep.mubr.bf16.mxu0 %v7730_v47  ;;  %4271 = vmatpush1.bf16.msra.mxu1 %v7733_v48  ;;  %v7826_v47 = vld [vmem:[%s8281_s14 + $0x15c] ss:$72 sps:$4 sm:$0xff]   ;;  %v7833_v48 = vld [vmem:[%s9518_s1 + $0x820] ss:$8 sps:$4 sm:$0xff]  }
 0x151   : > { %4272 = vmatprep.subr.bf16.mxu1 %v7747_v49  ;;  %v7847_v49 = vld [vmem:[%s9518_s1 + $0x834] ss:$8 sps:$4 sm:$0xff]  }
 0x154   : > { %4273 = vmatpush1.bf16.msra.mxu1 %v7745_v50  ;;  %v7845_v50 = vld [vmem:[%s9518_s1 + $0x830] ss:$8 sps:$4 sm:$0xff]  }
 0x155   : > { %4274 = vmatprep.subr.bf16.mxu1 %v7759_v51  ;;  %v7859_v51 = vld [vmem:[%s9518_s1 + $0x844] ss:$8 sps:$4 sm:$0xff]  }
 0x156   : > { %4126 = vmatmul.mubr.bf16.gmra.mrb[8].mxu1 %v7732_v52  ;;  %v7828_v52 = vld [vmem:[%s8281_s14 + $0x5b0] ss:$72 sps:$4 sm:$0xff]  }
 0x157   : > { %4978 = vmatmul.mubr.bf16.gmra.mrb[40].mxu0 %v7736_v53  ;;  %4135 = vmatprep.mubr.bf16.mxu1 %v7740_v54  ;;  %v7832_v53 = vld [vmem:[%s8281_s14 + $0x158] ss:$72 sps:$4 sm:$0xff]   ;;  %v7836_v54 = vld [vmem:[%s8281_s14 + $0x644] ss:$72 sps:$4 sm:$0xff]  }
 0x158   : > { %4987 = vmatprep.mubr.bf16.mxu0 %v7742_v55  ;;  %4275 = vmatpush1.bf16.msra.mxu1 %v7757_v56  ;;  %v7838_v55 = vld [vmem:[%s8281_s14 + $0x1ec] ss:$72 sps:$4 sm:$0xff]   ;;  %v7857_v56 = vld [vmem:[%s9518_s1 + $0x840] ss:$8 sps:$4 sm:$0xff]  }
 0x159   : > { %4276 = vmatprep.subr.bf16.mxu1 %v7771_v57  ;;  %v7871_v57 = vld [vmem:[%s9518_s1 + $0x854] ss:$8 sps:$4 sm:$0xff]  }
 0x15c   : > { %4277 = vmatpush1.bf16.msra.mxu1 %v7769_v58  ;;  %v7869_v58 = vld [vmem:[%s9518_s1 + $0x850] ss:$8 sps:$4 sm:$0xff]  }
 0x15d   : > { %4278 = vmatprep.subr.bf16.mxu1 %v7783_v59  ;;  %v7883_v59 = vld [vmem:[%s9518_s1 + $0x864] ss:$8 sps:$4 sm:$0xff]  }
 0x15e   : > { %4136 = vmatmul.mubr.bf16.gmra.mrb[12].mxu1 %v7744_v60  ;;  %v7840_v60 = vld [vmem:[%s8281_s14 + $0x640] ss:$72 sps:$4 sm:$0xff]  }
 0x15f   : > { %4988 = vmatmul.mubr.bf16.gmra.mrb[44].mxu0 %v7748_v61  ;;  %4145 = vmatprep.mubr.bf16.mxu1 %v7752_v62  ;;  %v7844_v61 = vld [vmem:[%s8281_s14 + $0x1e8] ss:$72 sps:$4 sm:$0xff]   ;;  %v7848_v62 = vld [vmem:[%s8281_s14 + $0x6d4] ss:$72 sps:$4 sm:$0xff]  }
 0x160   : > { %4997 = vmatprep.mubr.bf16.mxu0 %v7754_v63  ;;  %4279 = vmatpush1.bf16.msra.mxu1 %v7781_v0  ;;  %v7850_v63 = vld [vmem:[%s8281_s14 + $0x27c] ss:$72 sps:$4 sm:$0xff]   ;;  %v7881_v0 = vld [vmem:[%s9518_s1 + $0x860] ss:$8 sps:$4 sm:$0xff]  }
 0x161   : > { %4280 = vmatprep.subr.bf16.mxu1 %v7795_v1  ;;  %v7895_v1 = vld [vmem:[%s9518_s1 + $0x874] ss:$8 sps:$4 sm:$0xff]  }
 0x164   : > { %4281 = vmatpush1.bf16.msra.mxu1 %v7793_v2  ;;  %v7893_v2 = vld [vmem:[%s9518_s1 + $0x870] ss:$8 sps:$4 sm:$0xff]  }
 0x165   : > { %4282 = vmatprep.subr.bf16.mxu1 %v7808_v3  ;;  %v7904_v3 = vld [vmem:[%s9518_s1 + $0x884] ss:$8 sps:$4 sm:$0xff]  }
 0x166   : > { %4146 = vmatmul.mubr.bf16.gmra.mrb[16].mxu1 %v7756_v4  ;;  %v7852_v4 = vld [vmem:[%s8281_s14 + $0x6d0] ss:$72 sps:$4 sm:$0xff]  }
 0x167   : > { %4998 = vmatmul.mubr.bf16.gmra.mrb[48].mxu0 %v7760_v5  ;;  %4155 = vmatprep.mubr.bf16.mxu1 %v7764_v6  ;;  %v7856_v5 = vld [vmem:[%s8281_s14 + $0x278] ss:$72 sps:$4 sm:$0xff]   ;;  %v7860_v6 = vld [vmem:[%s8281_s14 + $0x764] ss:$72 sps:$4 sm:$0xff]  }
 0x168   : > { %5007 = vmatprep.mubr.bf16.mxu0 %v7766_v7  ;;  %4283 = vmatpush1.bf16.msra.mxu1 %v7806_v8  ;;  %v7862_v7 = vld [vmem:[%s8281_s14 + $0x30c] ss:$72 sps:$4 sm:$0xff]   ;;  %v7902_v8 = vld [vmem:[%s9518_s1 + $0x880] ss:$8 sps:$4 sm:$0xff]  }
 0x169   : > { %4284 = vmatprep.subr.bf16.mxu1 %v7819_v9  ;;  %v7913_v9 = vld [vmem:[%s9518_s1 + $0x894] ss:$8 sps:$4 sm:$0xff]  }
 0x16c   : > { %4285 = vmatpush1.bf16.msra.mxu1 %v7817_v10  ;;  %v7911_v10 = vld [vmem:[%s9518_s1 + $0x890] ss:$8 sps:$4 sm:$0xff]  }
 0x16d   : > { %4286 = vmatprep.subr.bf16.mxu1 %v7831_v11  ;;  %v7922_v11 = vld [vmem:[%s9518_s1 + $0x8a4] ss:$8 sps:$4 sm:$0xff]  }
 0x16e   : > { %4156 = vmatmul.mubr.bf16.gmra.mrb[20].mxu1 %v7768_v12  ;;  %v7864_v12 = vld [vmem:[%s8281_s14 + $0x760] ss:$72 sps:$4 sm:$0xff]  }
 0x16f   : > { %5008 = vmatmul.mubr.bf16.gmra.mrb[52].mxu0 %v7772_v13  ;;  %4165 = vmatprep.mubr.bf16.mxu1 %v7776_v14  ;;  %v7868_v13 = vld [vmem:[%s8281_s14 + $0x308] ss:$72 sps:$4 sm:$0xff]   ;;  %v7872_v14 = vld [vmem:[%s8281_s14 + $0x7f4] ss:$72 sps:$4 sm:$0xff]  }
 0x170   : > { %5017 = vmatprep.mubr.bf16.mxu0 %v7778_v15  ;;  %4287 = vmatpush1.bf16.msra.mxu1 %v7829_v16  ;;  %v7874_v15 = vld [vmem:[%s8281_s14 + $0x39c] ss:$72 sps:$4 sm:$0xff]   ;;  %v7920_v16 = vld [vmem:[%s9518_s1 + $0x8a0] ss:$8 sps:$4 sm:$0xff]  }
 0x171   : > { %4288 = vmatprep.subr.bf16.mxu1 %v7843_v17  ;;  %v7931_v17 = vld [vmem:[%s9518_s1 + $0x8b4] ss:$8 sps:$4 sm:$0xff]  }
 0x174   : > { %4289 = vmatpush1.bf16.msra.mxu1 %v7841_v18  ;;  %v7929_v18 = vld [vmem:[%s9518_s1 + $0x8b0] ss:$8 sps:$4 sm:$0xff]  }
 0x175   : > { %4290 = vmatprep.subr.bf16.mxu1 %v7855_v19  ;;  %v7940_v19 = vld [vmem:[%s9518_s1 + $0x8c4] ss:$8 sps:$4 sm:$0xff]  }
 0x176   : > { %4166 = vmatmul.mubr.bf16.gmra.mrb[24].mxu1 %v7780_v20  ;;  %v7876_v20 = vld [vmem:[%s8281_s14 + $0x7f0] ss:$72 sps:$4 sm:$0xff]  }
 0x177   : > { %5018 = vmatmul.mubr.bf16.gmra.mrb[56].mxu0 %v7784_v21  ;;  %4175 = vmatprep.mubr.bf16.mxu1 %v7788_v22  ;;  %v7880_v21 = vld [vmem:[%s8281_s14 + $0x398] ss:$72 sps:$4 sm:$0xff]   ;;  %v7884_v22 = vld [vmem:[%s8281_s14 + $0x884] ss:$72 sps:$4 sm:$0xff]  }
 0x178   : > { %5027 = vmatprep.mubr.bf16.mxu0 %v7790_v23  ;;  %4291 = vmatpush1.bf16.msra.mxu1 %v7853_v24  ;;  %v7886_v23 = vld [vmem:[%s8281_s14 + $0x42c] ss:$72 sps:$4 sm:$0xff]   ;;  %v7938_v24 = vld [vmem:[%s9518_s1 + $0x8c0] ss:$8 sps:$4 sm:$0xff]  }
 0x179   : > { %4292 = vmatprep.subr.bf16.mxu1 %v7867_v25  ;;  %v7949_v25 = vld [vmem:[%s9518_s1 + $0x8d4] ss:$8 sps:$4 sm:$0xff]  }
 0x17c   : > { %4293 = vmatpush1.bf16.msra.mxu1 %v7865_v26  ;;  %v7947_v26 = vld [vmem:[%s9518_s1 + $0x8d0] ss:$8 sps:$4 sm:$0xff]  }
 0x17d   : > { %4294 = vmatprep.subr.bf16.mxu1 %v7879_v27  ;;  %v7958_v27 = vld [vmem:[%s9518_s1 + $0x8e4] ss:$8 sps:$4 sm:$0xff]  }
 0x17e   : > { %4176 = vmatmul.mubr.bf16.gmra.mrb[28].mxu1 %v7792_v28  ;;  %v7888_v28 = vld [vmem:[%s8281_s14 + $0x880] ss:$72 sps:$4 sm:$0xff]  }
 0x17f   : > { %5028 = vmatmul.mubr.bf16.gmra.mrb[60].mxu0 %v7796_v29  ;;  %4185 = vmatprep.mubr.bf16.mxu1 %v7800_v30  ;;  %v7892_v29 = vld [vmem:[%s8281_s14 + $0x428] ss:$72 sps:$4 sm:$0xff]   ;;  %v7898_v30 = vld [vmem:[%s8281_s14 + $0x1c] ss:$72 sps:$4 sm:$0xff]  }
 0x180   : > { %5070 = vmatprep.mubr.bf16.mxu0 %v7804_v31  ;;  %4295 = vmatpush1.bf16.msra.mxu1 %v7877_v32  ;;  %v7899_v31 = vld [vmem:[%s8281_s14 + $0x4bc] ss:$72 sps:$4 sm:$0xff]   ;;  %v7956_v32 = vld [vmem:[%s9518_s1 + $0x8e0] ss:$8 sps:$4 sm:$0xff]  }
 0x181   : > { %4296 = vmatprep.subr.bf16.mxu1 %v7891_v33  ;;  %v7967_v33 = vld [vmem:[%s9518_s1 + $0x8f4] ss:$8 sps:$4 sm:$0xff]  }
 0x184   : > { %4297 = vmatpush1.bf16.msra.mxu1 %v7889_v34  ;;  %v7965_v34 = vld [vmem:[%s9518_s1 + $0x8f0] ss:$8 sps:$4 sm:$0xff]  }
 0x185   : > { %6647 = vmatprep.subr.bf16.mxu1 %v8064_v41  ;;  %v7909_v41 = vld [vmem:[%s8281_s14 + $0xa8] ss:$72 sps:$4 sm:$0xff]  }
 0x186   : > { %4186 = vmatmul.mubr.bf16.gmra.mrb[32].mxu1 %v7805_v36  ;;  %v7901_v36 = vld [vmem:[%s8281_s14 + $0x4b8] ss:$72 sps:$4 sm:$0xff]  }
 0x187   : > { %5071 = vmatmul.mubr.bf16.vlgmr.msra.gmra.mrb[0].mxu0 %v7802_v35  ;;  %4195 = vmatprep.mubr.bf16.mxu1 %v7812_v38  ;;  %v7896_v35 = vld [vmem:[%s8281_s14 + $0x18] ss:$72 sps:$4 sm:$0xff]   ;;  %v7907_v38 = vld [vmem:[%s8281_s14 + $0x54c] ss:$72 sps:$4 sm:$0xff]  }
 0x188   : > { %5232 = vmatpush1.bf16.msra.mxu0 %v7809_v37  ;;  %5080 = vmatprep.mubr.bf16.mxu0 %v7814_v39  ;;  %v7905_v37 = vld [vmem:[%s8281_s14 + $0xac] ss:$72 sps:$4 sm:$0xff]   ;;  %v8065_v39 = vld [vmem:[%s9518_s1 + $0x400] ss:$8 sps:$4 sm:$0xff]  }
 0x189   : > { %5233 = vmatprep.subr.bf16.mxu0 %v7823_v40  ;;  %v8066_v40 = vld [vmem:[%s9518_s1 + $0x414] ss:$8 sps:$4 sm:$0xff]  }
 0x18c   : > { %5234 = vmatpush1.bf16.msra.mxu0 %v7821_v42  ;;  %v7910_v42 = vld [vmem:[%s8281_s14 + $0x548] ss:$72 sps:$4 sm:$0xff]  }
 0x18d   : > { %5235 = vmatprep.subr.bf16.mxu0 %v7835_v43  ;;  %v8067_v43 = vld [vmem:[%s9518_s1 + $0x410] ss:$8 sps:$4 sm:$0xff]  }
 0x18e   : > { %4196 = vmatmul.mubr.bf16.gmra.mrb[36].mxu1 %v7816_v44  ;;  %v7914_v44 = vld [vmem:[%s8281_s14 + $0x13c] ss:$72 sps:$4 sm:$0xff]  }
 0x18f   : > { %5081 = vmatmul.mubr.bf16.gmra.mrb[4].mxu0 %v7820_v45  ;;  %4205 = vmatprep.mubr.bf16.mxu1 %v7824_v46  ;;  %v7916_v45 = vld [vmem:[%s8281_s14 + $0x5dc] ss:$72 sps:$4 sm:$0xff]  }
 0x190   : > { %5090 = vmatprep.mubr.bf16.mxu0 %v7826_v47  ;;  %5236 = vmatpush1.bf16.msra.mxu0 %v7833_v48  ;;  %v8068_v46 = vld [vmem:[%s9518_s1 + $0x424] ss:$8 sps:$4 sm:$0xff]   ;;  %v8069_v47 = vld [vmem:[%s9518_s1 + $0x420] ss:$8 sps:$4 sm:$0xff]   ;;  %v8070_v48 = vld [vmem:[%s9518_s1 + $0x434] ss:$8 sps:$4 sm:$0xff]  }
 0x191   : > { %5237 = vmatprep.subr.bf16.mxu0 %v7847_v49  ;;  %v7918_v49 = vld [vmem:[%s8281_s14 + $0x138] ss:$72 sps:$4 sm:$0xff]  }
 0x194   : > { %5238 = vmatpush1.bf16.msra.mxu0 %v7845_v50  ;;  %v7919_v50 = vld [vmem:[%s8281_s14 + $0x5d8] ss:$72 sps:$4 sm:$0xff]  }
 0x195   : > { %5239 = vmatprep.subr.bf16.mxu0 %v7859_v51  ;;  %v7923_v51 = vld [vmem:[%s8281_s14 + $0x1cc] ss:$72 sps:$4 sm:$0xff]  }
 0x196   : > { %4206 = vmatmul.mubr.bf16.gmra.mrb[40].mxu1 %v7828_v52  ;;  %v7925_v52 = vld [vmem:[%s8281_s14 + $0x66c] ss:$72 sps:$4 sm:$0xff]  }
 0x197   : > { %5091 = vmatmul.mubr.bf16.gmra.mrb[8].mxu0 %v7832_v53  ;;  %4215 = vmatprep.mubr.bf16.mxu1 %v7836_v54  ;;  %v8071_v53 = vld [vmem:[%s9518_s1 + $0x430] ss:$8 sps:$4 sm:$0xff]   ;;  %v8072_v54 = vld [vmem:[%s9518_s1 + $0x444] ss:$8 sps:$4 sm:$0xff]  }
 0x198   : > { %5100 = vmatprep.mubr.bf16.mxu0 %v7838_v55  ;;  %5240 = vmatpush1.bf16.msra.mxu0 %v7857_v56  ;;  %v8073_v55 = vld [vmem:[%s9518_s1 + $0x440] ss:$8 sps:$4 sm:$0xff]   ;;  %v8074_v56 = vld [vmem:[%s9518_s1 + $0x454] ss:$8 sps:$4 sm:$0xff]  }
 0x199   : > { %5241 = vmatprep.subr.bf16.mxu0 %v7871_v57  ;;  %v7927_v57 = vld [vmem:[%s8281_s14 + $0x1c8] ss:$72 sps:$4 sm:$0xff]  }
 0x19c   : > { %5242 = vmatpush1.bf16.msra.mxu0 %v7869_v58  ;;  %v7928_v58 = vld [vmem:[%s8281_s14 + $0x668] ss:$72 sps:$4 sm:$0xff]  }
 0x19d   : > { %5243 = vmatprep.subr.bf16.mxu0 %v7883_v59  ;;  %v7932_v59 = vld [vmem:[%s8281_s14 + $0x25c] ss:$72 sps:$4 sm:$0xff]  }
 0x19e   : > { %4216 = vmatmul.mubr.bf16.gmra.mrb[44].mxu1 %v7840_v60  ;;  %v7934_v60 = vld [vmem:[%s8281_s14 + $0x6fc] ss:$72 sps:$4 sm:$0xff]  }
 0x19f   : > { %5101 = vmatmul.mubr.bf16.gmra.mrb[12].mxu0 %v7844_v61  ;;  %4225 = vmatprep.mubr.bf16.mxu1 %v7848_v62  ;;  %v8075_v61 = vld [vmem:[%s9518_s1 + $0x450] ss:$8 sps:$4 sm:$0xff]   ;;  %v8076_v62 = vld [vmem:[%s9518_s1 + $0x464] ss:$8 sps:$4 sm:$0xff]  }
 0x1a0   : > { %5110 = vmatprep.mubr.bf16.mxu0 %v7850_v63  ;;  %5244 = vmatpush1.bf16.msra.mxu0 %v7881_v0  ;;  %v8077_v63 = vld [vmem:[%s9518_s1 + $0x460] ss:$8 sps:$4 sm:$0xff]   ;;  %v8078_v0 = vld [vmem:[%s9518_s1 + $0x474] ss:$8 sps:$4 sm:$0xff]  }
 0x1a1   : > { %5245 = vmatprep.subr.bf16.mxu0 %v7895_v1  ;;  %v7936_v1 = vld [vmem:[%s8281_s14 + $0x258] ss:$72 sps:$4 sm:$0xff]  }
 0x1a4   : > { %5246 = vmatpush1.bf16.msra.mxu0 %v7893_v2  ;;  %v7937_v2 = vld [vmem:[%s8281_s14 + $0x6f8] ss:$72 sps:$4 sm:$0xff]  }
 0x1a5   : > { %5247 = vmatprep.subr.bf16.mxu0 %v7904_v3  ;;  %v7941_v3 = vld [vmem:[%s8281_s14 + $0x2ec] ss:$72 sps:$4 sm:$0xff]  }
 0x1a6   : > { %4226 = vmatmul.mubr.bf16.gmra.mrb[48].mxu1 %v7852_v4  ;;  %v7943_v4 = vld [vmem:[%s8281_s14 + $0x78c] ss:$72 sps:$4 sm:$0xff]  }
 0x1a7   : > { %5111 = vmatmul.mubr.bf16.gmra.mrb[16].mxu0 %v7856_v5  ;;  %4235 = vmatprep.mubr.bf16.mxu1 %v7860_v6  ;;  %v8079_v5 = vld [vmem:[%s9518_s1 + $0x470] ss:$8 sps:$4 sm:$0xff]   ;;  %v8080_v6 = vld [vmem:[%s9518_s1 + $0x484] ss:$8 sps:$4 sm:$0xff]  }
 0x1a8   : > { %5120 = vmatprep.mubr.bf16.mxu0 %v7862_v7  ;;  %5248 = vmatpush1.bf16.msra.mxu0 %v7902_v8  ;;  %v8081_v7 = vld [vmem:[%s9518_s1 + $0x480] ss:$8 sps:$4 sm:$0xff]   ;;  %v8082_v8 = vld [vmem:[%s9518_s1 + $0x494] ss:$8 sps:$4 sm:$0xff]  }
 0x1a9   : > { %5249 = vmatprep.subr.bf16.mxu0 %v7913_v9  ;;  %v7945_v9 = vld [vmem:[%s8281_s14 + $0x2e8] ss:$72 sps:$4 sm:$0xff]  }
 0x1ac   : > { %5250 = vmatpush1.bf16.msra.mxu0 %v7911_v10  ;;  %v7946_v10 = vld [vmem:[%s8281_s14 + $0x788] ss:$72 sps:$4 sm:$0xff]  }
 0x1ad   : > { %5251 = vmatprep.subr.bf16.mxu0 %v7922_v11  ;;  %v7950_v11 = vld [vmem:[%s8281_s14 + $0x37c] ss:$72 sps:$4 sm:$0xff]  }
 0x1ae   : > { %4236 = vmatmul.mubr.bf16.gmra.mrb[52].mxu1 %v7864_v12  ;;  %v7952_v12 = vld [vmem:[%s8281_s14 + $0x81c] ss:$72 sps:$4 sm:$0xff]  }
 0x1af   : > { %5121 = vmatmul.mubr.bf16.gmra.mrb[20].mxu0 %v7868_v13  ;;  %4245 = vmatprep.mubr.bf16.mxu1 %v7872_v14  ;;  %v8083_v13 = vld [vmem:[%s9518_s1 + $0x490] ss:$8 sps:$4 sm:$0xff]   ;;  %v8084_v14 = vld [vmem:[%s9518_s1 + $0x4a4] ss:$8 sps:$4 sm:$0xff]  }
 0x1b0   : > { %5130 = vmatprep.mubr.bf16.mxu0 %v7874_v15  ;;  %5252 = vmatpush1.bf16.msra.mxu0 %v7920_v16  ;;  %v8085_v15 = vld [vmem:[%s9518_s1 + $0x4a0] ss:$8 sps:$4 sm:$0xff]   ;;  %v8086_v16 = vld [vmem:[%s9518_s1 + $0x4b4] ss:$8 sps:$4 sm:$0xff]  }
 0x1b1   : > { %5253 = vmatprep.subr.bf16.mxu0 %v7931_v17  ;;  %v7954_v17 = vld [vmem:[%s8281_s14 + $0x378] ss:$72 sps:$4 sm:$0xff]  }
 0x1b4   : > { %5254 = vmatpush1.bf16.msra.mxu0 %v7929_v18  ;;  %v7955_v18 = vld [vmem:[%s8281_s14 + $0x818] ss:$72 sps:$4 sm:$0xff]  }
 0x1b5   : > { %5255 = vmatprep.subr.bf16.mxu0 %v7940_v19  ;;  %v7959_v19 = vld [vmem:[%s8281_s14 + $0x40c] ss:$72 sps:$4 sm:$0xff]  }
 0x1b6   : > { %4246 = vmatmul.mubr.bf16.gmra.mrb[56].mxu1 %v7876_v20  ;;  %v7961_v20 = vld [vmem:[%s8281_s14 + $0x8ac] ss:$72 sps:$4 sm:$0xff]  }
 0x1b7   : > { %5131 = vmatmul.mubr.bf16.gmra.mrb[24].mxu0 %v7880_v21  ;;  %4255 = vmatprep.mubr.bf16.mxu1 %v7884_v22  ;;  %v8087_v21 = vld [vmem:[%s9518_s1 + $0x4b0] ss:$8 sps:$4 sm:$0xff]   ;;  %v8088_v22 = vld [vmem:[%s9518_s1 + $0x4c4] ss:$8 sps:$4 sm:$0xff]  }
 0x1b8   : > { %5140 = vmatprep.mubr.bf16.mxu0 %v7886_v23  ;;  %5256 = vmatpush1.bf16.msra.mxu0 %v7938_v24  ;;  %v8089_v23 = vld [vmem:[%s9518_s1 + $0x4c0] ss:$8 sps:$4 sm:$0xff]   ;;  %v8090_v24 = vld [vmem:[%s9518_s1 + $0x4d4] ss:$8 sps:$4 sm:$0xff]  }
 0x1b9   : > { %5257 = vmatprep.subr.bf16.mxu0 %v7949_v25  ;;  %v7963_v25 = vld [vmem:[%s8281_s14 + $0x408] ss:$72 sps:$4 sm:$0xff]  }
 0x1bc   : > { %5258 = vmatpush1.bf16.msra.mxu0 %v7947_v26  ;;  %v7964_v26 = vld [vmem:[%s8281_s14 + $0x8a8] ss:$72 sps:$4 sm:$0xff]  }
 0x1bd   : > { %5259 = vmatprep.subr.bf16.mxu0 %v7958_v27  ;;  %v7968_v27 = vld [vmem:[%s8281_s14 + $0x49c] ss:$72 sps:$4 sm:$0xff]  }
 0x1be   : > { %4256 = vmatmul.mubr.bf16.gmra.mrb[60].mxu1 %v7888_v28  ;;  %v7972_v28 = vld [vmem:[%s8281_s14 + $0x44] ss:$72 sps:$4 sm:$0xff]  }
 0x1bf   : > { %5141 = vmatmul.mubr.bf16.gmra.mrb[28].mxu0 %v7892_v29  ;;  %4298 = vmatprep.mubr.bf16.mxu1 %v7898_v30  ;;  %v8091_v29 = vld [vmem:[%s9518_s1 + $0x4d0] ss:$8 sps:$4 sm:$0xff]   ;;  %v8092_v30 = vld [vmem:[%s9518_s1 + $0x4e4] ss:$8 sps:$4 sm:$0xff]  }
 0x1c0   : > { %5150 = vmatprep.mubr.bf16.mxu0 %v7899_v31  ;;  %5260 = vmatpush1.bf16.msra.mxu0 %v7956_v32  ;;  %v8093_v31 = vld [vmem:[%s9518_s1 + $0x4e0] ss:$8 sps:$4 sm:$0xff]   ;;  %v8094_v32 = vld [vmem:[%s9518_s1 + $0x4f4] ss:$8 sps:$4 sm:$0xff]  }
 0x1c1   : > { %5261 = vmatprep.subr.bf16.mxu0 %v7967_v33  ;;  %v7970_v33 = vld [vmem:[%s8281_s14 + $0x40] ss:$72 sps:$4 sm:$0xff]  }
 0x1c4   : > { %5262 = vmatpush1.bf16.msra.mxu0 %v7965_v34  ;;  %v7973_v34 = vld [vmem:[%s8281_s14 + $0x498] ss:$72 sps:$4 sm:$0xff]  }
 0x1c6   : > { %4299 = vmatmul.mubr.bf16.vlgmr.msra.gmra.mrb[0].mxu1 %v7896_v35  ;;  %v7974_v35 = vld [vmem:[%s8281_s14 + $0x52c] ss:$72 sps:$4 sm:$0xff]  }
 0x1c7   : > { %5151 = vmatmul.mubr.bf16.gmra.mrb[32].mxu0 %v7901_v36  ;;  %6663 = vmatpush1.bf16.msra.mxu1 %v8065_v39  ;;  %v7976_v36 = vld [vmem:[%s8281_s14 + $0xd4] ss:$72 sps:$4 sm:$0xff]   ;;  %v7979_v39 = vld [vmem:[%s8281_s14 + $0xd0] ss:$72 sps:$4 sm:$0xff]  }
 0x1c8   : > { %4308 = vmatprep.mubr.bf16.mxu1 %v7905_v37  ;;  %5160 = vmatprep.mubr.bf16.mxu0 %v7907_v38  ;;  %v8095_v37 = vld [vmem:[%s9518_s1 + $0x4f0] ss:$8 sps:$4 sm:$0xff]  }
 0x1c9   : > { %6648 = vmatprep.subr.bf16.mxu1 %v8066_v40  ;;  %v7978_v38 = vld [vmem:[%s8281_s14 + $0x528] ss:$72 sps:$4 sm:$0xff]   ;;  %v7980_v40 = vld [vmem:[%s8281_s14 + $0x5bc] ss:$72 sps:$4 sm:$0xff]  }
 0x1cb   : > { %6664 = vmatpush1.bf16.msra.mxu1 %v8067_v43  ;;  %v7985_v43 = vld [vmem:[%s8281_s14 + $0x160] ss:$72 sps:$4 sm:$0xff]  }
 0x1cc   : > { %6649 = vmatprep.subr.bf16.mxu1 %v8068_v46  ;;  %v7990_v46 = vld [vmem:[%s8281_s14 + $0x648] ss:$72 sps:$4 sm:$0xff]  }
 0x1ce   : > { %4309 = vmatmul.mubr.bf16.gmra.mrb[4].mxu1 %v7909_v41  ;;  %v7982_v41 = vld [vmem:[%s8281_s14 + $0x164] ss:$72 sps:$4 sm:$0xff]  }
 0x1cf   : > { %5161 = vmatmul.mubr.bf16.gmra.mrb[36].mxu0 %v7910_v42  ;;  %4318 = vmatprep.mubr.bf16.mxu1 %v7914_v44  ;;  %v7984_v42 = vld [vmem:[%s8281_s14 + $0x5b8] ss:$72 sps:$4 sm:$0xff]   ;;  %v7986_v44 = vld [vmem:[%s8281_s14 + $0x64c] ss:$72 sps:$4 sm:$0xff]  }
 0x1d0   : > { %5170 = vmatprep.mubr.bf16.mxu0 %v7916_v45  ;;  %6665 = vmatpush1.bf16.msra.mxu1 %v8069_v47  ;;  %v7988_v45 = vld [vmem:[%s8281_s14 + $0x1f4] ss:$72 sps:$4 sm:$0xff]   ;;  %v7991_v47 = vld [vmem:[%s8281_s14 + $0x1f0] ss:$72 sps:$4 sm:$0xff]  }
 0x1d1   : > { %6650 = vmatprep.subr.bf16.mxu1 %v8070_v48  ;;  %v7992_v48 = vld [vmem:[%s8281_s14 + $0x6dc] ss:$72 sps:$4 sm:$0xff]  }
 0x1d4   : > { %6666 = vmatpush1.bf16.msra.mxu1 %v8071_v53  ;;  %v8000_v53 = vld [vmem:[%s8281_s14 + $0x314] ss:$72 sps:$4 sm:$0xff]  }
 0x1d5   : > { %6651 = vmatprep.subr.bf16.mxu1 %v8072_v54  ;;  %v8002_v54 = vld [vmem:[%s8281_s14 + $0x768] ss:$72 sps:$4 sm:$0xff]  }
 0x1d6   : > { %4319 = vmatmul.mubr.bf16.gmra.mrb[8].mxu1 %v7918_v49  ;;  %v7994_v49 = vld [vmem:[%s8281_s14 + $0x284] ss:$72 sps:$4 sm:$0xff]  }
 0x1d7   : > { %5171 = vmatmul.mubr.bf16.gmra.mrb[40].mxu0 %v7919_v50  ;;  %4328 = vmatprep.mubr.bf16.mxu1 %v7923_v51  ;;  %v7996_v50 = vld [vmem:[%s8281_s14 + $0x6d8] ss:$72 sps:$4 sm:$0xff]  }
 0x1d8   : > { %5180 = vmatprep.mubr.bf16.mxu0 %v7925_v52  ;;  %6667 = vmatpush1.bf16.msra.mxu1 %v8073_v55  ;;  %v7997_v51 = vld [vmem:[%s8281_s14 + $0x280] ss:$72 sps:$4 sm:$0xff]   ;;  %v7998_v52 = vld [vmem:[%s8281_s14 + $0x76c] ss:$72 sps:$4 sm:$0xff]   ;;  %v8003_v55 = vld [vmem:[%s8281_s14 + $0x310] ss:$72 sps:$4 sm:$0xff]  }
 0x1d9   : > { %6652 = vmatprep.subr.bf16.mxu1 %v8074_v56  ;;  %v8004_v56 = vld [vmem:[%s8281_s14 + $0x7fc] ss:$72 sps:$4 sm:$0xff]  }
 0x1dc   : > { %6668 = vmatpush1.bf16.msra.mxu1 %v8075_v61  ;;  %v8012_v61 = vld [vmem:[%s8281_s14 + $0x434] ss:$72 sps:$4 sm:$0xff]  }
 0x1dd   : > { %6653 = vmatprep.subr.bf16.mxu1 %v8076_v62  ;;  %v8014_v62 = vld [vmem:[%s8281_s14 + $0x888] ss:$72 sps:$4 sm:$0xff]  }
 0x1de   : > { %4329 = vmatmul.mubr.bf16.gmra.mrb[12].mxu1 %v7927_v57  ;;  %v8006_v57 = vld [vmem:[%s8281_s14 + $0x3a4] ss:$72 sps:$4 sm:$0xff]  }
 0x1df   : > { %5181 = vmatmul.mubr.bf16.gmra.mrb[44].mxu0 %v7928_v58  ;;  %4338 = vmatprep.mubr.bf16.mxu1 %v7932_v59  ;;  %v8008_v58 = vld [vmem:[%s8281_s14 + $0x7f8] ss:$72 sps:$4 sm:$0xff]  }
 0x1e0   : > { %5190 = vmatprep.mubr.bf16.mxu0 %v7934_v60  ;;  %6669 = vmatpush1.bf16.msra.mxu1 %v8077_v63  ;;  %v8009_v59 = vld [vmem:[%s8281_s14 + $0x3a0] ss:$72 sps:$4 sm:$0xff]   ;;  %v8010_v60 = vld [vmem:[%s8281_s14 + $0x88c] ss:$72 sps:$4 sm:$0xff]   ;;  %v8015_v63 = vld [vmem:[%s8281_s14 + $0x430] ss:$72 sps:$4 sm:$0xff]  }
 0x1e1   : > { %6654 = vmatprep.subr.bf16.mxu1 %v8078_v0  ;;  %v8018_v0 = vld [vmem:[%s8281_s14 + $0x4a4] ss:$72 sps:$4 sm:$0xff]  }
 0x1e4   : > { %6670 = vmatpush1.bf16.msra.mxu1 %v8079_v5  ;;  %v8024_v5 = vld [vmem:[%s8281_s14 + $0x554] ss:$72 sps:$4 sm:$0xff]  }
 0x1e5   : > { %6655 = vmatprep.subr.bf16.mxu1 %v8080_v6  ;;  %v8026_v6 = vld [vmem:[%s8281_s14 + $0x530] ss:$72 sps:$4 sm:$0xff]  }
 0x1e6   : > { %4339 = vmatmul.mubr.bf16.gmra.mrb[16].mxu1 %v7936_v1  ;;  %v8019_v1 = vld [vmem:[%s8281_s14 + $0x4c4] ss:$72 sps:$4 sm:$0xff]  }
 0x1e7   : > { %5191 = vmatmul.mubr.bf16.gmra.mrb[48].mxu0 %v7937_v2  ;;  %4348 = vmatprep.mubr.bf16.mxu1 %v7941_v3  ;;  %v8016_v2 = vld [vmem:[%s8281_s14 + $0x4a0] ss:$72 sps:$4 sm:$0xff]  }
 0x1e8   : > { %5200 = vmatprep.mubr.bf16.mxu0 %v7943_v4  ;;  %6671 = vmatpush1.bf16.msra.mxu1 %v8081_v7  ;;  %v8021_v3 = vld [vmem:[%s8281_s14 + $0x4c0] ss:$72 sps:$4 sm:$0xff]   ;;  %v8022_v4 = vld [vmem:[%s8281_s14 + $0x534] ss:$72 sps:$4 sm:$0xff]   ;;  %v8027_v7 = vld [vmem:[%s8281_s14 + $0x550] ss:$72 sps:$4 sm:$0xff]  }
 0x1e9   : > { %6656 = vmatprep.subr.bf16.mxu1 %v8082_v8  ;;  %v8028_v8 = vld [vmem:[%s8281_s14 + $0x5c4] ss:$72 sps:$4 sm:$0xff]  }
 0x1ec   : > { %6672 = vmatpush1.bf16.msra.mxu1 %v8083_v13  ;;  %v8036_v13 = vld [vmem:[%s8281_s14 + $0x674] ss:$72 sps:$4 sm:$0xff]  }
 0x1ed   : > { %6657 = vmatprep.subr.bf16.mxu1 %v8084_v14  ;;  %v8038_v14 = vld [vmem:[%s8281_s14 + $0x650] ss:$72 sps:$4 sm:$0xff]  }
 0x1ee   : > { %4349 = vmatmul.mubr.bf16.gmra.mrb[20].mxu1 %v7945_v9  ;;  %v8030_v9 = vld [vmem:[%s8281_s14 + $0x5e4] ss:$72 sps:$4 sm:$0xff]  }
 0x1ef   : > { %5201 = vmatmul.mubr.bf16.gmra.mrb[52].mxu0 %v7946_v10  ;;  %4358 = vmatprep.mubr.bf16.mxu1 %v7950_v11  ;;  %v8032_v10 = vld [vmem:[%s8281_s14 + $0x5c0] ss:$72 sps:$4 sm:$0xff]  }
 0x1f0   : > { %5210 = vmatprep.mubr.bf16.mxu0 %v7952_v12  ;;  %6673 = vmatpush1.bf16.msra.mxu1 %v8085_v15  ;;  %v8033_v11 = vld [vmem:[%s8281_s14 + $0x5e0] ss:$72 sps:$4 sm:$0xff]   ;;  %v8034_v12 = vld [vmem:[%s8281_s14 + $0x654] ss:$72 sps:$4 sm:$0xff]   ;;  %v8039_v15 = vld [vmem:[%s8281_s14 + $0x670] ss:$72 sps:$4 sm:$0xff]  }
 0x1f1   : > { %6658 = vmatprep.subr.bf16.mxu1 %v8086_v16  ;;  %v8040_v16 = vld [vmem:[%s8281_s14 + $0x6e4] ss:$72 sps:$4 sm:$0xff]  }
 0x1f4   : > { %6674 = vmatpush1.bf16.msra.mxu1 %v8087_v21  ;;  %v8048_v21 = vld [vmem:[%s8281_s14 + $0x794] ss:$72 sps:$4 sm:$0xff]  }
 0x1f5   : > { %6659 = vmatprep.subr.bf16.mxu1 %v8088_v22  ;;  %v8050_v22 = vld [vmem:[%s8281_s14 + $0x770] ss:$72 sps:$4 sm:$0xff]  }
 0x1f6   : > { %4359 = vmatmul.mubr.bf16.gmra.mrb[24].mxu1 %v7954_v17  ;;  %v8042_v17 = vld [vmem:[%s8281_s14 + $0x704] ss:$72 sps:$4 sm:$0xff]  }
 0x1f7   : > { %5211 = vmatmul.mubr.bf16.gmra.mrb[56].mxu0 %v7955_v18  ;;  %4368 = vmatprep.mubr.bf16.mxu1 %v7959_v19  ;;  %v8044_v18 = vld [vmem:[%s8281_s14 + $0x6e0] ss:$72 sps:$4 sm:$0xff]  }
 0x1f8   : > { %5220 = vmatprep.mubr.bf16.mxu0 %v7961_v20  ;;  %6675 = vmatpush1.bf16.msra.mxu1 %v8089_v23  ;;  %v8045_v19 = vld [vmem:[%s8281_s14 + $0x700] ss:$72 sps:$4 sm:$0xff]   ;;  %v8046_v20 = vld [vmem:[%s8281_s14 + $0x774] ss:$72 sps:$4 sm:$0xff]   ;;  %v8051_v23 = vld [vmem:[%s8281_s14 + $0x790] ss:$72 sps:$4 sm:$0xff]  }
 0x1f9   : > { %6660 = vmatprep.subr.bf16.mxu1 %v8090_v24  ;;  %v8052_v24 = vld [vmem:[%s8281_s14 + $0x804] ss:$72 sps:$4 sm:$0xff]  }
 0x1fc   : > { %6676 = vmatpush1.bf16.msra.mxu1 %v8091_v29  ;;  %v8060_v29 = vld [vmem:[%s8281_s14 + $0x8b4] ss:$72 sps:$4 sm:$0xff]  }
 0x1fd   : > { %6661 = vmatprep.subr.bf16.mxu1 %v8092_v30  ;;  %v8062_v30 = vld [vmem:[%s8281_s14 + $0x890] ss:$72 sps:$4 sm:$0xff]  }
 0x1fe   : > { %4369 = vmatmul.mubr.bf16.gmra.mrb[28].mxu1 %v7963_v25  ;;  %v8054_v25 = vld [vmem:[%s8281_s14 + $0x824] ss:$72 sps:$4 sm:$0xff]  }
 0x1ff   : > { %5221 = vmatmul.mubr.bf16.gmra.mrb[60].mxu0 %v7964_v26  ;;  %4378 = vmatprep.mubr.bf16.mxu1 %v7968_v27  ;;  %v8056_v26 = vld [vmem:[%s8281_s14 + $0x800] ss:$72 sps:$4 sm:$0xff]  }
 0x200   : > { %5263 = vmatprep.mubr.bf16.mxu0 %v7972_v28  ;;  %6677 = vmatpush1.bf16.msra.mxu1 %v8093_v31  ;;  %v8057_v27 = vld [vmem:[%s8281_s14 + $0x820] ss:$72 sps:$4 sm:$0xff]   ;;  %v8058_v28 = vld [vmem:[%s8281_s14 + $0x894] ss:$72 sps:$4 sm:$0xff]   ;;  %v8063_v31 = vld [vmem:[%s8281_s14 + $0x8b0] ss:$72 sps:$4 sm:$0xff]  }
 0x201   : > { %6662 = vmatprep.subr.bf16.mxu1 %v8094_v32  ;;  %s6612_s14 = sshll.u32 %s9523_s29, 3  ;;  %s6613_s29 = sshll.u32 %s9525_s16, 4 }
 0x202   : > { %s9448_s19 = scalar_lea.vmem %s9519_s2, %s6612_s14  ;;  %s225_s22 = scalar_lea.vmem %s9520_s3, %s6613_s29 }
 0x203   : > { %s230_s25 = scalar_lea.vmem %s9521_s4, %s6613_s29 }
 0x204   : > { %6678 = vmatpush1.bf16.msra.mxu1 %v8095_v37 }
 0x206   : > { %4379 = vmatmul.mubr.bf16.gmra.mrb[32].mxu1 %v7973_v34 }
 0x207   : > { %5264 = vmatmul.mubr.bf16.vlgmr.msra.gmra.mrb[0].mxu0 %v7970_v33  ;;  %4388 = vmatprep.mubr.bf16.mxu1 %v7974_v35 }
 0x208   : > { %5273 = vmatprep.mubr.bf16.mxu0 %v7976_v36 }
 0x20e   : > { %4389 = vmatmul.mubr.bf16.gmra.mrb[36].mxu1 %v7978_v38 }
 0x20f   : > { %5274 = vmatmul.mubr.bf16.gmra.mrb[4].mxu0 %v7979_v39  ;;  %4398 = vmatprep.mubr.bf16.mxu1 %v7980_v40 }
 0x210   : > { %5283 = vmatprep.mubr.bf16.mxu0 %v7982_v41 }
 0x216   : > { %4399 = vmatmul.mubr.bf16.gmra.mrb[40].mxu1 %v7984_v42 }
 0x217   : > { %5284 = vmatmul.mubr.bf16.gmra.mrb[8].mxu0 %v7985_v43  ;;  %4408 = vmatprep.mubr.bf16.mxu1 %v7986_v44 }
 0x218   : > { %5293 = vmatprep.mubr.bf16.mxu0 %v7988_v45 }
 0x21e   : > { %4409 = vmatmul.mubr.bf16.gmra.mrb[44].mxu1 %v7990_v46 }
 0x21f   : > { %5294 = vmatmul.mubr.bf16.gmra.mrb[12].mxu0 %v7991_v47  ;;  %4418 = vmatprep.mubr.bf16.mxu1 %v7992_v48 }
 0x220   : > { %5303 = vmatprep.mubr.bf16.mxu0 %v7994_v49 }
 0x226   : > { %4419 = vmatmul.mubr.bf16.gmra.mrb[48].mxu1 %v7996_v50 }
 0x227   : > { %5304 = vmatmul.mubr.bf16.gmra.mrb[16].mxu0 %v7997_v51  ;;  %4428 = vmatprep.mubr.bf16.mxu1 %v7998_v52 }
 0x228   : > { %5313 = vmatprep.mubr.bf16.mxu0 %v8000_v53 }
 0x22e   : > { %4429 = vmatmul.mubr.bf16.gmra.mrb[52].mxu1 %v8002_v54 }
 0x22f   : > { %5314 = vmatmul.mubr.bf16.gmra.mrb[20].mxu0 %v8003_v55  ;;  %4438 = vmatprep.mubr.bf16.mxu1 %v8004_v56 }
 0x230   : > { %5323 = vmatprep.mubr.bf16.mxu0 %v8006_v57 }
 0x236   : > { %4439 = vmatmul.mubr.bf16.gmra.mrb[56].mxu1 %v8008_v58 }
 0x237   : > { %5324 = vmatmul.mubr.bf16.gmra.mrb[24].mxu0 %v8009_v59  ;;  %4448 = vmatprep.mubr.bf16.mxu1 %v8010_v60 }
 0x238   : > { %5333 = vmatprep.mubr.bf16.mxu0 %v8012_v61 }
 0x23e   : > { %4449 = vmatmul.mubr.bf16.gmra.mrb[60].mxu1 %v8014_v62 }
 0x23f   : > { %5334 = vmatmul.mubr.bf16.gmra.mrb[28].mxu0 %v8015_v63  ;;  %4571 = vmatprep.mubr.bf16.mxu1 %v8018_v0 }
 0x240   : > { %5343 = vmatprep.mubr.bf16.mxu0 %v8019_v1 }
 0x246   : > { %4572 = vmatmul.mubr.bf16.vlgmr.msra.gmra.mrb[32].mxu1 %v8016_v2 }
 0x247   : > { %5344 = vmatmul.mubr.bf16.gmra.mrb[32].mxu0 %v8021_v3  ;;  %4581 = vmatprep.mubr.bf16.mxu1 %v8022_v4 }
 0x248   : > { %5353 = vmatprep.mubr.bf16.mxu0 %v8024_v5 }
 0x24e   : > { %4582 = vmatmul.mubr.bf16.gmra.mrb[36].mxu1 %v8026_v6 }
 0x24f   : > { %5354 = vmatmul.mubr.bf16.gmra.mrb[36].mxu0 %v8027_v7  ;;  %4591 = vmatprep.mubr.bf16.mxu1 %v8028_v8 }
 0x250   : > { %5363 = vmatprep.mubr.bf16.mxu0 %v8030_v9 }
 0x256   : > { %4592 = vmatmul.mubr.bf16.gmra.mrb[40].mxu1 %v8032_v10 }
 0x257   : > { %5364 = vmatmul.mubr.bf16.gmra.mrb[40].mxu0 %v8033_v11  ;;  %4601 = vmatprep.mubr.bf16.mxu1 %v8034_v12 }
 0x258   : > { %5373 = vmatprep.mubr.bf16.mxu0 %v8036_v13 }
 0x25e   : > { %4602 = vmatmul.mubr.bf16.gmra.mrb[44].mxu1 %v8038_v14 }
 0x25f   : > { %5374 = vmatmul.mubr.bf16.gmra.mrb[44].mxu0 %v8039_v15  ;;  %4611 = vmatprep.mubr.bf16.mxu1 %v8040_v16 }
 0x260   : > { %5383 = vmatprep.mubr.bf16.mxu0 %v8042_v17 }
 0x266   : > { %4612 = vmatmul.mubr.bf16.gmra.mrb[48].mxu1 %v8044_v18 }
 0x267   : > { %5384 = vmatmul.mubr.bf16.gmra.mrb[48].mxu0 %v8045_v19  ;;  %4621 = vmatprep.mubr.bf16.mxu1 %v8046_v20 }
 0x268   : > { %5393 = vmatprep.mubr.bf16.mxu0 %v8048_v21 }
 0x26e   : > { %4622 = vmatmul.mubr.bf16.gmra.mrb[52].mxu1 %v8050_v22 }
 0x26f   : > { %5394 = vmatmul.mubr.bf16.gmra.mrb[52].mxu0 %v8051_v23  ;;  %4631 = vmatprep.mubr.bf16.mxu1 %v8052_v24 }
 0x270   : > { %5403 = vmatprep.mubr.bf16.mxu0 %v8054_v25 }
 0x276   : > { %4632 = vmatmul.mubr.bf16.gmra.mrb[56].mxu1 %v8056_v26 }
 0x277   : > { %5404 = vmatmul.mubr.bf16.gmra.mrb[56].mxu0 %v8057_v27  ;;  %4641 = vmatprep.mubr.bf16.mxu1 %v8058_v28 }
 0x278   : > { %5413 = vmatprep.mubr.bf16.mxu0 %v8060_v29 }
 0x27e   : > { %4642 = vmatmul.mubr.bf16.gmra.mrb[60].mxu1 %v8062_v30 }
 0x27f   : > { %5414 = vmatmul.mubr.bf16.gmra.mrb[60].mxu0 %v8063_v31 }
 0x299   : > { %v4300_v32 = vpop.f32.mrb[0].mxu1 }
 0x29a   : > { %v4302_v33 = vpop.f32.mrb[1].mxu1 }
 0x29b   : > { %v4304_v34 = vpop.f32.mrb[2].mxu1 }
 0x29c   : > { %v4306_v35 = vpop.f32.mrb[3].mxu1 }
 0x2a1   : > { %v4310_v36 = vpop.f32.mrb[4].mxu1 }
 0x2a2   : > { %v4312_v37 = vpop.f32.mrb[5].mxu1 }
 0x2a3   : > { %v4314_v38 = vpop.f32.mrb[6].mxu1 }
 0x2a4   : > { %v4316_v39 = vpop.f32.mrb[7].mxu1 }
 0x2a9   : > { %v9396_v40 = vpop.f32.mrb[8].mxu1 }
 0x2aa   : > { %v9398_v41 = vpop.f32.mrb[9].mxu1 }
 0x2ab   : > { %v9400_v42 = vpop.f32.mrb[10].mxu1 }
 0x2ac   : > { %v9402_v43 = vpop.f32.mrb[11].mxu1 }
 0x2b1   : > { %v9404_v44 = vpop.f32.mrb[12].mxu1 }
 0x2b2   : > { %v9406_v45 = vpop.f32.mrb[13].mxu1 }
 0x2b3   : > { %v9408_v46 = vpop.f32.mrb[14].mxu1 }
 0x2b4   : > { %v9410_v47 = vpop.f32.mrb[15].mxu1 }
 0x2b9   : > { %v9412_v48 = vpop.f32.mrb[16].mxu1 }
 0x2ba   : > { %v9414_v49 = vpop.f32.mrb[17].mxu1 }
 0x2bb   : > { %v9416_v50 = vpop.f32.mrb[18].mxu1 }
 0x2bc   : > { %v9418_v51 = vpop.f32.mrb[19].mxu1 }
 0x2c1   : > { %v9420_v52 = vpop.f32.mrb[20].mxu1 }
 0x2c2   : > { %v9422_v53 = vpop.f32.mrb[21].mxu1 }
 0x2c3   : > { %v9424_v54 = vpop.f32.mrb[22].mxu1 }
 0x2c4   : > { %v9426_v55 = vpop.f32.mrb[23].mxu1 }
 0x2c9   : > { %v9428_v56 = vpop.f32.mrb[24].mxu1 }
 0x2ca   : > { %v9430_v57 = vpop.f32.mrb[25].mxu1 }
 0x2cb   : > { %v9432_v58 = vpop.f32.mrb[26].mxu1 }
 0x2cc   : > { %v9434_v59 = vpop.f32.mrb[27].mxu1 }
 0x2d1   : > { %v9436_v60 = vpop.f32.mrb[28].mxu1 }
 0x2d2   : > { %v9438_v61 = vpop.f32.mrb[29].mxu1 }
 0x2d3   : > { %v9440_v62 = vpop.f32.mrb[30].mxu1 }
 0x2d4   : > { %v9442_v63 = vpop.f32.mrb[31].mxu1 }
 0x2da   : > { %v5265_v0 = vpop.f32.mrb[0].mxu0 }
 0x2db   : > { %v6679_v1 = vadd.f32 %v5265_v0, %v4300_v32  ;;  %v5267_v2 = vpop.f32.mrb[1].mxu0 }
 0x2dc   : > { %v6680_v3 = vadd.f32 %v5267_v2, %v4302_v33  ;;  %v5269_v4 = vpop.f32.mrb[2].mxu0 }
 0x2dd   : > { %v6681_v5 = vadd.f32 %v5269_v4, %v4304_v34  ;;  %v5271_v6 = vpop.f32.mrb[3].mxu0  ;;  %v5722_v9 = vmul.f32 %v6679_v1, %v6679_v1 }
 0x2de   : > { %v6615_v7 = vpack.c.bf16 %v6680_v3, %v6679_v1  ;;  %v6682_v8 = vadd.f32 %v5271_v6, %v4306_v35  ;;  %v5723_v12 = vmul.f32 %v6680_v3, %v6680_v3 }
 0x2df   : > { %v5648_v10 = vadd.f32 %v6681_v5, %v6679_v1  ;;  %v5724_v11 = vmul.f32 %v6681_v5, %v6681_v5 }
 0x2e0   : > { %5616 = vst [vmem:[%s9448_s19] sm:$0xff] %v6615_v7  ;;  %v6616_v13 = vpack.c.bf16 %v6682_v8, %v6681_v5  ;;  %v5685_v14 = vadd.f32 %v6682_v8, %v6680_v3  ;;  %v5725_v15 = vmul.f32 %v6682_v8, %v6682_v8 }
 0x2e1   : > { %v5786_v16 = vadd.f32 %v5724_v11, %v5722_v9 }
 0x2e2   : > { %5617 = vst [vmem:[%s9448_s19 + $0x8] sm:$0xff] %v6616_v13  ;;  %v5823_v17 = vadd.f32 %v5725_v15, %v5723_v12  ;;  %v5275_v18 = vpop.f32.mrb[4].mxu0 }
 0x2e3   : > { %v6683_v19 = vadd.f32 %v5275_v18, %v4310_v36  ;;  %v5277_v20 = vpop.f32.mrb[5].mxu0 }
 0x2e4   : > { %v6684_v21 = vadd.f32 %v5277_v20, %v4312_v37  ;;  %v5279_v22 = vpop.f32.mrb[6].mxu0 }
 0x2e5   : > { %v5649_v23 = vadd.f32 %v6683_v19, %v5648_v10  ;;  %v5726_v24 = vmul.f32 %v6683_v19, %v6683_v19  ;;  %v6685_v25 = vadd.f32 %v5279_v22, %v4314_v38  ;;  %v5281_v26 = vpop.f32.mrb[7].mxu0 }
 0x2e6   : > { %v6617_v27 = vpack.c.bf16 %v6684_v21, %v6683_v19  ;;  %v5686_v28 = vadd.f32 %v6684_v21, %v5685_v14  ;;  %v5727_v29 = vmul.f32 %v6684_v21, %v6684_v21  ;;  %v6686_v30 = vadd.f32 %v5281_v26, %v4316_v39 }
 0x2e7   : > { %v5787_v31 = vadd.f32 %v5786_v16, %v5726_v24  ;;  %v5650_v32 = vadd.f32 %v6685_v25, %v5649_v23  ;;  %v5728_v33 = vmul.f32 %v6685_v25, %v6685_v25 }
 0x2e8   : > { %5618 = vst [vmem:[%s9448_s19 + $0x10] sm:$0xff] %v6617_v27  ;;  %v5824_v34 = vadd.f32 %v5823_v17, %v5727_v29  ;;  %v6618_v35 = vpack.c.bf16 %v6686_v30, %v6685_v25  ;;  %v5687_v0 = vadd.f32 %v6686_v30, %v5686_v28  ;;  %v5729_v36 = vmul.f32 %v6686_v30, %v6686_v30 }
 0x2e9   : > { %v5788_v1 = vadd.f32 %v5787_v31, %v5728_v33 }
 0x2ea   : > { %5619 = vst [vmem:[%s9448_s19 + $0x18] sm:$0xff] %v6618_v35  ;;  %v5825_v37 = vadd.f32 %v5824_v34, %v5729_v36  ;;  %v5285_v2 = vpop.f32.mrb[8].mxu0 }
 0x2eb   : > { %v6687_v38 = vadd.f32 %v5285_v2, %v9396_v40  ;;  %v5287_v3 = vpop.f32.mrb[9].mxu0 }
 0x2ec   : > { %v6688_v4 = vadd.f32 %v5287_v3, %v9398_v41  ;;  %v5289_v5 = vpop.f32.mrb[10].mxu0 }
 0x2ed   : > { %v5651_v39 = vadd.f32 %v6687_v38, %v5650_v32  ;;  %v5730_v6 = vmul.f32 %v6687_v38, %v6687_v38  ;;  %v6689_v7 = vadd.f32 %v5289_v5, %v9400_v42  ;;  %v5291_v8 = vpop.f32.mrb[11].mxu0 }
 0x2ee   : > { %v6619_v9 = vpack.c.bf16 %v6688_v4, %v6687_v38  ;;  %v5688_v10 = vadd.f32 %v6688_v4, %v5687_v0  ;;  %v5731_v11 = vmul.f32 %v6688_v4, %v6688_v4  ;;  %v6690_v12 = vadd.f32 %v5291_v8, %v9402_v43 }
 0x2ef   : > { %v5789_v13 = vadd.f32 %v5788_v1, %v5730_v6  ;;  %v5652_v14 = vadd.f32 %v6689_v7, %v5651_v39  ;;  %v5732_v15 = vmul.f32 %v6689_v7, %v6689_v7 }
 0x2f0   : > { %5620 = vst [vmem:[%s9448_s19 + $0x20] sm:$0xff] %v6619_v9  ;;  %v5826_v40 = vadd.f32 %v5825_v37, %v5731_v11  ;;  %v6620_v16 = vpack.c.bf16 %v6690_v12, %v6689_v7  ;;  %v5689_v17 = vadd.f32 %v6690_v12, %v5688_v10  ;;  %v5733_v41 = vmul.f32 %v6690_v12, %v6690_v12 }
 0x2f1   : > { %v5790_v18 = vadd.f32 %v5789_v13, %v5732_v15 }
 0x2f2   : > { %5621 = vst [vmem:[%s9448_s19 + $0x28] sm:$0xff] %v6620_v16  ;;  %v5827_v19 = vadd.f32 %v5826_v40, %v5733_v41  ;;  %v5295_v20 = vpop.f32.mrb[12].mxu0 }
 0x2f3   : > { %v6691_v42 = vadd.f32 %v5295_v20, %v9404_v44  ;;  %v5297_v21 = vpop.f32.mrb[13].mxu0 }
 0x2f4   : > { %v6692_v22 = vadd.f32 %v5297_v21, %v9406_v45  ;;  %v5299_v23 = vpop.f32.mrb[14].mxu0 }
 0x2f5   : > { %v5653_v43 = vadd.f32 %v6691_v42, %v5652_v14  ;;  %v5734_v24 = vmul.f32 %v6691_v42, %v6691_v42  ;;  %v6693_v25 = vadd.f32 %v5299_v23, %v9408_v46  ;;  %v5301_v26 = vpop.f32.mrb[15].mxu0 }
 0x2f6   : > { %v6621_v27 = vpack.c.bf16 %v6692_v22, %v6691_v42  ;;  %v5690_v28 = vadd.f32 %v6692_v22, %v5689_v17  ;;  %v5735_v29 = vmul.f32 %v6692_v22, %v6692_v22  ;;  %v6694_v30 = vadd.f32 %v5301_v26, %v9410_v47 }
 0x2f7   : > { %v5791_v31 = vadd.f32 %v5790_v18, %v5734_v24  ;;  %v5654_v32 = vadd.f32 %v6693_v25, %v5653_v43  ;;  %v5736_v33 = vmul.f32 %v6693_v25, %v6693_v25 }
 0x2f8   : > { %5622 = vst [vmem:[%s9448_s19 + $0x30] sm:$0xff] %v6621_v27  ;;  %v5828_v44 = vadd.f32 %v5827_v19, %v5735_v29  ;;  %v6622_v34 = vpack.c.bf16 %v6694_v30, %v6693_v25  ;;  %v5691_v35 = vadd.f32 %v6694_v30, %v5690_v28  ;;  %v5737_v45 = vmul.f32 %v6694_v30, %v6694_v30 }
 0x2f9   : > { %v5792_v0 = vadd.f32 %v5791_v31, %v5736_v33 }
 0x2fa   : > { %5623 = vst [vmem:[%s9448_s19 + $0x38] sm:$0xff] %v6622_v34  ;;  %v5829_v36 = vadd.f32 %v5828_v44, %v5737_v45  ;;  %v5305_v1 = vpop.f32.mrb[16].mxu0 }
 0x2fb   : > { %v6695_v46 = vadd.f32 %v5305_v1, %v9412_v48  ;;  %v5307_v37 = vpop.f32.mrb[17].mxu0 }
 0x2fc   : > { %v6696_v2 = vadd.f32 %v5307_v37, %v9414_v49  ;;  %v5309_v38 = vpop.f32.mrb[18].mxu0 }
 0x2fd   : > { %v5655_v47 = vadd.f32 %v6695_v46, %v5654_v32  ;;  %v5738_v3 = vmul.f32 %v6695_v46, %v6695_v46  ;;  %v6697_v4 = vadd.f32 %v5309_v38, %v9416_v50  ;;  %v5311_v5 = vpop.f32.mrb[19].mxu0 }
 0x2fe   : > { %v6623_v39 = vpack.c.bf16 %v6696_v2, %v6695_v46  ;;  %v5692_v6 = vadd.f32 %v6696_v2, %v5691_v35  ;;  %v5739_v7 = vmul.f32 %v6696_v2, %v6696_v2  ;;  %v6698_v8 = vadd.f32 %v5311_v5, %v9418_v51 }
 0x2ff   : > { %v5793_v9 = vadd.f32 %v5792_v0, %v5738_v3  ;;  %v5656_v10 = vadd.f32 %v6697_v4, %v5655_v47  ;;  %v5740_v11 = vmul.f32 %v6697_v4, %v6697_v4 }
 0x300   : > { %5624 = vst [vmem:[%s9448_s19 + $0x40] sm:$0xff] %v6623_v39  ;;  %v5830_v48 = vadd.f32 %v5829_v36, %v5739_v7  ;;  %v6624_v12 = vpack.c.bf16 %v6698_v8, %v6697_v4  ;;  %v5693_v13 = vadd.f32 %v6698_v8, %v5692_v6  ;;  %v5741_v49 = vmul.f32 %v6698_v8, %v6698_v8 }
 0x301   : > { %v5794_v14 = vadd.f32 %v5793_v9, %v5740_v11 }
 0x302   : > { %5625 = vst [vmem:[%s9448_s19 + $0x48] sm:$0xff] %v6624_v12  ;;  %v5831_v15 = vadd.f32 %v5830_v48, %v5741_v49  ;;  %v5315_v40 = vpop.f32.mrb[20].mxu0 }
 0x303   : > { %v6699_v50 = vadd.f32 %v5315_v40, %v9420_v52  ;;  %v5317_v16 = vpop.f32.mrb[21].mxu0 }
 0x304   : > { %v6700_v17 = vadd.f32 %v5317_v16, %v9422_v53  ;;  %v5319_v41 = vpop.f32.mrb[22].mxu0 }
 0x305   : > { %v5657_v51 = vadd.f32 %v6699_v50, %v5656_v10  ;;  %v5742_v18 = vmul.f32 %v6699_v50, %v6699_v50  ;;  %v6701_v19 = vadd.f32 %v5319_v41, %v9424_v54  ;;  %v5321_v20 = vpop.f32.mrb[23].mxu0 }
 0x306   : > { %v6625_v42 = vpack.c.bf16 %v6700_v17, %v6699_v50  ;;  %v5694_v21 = vadd.f32 %v6700_v17, %v5693_v13  ;;  %v5743_v22 = vmul.f32 %v6700_v17, %v6700_v17  ;;  %v6702_v23 = vadd.f32 %v5321_v20, %v9426_v55 }
 0x307   : > { %v5795_v43 = vadd.f32 %v5794_v14, %v5742_v18  ;;  %v5658_v24 = vadd.f32 %v6701_v19, %v5657_v51  ;;  %v5744_v25 = vmul.f32 %v6701_v19, %v6701_v19 }
 0x308   : > { %5626 = vst [vmem:[%s9448_s19 + $0x50] sm:$0xff] %v6625_v42  ;;  %v5832_v52 = vadd.f32 %v5831_v15, %v5743_v22  ;;  %v6626_v26 = vpack.c.bf16 %v6702_v23, %v6701_v19  ;;  %v5695_v27 = vadd.f32 %v6702_v23, %v5694_v21  ;;  %v5745_v53 = vmul.f32 %v6702_v23, %v6702_v23 }
 0x309   : > { %v5796_v28 = vadd.f32 %v5795_v43, %v5744_v25 }
 0x30a   : > { %5627 = vst [vmem:[%s9448_s19 + $0x58] sm:$0xff] %v6626_v26  ;;  %v5833_v29 = vadd.f32 %v5832_v52, %v5745_v53  ;;  %v5325_v30 = vpop.f32.mrb[24].mxu0 }
 0x30b   : > { %v6703_v54 = vadd.f32 %v5325_v30, %v9428_v56  ;;  %v5327_v31 = vpop.f32.mrb[25].mxu0 }
 0x30c   : > { %v6704_v32 = vadd.f32 %v5327_v31, %v9430_v57  ;;  %v5329_v33 = vpop.f32.mrb[26].mxu0 }
 0x30d   : > { %v5659_v55 = vadd.f32 %v6703_v54, %v5658_v24  ;;  %v5746_v44 = vmul.f32 %v6703_v54, %v6703_v54  ;;  %v6705_v34 = vadd.f32 %v5329_v33, %v9432_v58  ;;  %v5331_v35 = vpop.f32.mrb[27].mxu0 }
 0x30e   : > { %v6627_v45 = vpack.c.bf16 %v6704_v32, %v6703_v54  ;;  %v5696_v0 = vadd.f32 %v6704_v32, %v5695_v27  ;;  %v5747_v36 = vmul.f32 %v6704_v32, %v6704_v32  ;;  %v6706_v1 = vadd.f32 %v5331_v35, %v9434_v59 }
 0x30f   : > { %v5797_v46 = vadd.f32 %v5796_v28, %v5746_v44  ;;  %v5660_v37 = vadd.f32 %v6705_v34, %v5659_v55  ;;  %v5748_v2 = vmul.f32 %v6705_v34, %v6705_v34 }
 0x310   : > { %5628 = vst [vmem:[%s9448_s19 + $0x60] sm:$0xff] %v6627_v45  ;;  %v5834_v56 = vadd.f32 %v5833_v29, %v5747_v36  ;;  %v6628_v38 = vpack.c.bf16 %v6706_v1, %v6705_v34  ;;  %v5697_v47 = vadd.f32 %v6706_v1, %v5696_v0  ;;  %v5749_v57 = vmul.f32 %v6706_v1, %v6706_v1 }
 0x311   : > { %v5798_v3 = vadd.f32 %v5797_v46, %v5748_v2 }
 0x312   : > { %5629 = vst [vmem:[%s9448_s19 + $0x68] sm:$0xff] %v6628_v38  ;;  %v5835_v4 = vadd.f32 %v5834_v56, %v5749_v57  ;;  %v5335_v5 = vpop.f32.mrb[28].mxu0 }
 0x313   : > { %v6707_v58 = vadd.f32 %v5335_v5, %v9436_v60  ;;  %v5337_v39 = vpop.f32.mrb[29].mxu0 }
 0x314   : > { %v6708_v6 = vadd.f32 %v5337_v39, %v9438_v61  ;;  %v5339_v7 = vpop.f32.mrb[30].mxu0 }
 0x315   : > { %v5661_v59 = vadd.f32 %v6707_v58, %v5660_v37  ;;  %v5750_v8 = vmul.f32 %v6707_v58, %v6707_v58  ;;  %v6709_v9 = vadd.f32 %v5339_v7, %v9440_v62  ;;  %v5341_v10 = vpop.f32.mrb[31].mxu0 }
 0x316   : > { %v6629_v11 = vpack.c.bf16 %v6708_v6, %v6707_v58  ;;  %v5698_v48 = vadd.f32 %v6708_v6, %v5697_v47  ;;  %v5751_v12 = vmul.f32 %v6708_v6, %v6708_v6  ;;  %v6710_v13 = vadd.f32 %v5341_v10, %v9442_v63 }
 0x317   : > { %v5799_v49 = vadd.f32 %v5798_v3, %v5750_v8  ;;  %v5662_v14 = vadd.f32 %v6709_v9, %v5661_v59  ;;  %v5752_v15 = vmul.f32 %v6709_v9, %v6709_v9 }
 0x318   : > { %5630 = vst [vmem:[%s9448_s19 + $0x70] sm:$0xff] %v6629_v11  ;;  %v5836_v60 = vadd.f32 %v5835_v4, %v5751_v12  ;;  %v6630_v40 = vpack.c.bf16 %v6710_v13, %v6709_v9  ;;  %v5699_v50 = vadd.f32 %v6710_v13, %v5698_v48  ;;  %v5753_v61 = vmul.f32 %v6710_v13, %v6710_v13 }
 0x319   : > { %v5800_v16 = vadd.f32 %v5799_v49, %v5752_v15  ;;  %v4573_v41 = vpop.f32.mrb[32].mxu1 }
 0x31a   : > { %5631 = vst [vmem:[%s9448_s19 + $0x78] sm:$0xff] %v6630_v40  ;;  %v5837_v17 = vadd.f32 %v5836_v60, %v5753_v61  ;;  %v5345_v51 = vpop.f32.mrb[32].mxu0  ;;  %v4575_v18 = vpop.f32.mrb[33].mxu1 }
 0x31b   : > { %v6711_v62 = vadd.f32 %v5345_v51, %v4573_v41  ;;  %v5347_v19 = vpop.f32.mrb[33].mxu0  ;;  %v4577_v42 = vpop.f32.mrb[34].mxu1 }
 0x31c   : > { %v6712_v20 = vadd.f32 %v5347_v19, %v4575_v18  ;;  %v5349_v63 = vpop.f32.mrb[34].mxu0  ;;  %v4579_v43 = vpop.f32.mrb[35].mxu1 }
 0x31d   : > { %v5663_v21 = vadd.f32 %v6711_v62, %v5662_v14  ;;  %v5754_v22 = vmul.f32 %v6711_v62, %v6711_v62  ;;  %v6713_v23 = vadd.f32 %v5349_v63, %v4577_v42  ;;  %v5351_v24 = vpop.f32.mrb[35].mxu0 }
 0x31e   : > { %v6631_v25 = vpack.c.bf16 %v6712_v20, %v6711_v62  ;;  %v5700_v52 = vadd.f32 %v6712_v20, %v5699_v50  ;;  %v5755_v26 = vmul.f32 %v6712_v20, %v6712_v20  ;;  %v6714_v27 = vadd.f32 %v5351_v24, %v4579_v43 }
 0x31f   : > { %v5801_v53 = vadd.f32 %v5800_v16, %v5754_v22  ;;  %v5664_v28 = vadd.f32 %v6713_v23, %v5663_v21  ;;  %v5756_v29 = vmul.f32 %v6713_v23, %v6713_v23 }
 0x320   : > { %5632 = vst [vmem:[%s9448_s19 + $0x80] sm:$0xff] %v6631_v25  ;;  %v5838_v30 = vadd.f32 %v5837_v17, %v5755_v26  ;;  %v6632_v54 = vpack.c.bf16 %v6714_v27, %v6713_v23  ;;  %v5701_v31 = vadd.f32 %v6714_v27, %v5700_v52  ;;  %v5757_v32 = vmul.f32 %v6714_v27, %v6714_v27 }
 0x321   : > { %v5802_v33 = vadd.f32 %v5801_v53, %v5756_v29  ;;  %v4583_v44 = vpop.f32.mrb[36].mxu1 }
 0x322   : > { %5633 = vst [vmem:[%s9448_s19 + $0x88] sm:$0xff] %v6632_v54  ;;  %v5839_v55 = vadd.f32 %v5838_v30, %v5757_v32  ;;  %v5355_v34 = vpop.f32.mrb[36].mxu0  ;;  %v4585_v45 = vpop.f32.mrb[37].mxu1 }
 0x323   : > { %v6715_v35 = vadd.f32 %v5355_v34, %v4583_v44  ;;  %v5357_v0 = vpop.f32.mrb[37].mxu0  ;;  %v4587_v1 = vpop.f32.mrb[38].mxu1 }
 0x324   : > { %v6716_v36 = vadd.f32 %v5357_v0, %v4585_v45  ;;  %v5359_v46 = vpop.f32.mrb[38].mxu0  ;;  %v4589_v38 = vpop.f32.mrb[39].mxu1 }
 0x325   : > { %v5665_v37 = vadd.f32 %v6715_v35, %v5664_v28  ;;  %v5758_v2 = vmul.f32 %v6715_v35, %v6715_v35  ;;  %v6717_v56 = vadd.f32 %v5359_v46, %v4587_v1  ;;  %v5361_v47 = vpop.f32.mrb[39].mxu0 }
 0x326   : > { %v6633_v57 = vpack.c.bf16 %v6716_v36, %v6715_v35  ;;  %v5702_v3 = vadd.f32 %v6716_v36, %v5701_v31  ;;  %v5759_v4 = vmul.f32 %v6716_v36, %v6716_v36  ;;  %v6718_v5 = vadd.f32 %v5361_v47, %v4589_v38 }
 0x327   : > { %v5803_v58 = vadd.f32 %v5802_v33, %v5758_v2  ;;  %v5666_v39 = vadd.f32 %v6717_v56, %v5665_v37  ;;  %v5760_v6 = vmul.f32 %v6717_v56, %v6717_v56 }
 0x328   : > { %5634 = vst [vmem:[%s9448_s19 + $0x90] sm:$0xff] %v6633_v57  ;;  %v5840_v7 = vadd.f32 %v5839_v55, %v5759_v4  ;;  %v6634_v59 = vpack.c.bf16 %v6718_v5, %v6717_v56  ;;  %v5703_v8 = vadd.f32 %v6718_v5, %v5702_v3  ;;  %v5761_v9 = vmul.f32 %v6718_v5, %v6718_v5 }
 0x329   : > { %v5804_v10 = vadd.f32 %v5803_v58, %v5760_v6  ;;  %v4593_v48 = vpop.f32.mrb[40].mxu1 }
 0x32a   : > { %5635 = vst [vmem:[%s9448_s19 + $0x98] sm:$0xff] %v6634_v59  ;;  %v5841_v11 = vadd.f32 %v5840_v7, %v5761_v9  ;;  %v5365_v12 = vpop.f32.mrb[40].mxu0  ;;  %v4595_v49 = vpop.f32.mrb[41].mxu1 }
 0x32b   : > { %v6719_v13 = vadd.f32 %v5365_v12, %v4593_v48  ;;  %v5367_v14 = vpop.f32.mrb[41].mxu0  ;;  %v4597_v60 = vpop.f32.mrb[42].mxu1 }
 0x32c   : > { %v6720_v15 = vadd.f32 %v5367_v14, %v4595_v49  ;;  %v5369_v40 = vpop.f32.mrb[42].mxu0  ;;  %v4599_v17 = vpop.f32.mrb[43].mxu1 }
 0x32d   : > { %v5667_v50 = vadd.f32 %v6719_v13, %v5666_v39  ;;  %v5762_v61 = vmul.f32 %v6719_v13, %v6719_v13  ;;  %v6721_v16 = vadd.f32 %v5369_v40, %v4597_v60  ;;  %v5371_v41 = vpop.f32.mrb[43].mxu0 }
 0x32e   : > { %v6635_v51 = vpack.c.bf16 %v6720_v15, %v6719_v13  ;;  %v5704_v62 = vadd.f32 %v6720_v15, %v5703_v8  ;;  %v5763_v18 = vmul.f32 %v6720_v15, %v6720_v15  ;;  %v6722_v19 = vadd.f32 %v5371_v41, %v4599_v17 }
 0x32f   : > { %v5805_v20 = vadd.f32 %v5804_v10, %v5762_v61  ;;  %v5668_v42 = vadd.f32 %v6721_v16, %v5667_v50  ;;  %v5764_v63 = vmul.f32 %v6721_v16, %v6721_v16 }
 0x330   : > { %5636 = vst [vmem:[%s9448_s19 + $0xa0] sm:$0xff] %v6635_v51  ;;  %v5842_v21 = vadd.f32 %v5841_v11, %v5763_v18  ;;  %v6636_v22 = vpack.c.bf16 %v6722_v19, %v6721_v16  ;;  %v5705_v23 = vadd.f32 %v6722_v19, %v5704_v62  ;;  %v5765_v43 = vmul.f32 %v6722_v19, %v6722_v19 }
 0x331   : > { %v5806_v24 = vadd.f32 %v5805_v20, %v5764_v63  ;;  %v4603_v52 = vpop.f32.mrb[44].mxu1 }
 0x332   : > { %5637 = vst [vmem:[%s9448_s19 + $0xa8] sm:$0xff] %v6636_v22  ;;  %v5843_v25 = vadd.f32 %v5842_v21, %v5765_v43  ;;  %v5375_v26 = vpop.f32.mrb[44].mxu0  ;;  %v4605_v53 = vpop.f32.mrb[45].mxu1 }
 0x333   : > { %v6723_v27 = vadd.f32 %v5375_v26, %v4603_v52  ;;  %v5377_v28 = vpop.f32.mrb[45].mxu0  ;;  %v4607_v30 = vpop.f32.mrb[46].mxu1 }
 0x334   : > { %v6724_v29 = vadd.f32 %v5377_v28, %v4605_v53  ;;  %v5379_v54 = vpop.f32.mrb[46].mxu0  ;;  %v4609_v55 = vpop.f32.mrb[47].mxu1 }
 0x335   : > { %v5669_v31 = vadd.f32 %v6723_v27, %v5668_v42  ;;  %v5766_v32 = vmul.f32 %v6723_v27, %v6723_v27  ;;  %v6725_v33 = vadd.f32 %v5379_v54, %v4607_v30  ;;  %v5381_v44 = vpop.f32.mrb[47].mxu0 }
 0x336   : > { %v6637_v34 = vpack.c.bf16 %v6724_v29, %v6723_v27  ;;  %v5706_v35 = vadd.f32 %v6724_v29, %v5705_v23  ;;  %v5767_v45 = vmul.f32 %v6724_v29, %v6724_v29  ;;  %v6726_v0 = vadd.f32 %v5381_v44, %v4609_v55 }
 0x337   : > { %v5807_v36 = vadd.f32 %v5806_v24, %v5766_v32  ;;  %v5670_v1 = vadd.f32 %v6725_v33, %v5669_v31  ;;  %v5768_v46 = vmul.f32 %v6725_v33, %v6725_v33 }
 0x338   : > { %5638 = vst [vmem:[%s9448_s19 + $0xb0] sm:$0xff] %v6637_v34  ;;  %v5844_v37 = vadd.f32 %v5843_v25, %v5767_v45  ;;  %v6638_v2 = vpack.c.bf16 %v6726_v0, %v6725_v33  ;;  %v5707_v56 = vadd.f32 %v6726_v0, %v5706_v35  ;;  %v5769_v38 = vmul.f32 %v6726_v0, %v6726_v0 }
 0x339   : > { %v5808_v47 = vadd.f32 %v5807_v36, %v5768_v46  ;;  %v4613_v3 = vpop.f32.mrb[48].mxu1 }
 0x33a   : > { %5639 = vst [vmem:[%s9448_s19 + $0xb8] sm:$0xff] %v6638_v2  ;;  %v5845_v57 = vadd.f32 %v5844_v37, %v5769_v38  ;;  %v5385_v4 = vpop.f32.mrb[48].mxu0  ;;  %v4615_v58 = vpop.f32.mrb[49].mxu1 }
 0x33b   : > { %v6727_v5 = vadd.f32 %v5385_v4, %v4613_v3  ;;  %v5387_v39 = vpop.f32.mrb[49].mxu0  ;;  %v4617_v7 = vpop.f32.mrb[50].mxu1 }
 0x33c   : > { %v6728_v6 = vadd.f32 %v5387_v39, %v4615_v58  ;;  %v5389_v59 = vpop.f32.mrb[50].mxu0  ;;  %v4619_v11 = vpop.f32.mrb[51].mxu1 }
 0x33d   : > { %v5671_v8 = vadd.f32 %v6727_v5, %v5670_v1  ;;  %v5770_v9 = vmul.f32 %v6727_v5, %v6727_v5  ;;  %v6729_v10 = vadd.f32 %v5389_v59, %v4617_v7  ;;  %v5391_v48 = vpop.f32.mrb[51].mxu0 }
 0x33e   : > { %v6639_v12 = vpack.c.bf16 %v6728_v6, %v6727_v5  ;;  %v5708_v13 = vadd.f32 %v6728_v6, %v5707_v56  ;;  %v5771_v49 = vmul.f32 %v6728_v6, %v6728_v6  ;;  %v6730_v14 = vadd.f32 %v5391_v48, %v4619_v11 }
 0x33f   : > { %v5809_v15 = vadd.f32 %v5808_v47, %v5770_v9  ;;  %v5672_v60 = vadd.f32 %v6729_v10, %v5671_v8  ;;  %v5772_v40 = vmul.f32 %v6729_v10, %v6729_v10 }
 0x340   : > { %5640 = vst [vmem:[%s9448_s19 + $0xc0] sm:$0xff] %v6639_v12  ;;  %v5846_v50 = vadd.f32 %v5845_v57, %v5771_v49  ;;  %v6640_v61 = vpack.c.bf16 %v6730_v14, %v6729_v10  ;;  %v5709_v16 = vadd.f32 %v6730_v14, %v5708_v13  ;;  %v5773_v17 = vmul.f32 %v6730_v14, %v6730_v14 }
 0x341   : > { %v5810_v41 = vadd.f32 %v5809_v15, %v5772_v40  ;;  %v4623_v62 = vpop.f32.mrb[52].mxu1 }
 0x342   : > { %5641 = vst [vmem:[%s9448_s19 + $0xc8] sm:$0xff] %v6640_v61  ;;  %v5847_v51 = vadd.f32 %v5846_v50, %v5773_v17  ;;  %v5395_v18 = vpop.f32.mrb[52].mxu0  ;;  %v4625_v20 = vpop.f32.mrb[53].mxu1 }
 0x343   : > { %v6731_v19 = vadd.f32 %v5395_v18, %v4623_v62  ;;  %v5397_v42 = vpop.f32.mrb[53].mxu0  ;;  %v4627_v21 = vpop.f32.mrb[54].mxu1 }
 0x344   : > { %v6732_v63 = vadd.f32 %v5397_v42, %v4625_v20  ;;  %v5399_v22 = vpop.f32.mrb[54].mxu0  ;;  %v4629_v25 = vpop.f32.mrb[55].mxu1 }
 0x345   : > { %v5673_v23 = vadd.f32 %v6731_v19, %v5672_v60  ;;  %v5774_v43 = vmul.f32 %v6731_v19, %v6731_v19  ;;  %v6733_v24 = vadd.f32 %v5399_v22, %v4627_v21  ;;  %v5401_v52 = vpop.f32.mrb[55].mxu0 }
 0x346   : > { %v6641_v26 = vpack.c.bf16 %v6732_v63, %v6731_v19  ;;  %v5710_v27 = vadd.f32 %v6732_v63, %v5709_v16  ;;  %v5775_v53 = vmul.f32 %v6732_v63, %v6732_v63  ;;  %v6734_v28 = vadd.f32 %v5401_v52, %v4629_v25 }
 0x347   : > { %v5811_v29 = vadd.f32 %v5810_v41, %v5774_v43  ;;  %v5674_v30 = vadd.f32 %v6733_v24, %v5673_v23  ;;  %v5776_v54 = vmul.f32 %v6733_v24, %v6733_v24 }
 0x348   : > { %5642 = vst [vmem:[%s9448_s19 + $0xd0] sm:$0xff] %v6641_v26  ;;  %v5848_v31 = vadd.f32 %v5847_v51, %v5775_v53  ;;  %v6642_v32 = vpack.c.bf16 %v6734_v28, %v6733_v24  ;;  %v5711_v33 = vadd.f32 %v6734_v28, %v5710_v27  ;;  %v5777_v55 = vmul.f32 %v6734_v28, %v6734_v28 }
 0x349   : > { %v5812_v44 = vadd.f32 %v5811_v29, %v5776_v54  ;;  %v4633_v35 = vpop.f32.mrb[56].mxu1 }
 0x34a   : > { %5643 = vst [vmem:[%s9448_s19 + $0xd8] sm:$0xff] %v6642_v32  ;;  %v5849_v34 = vadd.f32 %v5848_v31, %v5777_v55  ;;  %v5405_v45 = vpop.f32.mrb[56].mxu0  ;;  %v4635_v36 = vpop.f32.mrb[57].mxu1 }
 0x34b   : > { %v6735_v0 = vadd.f32 %v5405_v45, %v4633_v35  ;;  %v5407_v1 = vpop.f32.mrb[57].mxu0  ;;  %v4637_v37 = vpop.f32.mrb[58].mxu1 }
 0x34c   : > { %v6736_v46 = vadd.f32 %v5407_v1, %v4635_v36  ;;  %v5409_v2 = vpop.f32.mrb[58].mxu0  ;;  %v4639_v57 = vpop.f32.mrb[59].mxu1 }
 0x34d   : > { %v5675_v56 = vadd.f32 %v6735_v0, %v5674_v30  ;;  %v5778_v38 = vmul.f32 %v6735_v0, %v6735_v0  ;;  %v6737_v47 = vadd.f32 %v5409_v2, %v4637_v37  ;;  %v5411_v3 = vpop.f32.mrb[59].mxu0 }
 0x34e   : > { %v6643_v4 = vpack.c.bf16 %v6736_v46, %v6735_v0  ;;  %v5712_v5 = vadd.f32 %v6736_v46, %v5711_v33  ;;  %v5779_v58 = vmul.f32 %v6736_v46, %v6736_v46  ;;  %v6738_v39 = vadd.f32 %v5411_v3, %v4639_v57 }
 0x34f   : > { %v5813_v6 = vadd.f32 %v5812_v44, %v5778_v38  ;;  %v5676_v7 = vadd.f32 %v6737_v47, %v5675_v56  ;;  %v5780_v59 = vmul.f32 %v6737_v47, %v6737_v47 }
 0x350   : > { %5644 = vst [vmem:[%s9448_s19 + $0xe0] sm:$0xff] %v6643_v4  ;;  %v5850_v8 = vadd.f32 %v5849_v34, %v5779_v58  ;;  %v6644_v9 = vpack.c.bf16 %v6738_v39, %v6737_v47  ;;  %v5713_v10 = vadd.f32 %v6738_v39, %v5712_v5  ;;  %v5781_v11 = vmul.f32 %v6738_v39, %v6738_v39 }
 0x351   : > { %v5814_v48 = vadd.f32 %v5813_v6, %v5780_v59  ;;  %v4643_v13 = vpop.f32.mrb[60].mxu1 }
 0x352   : > { %5645 = vst [vmem:[%s9448_s19 + $0xe8] sm:$0xff] %v6644_v9  ;;  %v5851_v12 = vadd.f32 %v5850_v8, %v5781_v11  ;;  %v5415_v49 = vpop.f32.mrb[60].mxu0  ;;  %v4645_v15 = vpop.f32.mrb[61].mxu1 }
 0x353   : > { %v6739_v14 = vadd.f32 %v5415_v49, %v4643_v13  ;;  %v5417_v60 = vpop.f32.mrb[61].mxu0  ;;  %v4647_v50 = vpop.f32.mrb[62].mxu1 }
 0x354   : > { %v6740_v40 = vadd.f32 %v5417_v60, %v4645_v15  ;;  %v5419_v61 = vpop.f32.mrb[62].mxu0  ;;  %v4649_v51 = vpop.f32.mrb[63].mxu1 }
 0x355   : > { %v5677_v16 = vadd.f32 %v6739_v14, %v5676_v7  ;;  %v5782_v17 = vmul.f32 %v6739_v14, %v6739_v14  ;;  %v6741_v41 = vadd.f32 %v5419_v61, %v4647_v50  ;;  %v5421_v62 = vpop.f32.mrb[63].mxu0 }
 0x356   : > { %v6645_v18 = vpack.c.bf16 %v6740_v40, %v6739_v14  ;;  %v5714_v19 = vadd.f32 %v6740_v40, %v5713_v10  ;;  %v5783_v20 = vmul.f32 %v6740_v40, %v6740_v40  ;;  %v6742_v42 = vadd.f32 %v5421_v62, %v4649_v51 }
 0x357   : > { %v5815_v63 = vadd.f32 %v5814_v48, %v5782_v17  ;;  %v5678_v21 = vadd.f32 %v6741_v41, %v5677_v16  ;;  %v5784_v22 = vmul.f32 %v6741_v41, %v6741_v41 }
 0x358   : > { %5646 = vst [vmem:[%s9448_s19 + $0xf0] sm:$0xff] %v6645_v18  ;;  %v5852_v23 = vadd.f32 %v5851_v12, %v5783_v20  ;;  %v6646_v43 = vpack.c.bf16 %v6742_v42, %v6741_v41  ;;  %v5715_v24 = vadd.f32 %v6742_v42, %v5714_v19  ;;  %v5785_v25 = vmul.f32 %v6742_v42, %v6742_v42 }
 0x359   : > { %v5679_v52 = vrot.slane %v5678_v21, 4  ;;  %v5816_v26 = vadd.f32 %v5815_v63, %v5784_v22 }
 0x35a   : > { %5647 = vst [vmem:[%s9448_s19 + $0xf8] sm:$0xff] %v6646_v43  ;;  %v5716_v27 = vrot.slane %v5715_v24, 4  ;;  %v5853_v53 = vadd.f32 %v5852_v23, %v5785_v25 }
 0x35b   : > { %v5680_v28 = vadd.f32 %v5679_v52, %v5678_v21  ;;  %v5817_v29 = vrot.slane %v5816_v26, 4 }
 0x35c   : > { %v5717_v30 = vadd.f32 %v5716_v27, %v5715_v24  ;;  %v5854_v54 = vrot.slane %v5853_v53, 4 }
 0x35d   : > { %v5681_v31 = vrot.slane %v5680_v28, 2  ;;  %v5818_v32 = vadd.f32 %v5817_v29, %v5816_v26 }
 0x35e   : > { %v5718_v33 = vrot.slane %v5717_v30, 2  ;;  %v5855_v55 = vadd.f32 %v5854_v54, %v5853_v53 }
 0x35f   : > { %v5682_v44 = vadd.f32 %v5681_v31, %v5680_v28  ;;  %v5819_v34 = vrot.slane %v5818_v32, 2 }
 0x360   : > { %v5719_v35 = vadd.f32 %v5718_v33, %v5717_v30  ;;  %v5856_v45 = vrot.slane %v5855_v55, 2 }
 0x361   : > { %v5683_v0 = vrot.slane %v5682_v44, 1  ;;  %v5820_v36 = vadd.f32 %v5819_v34, %v5818_v32 }
 0x362   : > { %v5720_v1 = vrot.slane %v5719_v35, 1  ;;  %v5857_v46 = vadd.f32 %v5856_v45, %v5855_v55 }
 0x363   : > { %v5684_v37 = vadd.f32 %v5683_v0, %v5682_v44  ;;  %v5821_v2 = vrot.slane %v5820_v36, 1 }
 0x364   : > { %v5721_v56 = vadd.f32 %v5720_v1, %v5719_v35  ;;  %v5858_v38 = vrot.slane %v5857_v46, 1 }
 0x365   : > { %v5822_v47 = vadd.f32 %v5821_v2, %v5820_v36  ;;  %5860 = vst [vmem:[%s225_s22] sm:$0xff] %v5684_v37 }
 0x366   : > { %v5859_v57 = vadd.f32 %v5858_v38, %v5857_v46  ;;  %5861 = vst [vmem:[%s225_s22 + $0x8] sm:$0xff] %v5721_v56 }
 0x367   : > { %5862 = vst [vmem:[%s230_s25] sm:$0xff] %v5822_v47 }
 0x368   : > { %5863 = vst [vmem:[%s230_s25 + $0x8] sm:$0xff] %v5859_v57 }
 0x369 PF: > { %s15_s15 = sadd.s32 1, %s8102_s15  }
 0x36a   : > { %p12_p5 = scmp.ge.s32.totalorder %s15_s15, 4  }
 0x36c   :  { %14 = sbr.rel (!%p12_p5) target bundleno = 1 (0x1), region = 82 }

// kernel: reduction_a_forward.16
= control target key start
LH: loop header
LB: loop body
LE: loop exit
PB: predicated region body
PF: predicated region fallthrough
CT: control target
= control target key end

     0   :  { %v42_v0 = vlaneseq  ;;  %s414_s1 = inlined_call_operand.vmem [shape: f32[1,256], index: 1, kind: input, shape index: {}]   ;;  %s415_s2 = inlined_call_operand.vmem [shape: f32[1,256], index: 2, kind: input, shape index: {}]   ;;  %s416_s0 = inlined_call_operand.vmem [shape: f32[104,256], index: 0, kind: input, shape index: {}]   ;;  %s417_s3 = inlined_call_operand.vmem [shape: f32[104,256], index: 3, kind: output, shape index: {}]  }
   0x1   :  { %v40_v2 = vld [vmem:[%s414_s1] sm:$0x3]  ;;  %v15_v6 = vld [vmem:[%s416_s0 + $0x8] sm:$0xff]  ;;  %v16_v8 = vld [vmem:[%s416_s0 + $0x10] sm:$0xff] }
   0x2   :  { %v43_v1 = vshrl.u32 %v42_v0, 7  ;;  %v78_v3 = vld [vmem:[%s415_s2] sm:$0x3]  ;;  %v17_v9 = vld [vmem:[%s416_s0 + $0x18] sm:$0xff]  ;;  %v19_v15 = vld [vmem:[%s416_s0 + $0x28] sm:$0xff] }
   0x3   :  { %v14_v4 = vld [vmem:[%s416_s0] sm:$0xff]  ;;  %v20_v16 = vld [vmem:[%s416_s0 + $0x30] sm:$0xff]  ;;  %v21_v17 = vld [vmem:[%s416_s0 + $0x38] sm:$0xff] }
   0x4   :  { %v44_v5 = vsub.s32 0, %v43_v1  ;;  %v48_v7 = vsub.s32 1, %v43_v1  ;;  %v18_v10 = vld [vmem:[%s416_s0 + $0x20] sm:$0xff]  ;;  %v23_v31 = vld [vmem:[%s416_s0 + $0x48] sm:$0xff]  ;;  %v24_v32 = vld [vmem:[%s416_s0 + $0x50] sm:$0xff] }
   0x5   :  { %v22_v30 = vld [vmem:[%s416_s0 + $0x40] sm:$0xff]  ;;  %v25_v37 = vld [vmem:[%s416_s0 + $0x58] sm:$0xff]  ;;  %v27_v39 = vld [vmem:[%s416_s0 + $0x68] sm:$0xff] }
   0x6   :  { %v213_v11 = vrot.slane %v40_v2, %v44_v5  ;;  %v215_v12 = vrot.slane %v78_v3, %v44_v5  ;;  %v217_v13 = vrot.slane %v40_v2, %v48_v7  ;;  %v219_v14 = vrot.slane %v78_v3, %v48_v7  ;;  %v26_v38 = vld [vmem:[%s416_s0 + $0x60] sm:$0xff]  ;;  %v28_v44 = vld [vmem:[%s416_s0 + $0x70] sm:$0xff]  ;;  %v29_v45 = vld [vmem:[%s416_s0 + $0x78] sm:$0xff] }
   0x7   :  { %v30_v62 = vld [vmem:[%s416_s0 + $0x80] sm:$0xff]  ;;  %v31_v63 = vld [vmem:[%s416_s0 + $0x88] sm:$0xff]  ;;  %v32_v0 = vld [vmem:[%s416_s0 + $0x90] sm:$0xff] }
   0x8   :  { %v52_v18 = vmul.f32 %v213_v11, %v14_v4  ;;  %v53_v19 = vmul.f32 %v217_v13, %v15_v6  ;;  %v54_v20 = vmul.f32 %v213_v11, %v16_v8  ;;  %v55_v21 = vmul.f32 %v217_v13, %v17_v9  ;;  %v33_v5 = vld [vmem:[%s416_s0 + $0x98] sm:$0xff]  ;;  %v34_v6 = vld [vmem:[%s416_s0 + $0xa0] sm:$0xff]  ;;  %v35_v7 = vld [vmem:[%s416_s0 + $0xa8] sm:$0xff] }
   0x9   :  { %v56_v22 = vmul.f32 %v213_v11, %v18_v10  ;;  %v57_v23 = vmul.f32 %v217_v13, %v19_v15  ;;  %v58_v24 = vmul.f32 %v213_v11, %v20_v16  ;;  %v59_v25 = vmul.f32 %v217_v13, %v21_v17  ;;  %v36_v16 = vld [vmem:[%s416_s0 + $0xb0] sm:$0xff]  ;;  %v37_v17 = vld [vmem:[%s416_s0 + $0xb8] sm:$0xff] }
   0xa   :  { %v90_v26 = vadd.f32 %v215_v12, %v52_v18  ;;  %v91_v27 = vadd.f32 %v219_v14, %v53_v19  ;;  %v92_v28 = vadd.f32 %v215_v12, %v54_v20  ;;  %v93_v29 = vadd.f32 %v219_v14, %v55_v21 }
   0xb   :  { %v94_v33 = vadd.f32 %v215_v12, %v56_v22  ;;  %v95_v34 = vadd.f32 %v219_v14, %v57_v23  ;;  %v96_v35 = vadd.f32 %v215_v12, %v58_v24  ;;  %v97_v36 = vadd.f32 %v219_v14, %v59_v25 }
   0xc   :  { %v116_v40 = vmax.f32 %v90_v26, 0.0  ;;  %v117_v41 = vmax.f32 %v91_v27, 0.0  ;;  %v118_v42 = vmax.f32 %v92_v28, 0.0  ;;  %v119_v43 = vmax.f32 %v93_v29, 0.0 }
   0xd   :  { %v120_v46 = vmax.f32 %v94_v33, 0.0  ;;  %v121_v47 = vmax.f32 %v95_v34, 0.0  ;;  %v122_v48 = vmax.f32 %v96_v35, 0.0  ;;  %v123_v49 = vmax.f32 %v97_v36, 0.0 }
   0xe   :  { %142 = vst [vmem:[%s417_s3] sm:$0xff] %v116_v40  ;;  %143 = vst [vmem:[%s417_s3 + $0x8] sm:$0xff] %v117_v41  ;;  %v60_v50 = vmul.f32 %v213_v11, %v22_v30  ;;  %v61_v51 = vmul.f32 %v217_v13, %v23_v31  ;;  %v62_v52 = vmul.f32 %v213_v11, %v24_v32 }
   0xf   :  { %144 = vst [vmem:[%s417_s3 + $0x10] sm:$0xff] %v118_v42  ;;  %145 = vst [vmem:[%s417_s3 + $0x18] sm:$0xff] %v119_v43  ;;  %v63_v53 = vmul.f32 %v217_v13, %v25_v37  ;;  %v64_v54 = vmul.f32 %v213_v11, %v26_v38  ;;  %v65_v55 = vmul.f32 %v217_v13, %v27_v39  ;;  %v38_v38 = vld [vmem:[%s416_s0 + $0xc0] sm:$0xff]  ;;  %v39_v39 = vld [vmem:[%s416_s0 + $0xc8] sm:$0xff] }
  0x10   :  { %146 = vst [vmem:[%s417_s3 + $0x20] sm:$0xff] %v120_v46  ;;  %147 = vst [vmem:[%s417_s3 + $0x28] sm:$0xff] %v121_v47  ;;  %v66_v56 = vmul.f32 %v213_v11, %v28_v44  ;;  %v67_v57 = vmul.f32 %v217_v13, %v29_v45  ;;  %v98_v58 = vadd.f32 %v215_v12, %v60_v50 }
  0x11   :  { %148 = vst [vmem:[%s417_s3 + $0x30] sm:$0xff] %v122_v48  ;;  %149 = vst [vmem:[%s417_s3 + $0x38] sm:$0xff] %v123_v49  ;;  %v99_v59 = vadd.f32 %v219_v14, %v61_v51  ;;  %v100_v60 = vadd.f32 %v215_v12, %v62_v52  ;;  %v101_v61 = vadd.f32 %v219_v14, %v63_v53 }
  0x12   :  { %v102_v1 = vadd.f32 %v215_v12, %v64_v54  ;;  %v103_v2 = vadd.f32 %v219_v14, %v65_v55  ;;  %v104_v3 = vadd.f32 %v215_v12, %v66_v56  ;;  %v105_v4 = vadd.f32 %v219_v14, %v67_v57 }
  0x13   :  { %v124_v8 = vmax.f32 %v98_v58, 0.0  ;;  %v125_v9 = vmax.f32 %v99_v59, 0.0  ;;  %v126_v10 = vmax.f32 %v100_v60, 0.0  ;;  %v127_v15 = vmax.f32 %v101_v61, 0.0 }
  0x14   :  { %v128_v18 = vmax.f32 %v102_v1, 0.0  ;;  %v129_v19 = vmax.f32 %v103_v2, 0.0  ;;  %v130_v20 = vmax.f32 %v104_v3, 0.0  ;;  %v131_v21 = vmax.f32 %v105_v4, 0.0 }
  0x15   :  { %150 = vst [vmem:[%s417_s3 + $0x40] sm:$0xff] %v124_v8  ;;  %151 = vst [vmem:[%s417_s3 + $0x48] sm:$0xff] %v125_v9  ;;  %v68_v22 = vmul.f32 %v213_v11, %v30_v62  ;;  %v69_v23 = vmul.f32 %v217_v13, %v31_v63  ;;  %v70_v24 = vmul.f32 %v213_v11, %v32_v0 }
  0x16   :  { %152 = vst [vmem:[%s417_s3 + $0x50] sm:$0xff] %v126_v10  ;;  %153 = vst [vmem:[%s417_s3 + $0x58] sm:$0xff] %v127_v15  ;;  %v71_v25 = vmul.f32 %v217_v13, %v33_v5  ;;  %v72_v26 = vmul.f32 %v213_v11, %v34_v6  ;;  %v73_v27 = vmul.f32 %v217_v13, %v35_v7 }
  0x17   :  { %154 = vst [vmem:[%s417_s3 + $0x60] sm:$0xff] %v128_v18  ;;  %155 = vst [vmem:[%s417_s3 + $0x68] sm:$0xff] %v129_v19  ;;  %v74_v28 = vmul.f32 %v213_v11, %v36_v16  ;;  %v75_v29 = vmul.f32 %v217_v13, %v37_v17  ;;  %v106_v30 = vadd.f32 %v215_v12, %v68_v22 }
  0x18   :  { %156 = vst [vmem:[%s417_s3 + $0x70] sm:$0xff] %v130_v20  ;;  %157 = vst [vmem:[%s417_s3 + $0x78] sm:$0xff] %v131_v21  ;;  %v107_v31 = vadd.f32 %v219_v14, %v69_v23  ;;  %v108_v32 = vadd.f32 %v215_v12, %v70_v24  ;;  %v109_v33 = vadd.f32 %v219_v14, %v71_v25 }
  0x19   :  { %v110_v34 = vadd.f32 %v215_v12, %v72_v26  ;;  %v111_v35 = vadd.f32 %v219_v14, %v73_v27  ;;  %v112_v36 = vadd.f32 %v215_v12, %v74_v28  ;;  %v113_v37 = vadd.f32 %v219_v14, %v75_v29 }
  0x1a   :  { %v132_v40 = vmax.f32 %v106_v30, 0.0  ;;  %v133_v41 = vmax.f32 %v107_v31, 0.0  ;;  %v134_v42 = vmax.f32 %v108_v32, 0.0  ;;  %v135_v43 = vmax.f32 %v109_v33, 0.0 }
  0x1b   :  { %v136_v44 = vmax.f32 %v110_v34, 0.0  ;;  %v137_v45 = vmax.f32 %v111_v35, 0.0  ;;  %v138_v46 = vmax.f32 %v112_v36, 0.0  ;;  %v139_v47 = vmax.f32 %v113_v37, 0.0 }
  0x1c   :  { %158 = vst [vmem:[%s417_s3 + $0x80] sm:$0xff] %v132_v40  ;;  %159 = vst [vmem:[%s417_s3 + $0x88] sm:$0xff] %v133_v41  ;;  %v76_v48 = vmul.f32 %v213_v11, %v38_v38  ;;  %v77_v49 = vmul.f32 %v217_v13, %v39_v39 }
  0x1d   :  { %160 = vst [vmem:[%s417_s3 + $0x90] sm:$0xff] %v134_v42  ;;  %161 = vst [vmem:[%s417_s3 + $0x98] sm:$0xff] %v135_v43 }
  0x1e   :  { %162 = vst [vmem:[%s417_s3 + $0xa0] sm:$0xff] %v136_v44  ;;  %163 = vst [vmem:[%s417_s3 + $0xa8] sm:$0xff] %v137_v45  ;;  %v114_v11 = vadd.f32 %v215_v12, %v76_v48  ;;  %v115_v13 = vadd.f32 %v219_v14, %v77_v49 }
  0x1f   :  { %164 = vst [vmem:[%s417_s3 + $0xb0] sm:$0xff] %v138_v46  ;;  %165 = vst [vmem:[%s417_s3 + $0xb8] sm:$0xff] %v139_v47 }
  0x20   :  { %v140_v50 = vmax.f32 %v114_v11, 0.0  ;;  %v141_v51 = vmax.f32 %v115_v13, 0.0 }
  0x22   :  { %166 = vst [vmem:[%s417_s3 + $0xc0] sm:$0xff] %v140_v50  ;;  %167 = vst [vmem:[%s417_s3 + $0xc8] sm:$0xff] %v141_v51 }

// kernel: reduction_a_forward.15
= control target key start
LH: loop header
LB: loop body
LE: loop exit
PB: predicated region body
PF: predicated region fallthrough
CT: control target
= control target key end

     0   :  { %s6230_s1 = inlined_call_operand.vmem [shape: bf16[2304,256], index: 1, kind: input, shape index: {}]   ;;  %s6231_s0 = inlined_call_operand.vmem [shape: bf16[104,2304], index: 0, kind: input, shape index: {}]   ;;  %s6232_s2 = inlined_call_operand.vmem [shape: f32[104,256], index: 2, kind: output, shape index: {0}]   ;;  %s6233_s3 = inlined_call_operand.vmem [shape: f32[8,256], index: 3, kind: output, shape index: {1}]   ;;  %s6234_s4 = inlined_call_operand.vmem [shape: f32[8,256], index: 4, kind: output, shape index: {2}]  }
   0x1   :  { %v4177_v0 = vld [vmem:[%s6230_s1 + $0x4] ss:$8 sps:$4 sm:$0xff]   ;;  %v4181_v2 = vld [vmem:[%s6230_s1] ss:$8 sps:$4 sm:$0xff]   ;;  %v4183_v4 = vld [vmem:[%s6230_s1 + $0x14] ss:$8 sps:$4 sm:$0xff]  }
   0x2   :  { %v4179_v1 = vld [vmem:[%s6230_s1 + $0x404] ss:$8 sps:$4 sm:$0xff]   ;;  %2462 = vmatprep.subr.bf16.mxu1 %v4177_v0  ;;  %v4182_v3 = vld [vmem:[%s6230_s1 + $0x400] ss:$8 sps:$4 sm:$0xff]   ;;  %v4185_v5 = vld [vmem:[%s6230_s1 + $0x414] ss:$8 sps:$4 sm:$0xff]  }
   0x3   :  { %2866 = vmatprep.subr.bf16.mxu0 %v4179_v1  ;;  %2463 = vmatpush1.bf16.msra.mxu1 %v4181_v2  ;;  %v4187_v6 = vld [vmem:[%s6230_s1 + $0x10] ss:$8 sps:$4 sm:$0xff]   ;;  %v4189_v8 = vld [vmem:[%s6230_s1 + $0x24] ss:$8 sps:$4 sm:$0xff]   ;;  %v4193_v10 = vld [vmem:[%s6230_s1 + $0x20] ss:$8 sps:$4 sm:$0xff]  }
   0x4   :  { %2867 = vmatpush1.bf16.msra.mxu0 %v4182_v3  ;;  %2464 = vmatprep.subr.bf16.mxu1 %v4183_v4  ;;  %v4188_v7 = vld [vmem:[%s6230_s1 + $0x410] ss:$8 sps:$4 sm:$0xff]   ;;  %v4191_v9 = vld [vmem:[%s6230_s1 + $0x424] ss:$8 sps:$4 sm:$0xff]   ;;  %v4194_v11 = vld [vmem:[%s6230_s1 + $0x420] ss:$8 sps:$4 sm:$0xff]  }
   0x5   :  { %2868 = vmatprep.subr.bf16.mxu0 %v4185_v5  ;;  %v4195_v12 = vld [vmem:[%s6230_s1 + $0x34] ss:$8 sps:$4 sm:$0xff]   ;;  %v4199_v14 = vld [vmem:[%s6230_s1 + $0x30] ss:$8 sps:$4 sm:$0xff]   ;;  %v4201_v16 = vld [vmem:[%s6230_s1 + $0x44] ss:$8 sps:$4 sm:$0xff]  }
   0x6   :  { %v4197_v13 = vld [vmem:[%s6230_s1 + $0x434] ss:$8 sps:$4 sm:$0xff]   ;;  %v4200_v15 = vld [vmem:[%s6230_s1 + $0x430] ss:$8 sps:$4 sm:$0xff]   ;;  %v4203_v17 = vld [vmem:[%s6230_s1 + $0x444] ss:$8 sps:$4 sm:$0xff]  }
   0x7   :  { %2465 = vmatpush1.bf16.msra.mxu1 %v4187_v6  ;;  %v4205_v18 = vld [vmem:[%s6230_s1 + $0x40] ss:$8 sps:$4 sm:$0xff]   ;;  %v4207_v20 = vld [vmem:[%s6230_s1 + $0x54] ss:$8 sps:$4 sm:$0xff]   ;;  %v4211_v22 = vld [vmem:[%s6230_s1 + $0x50] ss:$8 sps:$4 sm:$0xff]  }
   0x8   :  { %2869 = vmatpush1.bf16.msra.mxu0 %v4188_v7  ;;  %2466 = vmatprep.subr.bf16.mxu1 %v4189_v8  ;;  %v4206_v19 = vld [vmem:[%s6230_s1 + $0x440] ss:$8 sps:$4 sm:$0xff]   ;;  %v4209_v21 = vld [vmem:[%s6230_s1 + $0x454] ss:$8 sps:$4 sm:$0xff]   ;;  %v4212_v23 = vld [vmem:[%s6230_s1 + $0x450] ss:$8 sps:$4 sm:$0xff]  }
   0x9   :  { %2870 = vmatprep.subr.bf16.mxu0 %v4191_v9  ;;  %v4213_v24 = vld [vmem:[%s6230_s1 + $0x64] ss:$8 sps:$4 sm:$0xff]   ;;  %v4217_v26 = vld [vmem:[%s6230_s1 + $0x60] ss:$8 sps:$4 sm:$0xff]   ;;  %v4219_v28 = vld [vmem:[%s6230_s1 + $0x74] ss:$8 sps:$4 sm:$0xff]  }
   0xa   :  { %v4215_v25 = vld [vmem:[%s6230_s1 + $0x464] ss:$8 sps:$4 sm:$0xff]   ;;  %v4218_v27 = vld [vmem:[%s6230_s1 + $0x460] ss:$8 sps:$4 sm:$0xff]   ;;  %v4221_v29 = vld [vmem:[%s6230_s1 + $0x474] ss:$8 sps:$4 sm:$0xff]  }
   0xb   :  { %2467 = vmatpush1.bf16.msra.mxu1 %v4193_v10  ;;  %v4223_v30 = vld [vmem:[%s6230_s1 + $0x70] ss:$8 sps:$4 sm:$0xff]   ;;  %v4225_v32 = vld [vmem:[%s6230_s1 + $0x84] ss:$8 sps:$4 sm:$0xff]   ;;  %v4229_v34 = vld [vmem:[%s6230_s1 + $0x80] ss:$8 sps:$4 sm:$0xff]  }
   0xc   :  { %2871 = vmatpush1.bf16.msra.mxu0 %v4194_v11  ;;  %2468 = vmatprep.subr.bf16.mxu1 %v4195_v12  ;;  %v4224_v31 = vld [vmem:[%s6230_s1 + $0x470] ss:$8 sps:$4 sm:$0xff]   ;;  %v4227_v33 = vld [vmem:[%s6230_s1 + $0x484] ss:$8 sps:$4 sm:$0xff]   ;;  %v4230_v35 = vld [vmem:[%s6230_s1 + $0x480] ss:$8 sps:$4 sm:$0xff]  }
   0xd   :  { %2872 = vmatprep.subr.bf16.mxu0 %v4197_v13  ;;  %v4231_v36 = vld [vmem:[%s6230_s1 + $0x94] ss:$8 sps:$4 sm:$0xff]   ;;  %v4235_v38 = vld [vmem:[%s6230_s1 + $0x90] ss:$8 sps:$4 sm:$0xff]   ;;  %v4237_v40 = vld [vmem:[%s6230_s1 + $0xa4] ss:$8 sps:$4 sm:$0xff]  }
   0xe   :  { %v4233_v37 = vld [vmem:[%s6230_s1 + $0x494] ss:$8 sps:$4 sm:$0xff]   ;;  %v4236_v39 = vld [vmem:[%s6230_s1 + $0x490] ss:$8 sps:$4 sm:$0xff]   ;;  %v4239_v41 = vld [vmem:[%s6230_s1 + $0x4a4] ss:$8 sps:$4 sm:$0xff]  }
   0xf   :  { %2469 = vmatpush1.bf16.msra.mxu1 %v4199_v14  ;;  %v4241_v42 = vld [vmem:[%s6230_s1 + $0xa0] ss:$8 sps:$4 sm:$0xff]   ;;  %v4243_v44 = vld [vmem:[%s6230_s1 + $0xb4] ss:$8 sps:$4 sm:$0xff]   ;;  %v4247_v46 = vld [vmem:[%s6230_s1 + $0xb0] ss:$8 sps:$4 sm:$0xff]  }
  0x10   :  { %2873 = vmatpush1.bf16.msra.mxu0 %v4200_v15  ;;  %2470 = vmatprep.subr.bf16.mxu1 %v4201_v16  ;;  %v4242_v43 = vld [vmem:[%s6230_s1 + $0x4a0] ss:$8 sps:$4 sm:$0xff]   ;;  %v4245_v45 = vld [vmem:[%s6230_s1 + $0x4b4] ss:$8 sps:$4 sm:$0xff]   ;;  %v4248_v47 = vld [vmem:[%s6230_s1 + $0x4b0] ss:$8 sps:$4 sm:$0xff]  }
  0x11   :  { %2874 = vmatprep.subr.bf16.mxu0 %v4203_v17  ;;  %v4275_v48 = vld [vmem:[%s6231_s0 + $0x4] ss:$72 sps:$4 sm:$0xff]   ;;  %v4253_v52 = vld [vmem:[%s6230_s1 + $0xc0] ss:$8 sps:$4 sm:$0xff]   ;;  %v4255_v54 = vld [vmem:[%s6230_s1 + $0xd4] ss:$8 sps:$4 sm:$0xff]  }
  0x12   :  { %v4249_v49 = vld [vmem:[%s6230_s1 + $0xc4] ss:$8 sps:$4 sm:$0xff]   ;;  %2494 = vmatprep.mubr.bf16.mxu1 %v4275_v48  ;;  %v4254_v53 = vld [vmem:[%s6230_s1 + $0x4c0] ss:$8 sps:$4 sm:$0xff]   ;;  %v4257_v55 = vld [vmem:[%s6230_s1 + $0x4d4] ss:$8 sps:$4 sm:$0xff]  }
  0x13   :  { %2471 = vmatpush1.bf16.msra.mxu1 %v4205_v18  ;;  %v4251_v50 = vld [vmem:[%s6230_s1 + $0x4c4] ss:$8 sps:$4 sm:$0xff]   ;;  %v4259_v56 = vld [vmem:[%s6230_s1 + $0xd0] ss:$8 sps:$4 sm:$0xff]   ;;  %v4265_v60 = vld [vmem:[%s6230_s1 + $0xe0] ss:$8 sps:$4 sm:$0xff]  }
  0x14   :  { %2875 = vmatpush1.bf16.msra.mxu0 %v4206_v19  ;;  %2472 = vmatprep.subr.bf16.mxu1 %v4207_v20  ;;  %v4281_v51 = vld [vmem:[%s6231_s0 + $0x24] ss:$72 sps:$4 sm:$0xff]   ;;  %v4260_v57 = vld [vmem:[%s6230_s1 + $0x4d0] ss:$8 sps:$4 sm:$0xff]   ;;  %v4266_v61 = vld [vmem:[%s6230_s1 + $0x4e0] ss:$8 sps:$4 sm:$0xff]  }
  0x15   :  { %2876 = vmatprep.subr.bf16.mxu0 %v4209_v21  ;;  %2898 = vmatprep.mubr.bf16.mxu0 %v4281_v51  ;;  %v4261_v58 = vld [vmem:[%s6230_s1 + $0xe4] ss:$8 sps:$4 sm:$0xff]   ;;  %v4267_v62 = vld [vmem:[%s6230_s1 + $0xf4] ss:$8 sps:$4 sm:$0xff]   ;;  %v4271_v0 = vld [vmem:[%s6230_s1 + $0xf0] ss:$8 sps:$4 sm:$0xff]  }
  0x16   :  { %v4263_v59 = vld [vmem:[%s6230_s1 + $0x4e4] ss:$8 sps:$4 sm:$0xff]   ;;  %v4269_v63 = vld [vmem:[%s6230_s1 + $0x4f4] ss:$8 sps:$4 sm:$0xff]   ;;  %v4272_v1 = vld [vmem:[%s6230_s1 + $0x4f0] ss:$8 sps:$4 sm:$0xff]  }
  0x17   :  { %2473 = vmatpush1.bf16.msra.mxu1 %v4211_v22  ;;  %v4278_v2 = vld [vmem:[%s6230_s1 + $0x104] ss:$8 sps:$4 sm:$0xff]   ;;  %v4273_v3 = vld [vmem:[%s6231_s0] ss:$72 sps:$4 sm:$0xff]   ;;  %v4287_v8 = vld [vmem:[%s6230_s1 + $0x114] ss:$8 sps:$4 sm:$0xff]  }
  0x18   :  { %2877 = vmatpush1.bf16.msra.mxu0 %v4212_v23  ;;  %2474 = vmatprep.subr.bf16.mxu1 %v4213_v24  ;;  %v4284_v4 = vld [vmem:[%s6230_s1 + $0x504] ss:$8 sps:$4 sm:$0xff]   ;;  %v4276_v5 = vld [vmem:[%s6230_s1 + $0x100] ss:$8 sps:$4 sm:$0xff]   ;;  %v4290_v9 = vld [vmem:[%s6230_s1 + $0x514] ss:$8 sps:$4 sm:$0xff]  }
  0x19   :  { %2878 = vmatprep.subr.bf16.mxu0 %v4215_v25  ;;  %v4279_v6 = vld [vmem:[%s6231_s0 + $0x20] ss:$72 sps:$4 sm:$0xff]   ;;  %v4303_v10 = vld [vmem:[%s6231_s0 + $0x94] ss:$72 sps:$4 sm:$0xff]   ;;  %v4285_v12 = vld [vmem:[%s6230_s1 + $0x110] ss:$8 sps:$4 sm:$0xff]  }
  0x1a   :  { %v4282_v7 = vld [vmem:[%s6230_s1 + $0x500] ss:$8 sps:$4 sm:$0xff]   ;;  %v4308_v11 = vld [vmem:[%s6231_s0 + $0xb4] ss:$72 sps:$4 sm:$0xff]   ;;  %v4288_v13 = vld [vmem:[%s6230_s1 + $0x510] ss:$8 sps:$4 sm:$0xff]  }
  0x1b   :  { %2475 = vmatpush1.bf16.msra.mxu1 %v4217_v26  ;;  %v4293_v14 = vld [vmem:[%s6230_s1 + $0x124] ss:$8 sps:$4 sm:$0xff]   ;;  %v4291_v16 = vld [vmem:[%s6230_s1 + $0x120] ss:$8 sps:$4 sm:$0xff]   ;;  %v4299_v18 = vld [vmem:[%s6230_s1 + $0x134] ss:$8 sps:$4 sm:$0xff]  }
  0x1c   :  { %2879 = vmatpush1.bf16.msra.mxu0 %v4218_v27  ;;  %2476 = vmatprep.subr.bf16.mxu1 %v4219_v28  ;;  %v4296_v15 = vld [vmem:[%s6230_s1 + $0x524] ss:$8 sps:$4 sm:$0xff]   ;;  %v4294_v17 = vld [vmem:[%s6230_s1 + $0x520] ss:$8 sps:$4 sm:$0xff]   ;;  %v4313_v19 = vld [vmem:[%s6231_s0 + $0x90] ss:$72 sps:$4 sm:$0xff]  }
  0x1d   :  { %2880 = vmatprep.subr.bf16.mxu0 %v4221_v29  ;;  %v4314_v20 = vld [vmem:[%s6231_s0 + $0xb0] ss:$72 sps:$4 sm:$0xff]   ;;  %v4302_v21 = vld [vmem:[%s6230_s1 + $0x534] ss:$8 sps:$4 sm:$0xff]   ;;  %v4321_v22 = vld [vmem:[%s6231_s0 + $0x124] ss:$72 sps:$4 sm:$0xff]  }
  0x1e   :  { %v4326_v23 = vld [vmem:[%s6231_s0 + $0x144] ss:$72 sps:$4 sm:$0xff]   ;;  %v4297_v24 = vld [vmem:[%s6230_s1 + $0x130] ss:$8 sps:$4 sm:$0xff]   ;;  %v4305_v28 = vld [vmem:[%s6230_s1 + $0x140] ss:$8 sps:$4 sm:$0xff]  }
  0x1f   :  { %2477 = vmatpush1.bf16.msra.mxu1 %v4223_v30  ;;  %v4300_v25 = vld [vmem:[%s6230_s1 + $0x530] ss:$8 sps:$4 sm:$0xff]   ;;  %v4307_v26 = vld [vmem:[%s6230_s1 + $0x144] ss:$8 sps:$4 sm:$0xff]   ;;  %v4310_v29 = vld [vmem:[%s6230_s1 + $0x540] ss:$8 sps:$4 sm:$0xff]  }
  0x20   :  { %2881 = vmatpush1.bf16.msra.mxu0 %v4224_v31  ;;  %2478 = vmatprep.subr.bf16.mxu1 %v4225_v32  ;;  %v4312_v27 = vld [vmem:[%s6230_s1 + $0x544] ss:$8 sps:$4 sm:$0xff]   ;;  %v4317_v30 = vld [vmem:[%s6230_s1 + $0x154] ss:$8 sps:$4 sm:$0xff]   ;;  %v4331_v31 = vld [vmem:[%s6231_s0 + $0x120] ss:$72 sps:$4 sm:$0xff]  }
  0x21   :  { %2882 = vmatprep.subr.bf16.mxu0 %v4227_v33  ;;  %v4332_v32 = vld [vmem:[%s6231_s0 + $0x140] ss:$72 sps:$4 sm:$0xff]   ;;  %v4320_v33 = vld [vmem:[%s6230_s1 + $0x554] ss:$8 sps:$4 sm:$0xff]   ;;  %v4333_v48 = vld [vmem:[%s6230_s1 + $0x170] ss:$8 sps:$4 sm:$0xff]  }
  0x22   :  { %v4348_v51 = vld [vmem:[%s6230_s1 + $0x584] ss:$8 sps:$4 sm:$0xff]  }
  0x23   :  { %2479 = vmatpush1.bf16.msra.mxu1 %v4229_v34  ;;  %v4339_v34 = vld [vmem:[%s6231_s0 + $0x1b4] ss:$72 sps:$4 sm:$0xff]  }
  0x24   :  { %2883 = vmatpush1.bf16.msra.mxu0 %v4230_v35  ;;  %2480 = vmatprep.subr.bf16.mxu1 %v4231_v36  ;;  %v4344_v35 = vld [vmem:[%s6231_s0 + $0x1d4] ss:$72 sps:$4 sm:$0xff]   ;;  %v4315_v36 = vld [vmem:[%s6230_s1 + $0x150] ss:$8 sps:$4 sm:$0xff]  }
  0x25   :  { %2884 = vmatprep.subr.bf16.mxu0 %v4233_v37  ;;  %v4318_v37 = vld [vmem:[%s6230_s1 + $0x550] ss:$8 sps:$4 sm:$0xff]  }
  0x27   :  { %2481 = vmatpush1.bf16.msra.mxu1 %v4235_v38  ;;  %v4325_v38 = vld [vmem:[%s6230_s1 + $0x164] ss:$8 sps:$4 sm:$0xff]  }
  0x28   :  { %2885 = vmatpush1.bf16.msra.mxu0 %v4236_v39  ;;  %2482 = vmatprep.subr.bf16.mxu1 %v4237_v40  ;;  %v4330_v39 = vld [vmem:[%s6230_s1 + $0x564] ss:$8 sps:$4 sm:$0xff]   ;;  %v4323_v40 = vld [vmem:[%s6230_s1 + $0x160] ss:$8 sps:$4 sm:$0xff]  }
  0x29   :  { %2886 = vmatprep.subr.bf16.mxu0 %v4239_v41  ;;  %v4328_v41 = vld [vmem:[%s6230_s1 + $0x560] ss:$8 sps:$4 sm:$0xff]  }
  0x2b   :  { %2483 = vmatpush1.bf16.msra.mxu1 %v4241_v42  ;;  %v4335_v42 = vld [vmem:[%s6230_s1 + $0x174] ss:$8 sps:$4 sm:$0xff]  }
  0x2c   :  { %2887 = vmatpush1.bf16.msra.mxu0 %v4242_v43  ;;  %2484 = vmatprep.subr.bf16.mxu1 %v4243_v44  ;;  %v4349_v43 = vld [vmem:[%s6231_s0 + $0x1b0] ss:$72 sps:$4 sm:$0xff]  }
  0x2d   :  { %2888 = vmatprep.subr.bf16.mxu0 %v4245_v45  ;;  %v4350_v44 = vld [vmem:[%s6231_s0 + $0x1d0] ss:$72 sps:$4 sm:$0xff]   ;;  %v4338_v45 = vld [vmem:[%s6230_s1 + $0x574] ss:$8 sps:$4 sm:$0xff]  }
  0x2f   :  { %2485 = vmatpush1.bf16.msra.mxu1 %v4247_v46  ;;  %v4357_v46 = vld [vmem:[%s6231_s0 + $0x244] ss:$72 sps:$4 sm:$0xff]  }
  0x30   :  { %2889 = vmatpush1.bf16.msra.mxu0 %v4248_v47  ;;  %2486 = vmatprep.subr.bf16.mxu1 %v4249_v49  ;;  %v4362_v47 = vld [vmem:[%s6231_s0 + $0x264] ss:$72 sps:$4 sm:$0xff]   ;;  %v4336_v49 = vld [vmem:[%s6230_s1 + $0x570] ss:$8 sps:$4 sm:$0xff]  }
  0x31   :  { %2890 = vmatprep.subr.bf16.mxu0 %v4251_v50  ;;  %v4343_v50 = vld [vmem:[%s6230_s1 + $0x184] ss:$8 sps:$4 sm:$0xff]  }
  0x33   :  { %2487 = vmatpush1.bf16.msra.mxu1 %v4253_v52  ;;  %v4341_v52 = vld [vmem:[%s6230_s1 + $0x180] ss:$8 sps:$4 sm:$0xff]  }
  0x34   :  { %2891 = vmatpush1.bf16.msra.mxu0 %v4254_v53  ;;  %2488 = vmatprep.subr.bf16.mxu1 %v4255_v54  ;;  %v4367_v53 = vld [vmem:[%s6231_s0 + $0x240] ss:$72 sps:$4 sm:$0xff]  }
  0x35   :  { %2892 = vmatprep.subr.bf16.mxu0 %v4257_v55  ;;  %v4368_v54 = vld [vmem:[%s6231_s0 + $0x260] ss:$72 sps:$4 sm:$0xff]  }
  0x36   :  { %v4346_v55 = vld [vmem:[%s6230_s1 + $0x580] ss:$8 sps:$4 sm:$0xff]  }
  0x37   :  { %2489 = vmatpush1.bf16.msra.mxu1 %v4259_v56  ;;  %v4353_v56 = vld [vmem:[%s6230_s1 + $0x194] ss:$8 sps:$4 sm:$0xff]  }
  0x38   :  { %2893 = vmatpush1.bf16.msra.mxu0 %v4260_v57  ;;  %2490 = vmatprep.subr.bf16.mxu1 %v4261_v58  ;;  %v4356_v57 = vld [vmem:[%s6230_s1 + $0x594] ss:$8 sps:$4 sm:$0xff]  }
  0x39   :  { %2894 = vmatprep.subr.bf16.mxu0 %v4263_v59  ;;  %v4375_v58 = vld [vmem:[%s6231_s0 + $0x2d4] ss:$72 sps:$4 sm:$0xff]   ;;  %v4351_v59 = vld [vmem:[%s6230_s1 + $0x190] ss:$8 sps:$4 sm:$0xff]  }
  0x3b   :  { %2491 = vmatpush1.bf16.msra.mxu1 %v4265_v60  ;;  %v4380_v60 = vld [vmem:[%s6231_s0 + $0x2f4] ss:$72 sps:$4 sm:$0xff]  }
  0x3c   :  { %2895 = vmatpush1.bf16.msra.mxu0 %v4266_v61  ;;  %2492 = vmatprep.subr.bf16.mxu1 %v4267_v62  ;;  %v4354_v61 = vld [vmem:[%s6230_s1 + $0x590] ss:$8 sps:$4 sm:$0xff]   ;;  %v4361_v62 = vld [vmem:[%s6230_s1 + $0x1a4] ss:$8 sps:$4 sm:$0xff]  }
  0x3d   :  { %2896 = vmatprep.subr.bf16.mxu0 %v4269_v63  ;;  %v4366_v63 = vld [vmem:[%s6230_s1 + $0x5a4] ss:$8 sps:$4 sm:$0xff]  }
  0x3f   :  { %2493 = vmatpush1.bf16.msra.mxu1 %v4271_v0  ;;  %v4385_v0 = vld [vmem:[%s6231_s0 + $0x2d0] ss:$72 sps:$4 sm:$0xff]  }
  0x40   :  { %2897 = vmatpush1.bf16.msra.mxu0 %v4272_v1  ;;  %2563 = vmatprep.subr.bf16.mxu1 %v4278_v2  ;;  %v4386_v1 = vld [vmem:[%s6231_s0 + $0x2f0] ss:$72 sps:$4 sm:$0xff]   ;;  %v122_v2 = vld [vmem:[%s6231_s0 + $0x360] sm:$0xff] }
  0x41   :  { %2967 = vmatprep.subr.bf16.mxu0 %v4284_v4  ;;  %v4359_v4 = vld [vmem:[%s6230_s1 + $0x1a0] ss:$8 sps:$4 sm:$0xff]  }
  0x42   :  { %2495 = vmatmul.mubr.bf16.vlgmr.msra.gmra.mrb[0].mxu1 %v4273_v3  ;;  %v126_v3 = vld [vmem:[%s6231_s0 + $0x380] sm:$0xff] }
  0x43   :  { %2899 = vmatmul.mubr.bf16.vlgmr.msra.gmra.mrb[0].mxu0 %v4279_v6  ;;  %2564 = vmatpush1.bf16.msra.mxu1 %v4276_v5  ;;  %v4364_v5 = vld [vmem:[%s6230_s1 + $0x5a0] ss:$8 sps:$4 sm:$0xff]   ;;  %v4371_v6 = vld [vmem:[%s6230_s1 + $0x1b4] ss:$8 sps:$4 sm:$0xff]  }
  0x44   :  { %2968 = vmatpush1.bf16.msra.mxu0 %v4282_v7  ;;  %2565 = vmatprep.subr.bf16.mxu1 %v4287_v8  ;;  %v4374_v7 = vld [vmem:[%s6230_s1 + $0x5b4] ss:$8 sps:$4 sm:$0xff]   ;;  %v3620_v8 = vcombine.high %v122_v2, %v122_v2 }
  0x45   :  { %2969 = vmatprep.subr.bf16.mxu0 %v4290_v9  ;;  %2504 = vmatprep.mubr.bf16.mxu1 %v4303_v10  ;;  %v3628_v9 = vcombine.high %v126_v3, %v126_v3  ;;  %v4369_v10 = vld [vmem:[%s6230_s1 + $0x1b0] ss:$8 sps:$4 sm:$0xff]  }
  0x46   :  { %2908 = vmatprep.mubr.bf16.mxu0 %v4308_v11  ;;  %v4372_v11 = vld [vmem:[%s6230_s1 + $0x5b0] ss:$8 sps:$4 sm:$0xff]  }
  0x47   :  { %2566 = vmatpush1.bf16.msra.mxu1 %v4285_v12  ;;  %v4379_v12 = vld [vmem:[%s6230_s1 + $0x1c4] ss:$8 sps:$4 sm:$0xff]  }
  0x48   :  { %2970 = vmatpush1.bf16.msra.mxu0 %v4288_v13  ;;  %2567 = vmatprep.subr.bf16.mxu1 %v4293_v14  ;;  %v4384_v13 = vld [vmem:[%s6230_s1 + $0x5c4] ss:$8 sps:$4 sm:$0xff]   ;;  %v4377_v14 = vld [vmem:[%s6230_s1 + $0x1c0] ss:$8 sps:$4 sm:$0xff]  }
  0x49   :  { %2971 = vmatprep.subr.bf16.mxu0 %v4296_v15  ;;  %v3619_v15 = vcombine.low %v122_v2, %v122_v2  ;;  %v4451_v2 = vld [vmem:[%s6230_s1 + $0x250] ss:$8 sps:$4 sm:$0xff]  }
  0x4a   :  { %2505 = vmatmul.mubr.bf16.gmra.mrb[4].mxu1 %v4313_v19  ;;  %v4392_v19 = vld [vmem:[%s6230_s1 + $0x5d4] ss:$8 sps:$4 sm:$0xff]  }
  0x4b   :  { %2909 = vmatmul.mubr.bf16.gmra.mrb[4].mxu0 %v4314_v20  ;;  %2568 = vmatpush1.bf16.msra.mxu1 %v4291_v16  ;;  %v3627_v16 = vcombine.low %v126_v3, %v126_v3  ;;  %v4411_v20 = vld [vmem:[%s6231_s0 + $0xc] ss:$72 sps:$4 sm:$0xff]   ;;  %v4454_v3 = vld [vmem:[%s6230_s1 + $0x650] ss:$8 sps:$4 sm:$0xff]  }
  0x4c   :  { %2972 = vmatpush1.bf16.msra.mxu0 %v4294_v17  ;;  %2569 = vmatprep.subr.bf16.mxu1 %v4299_v18  ;;  %v4382_v17 = vld [vmem:[%s6230_s1 + $0x5c0] ss:$8 sps:$4 sm:$0xff]   ;;  %v4389_v18 = vld [vmem:[%s6230_s1 + $0x1d4] ss:$8 sps:$4 sm:$0xff]  }
  0x4d   :  { %2973 = vmatprep.subr.bf16.mxu0 %v4302_v21  ;;  %2514 = vmatprep.mubr.bf16.mxu1 %v4321_v22  ;;  %v4417_v21 = vld [vmem:[%s6231_s0 + $0x2c] ss:$72 sps:$4 sm:$0xff]   ;;  %v4387_v22 = vld [vmem:[%s6230_s1 + $0x1d0] ss:$8 sps:$4 sm:$0xff]  }
  0x4e   :  { %2918 = vmatprep.mubr.bf16.mxu0 %v4326_v23  ;;  %v4390_v23 = vld [vmem:[%s6230_s1 + $0x5d0] ss:$8 sps:$4 sm:$0xff]  }
  0x4f   :  { %2570 = vmatpush1.bf16.msra.mxu1 %v4297_v24  ;;  %v4396_v24 = vld [vmem:[%s6230_s1 + $0x1e4] ss:$8 sps:$4 sm:$0xff]  }
  0x50   :  { %2974 = vmatpush1.bf16.msra.mxu0 %v4300_v25  ;;  %2571 = vmatprep.subr.bf16.mxu1 %v4307_v26  ;;  %v4400_v25 = vld [vmem:[%s6230_s1 + $0x5e4] ss:$8 sps:$4 sm:$0xff]   ;;  %v4394_v26 = vld [vmem:[%s6230_s1 + $0x1e0] ss:$8 sps:$4 sm:$0xff]  }
  0x51   :  { %2975 = vmatprep.subr.bf16.mxu0 %v4312_v27  ;;  %v4398_v27 = vld [vmem:[%s6230_s1 + $0x5e0] ss:$8 sps:$4 sm:$0xff]  }
  0x52   :  { %2515 = vmatmul.mubr.bf16.gmra.mrb[8].mxu1 %v4331_v31  ;;  %v4406_v31 = vld [vmem:[%s6230_s1 + $0x5f0] ss:$8 sps:$4 sm:$0xff]  }
  0x53   :  { %2919 = vmatmul.mubr.bf16.gmra.mrb[8].mxu0 %v4332_v32  ;;  %2572 = vmatpush1.bf16.msra.mxu1 %v4305_v28  ;;  %v4405_v28 = vld [vmem:[%s6230_s1 + $0x1f4] ss:$8 sps:$4 sm:$0xff]   ;;  %v4414_v32 = vld [vmem:[%s6230_s1 + $0x204] ss:$8 sps:$4 sm:$0xff]  }
  0x54   :  { %2976 = vmatpush1.bf16.msra.mxu0 %v4310_v29  ;;  %2573 = vmatprep.subr.bf16.mxu1 %v4317_v30  ;;  %v4408_v29 = vld [vmem:[%s6230_s1 + $0x5f4] ss:$8 sps:$4 sm:$0xff]   ;;  %v4403_v30 = vld [vmem:[%s6230_s1 + $0x1f0] ss:$8 sps:$4 sm:$0xff]  }
  0x55   :  { %2977 = vmatprep.subr.bf16.mxu0 %v4320_v33  ;;  %2524 = vmatprep.mubr.bf16.mxu1 %v4339_v34  ;;  %v4420_v33 = vld [vmem:[%s6230_s1 + $0x604] ss:$8 sps:$4 sm:$0xff]   ;;  %v4409_v34 = vld [vmem:[%s6231_s0 + $0x8] ss:$72 sps:$4 sm:$0xff]  }
  0x56   :  { %2928 = vmatprep.mubr.bf16.mxu0 %v4344_v35  ;;  %v4412_v35 = vld [vmem:[%s6230_s1 + $0x200] ss:$8 sps:$4 sm:$0xff]  }
  0x57   :  { %2574 = vmatpush1.bf16.msra.mxu1 %v4315_v36  ;;  %v4415_v36 = vld [vmem:[%s6231_s0 + $0x28] ss:$72 sps:$4 sm:$0xff]  }
  0x58   :  { %2978 = vmatpush1.bf16.msra.mxu0 %v4318_v37  ;;  %2575 = vmatprep.subr.bf16.mxu1 %v4325_v38  ;;  %v4418_v37 = vld [vmem:[%s6230_s1 + $0x600] ss:$8 sps:$4 sm:$0xff]   ;;  %v4423_v38 = vld [vmem:[%s6230_s1 + $0x214] ss:$8 sps:$4 sm:$0xff]  }
  0x59   :  { %2979 = vmatprep.subr.bf16.mxu0 %v4330_v39  ;;  %v4426_v39 = vld [vmem:[%s6230_s1 + $0x614] ss:$8 sps:$4 sm:$0xff]  }
  0x5a   :  { %2525 = vmatmul.mubr.bf16.gmra.mrb[12].mxu1 %v4349_v43  ;;  %v4424_v43 = vld [vmem:[%s6230_s1 + $0x610] ss:$8 sps:$4 sm:$0xff]  }
  0x5b   :  { %2929 = vmatmul.mubr.bf16.gmra.mrb[12].mxu0 %v4350_v44  ;;  %2576 = vmatpush1.bf16.msra.mxu1 %v4323_v40  ;;  %v4439_v40 = vld [vmem:[%s6231_s0 + $0x9c] ss:$72 sps:$4 sm:$0xff]  }
  0x5c   :  { %2980 = vmatpush1.bf16.msra.mxu0 %v4328_v41  ;;  %2577 = vmatprep.subr.bf16.mxu1 %v4335_v42  ;;  %v4444_v41 = vld [vmem:[%s6231_s0 + $0xbc] ss:$72 sps:$4 sm:$0xff]   ;;  %v4421_v42 = vld [vmem:[%s6230_s1 + $0x210] ss:$8 sps:$4 sm:$0xff]  }
  0x5d   :  { %2981 = vmatprep.subr.bf16.mxu0 %v4338_v45  ;;  %2534 = vmatprep.mubr.bf16.mxu1 %v4357_v46  ;;  %v4429_v44 = vld [vmem:[%s6230_s1 + $0x224] ss:$8 sps:$4 sm:$0xff]   ;;  %v4427_v46 = vld [vmem:[%s6230_s1 + $0x220] ss:$8 sps:$4 sm:$0xff]  }
  0x5e   :  { %2938 = vmatprep.mubr.bf16.mxu0 %v4362_v47  ;;  %v4432_v45 = vld [vmem:[%s6230_s1 + $0x624] ss:$8 sps:$4 sm:$0xff]   ;;  %v4449_v47 = vld [vmem:[%s6231_s0 + $0x98] ss:$72 sps:$4 sm:$0xff]  }
  0x5f   :  { %2578 = vmatpush1.bf16.msra.mxu1 %v4333_v48  ;;  %v4450_v48 = vld [vmem:[%s6231_s0 + $0xb8] ss:$72 sps:$4 sm:$0xff]  }
  0x60   :  { %2982 = vmatpush1.bf16.msra.mxu0 %v4336_v49  ;;  %2579 = vmatprep.subr.bf16.mxu1 %v4343_v50  ;;  %v4430_v49 = vld [vmem:[%s6230_s1 + $0x620] ss:$8 sps:$4 sm:$0xff]   ;;  %v4435_v50 = vld [vmem:[%s6230_s1 + $0x234] ss:$8 sps:$4 sm:$0xff]  }
  0x61   :  { %2983 = vmatprep.subr.bf16.mxu0 %v4348_v51  ;;  %v4438_v51 = vld [vmem:[%s6230_s1 + $0x634] ss:$8 sps:$4 sm:$0xff]  }
  0x62   :  { %2535 = vmatmul.mubr.bf16.gmra.mrb[16].mxu1 %v4367_v53  ;;  %v4462_v53 = vld [vmem:[%s6231_s0 + $0x14c] ss:$72 sps:$4 sm:$0xff]  }
  0x63   :  { %2939 = vmatmul.mubr.bf16.gmra.mrb[16].mxu0 %v4368_v54  ;;  %2580 = vmatpush1.bf16.msra.mxu1 %v4341_v52  ;;  %v4457_v52 = vld [vmem:[%s6231_s0 + $0x12c] ss:$72 sps:$4 sm:$0xff]   ;;  %v4433_v54 = vld [vmem:[%s6230_s1 + $0x230] ss:$8 sps:$4 sm:$0xff]  }
  0x64   :  { %2984 = vmatpush1.bf16.msra.mxu0 %v4346_v55  ;;  %2581 = vmatprep.subr.bf16.mxu1 %v4353_v56  ;;  %v4436_v55 = vld [vmem:[%s6230_s1 + $0x630] ss:$8 sps:$4 sm:$0xff]   ;;  %v4443_v56 = vld [vmem:[%s6230_s1 + $0x244] ss:$8 sps:$4 sm:$0xff]  }
  0x65   :  { %2985 = vmatprep.subr.bf16.mxu0 %v4356_v57  ;;  %2544 = vmatprep.mubr.bf16.mxu1 %v4375_v58  ;;  %v4448_v57 = vld [vmem:[%s6230_s1 + $0x644] ss:$8 sps:$4 sm:$0xff]   ;;  %v4441_v58 = vld [vmem:[%s6230_s1 + $0x240] ss:$8 sps:$4 sm:$0xff]  }
  0x66   :  { %2948 = vmatprep.mubr.bf16.mxu0 %v4380_v60  ;;  %v4468_v60 = vld [vmem:[%s6231_s0 + $0x148] ss:$72 sps:$4 sm:$0xff]  }
  0x67   :  { %2582 = vmatpush1.bf16.msra.mxu1 %v4351_v59  ;;  %v4467_v59 = vld [vmem:[%s6231_s0 + $0x128] ss:$72 sps:$4 sm:$0xff]  }
  0x68   :  { %2986 = vmatpush1.bf16.msra.mxu0 %v4354_v61  ;;  %2583 = vmatprep.subr.bf16.mxu1 %v4361_v62  ;;  %v4446_v61 = vld [vmem:[%s6230_s1 + $0x640] ss:$8 sps:$4 sm:$0xff]   ;;  %v4453_v62 = vld [vmem:[%s6230_s1 + $0x254] ss:$8 sps:$4 sm:$0xff]  }
  0x69   :  { %2987 = vmatprep.subr.bf16.mxu0 %v4366_v63  ;;  %v4456_v63 = vld [vmem:[%s6230_s1 + $0x654] ss:$8 sps:$4 sm:$0xff]  }
  0x6a   :  { %2545 = vmatmul.mubr.bf16.gmra.mrb[20].mxu1 %v4385_v0  ;;  %v4475_v0 = vld [vmem:[%s6231_s0 + $0x1bc] ss:$72 sps:$4 sm:$0xff]  }
  0x6b   :  { %2949 = vmatmul.mubr.bf16.gmra.mrb[20].mxu0 %v4386_v1  ;;  %2584 = vmatpush1.bf16.msra.mxu1 %v4359_v4  ;;  %v4480_v1 = vld [vmem:[%s6231_s0 + $0x1dc] ss:$72 sps:$4 sm:$0xff]  }
  0x6c   :  { %2988 = vmatpush1.bf16.msra.mxu0 %v4364_v5  ;;  %2585 = vmatprep.subr.bf16.mxu1 %v4371_v6  ;;  %v4461_v4 = vld [vmem:[%s6230_s1 + $0x264] ss:$8 sps:$4 sm:$0xff]   ;;  %v4459_v6 = vld [vmem:[%s6230_s1 + $0x260] ss:$8 sps:$4 sm:$0xff]  }
  0x6d   :  { %2989 = vmatprep.subr.bf16.mxu0 %v4374_v7  ;;  %2554 = vmatprep.mubr.bf16.mxu1 %v3620_v8  ;;  %v4466_v5 = vld [vmem:[%s6230_s1 + $0x664] ss:$8 sps:$4 sm:$0xff]   ;;  %v4485_v7 = vld [vmem:[%s6231_s0 + $0x1b8] ss:$72 sps:$4 sm:$0xff]  }
  0x6e   :  { %2958 = vmatprep.mubr.bf16.mxu0 %v3628_v9  ;;  %v4486_v8 = vld [vmem:[%s6231_s0 + $0x1d8] ss:$72 sps:$4 sm:$0xff]  }
  0x6f   :  { %2586 = vmatpush1.bf16.msra.mxu1 %v4369_v10  ;;  %v4464_v9 = vld [vmem:[%s6230_s1 + $0x660] ss:$8 sps:$4 sm:$0xff]   ;;  %v4471_v10 = vld [vmem:[%s6230_s1 + $0x274] ss:$8 sps:$4 sm:$0xff]  }
  0x70   :  { %2990 = vmatpush1.bf16.msra.mxu0 %v4372_v11  ;;  %2587 = vmatprep.subr.bf16.mxu1 %v4379_v12  ;;  %v4474_v11 = vld [vmem:[%s6230_s1 + $0x674] ss:$8 sps:$4 sm:$0xff]  }
  0x71   :  { %2991 = vmatprep.subr.bf16.mxu0 %v4384_v13  ;;  %v4493_v12 = vld [vmem:[%s6231_s0 + $0x24c] ss:$72 sps:$4 sm:$0xff]  }
  0x72   :  { %2555 = vmatmul.mubr.bf16.gmra.mrb[24].mxu1 %v3619_v15  ;;  %v4498_v13 = vld [vmem:[%s6231_s0 + $0x26c] ss:$72 sps:$4 sm:$0xff]   ;;  %v4472_v15 = vld [vmem:[%s6230_s1 + $0x670] ss:$8 sps:$4 sm:$0xff]  }
  0x73   :  { %2959 = vmatmul.mubr.bf16.gmra.mrb[24].mxu0 %v3627_v16  ;;  %2588 = vmatpush1.bf16.msra.mxu1 %v4377_v14  ;;  %v4469_v14 = vld [vmem:[%s6230_s1 + $0x270] ss:$8 sps:$4 sm:$0xff]   ;;  %v4479_v16 = vld [vmem:[%s6230_s1 + $0x284] ss:$8 sps:$4 sm:$0xff]  }
  0x74   :  { %2992 = vmatpush1.bf16.msra.mxu0 %v4382_v17  ;;  %2589 = vmatprep.subr.bf16.mxu1 %v4389_v18  ;;  %v4484_v17 = vld [vmem:[%s6230_s1 + $0x684] ss:$8 sps:$4 sm:$0xff]   ;;  %v4477_v18 = vld [vmem:[%s6230_s1 + $0x280] ss:$8 sps:$4 sm:$0xff]  }
  0x75   :  { %2993 = vmatprep.subr.bf16.mxu0 %v4392_v19  ;;  %2595 = vmatprep.mubr.bf16.mxu1 %v4411_v20  ;;  %v4482_v19 = vld [vmem:[%s6230_s1 + $0x680] ss:$8 sps:$4 sm:$0xff]  }
  0x76   :  { %2999 = vmatprep.mubr.bf16.mxu0 %v4417_v21  ;;  %v4503_v20 = vld [vmem:[%s6231_s0 + $0x248] ss:$72 sps:$4 sm:$0xff]  }
  0x77   :  { %2590 = vmatpush1.bf16.msra.mxu1 %v4387_v22  ;;  %v4504_v21 = vld [vmem:[%s6231_s0 + $0x268] ss:$72 sps:$4 sm:$0xff]   ;;  %v4489_v22 = vld [vmem:[%s6230_s1 + $0x294] ss:$8 sps:$4 sm:$0xff]  }
  0x78   :  { %2994 = vmatpush1.bf16.msra.mxu0 %v4390_v23  ;;  %2591 = vmatprep.subr.bf16.mxu1 %v4396_v24  ;;  %v4492_v23 = vld [vmem:[%s6230_s1 + $0x694] ss:$8 sps:$4 sm:$0xff]  }
  0x79   :  { %2995 = vmatprep.subr.bf16.mxu0 %v4400_v25  ;;  %v4511_v24 = vld [vmem:[%s6231_s0 + $0x2dc] ss:$72 sps:$4 sm:$0xff]  }
  0x7a   :  { %v4516_v25 = vld [vmem:[%s6231_s0 + $0x2fc] ss:$72 sps:$4 sm:$0xff]  }
  0x7b   :  { %2592 = vmatpush1.bf16.msra.mxu1 %v4394_v26  ;;  %v4487_v26 = vld [vmem:[%s6230_s1 + $0x290] ss:$8 sps:$4 sm:$0xff]  }
  0x7c   :  { %2996 = vmatpush1.bf16.msra.mxu0 %v4398_v27  ;;  %2593 = vmatprep.subr.bf16.mxu1 %v4405_v28  ;;  %v4490_v27 = vld [vmem:[%s6230_s1 + $0x690] ss:$8 sps:$4 sm:$0xff]   ;;  %v4497_v28 = vld [vmem:[%s6230_s1 + $0x2a4] ss:$8 sps:$4 sm:$0xff]  }
  0x7d   :  { %2997 = vmatprep.subr.bf16.mxu0 %v4408_v29  ;;  %v4502_v29 = vld [vmem:[%s6230_s1 + $0x6a4] ss:$8 sps:$4 sm:$0xff]  }
  0x7f   :  { %2594 = vmatpush1.bf16.msra.mxu1 %v4403_v30  ;;  %v4495_v30 = vld [vmem:[%s6230_s1 + $0x2a0] ss:$8 sps:$4 sm:$0xff]  }
  0x80   :  { %2998 = vmatpush1.bf16.msra.mxu0 %v4406_v31  ;;  %2664 = vmatprep.subr.bf16.mxu1 %v4414_v32  ;;  %v4500_v31 = vld [vmem:[%s6230_s1 + $0x6a0] ss:$8 sps:$4 sm:$0xff]  }
  0x81   :  { %3068 = vmatprep.subr.bf16.mxu0 %v4420_v33  ;;  %v4521_v32 = vld [vmem:[%s6231_s0 + $0x2d8] ss:$72 sps:$4 sm:$0xff]  }
  0x82   :  { %2596 = vmatmul.mubr.bf16.vlgmr.msra.gmra.mrb[0].mxu1 %v4409_v34  ;;  %v4522_v33 = vld [vmem:[%s6231_s0 + $0x2f8] ss:$72 sps:$4 sm:$0xff]   ;;  %v123_v34 = vld [vmem:[%s6231_s0 + $0x368] sm:$0xff] }
  0x83   :  { %3000 = vmatmul.mubr.bf16.vlgmr.msra.gmra.mrb[0].mxu0 %v4415_v36  ;;  %2665 = vmatpush1.bf16.msra.mxu1 %v4412_v35  ;;  %v127_v35 = vld [vmem:[%s6231_s0 + $0x388] sm:$0xff]  ;;  %v4507_v36 = vld [vmem:[%s6230_s1 + $0x2b4] ss:$8 sps:$4 sm:$0xff]  }
  0x84   :  { %3069 = vmatpush1.bf16.msra.mxu0 %v4418_v37  ;;  %2666 = vmatprep.subr.bf16.mxu1 %v4423_v38  ;;  %v4510_v37 = vld [vmem:[%s6230_s1 + $0x6b4] ss:$8 sps:$4 sm:$0xff]   ;;  %v3622_v38 = vcombine.high %v123_v34, %v123_v34 }
  0x85   :  { %3070 = vmatprep.subr.bf16.mxu0 %v4426_v39  ;;  %2605 = vmatprep.mubr.bf16.mxu1 %v4439_v40  ;;  %v3630_v39 = vcombine.high %v127_v35, %v127_v35  ;;  %v4505_v40 = vld [vmem:[%s6230_s1 + $0x2b0] ss:$8 sps:$4 sm:$0xff]  }
  0x86   :  { %3009 = vmatprep.mubr.bf16.mxu0 %v4444_v41  ;;  %v4508_v41 = vld [vmem:[%s6230_s1 + $0x6b0] ss:$8 sps:$4 sm:$0xff]  }
  0x87   :  { %2667 = vmatpush1.bf16.msra.mxu1 %v4421_v42  ;;  %v4515_v42 = vld [vmem:[%s6230_s1 + $0x2c4] ss:$8 sps:$4 sm:$0xff]  }
  0x88   :  { %3071 = vmatpush1.bf16.msra.mxu0 %v4424_v43  ;;  %2668 = vmatprep.subr.bf16.mxu1 %v4429_v44  ;;  %v4520_v43 = vld [vmem:[%s6230_s1 + $0x6c4] ss:$8 sps:$4 sm:$0xff]   ;;  %v4513_v44 = vld [vmem:[%s6230_s1 + $0x2c0] ss:$8 sps:$4 sm:$0xff]  }
  0x89   :  { %3072 = vmatprep.subr.bf16.mxu0 %v4432_v45  ;;  %v3621_v45 = vcombine.low %v123_v34, %v123_v34  ;;  %v4600_v34 = vld [vmem:[%s6230_s1 + $0x364] ss:$8 sps:$4 sm:$0xff]  }
  0x8a   :  { %2606 = vmatmul.mubr.bf16.gmra.mrb[4].mxu1 %v4449_v47  ;;  %v4518_v47 = vld [vmem:[%s6230_s1 + $0x6c0] ss:$8 sps:$4 sm:$0xff]  }
  0x8b   :  { %3010 = vmatmul.mubr.bf16.gmra.mrb[4].mxu0 %v4450_v48  ;;  %2669 = vmatpush1.bf16.msra.mxu1 %v4427_v46  ;;  %v3629_v46 = vcombine.low %v127_v35, %v127_v35  ;;  %v4525_v48 = vld [vmem:[%s6230_s1 + $0x2d4] ss:$8 sps:$4 sm:$0xff]   ;;  %v4604_v35 = vld [vmem:[%s6230_s1 + $0x764] ss:$8 sps:$4 sm:$0xff]  }
  0x8c   :  { %3073 = vmatpush1.bf16.msra.mxu0 %v4430_v49  ;;  %2670 = vmatprep.subr.bf16.mxu1 %v4435_v50  ;;  %v4528_v49 = vld [vmem:[%s6230_s1 + $0x6d4] ss:$8 sps:$4 sm:$0xff]  }
  0x8d   :  { %3074 = vmatprep.subr.bf16.mxu0 %v4438_v51  ;;  %2615 = vmatprep.mubr.bf16.mxu1 %v4457_v52  ;;  %v4547_v50 = vld [vmem:[%s6231_s0 + $0x14] ss:$72 sps:$4 sm:$0xff]   ;;  %v4523_v52 = vld [vmem:[%s6230_s1 + $0x2d0] ss:$8 sps:$4 sm:$0xff]  }
  0x8e   :  { %3019 = vmatprep.mubr.bf16.mxu0 %v4462_v53  ;;  %v4553_v51 = vld [vmem:[%s6231_s0 + $0x34] ss:$72 sps:$4 sm:$0xff]   ;;  %v4526_v53 = vld [vmem:[%s6230_s1 + $0x6d0] ss:$8 sps:$4 sm:$0xff]  }
  0x8f   :  { %2671 = vmatpush1.bf16.msra.mxu1 %v4433_v54  ;;  %v4532_v54 = vld [vmem:[%s6230_s1 + $0x2e4] ss:$8 sps:$4 sm:$0xff]  }
  0x90   :  { %3075 = vmatpush1.bf16.msra.mxu0 %v4436_v55  ;;  %2672 = vmatprep.subr.bf16.mxu1 %v4443_v56  ;;  %v4536_v55 = vld [vmem:[%s6230_s1 + $0x6e4] ss:$8 sps:$4 sm:$0xff]   ;;  %v4530_v56 = vld [vmem:[%s6230_s1 + $0x2e0] ss:$8 sps:$4 sm:$0xff]  }
  0x91   :  { %3076 = vmatprep.subr.bf16.mxu0 %v4448_v57  ;;  %v4534_v57 = vld [vmem:[%s6230_s1 + $0x6e0] ss:$8 sps:$4 sm:$0xff]  }
  0x92   :  { %2616 = vmatmul.mubr.bf16.gmra.mrb[8].mxu1 %v4467_v59  ;;  %v4544_v59 = vld [vmem:[%s6230_s1 + $0x6f4] ss:$8 sps:$4 sm:$0xff]  }
  0x93   :  { %3020 = vmatmul.mubr.bf16.gmra.mrb[8].mxu0 %v4468_v60  ;;  %2673 = vmatpush1.bf16.msra.mxu1 %v4441_v58  ;;  %v4541_v58 = vld [vmem:[%s6230_s1 + $0x2f4] ss:$8 sps:$4 sm:$0xff]   ;;  %v4539_v60 = vld [vmem:[%s6230_s1 + $0x2f0] ss:$8 sps:$4 sm:$0xff]  }
  0x94   :  { %3077 = vmatpush1.bf16.msra.mxu0 %v4446_v61  ;;  %2674 = vmatprep.subr.bf16.mxu1 %v4453_v62  ;;  %v4542_v61 = vld [vmem:[%s6230_s1 + $0x6f0] ss:$8 sps:$4 sm:$0xff]   ;;  %v4550_v62 = vld [vmem:[%s6230_s1 + $0x304] ss:$8 sps:$4 sm:$0xff]  }
  0x95   :  { %3078 = vmatprep.subr.bf16.mxu0 %v4456_v63  ;;  %2625 = vmatprep.mubr.bf16.mxu1 %v4475_v0  ;;  %v4556_v63 = vld [vmem:[%s6230_s1 + $0x704] ss:$8 sps:$4 sm:$0xff]   ;;  %v4545_v0 = vld [vmem:[%s6231_s0 + $0x10] ss:$72 sps:$4 sm:$0xff]  }
  0x96   :  { %3029 = vmatprep.mubr.bf16.mxu0 %v4480_v1  ;;  %v4548_v1 = vld [vmem:[%s6230_s1 + $0x300] ss:$8 sps:$4 sm:$0xff]  }
  0x97   :  { %2675 = vmatpush1.bf16.msra.mxu1 %v4451_v2  ;;  %v4551_v2 = vld [vmem:[%s6231_s0 + $0x30] ss:$72 sps:$4 sm:$0xff]  }
  0x98   :  { %3079 = vmatpush1.bf16.msra.mxu0 %v4454_v3  ;;  %2676 = vmatprep.subr.bf16.mxu1 %v4461_v4  ;;  %v4554_v3 = vld [vmem:[%s6230_s1 + $0x700] ss:$8 sps:$4 sm:$0xff]   ;;  %v4559_v4 = vld [vmem:[%s6230_s1 + $0x314] ss:$8 sps:$4 sm:$0xff]  }
  0x99   :  { %3080 = vmatprep.subr.bf16.mxu0 %v4466_v5  ;;  %v4562_v5 = vld [vmem:[%s6230_s1 + $0x714] ss:$8 sps:$4 sm:$0xff]  }
  0x9a   :  { %2626 = vmatmul.mubr.bf16.gmra.mrb[12].mxu1 %v4485_v7  ;;  %v4577_v7 = vld [vmem:[%s6231_s0 + $0xc4] ss:$72 sps:$4 sm:$0xff]  }
  0x9b   :  { %3030 = vmatmul.mubr.bf16.gmra.mrb[12].mxu0 %v4486_v8  ;;  %2677 = vmatpush1.bf16.msra.mxu1 %v4459_v6  ;;  %v4575_v6 = vld [vmem:[%s6231_s0 + $0xa4] ss:$72 sps:$4 sm:$0xff]   ;;  %v4557_v8 = vld [vmem:[%s6230_s1 + $0x310] ss:$8 sps:$4 sm:$0xff]  }
  0x9c   :  { %3081 = vmatpush1.bf16.msra.mxu0 %v4464_v9  ;;  %2678 = vmatprep.subr.bf16.mxu1 %v4471_v10  ;;  %v4560_v9 = vld [vmem:[%s6230_s1 + $0x710] ss:$8 sps:$4 sm:$0xff]   ;;  %v4565_v10 = vld [vmem:[%s6230_s1 + $0x324] ss:$8 sps:$4 sm:$0xff]  }
  0x9d   :  { %3082 = vmatprep.subr.bf16.mxu0 %v4474_v11  ;;  %2635 = vmatprep.mubr.bf16.mxu1 %v4493_v12  ;;  %v4568_v11 = vld [vmem:[%s6230_s1 + $0x724] ss:$8 sps:$4 sm:$0xff]   ;;  %v4563_v12 = vld [vmem:[%s6230_s1 + $0x320] ss:$8 sps:$4 sm:$0xff]  }
  0x9e   :  { %3039 = vmatprep.mubr.bf16.mxu0 %v4498_v13  ;;  %v4579_v13 = vld [vmem:[%s6231_s0 + $0xa0] ss:$72 sps:$4 sm:$0xff]  }
  0x9f   :  { %2679 = vmatpush1.bf16.msra.mxu1 %v4469_v14  ;;  %v4583_v14 = vld [vmem:[%s6231_s0 + $0xc0] ss:$72 sps:$4 sm:$0xff]  }
  0xa0   :  { %3083 = vmatpush1.bf16.msra.mxu0 %v4472_v15  ;;  %2680 = vmatprep.subr.bf16.mxu1 %v4479_v16  ;;  %v4566_v15 = vld [vmem:[%s6230_s1 + $0x720] ss:$8 sps:$4 sm:$0xff]   ;;  %v4571_v16 = vld [vmem:[%s6230_s1 + $0x334] ss:$8 sps:$4 sm:$0xff]  }
  0xa1   :  { %3084 = vmatprep.subr.bf16.mxu0 %v4484_v17  ;;  %v4574_v17 = vld [vmem:[%s6230_s1 + $0x734] ss:$8 sps:$4 sm:$0xff]  }
  0xa2   :  { %2636 = vmatmul.mubr.bf16.gmra.mrb[16].mxu1 %v4503_v20  ;;  %v4569_v20 = vld [vmem:[%s6230_s1 + $0x330] ss:$8 sps:$4 sm:$0xff]  }
  0xa3   :  { %3040 = vmatmul.mubr.bf16.gmra.mrb[16].mxu0 %v4504_v21  ;;  %2681 = vmatpush1.bf16.msra.mxu1 %v4477_v18  ;;  %v4593_v18 = vld [vmem:[%s6231_s0 + $0x134] ss:$72 sps:$4 sm:$0xff]   ;;  %v4572_v21 = vld [vmem:[%s6230_s1 + $0x730] ss:$8 sps:$4 sm:$0xff]  }
  0xa4   :  { %3085 = vmatpush1.bf16.msra.mxu0 %v4482_v19  ;;  %2682 = vmatprep.subr.bf16.mxu1 %v4489_v22  ;;  %v4595_v19 = vld [vmem:[%s6231_s0 + $0x154] ss:$72 sps:$4 sm:$0xff]   ;;  %v4582_v22 = vld [vmem:[%s6230_s1 + $0x344] ss:$8 sps:$4 sm:$0xff]  }
  0xa5   :  { %3086 = vmatprep.subr.bf16.mxu0 %v4492_v23  ;;  %2645 = vmatprep.mubr.bf16.mxu1 %v4511_v24  ;;  %v4586_v23 = vld [vmem:[%s6230_s1 + $0x744] ss:$8 sps:$4 sm:$0xff]   ;;  %v4580_v24 = vld [vmem:[%s6230_s1 + $0x340] ss:$8 sps:$4 sm:$0xff]  }
  0xa6   :  { %3049 = vmatprep.mubr.bf16.mxu0 %v4516_v25  ;;  %v4597_v25 = vld [vmem:[%s6231_s0 + $0x130] ss:$72 sps:$4 sm:$0xff]  }
  0xa7   :  { %2683 = vmatpush1.bf16.msra.mxu1 %v4487_v26  ;;  %v4601_v26 = vld [vmem:[%s6231_s0 + $0x150] ss:$72 sps:$4 sm:$0xff]  }
  0xa8   :  { %3087 = vmatpush1.bf16.msra.mxu0 %v4490_v27  ;;  %2684 = vmatprep.subr.bf16.mxu1 %v4497_v28  ;;  %v4584_v27 = vld [vmem:[%s6230_s1 + $0x740] ss:$8 sps:$4 sm:$0xff]   ;;  %v4589_v28 = vld [vmem:[%s6230_s1 + $0x354] ss:$8 sps:$4 sm:$0xff]  }
  0xa9   :  { %3088 = vmatprep.subr.bf16.mxu0 %v4502_v29  ;;  %v4592_v29 = vld [vmem:[%s6230_s1 + $0x754] ss:$8 sps:$4 sm:$0xff]  }
  0xaa   :  { %2646 = vmatmul.mubr.bf16.gmra.mrb[20].mxu1 %v4521_v32  ;;  %v4587_v32 = vld [vmem:[%s6230_s1 + $0x350] ss:$8 sps:$4 sm:$0xff]  }
  0xab   :  { %3050 = vmatmul.mubr.bf16.gmra.mrb[20].mxu0 %v4522_v33  ;;  %2685 = vmatpush1.bf16.msra.mxu1 %v4495_v30  ;;  %v4611_v30 = vld [vmem:[%s6231_s0 + $0x1c4] ss:$72 sps:$4 sm:$0xff]   ;;  %v4590_v33 = vld [vmem:[%s6230_s1 + $0x750] ss:$8 sps:$4 sm:$0xff]  }
  0xac   :  { %3089 = vmatpush1.bf16.msra.mxu0 %v4500_v31  ;;  %2686 = vmatprep.subr.bf16.mxu1 %v4507_v36  ;;  %v4613_v31 = vld [vmem:[%s6231_s0 + $0x1e4] ss:$72 sps:$4 sm:$0xff]   ;;  %v4598_v36 = vld [vmem:[%s6230_s1 + $0x360] ss:$8 sps:$4 sm:$0xff]  }
  0xad   :  { %3090 = vmatprep.subr.bf16.mxu0 %v4510_v37  ;;  %2655 = vmatprep.mubr.bf16.mxu1 %v3622_v38  ;;  %v4615_v37 = vld [vmem:[%s6231_s0 + $0x1c0] ss:$72 sps:$4 sm:$0xff]  }
  0xae   :  { %3059 = vmatprep.mubr.bf16.mxu0 %v3630_v39  ;;  %v4619_v38 = vld [vmem:[%s6231_s0 + $0x1e0] ss:$72 sps:$4 sm:$0xff]  }
  0xaf   :  { %2687 = vmatpush1.bf16.msra.mxu1 %v4505_v40  ;;  %v4602_v39 = vld [vmem:[%s6230_s1 + $0x760] ss:$8 sps:$4 sm:$0xff]   ;;  %v4607_v40 = vld [vmem:[%s6230_s1 + $0x374] ss:$8 sps:$4 sm:$0xff]  }
  0xb0   :  { %3091 = vmatpush1.bf16.msra.mxu0 %v4508_v41  ;;  %2688 = vmatprep.subr.bf16.mxu1 %v4515_v42  ;;  %v4610_v41 = vld [vmem:[%s6230_s1 + $0x774] ss:$8 sps:$4 sm:$0xff]  }
  0xb1   :  { %3092 = vmatprep.subr.bf16.mxu0 %v4520_v43  ;;  %v4629_v42 = vld [vmem:[%s6231_s0 + $0x254] ss:$72 sps:$4 sm:$0xff]  }
  0xb2   :  { %2656 = vmatmul.mubr.bf16.gmra.mrb[24].mxu1 %v3621_v45  ;;  %v4631_v43 = vld [vmem:[%s6231_s0 + $0x274] ss:$72 sps:$4 sm:$0xff]   ;;  %v4608_v45 = vld [vmem:[%s6230_s1 + $0x770] ss:$8 sps:$4 sm:$0xff]  }
  0xb3   :  { %3060 = vmatmul.mubr.bf16.gmra.mrb[24].mxu0 %v3629_v46  ;;  %2689 = vmatpush1.bf16.msra.mxu1 %v4513_v44  ;;  %v4605_v44 = vld [vmem:[%s6230_s1 + $0x370] ss:$8 sps:$4 sm:$0xff]   ;;  %v4618_v46 = vld [vmem:[%s6230_s1 + $0x384] ss:$8 sps:$4 sm:$0xff]  }
  0xb4   :  { %3093 = vmatpush1.bf16.msra.mxu0 %v4518_v47  ;;  %2690 = vmatprep.subr.bf16.mxu1 %v4525_v48  ;;  %v4622_v47 = vld [vmem:[%s6230_s1 + $0x784] ss:$8 sps:$4 sm:$0xff]   ;;  %v4616_v48 = vld [vmem:[%s6230_s1 + $0x380] ss:$8 sps:$4 sm:$0xff]  }
  0xb5   :  { %3094 = vmatprep.subr.bf16.mxu0 %v4528_v49  ;;  %2696 = vmatprep.mubr.bf16.mxu1 %v4547_v50  ;;  %v4633_v49 = vld [vmem:[%s6231_s0 + $0x250] ss:$72 sps:$4 sm:$0xff]  }
  0xb6   :  { %3100 = vmatprep.mubr.bf16.mxu0 %v4553_v51  ;;  %v4637_v50 = vld [vmem:[%s6231_s0 + $0x270] ss:$72 sps:$4 sm:$0xff]   ;;  %v4620_v51 = vld [vmem:[%s6230_s1 + $0x780] ss:$8 sps:$4 sm:$0xff]  }
  0xb7   :  { %2691 = vmatpush1.bf16.msra.mxu1 %v4523_v52  ;;  %v4625_v52 = vld [vmem:[%s6230_s1 + $0x394] ss:$8 sps:$4 sm:$0xff]  }
  0xb8   :  { %3095 = vmatpush1.bf16.msra.mxu0 %v4526_v53  ;;  %2692 = vmatprep.subr.bf16.mxu1 %v4532_v54  ;;  %v4628_v53 = vld [vmem:[%s6230_s1 + $0x794] ss:$8 sps:$4 sm:$0xff]   ;;  %v4647_v54 = vld [vmem:[%s6231_s0 + $0x2e4] ss:$72 sps:$4 sm:$0xff]  }
  0xb9   :  { %3096 = vmatprep.subr.bf16.mxu0 %v4536_v55  ;;  %v4623_v55 = vld [vmem:[%s6230_s1 + $0x390] ss:$8 sps:$4 sm:$0xff]  }
  0xbb   :  { %2693 = vmatpush1.bf16.msra.mxu1 %v4530_v56  ;;  %v4649_v56 = vld [vmem:[%s6231_s0 + $0x304] ss:$72 sps:$4 sm:$0xff]  }
  0xbc   :  { %3097 = vmatpush1.bf16.msra.mxu0 %v4534_v57  ;;  %2694 = vmatprep.subr.bf16.mxu1 %v4541_v58  ;;  %v4626_v57 = vld [vmem:[%s6230_s1 + $0x790] ss:$8 sps:$4 sm:$0xff]   ;;  %v4636_v58 = vld [vmem:[%s6230_s1 + $0x3a4] ss:$8 sps:$4 sm:$0xff]  }
  0xbd   :  { %3098 = vmatprep.subr.bf16.mxu0 %v4544_v59  ;;  %v4640_v59 = vld [vmem:[%s6230_s1 + $0x7a4] ss:$8 sps:$4 sm:$0xff]  }
  0xbf   :  { %2695 = vmatpush1.bf16.msra.mxu1 %v4539_v60  ;;  %v4651_v60 = vld [vmem:[%s6231_s0 + $0x2e0] ss:$72 sps:$4 sm:$0xff]  }
  0xc0   :  { %3099 = vmatpush1.bf16.msra.mxu0 %v4542_v61  ;;  %2765 = vmatprep.subr.bf16.mxu1 %v4550_v62  ;;  %v4655_v61 = vld [vmem:[%s6231_s0 + $0x300] ss:$72 sps:$4 sm:$0xff]  }
  0xc1   :  { %3169 = vmatprep.subr.bf16.mxu0 %v4556_v63  ;;  %v4634_v62 = vld [vmem:[%s6230_s1 + $0x3a0] ss:$8 sps:$4 sm:$0xff]   ;;  %v124_v63 = vld [vmem:[%s6231_s0 + $0x370] sm:$0xff] }
  0xc2   :  { %2697 = vmatmul.mubr.bf16.vlgmr.msra.gmra.mrb[0].mxu1 %v4545_v0  ;;  %v128_v0 = vld [vmem:[%s6231_s0 + $0x390] sm:$0xff] }
  0xc3   :  { %3101 = vmatmul.mubr.bf16.vlgmr.msra.gmra.mrb[0].mxu0 %v4551_v2  ;;  %2766 = vmatpush1.bf16.msra.mxu1 %v4548_v1  ;;  %v4638_v1 = vld [vmem:[%s6230_s1 + $0x7a0] ss:$8 sps:$4 sm:$0xff]   ;;  %v4643_v2 = vld [vmem:[%s6230_s1 + $0x3b4] ss:$8 sps:$4 sm:$0xff]  }
  0xc4   :  { %3170 = vmatpush1.bf16.msra.mxu0 %v4554_v3  ;;  %2767 = vmatprep.subr.bf16.mxu1 %v4559_v4  ;;  %v4646_v3 = vld [vmem:[%s6230_s1 + $0x7b4] ss:$8 sps:$4 sm:$0xff]   ;;  %v3624_v4 = vcombine.high %v124_v63, %v124_v63 }
  0xc5   :  { %3171 = vmatprep.subr.bf16.mxu0 %v4562_v5  ;;  %2706 = vmatprep.mubr.bf16.mxu1 %v4575_v6  ;;  %v3632_v5 = vcombine.high %v128_v0, %v128_v0  ;;  %v4641_v6 = vld [vmem:[%s6230_s1 + $0x3b0] ss:$8 sps:$4 sm:$0xff]  }
  0xc6   :  { %3110 = vmatprep.mubr.bf16.mxu0 %v4577_v7  ;;  %v4644_v7 = vld [vmem:[%s6230_s1 + $0x7b0] ss:$8 sps:$4 sm:$0xff]  }
  0xc7   :  { %2768 = vmatpush1.bf16.msra.mxu1 %v4557_v8  ;;  %v4654_v8 = vld [vmem:[%s6230_s1 + $0x3c4] ss:$8 sps:$4 sm:$0xff]  }
  0xc8   :  { %3172 = vmatpush1.bf16.msra.mxu0 %v4560_v9  ;;  %2769 = vmatprep.subr.bf16.mxu1 %v4565_v10  ;;  %v4658_v9 = vld [vmem:[%s6230_s1 + $0x7c4] ss:$8 sps:$4 sm:$0xff]   ;;  %v4652_v10 = vld [vmem:[%s6230_s1 + $0x3c0] ss:$8 sps:$4 sm:$0xff]  }
  0xc9   :  { %3173 = vmatprep.subr.bf16.mxu0 %v4568_v11  ;;  %v3623_v11 = vcombine.low %v124_v63, %v124_v63  ;;  %v4735_v63 = vld [vmem:[%s6230_s1 + $0x880] ss:$8 sps:$4 sm:$0xff]  }
  0xca   :  { %2707 = vmatmul.mubr.bf16.gmra.mrb[4].mxu1 %v4579_v13  ;;  %v4656_v13 = vld [vmem:[%s6230_s1 + $0x7c0] ss:$8 sps:$4 sm:$0xff]  }
  0xcb   :  { %3111 = vmatmul.mubr.bf16.gmra.mrb[4].mxu0 %v4583_v14  ;;  %2770 = vmatpush1.bf16.msra.mxu1 %v4563_v12  ;;  %v3631_v12 = vcombine.low %v128_v0, %v128_v0  ;;  %v4661_v14 = vld [vmem:[%s6230_s1 + $0x3d4] ss:$8 sps:$4 sm:$0xff]  }
  0xcc   :  { %3174 = vmatpush1.bf16.msra.mxu0 %v4566_v15  ;;  %2771 = vmatprep.subr.bf16.mxu1 %v4571_v16  ;;  %v4664_v15 = vld [vmem:[%s6230_s1 + $0x7d4] ss:$8 sps:$4 sm:$0xff]  }
  0xcd   :  { %3175 = vmatprep.subr.bf16.mxu0 %v4574_v17  ;;  %2716 = vmatprep.mubr.bf16.mxu1 %v4593_v18  ;;  %v4683_v16 = vld [vmem:[%s6231_s0 + $0x1c] ss:$72 sps:$4 sm:$0xff]   ;;  %v4659_v18 = vld [vmem:[%s6230_s1 + $0x3d0] ss:$8 sps:$4 sm:$0xff]  }
  0xce   :  { %3120 = vmatprep.mubr.bf16.mxu0 %v4595_v19  ;;  %v4686_v17 = vld [vmem:[%s6231_s0 + $0x3c] ss:$72 sps:$4 sm:$0xff]   ;;  %v4662_v19 = vld [vmem:[%s6230_s1 + $0x7d0] ss:$8 sps:$4 sm:$0xff]  }
  0xcf   :  { %2772 = vmatpush1.bf16.msra.mxu1 %v4569_v20  ;;  %v4670_v20 = vld [vmem:[%s6230_s1 + $0x3e4] ss:$8 sps:$4 sm:$0xff]   ;;  %v4740_v0 = vld [vmem:[%s6230_s1 + $0x894] ss:$8 sps:$4 sm:$0xff]  }
  0xd0   :  { %3176 = vmatpush1.bf16.msra.mxu0 %v4572_v21  ;;  %2773 = vmatprep.subr.bf16.mxu1 %v4582_v22  ;;  %v4674_v21 = vld [vmem:[%s6230_s1 + $0x7e4] ss:$8 sps:$4 sm:$0xff]   ;;  %v4668_v22 = vld [vmem:[%s6230_s1 + $0x3e0] ss:$8 sps:$4 sm:$0xff]  }
  0xd1   :  { %3177 = vmatprep.subr.bf16.mxu0 %v4586_v23  ;;  %v4672_v23 = vld [vmem:[%s6230_s1 + $0x7e0] ss:$8 sps:$4 sm:$0xff]  }
  0xd2   :  { %2717 = vmatmul.mubr.bf16.gmra.mrb[8].mxu1 %v4597_v25  ;;  %v4680_v25 = vld [vmem:[%s6230_s1 + $0x7f4] ss:$8 sps:$4 sm:$0xff]  }
  0xd3   :  { %3121 = vmatmul.mubr.bf16.gmra.mrb[8].mxu0 %v4601_v26  ;;  %2774 = vmatpush1.bf16.msra.mxu1 %v4580_v24  ;;  %v4677_v24 = vld [vmem:[%s6230_s1 + $0x3f4] ss:$8 sps:$4 sm:$0xff]   ;;  %v4675_v26 = vld [vmem:[%s6230_s1 + $0x3f0] ss:$8 sps:$4 sm:$0xff]  }
  0xd4   :  { %3178 = vmatpush1.bf16.msra.mxu0 %v4584_v27  ;;  %2775 = vmatprep.subr.bf16.mxu1 %v4589_v28  ;;  %v4678_v27 = vld [vmem:[%s6230_s1 + $0x7f0] ss:$8 sps:$4 sm:$0xff]   ;;  %v4689_v28 = vld [vmem:[%s6230_s1 + $0x804] ss:$8 sps:$4 sm:$0xff]  }
  0xd5   :  { %3179 = vmatprep.subr.bf16.mxu0 %v4592_v29  ;;  %2726 = vmatprep.mubr.bf16.mxu1 %v4611_v30  ;;  %v4681_v29 = vld [vmem:[%s6231_s0 + $0x18] ss:$72 sps:$4 sm:$0xff]  }
  0xd6   :  { %3130 = vmatprep.mubr.bf16.mxu0 %v4613_v31  ;;  %v4684_v30 = vld [vmem:[%s6231_s0 + $0x38] ss:$72 sps:$4 sm:$0xff]  }
  0xd7   :  { %2776 = vmatpush1.bf16.msra.mxu1 %v4587_v32  ;;  %v4687_v31 = vld [vmem:[%s6230_s1 + $0x800] ss:$8 sps:$4 sm:$0xff]   ;;  %v4692_v32 = vld [vmem:[%s6230_s1 + $0x814] ss:$8 sps:$4 sm:$0xff]  }
  0xd8   :  { %3180 = vmatpush1.bf16.msra.mxu0 %v4590_v33  ;;  %2777 = vmatprep.subr.bf16.mxu1 %v4600_v34  ;;  %v4693_v33 = vld [vmem:[%s6231_s0 + $0xac] ss:$72 sps:$4 sm:$0xff]  }
  0xd9   :  { %3181 = vmatprep.subr.bf16.mxu0 %v4604_v35  ;;  %v4695_v34 = vld [vmem:[%s6231_s0 + $0xcc] ss:$72 sps:$4 sm:$0xff]   ;;  %v4690_v35 = vld [vmem:[%s6230_s1 + $0x810] ss:$8 sps:$4 sm:$0xff]  }
  0xda   :  { %2727 = vmatmul.mubr.bf16.gmra.mrb[12].mxu1 %v4615_v37  ;;  %v4697_v37 = vld [vmem:[%s6231_s0 + $0xa8] ss:$72 sps:$4 sm:$0xff]  }
  0xdb   :  { %3131 = vmatmul.mubr.bf16.gmra.mrb[12].mxu0 %v4619_v38  ;;  %2778 = vmatpush1.bf16.msra.mxu1 %v4598_v36  ;;  %v4701_v36 = vld [vmem:[%s6230_s1 + $0x824] ss:$8 sps:$4 sm:$0xff]   ;;  %v4698_v38 = vld [vmem:[%s6231_s0 + $0xc8] ss:$72 sps:$4 sm:$0xff]  }
  0xdc   :  { %3182 = vmatpush1.bf16.msra.mxu0 %v4602_v39  ;;  %2779 = vmatprep.subr.bf16.mxu1 %v4607_v40  ;;  %v4699_v39 = vld [vmem:[%s6230_s1 + $0x820] ss:$8 sps:$4 sm:$0xff]   ;;  %v4704_v40 = vld [vmem:[%s6230_s1 + $0x834] ss:$8 sps:$4 sm:$0xff]  }
  0xdd   :  { %3183 = vmatprep.subr.bf16.mxu0 %v4610_v41  ;;  %2736 = vmatprep.mubr.bf16.mxu1 %v4629_v42  ;;  %v4705_v41 = vld [vmem:[%s6231_s0 + $0x13c] ss:$72 sps:$4 sm:$0xff]  }
  0xde   :  { %3140 = vmatprep.mubr.bf16.mxu0 %v4631_v43  ;;  %v4707_v42 = vld [vmem:[%s6231_s0 + $0x15c] ss:$72 sps:$4 sm:$0xff]   ;;  %v4702_v43 = vld [vmem:[%s6230_s1 + $0x830] ss:$8 sps:$4 sm:$0xff]  }
  0xdf   :  { %2780 = vmatpush1.bf16.msra.mxu1 %v4605_v44  ;;  %v4713_v44 = vld [vmem:[%s6230_s1 + $0x844] ss:$8 sps:$4 sm:$0xff]  }
  0xe0   :  { %3184 = vmatpush1.bf16.msra.mxu0 %v4608_v45  ;;  %2781 = vmatprep.subr.bf16.mxu1 %v4618_v46  ;;  %v4709_v45 = vld [vmem:[%s6231_s0 + $0x138] ss:$72 sps:$4 sm:$0xff]  }
  0xe1   :  { %3185 = vmatprep.subr.bf16.mxu0 %v4622_v47  ;;  %v4710_v46 = vld [vmem:[%s6231_s0 + $0x158] ss:$72 sps:$4 sm:$0xff]  }
  0xe2   :  { %2737 = vmatmul.mubr.bf16.gmra.mrb[16].mxu1 %v4633_v49  ;;  %v4711_v47 = vld [vmem:[%s6230_s1 + $0x840] ss:$8 sps:$4 sm:$0xff]   ;;  %v4717_v49 = vld [vmem:[%s6231_s0 + $0x1cc] ss:$72 sps:$4 sm:$0xff]  }
  0xe3   :  { %3141 = vmatmul.mubr.bf16.gmra.mrb[16].mxu0 %v4637_v50  ;;  %2782 = vmatpush1.bf16.msra.mxu1 %v4616_v48  ;;  %v4716_v48 = vld [vmem:[%s6230_s1 + $0x854] ss:$8 sps:$4 sm:$0xff]  }
  0xe4   :  { %3186 = vmatpush1.bf16.msra.mxu0 %v4620_v51  ;;  %2783 = vmatprep.subr.bf16.mxu1 %v4625_v52  ;;  %v4719_v50 = vld [vmem:[%s6231_s0 + $0x1ec] ss:$72 sps:$4 sm:$0xff]   ;;  %v4714_v51 = vld [vmem:[%s6230_s1 + $0x850] ss:$8 sps:$4 sm:$0xff]  }
  0xe5   :  { %3187 = vmatprep.subr.bf16.mxu0 %v4628_v53  ;;  %2746 = vmatprep.mubr.bf16.mxu1 %v4647_v54  ;;  %v4725_v52 = vld [vmem:[%s6230_s1 + $0x864] ss:$8 sps:$4 sm:$0xff]   ;;  %v4721_v53 = vld [vmem:[%s6231_s0 + $0x1c8] ss:$72 sps:$4 sm:$0xff]  }
  0xe6   :  { %3150 = vmatprep.mubr.bf16.mxu0 %v4649_v56  ;;  %v4722_v54 = vld [vmem:[%s6231_s0 + $0x1e8] ss:$72 sps:$4 sm:$0xff]   ;;  %v4728_v56 = vld [vmem:[%s6230_s1 + $0x874] ss:$8 sps:$4 sm:$0xff]  }
  0xe7   :  { %2784 = vmatpush1.bf16.msra.mxu1 %v4623_v55  ;;  %v4723_v55 = vld [vmem:[%s6230_s1 + $0x860] ss:$8 sps:$4 sm:$0xff]  }
  0xe8   :  { %3188 = vmatpush1.bf16.msra.mxu0 %v4626_v57  ;;  %2785 = vmatprep.subr.bf16.mxu1 %v4636_v58  ;;  %v4729_v57 = vld [vmem:[%s6231_s0 + $0x25c] ss:$72 sps:$4 sm:$0xff]  }
  0xe9   :  { %3189 = vmatprep.subr.bf16.mxu0 %v4640_v59  ;;  %v4731_v58 = vld [vmem:[%s6231_s0 + $0x27c] ss:$72 sps:$4 sm:$0xff]   ;;  %v4726_v59 = vld [vmem:[%s6230_s1 + $0x870] ss:$8 sps:$4 sm:$0xff]  }
  0xea   :  { %2747 = vmatmul.mubr.bf16.gmra.mrb[20].mxu1 %v4651_v60  ;;  %v4737_v60 = vld [vmem:[%s6230_s1 + $0x884] ss:$8 sps:$4 sm:$0xff]  }
  0xeb   :  { %3151 = vmatmul.mubr.bf16.gmra.mrb[20].mxu0 %v4655_v61  ;;  %2786 = vmatpush1.bf16.msra.mxu1 %v4634_v62  ;;  %v4733_v61 = vld [vmem:[%s6231_s0 + $0x258] ss:$72 sps:$4 sm:$0xff]  }
  0xec   :  { %3190 = vmatpush1.bf16.msra.mxu0 %v4638_v1  ;;  %2787 = vmatprep.subr.bf16.mxu1 %v4643_v2  ;;  %v4734_v62 = vld [vmem:[%s6231_s0 + $0x278] ss:$72 sps:$4 sm:$0xff]   ;;  %v4741_v1 = vld [vmem:[%s6231_s0 + $0x2ec] ss:$72 sps:$4 sm:$0xff]  }
  0xed   :  { %3191 = vmatprep.subr.bf16.mxu0 %v4646_v3  ;;  %2756 = vmatprep.mubr.bf16.mxu1 %v3624_v4  ;;  %v4743_v2 = vld [vmem:[%s6231_s0 + $0x30c] ss:$72 sps:$4 sm:$0xff]   ;;  %v4738_v3 = vld [vmem:[%s6230_s1 + $0x890] ss:$8 sps:$4 sm:$0xff]  }
  0xee   :  { %3160 = vmatprep.mubr.bf16.mxu0 %v3632_v5  ;;  %v4749_v4 = vld [vmem:[%s6230_s1 + $0x8a4] ss:$8 sps:$4 sm:$0xff]   ;;  %v4745_v5 = vld [vmem:[%s6231_s0 + $0x2e8] ss:$72 sps:$4 sm:$0xff]  }
  0xef   :  { %2788 = vmatpush1.bf16.msra.mxu1 %v4641_v6  ;;  %v4746_v6 = vld [vmem:[%s6231_s0 + $0x308] ss:$72 sps:$4 sm:$0xff]  }
  0xf0   :  { %3192 = vmatpush1.bf16.msra.mxu0 %v4644_v7  ;;  %2789 = vmatprep.subr.bf16.mxu1 %v4654_v8  ;;  %v125_v7 = vld [vmem:[%s6231_s0 + $0x378] sm:$0xff] }
  0xf1   :  { %3193 = vmatprep.subr.bf16.mxu0 %v4658_v9  ;;  %v129_v8 = vld [vmem:[%s6231_s0 + $0x398] sm:$0xff]  ;;  %v4747_v9 = vld [vmem:[%s6230_s1 + $0x8a0] ss:$8 sps:$4 sm:$0xff]  }
  0xf2   :  { %2757 = vmatmul.mubr.bf16.gmra.mrb[24].mxu1 %v3623_v11  ;;  %v3626_v11 = vcombine.high %v125_v7, %v125_v7 }
  0xf3   :  { %3161 = vmatmul.mubr.bf16.gmra.mrb[24].mxu0 %v3631_v12  ;;  %2790 = vmatpush1.bf16.msra.mxu1 %v4652_v10  ;;  %v4752_v10 = vld [vmem:[%s6230_s1 + $0x8b4] ss:$8 sps:$4 sm:$0xff]   ;;  %v3634_v12 = vcombine.high %v129_v8, %v129_v8 }
  0xf4   :  { %3194 = vmatpush1.bf16.msra.mxu0 %v4656_v13  ;;  %2791 = vmatprep.subr.bf16.mxu1 %v4661_v14  ;;  %v4750_v13 = vld [vmem:[%s6230_s1 + $0x8b0] ss:$8 sps:$4 sm:$0xff]   ;;  %v4759_v14 = vld [vmem:[%s6230_s1 + $0x8c4] ss:$8 sps:$4 sm:$0xff]  }
  0xf5   :  { %3195 = vmatprep.subr.bf16.mxu0 %v4664_v15  ;;  %2797 = vmatprep.mubr.bf16.mxu1 %v4683_v16  ;;  %v3625_v15 = vcombine.low %v125_v7, %v125_v7  ;;  %v3633_v16 = vcombine.low %v129_v8, %v129_v8 }
  0xf6   :  { %3201 = vmatprep.mubr.bf16.mxu0 %v4686_v17  ;;  %v4757_v17 = vld [vmem:[%s6230_s1 + $0x8c0] ss:$8 sps:$4 sm:$0xff]  }
  0xf7   :  { %2792 = vmatpush1.bf16.msra.mxu1 %v4659_v18  ;;  %v4762_v18 = vld [vmem:[%s6230_s1 + $0x8d4] ss:$8 sps:$4 sm:$0xff]  }
  0xf8   :  { %3196 = vmatpush1.bf16.msra.mxu0 %v4662_v19  ;;  %2793 = vmatprep.subr.bf16.mxu1 %v4670_v20  ;;  %v4771_v19 = vld [vmem:[%s6231_s0 + $0x44] ss:$72 sps:$4 sm:$0xff]  }
  0xf9   :  { %3197 = vmatprep.subr.bf16.mxu0 %v4674_v21  ;;  %v4774_v20 = vld [vmem:[%s6231_s0 + $0x284] ss:$72 sps:$4 sm:$0xff]   ;;  %v4760_v21 = vld [vmem:[%s6230_s1 + $0x8d0] ss:$8 sps:$4 sm:$0xff]  }
  0xfb   :  { %2794 = vmatpush1.bf16.msra.mxu1 %v4668_v22  ;;  %v4765_v22 = vld [vmem:[%s6230_s1 + $0x8e4] ss:$8 sps:$4 sm:$0xff]  }
  0xfc   :  { %3198 = vmatpush1.bf16.msra.mxu0 %v4672_v23  ;;  %2795 = vmatprep.subr.bf16.mxu1 %v4677_v24  ;;  %v4763_v23 = vld [vmem:[%s6230_s1 + $0x8e0] ss:$8 sps:$4 sm:$0xff]   ;;  %v4768_v24 = vld [vmem:[%s6230_s1 + $0x8f4] ss:$8 sps:$4 sm:$0xff]  }
  0xfd   :  { %3199 = vmatprep.subr.bf16.mxu0 %v4680_v25  ;;  %v4766_v25 = vld [vmem:[%s6230_s1 + $0x8f0] ss:$8 sps:$4 sm:$0xff]  }
  0xff   :  { %2796 = vmatpush1.bf16.msra.mxu1 %v4675_v26  ;;  %v4769_v26 = vld [vmem:[%s6231_s0 + $0x40] ss:$72 sps:$4 sm:$0xff]  }
 0x100   :  { %3200 = vmatpush1.bf16.msra.mxu0 %v4678_v27  ;;  %3925 = vmatprep.subr.bf16.mxu1 %v4689_v28  ;;  %v4772_v27 = vld [vmem:[%s6231_s0 + $0x280] ss:$72 sps:$4 sm:$0xff]  }
 0x101   :  { %3270 = vmatprep.subr.bf16.mxu0 %v4689_v28  ;;  %v4775_v28 = vld [vmem:[%s6231_s0 + $0xd4] ss:$72 sps:$4 sm:$0xff]  }
 0x102   :  { %2798 = vmatmul.mubr.bf16.vlgmr.msra.gmra.mrb[0].mxu1 %v4681_v29  ;;  %v4777_v29 = vld [vmem:[%s6231_s0 + $0x314] ss:$72 sps:$4 sm:$0xff]  }
 0x103   :  { %3202 = vmatmul.mubr.bf16.vlgmr.msra.gmra.mrb[0].mxu0 %v4684_v30  ;;  %3941 = vmatpush1.bf16.msra.mxu1 %v4687_v31  ;;  %v130_v30 = vld [vmem:[%s6231_s0 + $0x3a0] sm:$0xff] }
 0x104   :  { %3271 = vmatpush1.bf16.msra.mxu0 %v4687_v31  ;;  %3926 = vmatprep.subr.bf16.mxu1 %v4692_v32  ;;  %v4779_v31 = vld [vmem:[%s6231_s0 + $0xd0] ss:$72 sps:$4 sm:$0xff]  }
 0x105   :  { %3272 = vmatprep.subr.bf16.mxu0 %v4692_v32  ;;  %2807 = vmatprep.mubr.bf16.mxu1 %v4693_v33  ;;  %v4780_v32 = vld [vmem:[%s6231_s0 + $0x310] ss:$72 sps:$4 sm:$0xff]   ;;  %v4781_v33 = vld [vmem:[%s6231_s0 + $0x164] ss:$72 sps:$4 sm:$0xff]  }
 0x106   :  { %3211 = vmatprep.mubr.bf16.mxu0 %v4695_v34  ;;  %v3636_v34 = vcombine.high %v130_v30, %v130_v30 }
 0x107   :  { %3942 = vmatpush1.bf16.msra.mxu1 %v4690_v35 }
 0x108   :  { %3273 = vmatpush1.bf16.msra.mxu0 %v4690_v35  ;;  %3927 = vmatprep.subr.bf16.mxu1 %v4701_v36  ;;  %v4784_v35 = vld [vmem:[%s6231_s0 + $0x160] ss:$72 sps:$4 sm:$0xff]  }
 0x109   :  { %3274 = vmatprep.subr.bf16.mxu0 %v4701_v36  ;;  %v3635_v36 = vcombine.low %v130_v30, %v130_v30 }
 0x10a   :  { %2808 = vmatmul.mubr.bf16.gmra.mrb[4].mxu1 %v4697_v37  ;;  %v4786_v37 = vld [vmem:[%s6231_s0 + $0x1f4] ss:$72 sps:$4 sm:$0xff]  }
 0x10b   :  { %3212 = vmatmul.mubr.bf16.gmra.mrb[4].mxu0 %v4698_v38  ;;  %3943 = vmatpush1.bf16.msra.mxu1 %v4699_v39  ;;  %v4788_v38 = vld [vmem:[%s6231_s0 + $0x1f0] ss:$72 sps:$4 sm:$0xff]  }
 0x10c   :  { %3275 = vmatpush1.bf16.msra.mxu0 %v4699_v39  ;;  %3928 = vmatprep.subr.bf16.mxu1 %v4704_v40 }
 0x10d   :  { %3276 = vmatprep.subr.bf16.mxu0 %v4704_v40  ;;  %2817 = vmatprep.mubr.bf16.mxu1 %v4705_v41 }
 0x10e   :  { %3221 = vmatprep.mubr.bf16.mxu0 %v4707_v42 }
 0x10f   :  { %3944 = vmatpush1.bf16.msra.mxu1 %v4702_v43 }
 0x110   :  { %3277 = vmatpush1.bf16.msra.mxu0 %v4702_v43  ;;  %3929 = vmatprep.subr.bf16.mxu1 %v4713_v44 }
 0x111   :  { %3278 = vmatprep.subr.bf16.mxu0 %v4713_v44 }
 0x112   :  { %2818 = vmatmul.mubr.bf16.gmra.mrb[8].mxu1 %v4709_v45 }
 0x113   :  { %3222 = vmatmul.mubr.bf16.gmra.mrb[8].mxu0 %v4710_v46  ;;  %3945 = vmatpush1.bf16.msra.mxu1 %v4711_v47 }
 0x114   :  { %3279 = vmatpush1.bf16.msra.mxu0 %v4711_v47  ;;  %3930 = vmatprep.subr.bf16.mxu1 %v4716_v48 }
 0x115   :  { %3280 = vmatprep.subr.bf16.mxu0 %v4716_v48  ;;  %2827 = vmatprep.mubr.bf16.mxu1 %v4717_v49 }
 0x116   :  { %3231 = vmatprep.mubr.bf16.mxu0 %v4719_v50 }
 0x117   :  { %3946 = vmatpush1.bf16.msra.mxu1 %v4714_v51 }
 0x118   :  { %3281 = vmatpush1.bf16.msra.mxu0 %v4714_v51  ;;  %3931 = vmatprep.subr.bf16.mxu1 %v4725_v52 }
 0x119   :  { %3282 = vmatprep.subr.bf16.mxu0 %v4725_v52 }
 0x11a   :  { %2828 = vmatmul.mubr.bf16.gmra.mrb[12].mxu1 %v4721_v53 }
 0x11b   :  { %3232 = vmatmul.mubr.bf16.gmra.mrb[12].mxu0 %v4722_v54  ;;  %3947 = vmatpush1.bf16.msra.mxu1 %v4723_v55 }
 0x11c   :  { %3283 = vmatpush1.bf16.msra.mxu0 %v4723_v55  ;;  %3932 = vmatprep.subr.bf16.mxu1 %v4728_v56 }
 0x11d   :  { %3284 = vmatprep.subr.bf16.mxu0 %v4728_v56  ;;  %2837 = vmatprep.mubr.bf16.mxu1 %v4729_v57 }
 0x11e   :  { %3241 = vmatprep.mubr.bf16.mxu0 %v4731_v58 }
 0x11f   :  { %3948 = vmatpush1.bf16.msra.mxu1 %v4726_v59 }
 0x120   :  { %3285 = vmatpush1.bf16.msra.mxu0 %v4726_v59  ;;  %3933 = vmatprep.subr.bf16.mxu1 %v4737_v60 }
 0x121   :  { %3286 = vmatprep.subr.bf16.mxu0 %v4737_v60 }
 0x122   :  { %2838 = vmatmul.mubr.bf16.gmra.mrb[16].mxu1 %v4733_v61 }
 0x123   :  { %3242 = vmatmul.mubr.bf16.gmra.mrb[16].mxu0 %v4734_v62  ;;  %3949 = vmatpush1.bf16.msra.mxu1 %v4735_v63 }
 0x124   :  { %3287 = vmatpush1.bf16.msra.mxu0 %v4735_v63  ;;  %3934 = vmatprep.subr.bf16.mxu1 %v4740_v0 }
 0x125   :  { %3288 = vmatprep.subr.bf16.mxu0 %v4740_v0  ;;  %2847 = vmatprep.mubr.bf16.mxu1 %v4741_v1 }
 0x126   :  { %3251 = vmatprep.mubr.bf16.mxu0 %v4743_v2 }
 0x127   :  { %3950 = vmatpush1.bf16.msra.mxu1 %v4738_v3 }
 0x128   :  { %3289 = vmatpush1.bf16.msra.mxu0 %v4738_v3  ;;  %3935 = vmatprep.subr.bf16.mxu1 %v4749_v4 }
 0x129   :  { %3290 = vmatprep.subr.bf16.mxu0 %v4749_v4 }
 0x12a   :  { %2848 = vmatmul.mubr.bf16.gmra.mrb[20].mxu1 %v4745_v5 }
 0x12b   :  { %3252 = vmatmul.mubr.bf16.gmra.mrb[20].mxu0 %v4746_v6  ;;  %3951 = vmatpush1.bf16.msra.mxu1 %v4747_v9 }
 0x12c   :  { %3291 = vmatpush1.bf16.msra.mxu0 %v4747_v9  ;;  %3936 = vmatprep.subr.bf16.mxu1 %v4752_v10 }
 0x12d   :  { %3292 = vmatprep.subr.bf16.mxu0 %v4752_v10  ;;  %2857 = vmatprep.mubr.bf16.mxu1 %v3626_v11 }
 0x12e   :  { %3261 = vmatprep.mubr.bf16.mxu0 %v3634_v12 }
 0x12f   :  { %3952 = vmatpush1.bf16.msra.mxu1 %v4750_v13 }
 0x130   :  { %3293 = vmatpush1.bf16.msra.mxu0 %v4750_v13  ;;  %3937 = vmatprep.subr.bf16.mxu1 %v4759_v14 }
 0x131   :  { %3294 = vmatprep.subr.bf16.mxu0 %v4759_v14 }
 0x132   :  { %2858 = vmatmul.mubr.bf16.gmra.mrb[24].mxu1 %v3625_v15 }
 0x133   :  { %3262 = vmatmul.mubr.bf16.gmra.mrb[24].mxu0 %v3633_v16  ;;  %3953 = vmatpush1.bf16.msra.mxu1 %v4757_v17 }
 0x134   :  { %3295 = vmatpush1.bf16.msra.mxu0 %v4757_v17  ;;  %3938 = vmatprep.subr.bf16.mxu1 %v4762_v18 }
 0x135   :  { %3296 = vmatprep.subr.bf16.mxu0 %v4762_v18  ;;  %3302 = vmatprep.mubr.bf16.mxu0 %v4771_v19 }
 0x136   :  { %3342 = vmatprep.mubr.bf16.mxu1 %v4774_v20 }
 0x137   :  { %3954 = vmatpush1.bf16.msra.mxu1 %v4760_v21 }
 0x138   :  { %3297 = vmatpush1.bf16.msra.mxu0 %v4760_v21  ;;  %3939 = vmatprep.subr.bf16.mxu1 %v4765_v22 }
 0x139   :  { %3298 = vmatprep.subr.bf16.mxu0 %v4765_v22 }
 0x13b   :  { %3955 = vmatpush1.bf16.msra.mxu1 %v4763_v23 }
 0x13c   :  { %3299 = vmatpush1.bf16.msra.mxu0 %v4763_v23  ;;  %3940 = vmatprep.subr.bf16.mxu1 %v4768_v24 }
 0x13d   :  { %3300 = vmatprep.subr.bf16.mxu0 %v4768_v24 }
 0x13f   :  { %3956 = vmatpush1.bf16.msra.mxu1 %v4766_v25 }
 0x140   :  { %3301 = vmatpush1.bf16.msra.mxu0 %v4766_v25 }
 0x142   :  { %3343 = vmatmul.mubr.bf16.vlgmr.msra.gmra.mrb[28].mxu1 %v4772_v27 }
 0x143   :  { %3303 = vmatmul.mubr.bf16.vlgmr.msra.gmra.mrb[0].mxu0 %v4769_v26  ;;  %3352 = vmatprep.mubr.bf16.mxu1 %v4777_v29 }
 0x144   :  { %3312 = vmatprep.mubr.bf16.mxu0 %v4775_v28 }
 0x14a   :  { %3353 = vmatmul.mubr.bf16.gmra.mrb[32].mxu1 %v4780_v32 }
 0x14b   :  { %3313 = vmatmul.mubr.bf16.gmra.mrb[4].mxu0 %v4779_v31  ;;  %3362 = vmatprep.mubr.bf16.mxu1 %v3636_v34 }
 0x14c   :  { %3322 = vmatprep.mubr.bf16.mxu0 %v4781_v33 }
 0x152   :  { %3363 = vmatmul.mubr.bf16.gmra.mrb[36].mxu1 %v3635_v36 }
 0x153   :  { %3323 = vmatmul.mubr.bf16.gmra.mrb[8].mxu0 %v4784_v35 }
 0x154   :  { %3332 = vmatprep.mubr.bf16.mxu0 %v4786_v37 }
 0x15b   :  { %3333 = vmatmul.mubr.bf16.gmra.mrb[12].mxu0 %v4788_v38 }
 0x1d5   :  { %v2799_v39 = vpop.f32.mrb[0].mxu1 }
 0x1d6   :  { %v2801_v40 = vpop.f32.mrb[1].mxu1 }
 0x1d7   :  { %v2803_v41 = vpop.f32.mrb[2].mxu1 }
 0x1d8   :  { %v6029_v42 = vpop.f32.mrb[3].mxu1 }
 0x1dd   :  { %v6031_v43 = vpop.f32.mrb[4].mxu1 }
 0x1de   :  { %v6033_v44 = vpop.f32.mrb[5].mxu1 }
 0x1df   :  { %v6035_v45 = vpop.f32.mrb[6].mxu1 }
 0x1e0   :  { %v6037_v46 = vpop.f32.mrb[7].mxu1 }
 0x1e5   :  { %v6039_v47 = vpop.f32.mrb[8].mxu1 }
 0x1e6   :  { %v6041_v48 = vpop.f32.mrb[9].mxu1 }
 0x1e7   :  { %v6043_v49 = vpop.f32.mrb[10].mxu1 }
 0x1e8   :  { %v6045_v50 = vpop.f32.mrb[11].mxu1 }
 0x1ed   :  { %v6047_v51 = vpop.f32.mrb[12].mxu1 }
 0x1ee   :  { %v6049_v52 = vpop.f32.mrb[13].mxu1 }
 0x1ef   :  { %v6051_v53 = vpop.f32.mrb[14].mxu1 }
 0x1f0   :  { %v6053_v54 = vpop.f32.mrb[15].mxu1 }
 0x1f5   :  { %v2839_v55 = vpop.f32.mrb[16].mxu1 }
 0x1f6   :  { %v3243_v56 = vpop.f32.mrb[16].mxu0  ;;  %v2841_v58 = vpop.f32.mrb[17].mxu1 }
 0x1f7   :  { %v3973_v57 = vadd.f32 %v3243_v56, %v2839_v55  ;;  %v3245_v59 = vpop.f32.mrb[17].mxu0  ;;  %v2843_v61 = vpop.f32.mrb[18].mxu1 }
 0x1f8   :  { %v3975_v60 = vadd.f32 %v3245_v59, %v2841_v58  ;;  %v3247_v62 = vpop.f32.mrb[18].mxu0  ;;  %v2845_v0 = vpop.f32.mrb[19].mxu1 }
 0x1f9   :  { %v3977_v63 = vadd.f32 %v3247_v62, %v2843_v61  ;;  %v3249_v1 = vpop.f32.mrb[19].mxu0 }
 0x1fa   :  { %v3979_v2 = vadd.f32 %v3249_v1, %v2845_v0 }
 0x1fd   :  { %v2849_v3 = vpop.f32.mrb[20].mxu1 }
 0x1fe   :  { %v3253_v4 = vpop.f32.mrb[20].mxu0  ;;  %v2851_v6 = vpop.f32.mrb[21].mxu1 }
 0x1ff   :  { %v3981_v5 = vadd.f32 %v3253_v4, %v2849_v3  ;;  %v3255_v7 = vpop.f32.mrb[21].mxu0  ;;  %v2853_v9 = vpop.f32.mrb[22].mxu1 }
 0x200   :  { %v3983_v8 = vadd.f32 %v3255_v7, %v2851_v6  ;;  %v3257_v10 = vpop.f32.mrb[22].mxu0  ;;  %v2855_v12 = vpop.f32.mrb[23].mxu1 }
 0x201   :  { %v6055_v11 = vadd.f32 %v3257_v10, %v2853_v9  ;;  %v3259_v13 = vpop.f32.mrb[23].mxu0 }
 0x202   :  { %v6057_v14 = vadd.f32 %v3259_v13, %v2855_v12 }
 0x205   :  { %v2859_v15 = vpop.f32.mrb[24].mxu1 }
 0x206   :  { %v3263_v16 = vpop.f32.mrb[24].mxu0  ;;  %v2861_v18 = vpop.f32.mrb[25].mxu1 }
 0x207   :  { %v6059_v17 = vadd.f32 %v3263_v16, %v2859_v15  ;;  %v3265_v19 = vpop.f32.mrb[25].mxu0  ;;  %v2863_v21 = vpop.f32.mrb[26].mxu1 }
 0x208   :  { %v6061_v20 = vadd.f32 %v3265_v19, %v2861_v18  ;;  %v3267_v22 = vpop.f32.mrb[26].mxu0  ;;  %v2864_v23 = vpop.f32.mrb[27].mxu1 }
 0x209   :  { %v3268_v24 = vpop.f32.mrb[27].mxu0 }
 0x215   :  { %v3344_v26 = vpop.f32.mrb[28].mxu1 }
 0x216   :  { %v3304_v25 = vpop.f32.mrb[0].mxu0  ;;  %v6063_v28 = vadd.f32 %v3973_v57, %v3344_v26  ;;  %v3346_v30 = vpop.f32.mrb[29].mxu1 }
 0x217   :  { %v3957_v27 = vadd.f32 %v3304_v25, %v2799_v39  ;;  %v3306_v29 = vpop.f32.mrb[1].mxu0  ;;  %v6065_v32 = vadd.f32 %v3975_v60, %v3346_v30  ;;  %v3348_v34 = vpop.f32.mrb[30].mxu1 }
 0x218   :  { %v3958_v31 = vadd.f32 %v3306_v29, %v2801_v40  ;;  %v3308_v33 = vpop.f32.mrb[2].mxu0  ;;  %3387 = vst [vmem:[%s6232_s2 + $0x80] sm:$0xff] %v6063_v28  ;;  %v6074_v36 = vadd.f32 %v3977_v63, %v3348_v34  ;;  %v3350_v38 = vpop.f32.mrb[31].mxu1 }
 0x219   :  { %3371 = vst [vmem:[%s6232_s2] sm:$0xff] %v3957_v27  ;;  %v3959_v35 = vadd.f32 %v3308_v33, %v2803_v41  ;;  %v3310_v37 = vpop.f32.mrb[3].mxu0  ;;  %3388 = vst [vmem:[%s6232_s2 + $0x88] sm:$0xff] %v6065_v32  ;;  %v6084_v40 = vadd.f32 %v3979_v2, %v3350_v38  ;;  %v3433_v55 = vmul.f32 %v3957_v27, %v3957_v27 }
 0x21a   :  { %3372 = vst [vmem:[%s6232_s2 + $0x8] sm:$0xff] %v3958_v31  ;;  %v3960_v39 = vadd.f32 %v3310_v37, %v6029_v42  ;;  %3389 = vst [vmem:[%s6232_s2 + $0x90] sm:$0xff] %v6074_v36  ;;  %v3434_v57 = vmul.f32 %v3958_v31, %v3958_v31 }
 0x21b   :  { %3373 = vst [vmem:[%s6232_s2 + $0x10] sm:$0xff] %v3959_v35  ;;  %v3397_v41 = vadd.f32 %v3959_v35, %v3957_v27  ;;  %v3435_v56 = vmul.f32 %v3959_v35, %v3959_v35  ;;  %3390 = vst [vmem:[%s6232_s2 + $0x98] sm:$0xff] %v6084_v40 }
 0x21c   :  { %3374 = vst [vmem:[%s6232_s2 + $0x18] sm:$0xff] %v3960_v39  ;;  %v3415_v42 = vadd.f32 %v3960_v39, %v3958_v31  ;;  %v3436_v58 = vmul.f32 %v3960_v39, %v3960_v39 }
 0x21d   :  { %v3459_v59 = vadd.f32 %v3435_v56, %v3433_v55  ;;  %v3354_v62 = vpop.f32.mrb[32].mxu1 }
 0x21e   :  { %v3477_v60 = vadd.f32 %v3436_v58, %v3434_v57  ;;  %v3314_v61 = vpop.f32.mrb[4].mxu0  ;;  %v6101_v0 = vadd.f32 %v3981_v5, %v3354_v62  ;;  %v3356_v2 = vpop.f32.mrb[33].mxu1 }
 0x21f   :  { %v3961_v63 = vadd.f32 %v3314_v61, %v6031_v43  ;;  %v3316_v1 = vpop.f32.mrb[5].mxu0  ;;  %v6104_v4 = vadd.f32 %v3983_v8, %v3356_v2  ;;  %v3358_v7 = vpop.f32.mrb[34].mxu1 }
 0x220   :  { %v3962_v3 = vadd.f32 %v3316_v1, %v6033_v44  ;;  %v3318_v6 = vpop.f32.mrb[6].mxu0  ;;  %3391 = vst [vmem:[%s6232_s2 + $0xa0] sm:$0xff] %v6101_v0  ;;  %v3360_v12 = vpop.f32.mrb[35].mxu1  ;;  %v6122_v13 = vadd.f32 %v6055_v11, %v3358_v7 }
 0x221   :  { %3375 = vst [vmem:[%s6232_s2 + $0x20] sm:$0xff] %v3961_v63  ;;  %v3398_v9 = vadd.f32 %v3961_v63, %v3397_v41  ;;  %v3437_v10 = vmul.f32 %v3961_v63, %v3961_v63  ;;  %v3963_v43 = vadd.f32 %v3318_v6, %v6035_v45  ;;  %v3320_v5 = vpop.f32.mrb[7].mxu0  ;;  %3392 = vst [vmem:[%s6232_s2 + $0xa8] sm:$0xff] %v6104_v4 }
 0x222   :  { %3376 = vst [vmem:[%s6232_s2 + $0x28] sm:$0xff] %v3962_v3  ;;  %v3416_v44 = vadd.f32 %v3962_v3, %v3415_v42  ;;  %v3438_v8 = vmul.f32 %v3962_v3, %v3962_v3  ;;  %v3964_v18 = vadd.f32 %v3320_v5, %v6037_v46  ;;  %3393 = vst [vmem:[%s6232_s2 + $0xb0] sm:$0xff] %v6122_v13 }
 0x223   :  { %v3460_v15 = vadd.f32 %v3459_v59, %v3437_v10  ;;  %3377 = vst [vmem:[%s6232_s2 + $0x30] sm:$0xff] %v3963_v43  ;;  %v3399_v45 = vadd.f32 %v3963_v43, %v3398_v9  ;;  %v3439_v16 = vmul.f32 %v3963_v43, %v3963_v43  ;;  %v6133_v21 = vadd.f32 %v6057_v14, %v3360_v12 }
 0x224   :  { %v3478_v19 = vadd.f32 %v3477_v60, %v3438_v8  ;;  %3378 = vst [vmem:[%s6232_s2 + $0x38] sm:$0xff] %v3964_v18  ;;  %v3417_v22 = vadd.f32 %v3964_v18, %v3416_v44  ;;  %v3440_v23 = vmul.f32 %v3964_v18, %v3964_v18  ;;  %v3449_v44 = vmul.f32 %v6063_v28, %v6063_v28 }
 0x225   :  { %v3461_v11 = vadd.f32 %v3460_v15, %v3439_v16  ;;  %3394 = vst [vmem:[%s6232_s2 + $0xb8] sm:$0xff] %v6133_v21  ;;  %v3364_v24 = vpop.f32.mrb[36].mxu1  ;;  %v3450_v15 = vmul.f32 %v6065_v32, %v6065_v32  ;;  %v3451_v18 = vmul.f32 %v6074_v36, %v6074_v36 }
 0x226   :  { %v3324_v46 = vpop.f32.mrb[8].mxu0  ;;  %v3479_v25 = vadd.f32 %v3478_v19, %v3440_v23  ;;  %v6144_v14 = vadd.f32 %v6059_v17, %v3364_v24  ;;  %v3366_v29 = vpop.f32.mrb[37].mxu1 }
 0x227   :  { %v3965_v26 = vadd.f32 %v3324_v46, %v6039_v47  ;;  %v3326_v27 = vpop.f32.mrb[9].mxu0  ;;  %v6148_v31 = vadd.f32 %v6061_v20, %v3366_v29  ;;  %v3368_v34 = vpop.f32.mrb[38].mxu1 }
 0x228   :  { %v3966_v30 = vadd.f32 %v3326_v27, %v6041_v48  ;;  %v3328_v33 = vpop.f32.mrb[10].mxu0  ;;  %3395 = vst [vmem:[%s6232_s2 + $0xc0] sm:$0xff] %v6144_v14  ;;  %v3369_v48 = vpop.f32.mrb[39].mxu1 }
 0x229   :  { %3379 = vst [vmem:[%s6232_s2 + $0x40] sm:$0xff] %v3965_v26  ;;  %v3400_v35 = vadd.f32 %v3965_v26, %v3399_v45  ;;  %v3441_v37 = vmul.f32 %v3965_v26, %v3965_v26  ;;  %v3967_v47 = vadd.f32 %v3328_v33, %v6043_v49  ;;  %v3330_v17 = vpop.f32.mrb[11].mxu0  ;;  %3396 = vst [vmem:[%s6232_s2 + $0xc8] sm:$0xff] %v6148_v31 }
 0x22a   :  { %3380 = vst [vmem:[%s6232_s2 + $0x48] sm:$0xff] %v3966_v30  ;;  %v3418_v20 = vadd.f32 %v3966_v30, %v3417_v22  ;;  %v3442_v38 = vmul.f32 %v3966_v30, %v3966_v30  ;;  %v3968_v39 = vadd.f32 %v3330_v17, %v6045_v50  ;;  %v3452_v22 = vmul.f32 %v6084_v40, %v6084_v40 }
 0x22b   :  { %v3462_v55 = vadd.f32 %v3461_v11, %v3441_v37  ;;  %3381 = vst [vmem:[%s6232_s2 + $0x50] sm:$0xff] %v3967_v47  ;;  %v3401_v49 = vadd.f32 %v3967_v47, %v3400_v35  ;;  %v3443_v41 = vmul.f32 %v3967_v47, %v3967_v47 }
 0x22c   :  { %v3480_v56 = vadd.f32 %v3479_v25, %v3442_v38  ;;  %3382 = vst [vmem:[%s6232_s2 + $0x58] sm:$0xff] %v3968_v39  ;;  %v3419_v57 = vadd.f32 %v3968_v39, %v3418_v20  ;;  %v3444_v42 = vmul.f32 %v3968_v39, %v3968_v39 }
 0x22d   :  { %v3463_v58 = vadd.f32 %v3462_v55, %v3443_v41 }
 0x22e   :  { %v3481_v59 = vadd.f32 %v3480_v56, %v3444_v42  ;;  %v3334_v60 = vpop.f32.mrb[12].mxu0 }
 0x22f   :  { %v3969_v61 = vadd.f32 %v3334_v60, %v6047_v51  ;;  %v3336_v50 = vpop.f32.mrb[13].mxu0 }
 0x230   :  { %v3970_v62 = vadd.f32 %v3336_v50, %v6049_v52  ;;  %v3338_v63 = vpop.f32.mrb[14].mxu0 }
 0x231   :  { %3383 = vst [vmem:[%s6232_s2 + $0x60] sm:$0xff] %v3969_v61  ;;  %v3402_v1 = vadd.f32 %v3969_v61, %v3401_v49  ;;  %v3445_v2 = vmul.f32 %v3969_v61, %v3969_v61  ;;  %v3971_v3 = vadd.f32 %v3338_v63, %v6051_v53  ;;  %v3340_v6 = vpop.f32.mrb[15].mxu0 }
 0x232   :  { %3384 = vst [vmem:[%s6232_s2 + $0x68] sm:$0xff] %v3970_v62  ;;  %v3420_v7 = vadd.f32 %v3970_v62, %v3419_v57  ;;  %v3446_v9 = vmul.f32 %v3970_v62, %v3970_v62  ;;  %v3972_v51 = vadd.f32 %v3340_v6, %v6053_v54 }
 0x233   :  { %v3464_v10 = vadd.f32 %v3463_v58, %v3445_v2  ;;  %3385 = vst [vmem:[%s6232_s2 + $0x70] sm:$0xff] %v3971_v3  ;;  %v3403_v52 = vadd.f32 %v3971_v3, %v3402_v1  ;;  %v3447_v43 = vmul.f32 %v3971_v3, %v3971_v3 }
 0x234   :  { %v3482_v5 = vadd.f32 %v3481_v59, %v3446_v9  ;;  %3386 = vst [vmem:[%s6232_s2 + $0x78] sm:$0xff] %v3972_v51  ;;  %v3421_v53 = vadd.f32 %v3972_v51, %v3420_v7  ;;  %v3448_v12 = vmul.f32 %v3972_v51, %v3972_v51 }
 0x235   :  { %v3404_v8 = vadd.f32 %v6063_v28, %v3403_v52  ;;  %v3465_v54 = vadd.f32 %v3464_v10, %v3447_v43  ;;  %v3453_v28 = vmul.f32 %v6101_v0, %v6101_v0 }
 0x236   :  { %v3422_v45 = vadd.f32 %v6065_v32, %v3421_v53  ;;  %v3483_v16 = vadd.f32 %v3482_v5, %v3448_v12  ;;  %v3454_v32 = vmul.f32 %v6104_v4, %v6104_v4 }
 0x237   :  { %v3405_v19 = vadd.f32 %v6074_v36, %v3404_v8  ;;  %v3466_v11 = vadd.f32 %v3465_v54, %v3449_v44  ;;  %v3455_v36 = vmul.f32 %v6122_v13, %v6122_v13 }
 0x238   :  { %v3423_v23 = vadd.f32 %v6084_v40, %v3422_v45  ;;  %v3484_v46 = vadd.f32 %v3483_v16, %v3450_v15  ;;  %v3456_v40 = vmul.f32 %v6133_v21, %v6133_v21 }
 0x239   :  { %v3406_v24 = vadd.f32 %v6101_v0, %v3405_v19  ;;  %v3467_v25 = vadd.f32 %v3466_v11, %v3451_v18  ;;  %v3457_v0 = vmul.f32 %v6144_v14, %v6144_v14 }
 0x23a   :  { %v3424_v26 = vadd.f32 %v6104_v4, %v3423_v23  ;;  %v3485_v27 = vadd.f32 %v3484_v46, %v3452_v22  ;;  %v3458_v4 = vmul.f32 %v6148_v31, %v6148_v31 }
 0x23b   :  { %v3407_v29 = vadd.f32 %v6122_v13, %v3406_v24  ;;  %v3468_v30 = vadd.f32 %v3467_v25, %v3453_v28 }
 0x23c   :  { %v3425_v33 = vadd.f32 %v6133_v21, %v3424_v26  ;;  %v3486_v34 = vadd.f32 %v3485_v27, %v3454_v32 }
 0x23d   :  { %v3408_v35 = vadd.f32 %v6144_v14, %v3407_v29  ;;  %v3469_v37 = vadd.f32 %v3468_v30, %v3455_v36 }
 0x23e   :  { %v3426_v47 = vadd.f32 %v6148_v31, %v3425_v33  ;;  %v3487_v17 = vadd.f32 %v3486_v34, %v3456_v40 }
 0x23f   :  { %v3409_v13 = vrot.slane %v3408_v35, 4  ;;  %v3470_v48 = vadd.f32 %v3469_v37, %v3457_v0 }
 0x240   :  { %v3427_v20 = vrot.slane %v3426_v47, 4  ;;  %v3488_v38 = vadd.f32 %v3487_v17, %v3458_v4 }
 0x241   :  { %v3410_v39 = vadd.f32 %v3409_v13, %v3408_v35  ;;  %v3471_v55 = vrot.slane %v3470_v48, 4 }
 0x242   :  { %v3428_v21 = vadd.f32 %v3427_v20, %v3426_v47  ;;  %v3489_v49 = vrot.slane %v3488_v38, 4 }
 0x243   :  { %v3411_v41 = vrot.slane %v3410_v39, 2  ;;  %v3472_v56 = vadd.f32 %v3471_v55, %v3470_v48 }
 0x244   :  { %v3429_v57 = vrot.slane %v3428_v21, 2  ;;  %v3490_v42 = vadd.f32 %v3489_v49, %v3488_v38 }
 0x245   :  { %v3412_v14 = vadd.f32 %v3411_v41, %v3410_v39  ;;  %v3473_v58 = vrot.slane %v3472_v56, 2 }
 0x246   :  { %v3430_v59 = vadd.f32 %v3429_v57, %v3428_v21  ;;  %v3491_v60 = vrot.slane %v3490_v42, 2 }
 0x247   :  { %v3413_v61 = vrot.slane %v3412_v14, 1  ;;  %v3474_v50 = vadd.f32 %v3473_v58, %v3472_v56 }
 0x248   :  { %v3431_v31 = vrot.slane %v3430_v59, 1  ;;  %v3492_v62 = vadd.f32 %v3491_v60, %v3490_v42 }
 0x249   :  { %v3414_v63 = vadd.f32 %v3413_v61, %v3412_v14  ;;  %v3475_v1 = vrot.slane %v3474_v50, 1 }
 0x24a   :  { %v3432_v2 = vadd.f32 %v3431_v31, %v3430_v59  ;;  %v3493_v3 = vrot.slane %v3492_v62, 1 }
 0x24b   :  { %v3476_v6 = vadd.f32 %v3475_v1, %v3474_v50  ;;  %3495 = vst [vmem:[%s6233_s3] sm:$0xff] %v3414_v63 }
 0x24c   :  { %v3494_v7 = vadd.f32 %v3493_v3, %v3492_v62  ;;  %3496 = vst [vmem:[%s6233_s3 + $0x8] sm:$0xff] %v3432_v2 }
 0x24d   :  { %3497 = vst [vmem:[%s6234_s4] sm:$0xff] %v3476_v6 }
 0x24e   :  { %3498 = vst [vmem:[%s6234_s4 + $0x8] sm:$0xff] %v3494_v7 }

// kernel: reduction_a_forward.9
= control target key start
LH: loop header
LB: loop body
LE: loop exit
PB: predicated region body
PF: predicated region fallthrough
CT: control target
= control target key end

     0   :  { %v753_v0 = vmov 0.0   ;;  %vm754_vm0 = vmmov 0   ;;  %v755_v3 = vmov 0   ;;  %s1038_s1 = inlined_call_operand.vmem [shape: bf16[128,384], index: 1, kind: input, shape index: {}]   ;;  %s1039_s0 = inlined_call_operand.vmem [shape: bf16[104,128], index: 0, kind: input, shape index: {}]   ;;  %s1040_s2 = inlined_call_operand.vmem [shape: f32[104,384], index: 2, kind: output, shape index: {0}]   ;;  %s1041_s3 = inlined_call_operand.vmem [shape: f32[8,384], index: 3, kind: output, shape index: {1}]   ;;  %s1042_s4 = inlined_call_operand.vmem [shape: f32[8,384], index: 4, kind: output, shape index: {2}]  }
   0x1   :  { %667 = vmatprep.subr.bf16.mxu1 %v753_v0  ;;  %v714_v1 = vld [vmem:[%s1038_s1 + $0x4] ss:$12 sps:$4 sm:$0xff]   ;;  %683 = vmatprep.mubr.msk.bf16.mxu1 %vm754_vm0, %v753_v0  ;;  %v716_v2 = vld [vmem:[%s1038_s1 + $0x8] ss:$12 sps:$4 sm:$0xff]   ;;  %v717_v4 = vld [vmem:[%s1038_s1] ss:$12 sps:$4 sm:$0xff]  }
   0x2   :  { %260 = vmatprep.mubr.bf16.mxu0 %v755_v3  ;;  %228 = vmatprep.subr.bf16.mxu0 %v714_v1  ;;  %v718_v5 = vld [vmem:[%s1038_s1 + $0x1c] ss:$12 sps:$4 sm:$0xff]   ;;  %v720_v6 = vld [vmem:[%s1038_s1 + $0x20] ss:$12 sps:$4 sm:$0xff]   ;;  %v721_v7 = vld [vmem:[%s1038_s1 + $0x18] ss:$12 sps:$4 sm:$0xff]  }
   0x3   :  { %668 = vmatpush3.bf16.msra.mxu1 %v716_v2  ;;  %229 = vmatpush1.bf16.msra.mxu0 %v717_v4  ;;  %v722_v8 = vld [vmem:[%s1038_s1 + $0x34] ss:$12 sps:$4 sm:$0xff]   ;;  %v724_v9 = vld [vmem:[%s1038_s1 + $0x38] ss:$12 sps:$4 sm:$0xff]   ;;  %v725_v10 = vld [vmem:[%s1038_s1 + $0x30] ss:$12 sps:$4 sm:$0xff]  }
   0x4   :  { %669 = vmatprep.subr.bf16.mxu1 %v753_v0  ;;  %230 = vmatprep.subr.bf16.mxu0 %v718_v5  ;;  %v726_v11 = vld [vmem:[%s1038_s1 + $0x4c] ss:$12 sps:$4 sm:$0xff]   ;;  %v728_v12 = vld [vmem:[%s1038_s1 + $0x50] ss:$12 sps:$4 sm:$0xff]   ;;  %v729_v13 = vld [vmem:[%s1038_s1 + $0x48] ss:$12 sps:$4 sm:$0xff]  }
   0x5   :  { %v730_v14 = vld [vmem:[%s1038_s1 + $0x64] ss:$12 sps:$4 sm:$0xff]   ;;  %v732_v15 = vld [vmem:[%s1038_s1 + $0x68] ss:$12 sps:$4 sm:$0xff]   ;;  %v733_v16 = vld [vmem:[%s1038_s1 + $0x60] ss:$12 sps:$4 sm:$0xff]  }
   0x6   :  { %v734_v17 = vld [vmem:[%s1038_s1 + $0x7c] ss:$12 sps:$4 sm:$0xff]   ;;  %v736_v18 = vld [vmem:[%s1038_s1 + $0x80] ss:$12 sps:$4 sm:$0xff]   ;;  %v737_v19 = vld [vmem:[%s1038_s1 + $0x78] ss:$12 sps:$4 sm:$0xff]  }
   0x7   :  { %670 = vmatpush3.bf16.msra.mxu1 %v720_v6  ;;  %231 = vmatpush1.bf16.msra.mxu0 %v721_v7  ;;  %v738_v20 = vld [vmem:[%s1038_s1 + $0x94] ss:$12 sps:$4 sm:$0xff]   ;;  %v740_v21 = vld [vmem:[%s1038_s1 + $0x98] ss:$12 sps:$4 sm:$0xff]   ;;  %v741_v22 = vld [vmem:[%s1038_s1 + $0x90] ss:$12 sps:$4 sm:$0xff]  }
   0x8   :  { %671 = vmatprep.subr.bf16.mxu1 %v753_v0  ;;  %232 = vmatprep.subr.bf16.mxu0 %v722_v8  ;;  %v742_v23 = vld [vmem:[%s1038_s1 + $0xac] ss:$12 sps:$4 sm:$0xff]   ;;  %v744_v24 = vld [vmem:[%s1038_s1 + $0xb0] ss:$12 sps:$4 sm:$0xff]   ;;  %v745_v25 = vld [vmem:[%s1038_s1 + $0xa8] ss:$12 sps:$4 sm:$0xff]  }
   0x9   :  { %v746_v26 = vld [vmem:[%s1039_s0] sm:$0xff]   ;;  %v747_v27 = vld [vmem:[%s1039_s0 + $0x8] sm:$0xff]   ;;  %v748_v28 = vld [vmem:[%s1039_s0 + $0x10] sm:$0xff]  }
   0xa   :  { %v749_v29 = vld [vmem:[%s1039_s0 + $0x18] sm:$0xff]   ;;  %v750_v30 = vld [vmem:[%s1039_s0 + $0x20] sm:$0xff]   ;;  %v751_v31 = vld [vmem:[%s1039_s0 + $0x28] sm:$0xff]  }
   0xb   :  { %672 = vmatpush3.bf16.msra.mxu1 %v724_v9  ;;  %233 = vmatpush1.bf16.msra.mxu0 %v725_v10  ;;  %v752_v32 = vld [vmem:[%s1039_s0 + $0x30] ss:$0 sps:$4 sm:$0xff]  }
   0xc   :  { %673 = vmatprep.subr.bf16.mxu1 %v753_v0  ;;  %234 = vmatprep.subr.bf16.mxu0 %v726_v11 }
   0xf   :  { %674 = vmatpush3.bf16.msra.mxu1 %v728_v12  ;;  %235 = vmatpush1.bf16.msra.mxu0 %v729_v13 }
  0x10   :  { %675 = vmatprep.subr.bf16.mxu1 %v753_v0  ;;  %236 = vmatprep.subr.bf16.mxu0 %v730_v14 }
  0x13   :  { %676 = vmatpush3.bf16.msra.mxu1 %v732_v15  ;;  %237 = vmatpush1.bf16.msra.mxu0 %v733_v16 }
  0x14   :  { %677 = vmatprep.subr.bf16.mxu1 %v753_v0  ;;  %238 = vmatprep.subr.bf16.mxu0 %v734_v17 }
  0x17   :  { %678 = vmatpush3.bf16.msra.mxu1 %v736_v18  ;;  %239 = vmatpush1.bf16.msra.mxu0 %v737_v19 }
  0x18   :  { %679 = vmatprep.subr.bf16.mxu1 %v753_v0  ;;  %240 = vmatprep.subr.bf16.mxu0 %v738_v20 }
  0x1b   :  { %680 = vmatpush3.bf16.msra.mxu1 %v740_v21  ;;  %241 = vmatpush1.bf16.msra.mxu0 %v741_v22 }
  0x1c   :  { %681 = vmatprep.subr.bf16.mxu1 %v753_v0  ;;  %242 = vmatprep.subr.bf16.mxu0 %v742_v23 }
  0x1f   :  { %682 = vmatpush3.bf16.msra.mxu1 %v744_v24  ;;  %243 = vmatpush1.bf16.msra.mxu0 %v745_v25 }
  0x22   :  { %684 = vmatmul.mubr.bf16.vlgmr.msra.gmra.mrb[0].mxu1 %v746_v26  ;;  %261 = vmatmul.mubr.bf16.vlgmr.msra.gmra.mrb[0].mxu0 %v746_v26 }
  0x23   :  { %687 = vmatprep.mubr.msk.bf16.mxu1 %vm754_vm0, %v753_v0  ;;  %270 = vmatprep.mubr.bf16.mxu0 %v755_v3 }
  0x2a   :  { %688 = vmatmul.mubr.bf16.gmra.mrb[4].mxu1 %v747_v27  ;;  %271 = vmatmul.mubr.bf16.gmra.mrb[4].mxu0 %v747_v27 }
  0x2b   :  { %691 = vmatprep.mubr.msk.bf16.mxu1 %vm754_vm0, %v753_v0  ;;  %280 = vmatprep.mubr.bf16.mxu0 %v755_v3 }
  0x32   :  { %692 = vmatmul.mubr.bf16.gmra.mrb[8].mxu1 %v748_v28  ;;  %281 = vmatmul.mubr.bf16.gmra.mrb[8].mxu0 %v748_v28 }
  0x33   :  { %695 = vmatprep.mubr.msk.bf16.mxu1 %vm754_vm0, %v753_v0  ;;  %290 = vmatprep.mubr.bf16.mxu0 %v755_v3 }
  0x3a   :  { %696 = vmatmul.mubr.bf16.gmra.mrb[12].mxu1 %v749_v29  ;;  %291 = vmatmul.mubr.bf16.gmra.mrb[12].mxu0 %v749_v29 }
  0x3b   :  { %699 = vmatprep.mubr.msk.bf16.mxu1 %vm754_vm0, %v753_v0  ;;  %300 = vmatprep.mubr.bf16.mxu0 %v755_v3 }
  0x42   :  { %700 = vmatmul.mubr.bf16.gmra.mrb[16].mxu1 %v750_v30  ;;  %301 = vmatmul.mubr.bf16.gmra.mrb[16].mxu0 %v750_v30 }
  0x43   :  { %703 = vmatprep.mubr.msk.bf16.mxu1 %vm754_vm0, %v753_v0  ;;  %310 = vmatprep.mubr.bf16.mxu0 %v755_v3 }
  0x4a   :  { %704 = vmatmul.mubr.bf16.gmra.mrb[20].mxu1 %v751_v31  ;;  %311 = vmatmul.mubr.bf16.gmra.mrb[20].mxu0 %v751_v31 }
  0x4b   :  { %707 = vmatprep.mubr.msk.bf16.mxu1 %vm754_vm0, %v753_v0  ;;  %320 = vmatprep.mubr.bf16.mxu0 %v755_v3 }
  0x52   :  { %708 = vmatmul.mubr.bf16.gmra.mrb[24].mxu1 %v752_v32  ;;  %321 = vmatmul.mubr.bf16.gmra.mrb[24].mxu0 %v752_v32 }
  0xf5   :  { %v363_v33 = vpop.f32.mrb[0].mxu1  ;;  %v262_v35 = vpop.f32.mrb[0].mxu0 }
  0xf6   :  { %419 = vst [vmem:[%s1040_s2 + $0x10] sm:$0xff] %v363_v33  ;;  %v512_v34 = vmul.f32 %v363_v33, %v363_v33  ;;  %v685_v36 = vpop.f32.mrb[1].mxu1  ;;  %417 = vst [vmem:[%s1040_s2] sm:$0xff] %v262_v35  ;;  %v264_v37 = vpop.f32.mrb[1].mxu0  ;;  %v510_v43 = vmul.f32 %v262_v35, %v262_v35 }
  0xf7   :  { %v366_v38 = vpop.f32.mrb[2].mxu1  ;;  %418 = vst [vmem:[%s1040_s2 + $0x8] sm:$0xff] %v264_v37  ;;  %v266_v41 = vpop.f32.mrb[2].mxu0  ;;  %v511_v47 = vmul.f32 %v264_v37, %v264_v37 }
  0xf8   :  { %422 = vst [vmem:[%s1040_s2 + $0x28] sm:$0xff] %v366_v38  ;;  %v492_v39 = vadd.f32 %v366_v38, %v363_v33  ;;  %v515_v40 = vmul.f32 %v366_v38, %v366_v38  ;;  %v686_v42 = vpop.f32.mrb[3].mxu1  ;;  %420 = vst [vmem:[%s1040_s2 + $0x18] sm:$0xff] %v266_v41  ;;  %v456_v44 = vadd.f32 %v266_v41, %v262_v35  ;;  %v268_v46 = vpop.f32.mrb[3].mxu0 }
  0xf9   :  { %v513_v45 = vmul.f32 %v266_v41, %v266_v41  ;;  %421 = vst [vmem:[%s1040_s2 + $0x20] sm:$0xff] %v268_v46  ;;  %v474_v49 = vadd.f32 %v268_v46, %v264_v37  ;;  %v514_v50 = vmul.f32 %v268_v46, %v268_v46 }
  0xfa   :  { %v585_v48 = vadd.f32 %v515_v40, %v512_v34 }
  0xfb   :  { %v549_v51 = vadd.f32 %v513_v45, %v510_v43  ;;  %v567_v52 = vadd.f32 %v514_v50, %v511_v47 }
  0xfd   :  { %v371_v53 = vpop.f32.mrb[4].mxu1  ;;  %v272_v56 = vpop.f32.mrb[4].mxu0 }
  0xfe   :  { %425 = vst [vmem:[%s1040_s2 + $0x40] sm:$0xff] %v371_v53  ;;  %v493_v54 = vadd.f32 %v492_v39, %v371_v53  ;;  %v518_v55 = vmul.f32 %v371_v53, %v371_v53  ;;  %v689_v57 = vpop.f32.mrb[5].mxu1  ;;  %423 = vst [vmem:[%s1040_s2 + $0x30] sm:$0xff] %v272_v56  ;;  %v457_v58 = vadd.f32 %v456_v44, %v272_v56  ;;  %v274_v60 = vpop.f32.mrb[5].mxu0 }
  0xff   :  { %v516_v59 = vmul.f32 %v272_v56, %v272_v56  ;;  %v374_v61 = vpop.f32.mrb[6].mxu1  ;;  %424 = vst [vmem:[%s1040_s2 + $0x38] sm:$0xff] %v274_v60  ;;  %v475_v63 = vadd.f32 %v474_v49, %v274_v60  ;;  %v517_v0 = vmul.f32 %v274_v60, %v274_v60  ;;  %v276_v2 = vpop.f32.mrb[6].mxu0 }
 0x100   :  { %v586_v62 = vadd.f32 %v585_v48, %v518_v55  ;;  %428 = vst [vmem:[%s1040_s2 + $0x58] sm:$0xff] %v374_v61  ;;  %v494_v1 = vadd.f32 %v493_v54, %v374_v61  ;;  %v690_v3 = vpop.f32.mrb[7].mxu1  ;;  %v521_v5 = vmul.f32 %v374_v61, %v374_v61  ;;  %426 = vst [vmem:[%s1040_s2 + $0x48] sm:$0xff] %v276_v2  ;;  %v278_v8 = vpop.f32.mrb[7].mxu0 }
 0x101   :  { %v550_v4 = vadd.f32 %v549_v51, %v516_v59  ;;  %v458_v6 = vadd.f32 %v457_v58, %v276_v2  ;;  %v519_v7 = vmul.f32 %v276_v2, %v276_v2  ;;  %v568_v9 = vadd.f32 %v567_v52, %v517_v0  ;;  %427 = vst [vmem:[%s1040_s2 + $0x50] sm:$0xff] %v278_v8 }
 0x102   :  { %v476_v10 = vadd.f32 %v475_v63, %v278_v8  ;;  %v520_v11 = vmul.f32 %v278_v8, %v278_v8  ;;  %v587_v12 = vadd.f32 %v586_v62, %v521_v5 }
 0x103   :  { %v551_v13 = vadd.f32 %v550_v4, %v519_v7 }
 0x104   :  { %v569_v14 = vadd.f32 %v568_v9, %v520_v11 }
 0x105   :  { %v379_v15 = vpop.f32.mrb[8].mxu1  ;;  %v282_v18 = vpop.f32.mrb[8].mxu0 }
 0x106   :  { %431 = vst [vmem:[%s1040_s2 + $0x70] sm:$0xff] %v379_v15  ;;  %v495_v16 = vadd.f32 %v494_v1, %v379_v15  ;;  %v524_v17 = vmul.f32 %v379_v15, %v379_v15  ;;  %v693_v19 = vpop.f32.mrb[9].mxu1  ;;  %429 = vst [vmem:[%s1040_s2 + $0x60] sm:$0xff] %v282_v18  ;;  %v459_v20 = vadd.f32 %v458_v6, %v282_v18  ;;  %v284_v22 = vpop.f32.mrb[9].mxu0 }
 0x107   :  { %v522_v21 = vmul.f32 %v282_v18, %v282_v18  ;;  %v382_v23 = vpop.f32.mrb[10].mxu1  ;;  %430 = vst [vmem:[%s1040_s2 + $0x68] sm:$0xff] %v284_v22  ;;  %v477_v25 = vadd.f32 %v476_v10, %v284_v22  ;;  %v523_v26 = vmul.f32 %v284_v22, %v284_v22  ;;  %v286_v28 = vpop.f32.mrb[10].mxu0 }
 0x108   :  { %v588_v24 = vadd.f32 %v587_v12, %v524_v17  ;;  %434 = vst [vmem:[%s1040_s2 + $0x88] sm:$0xff] %v382_v23  ;;  %v496_v27 = vadd.f32 %v495_v16, %v382_v23  ;;  %v694_v29 = vpop.f32.mrb[11].mxu1  ;;  %v527_v31 = vmul.f32 %v382_v23, %v382_v23  ;;  %432 = vst [vmem:[%s1040_s2 + $0x78] sm:$0xff] %v286_v28  ;;  %v288_v34 = vpop.f32.mrb[11].mxu0 }
 0x109   :  { %v552_v30 = vadd.f32 %v551_v13, %v522_v21  ;;  %v460_v32 = vadd.f32 %v459_v20, %v286_v28  ;;  %v525_v33 = vmul.f32 %v286_v28, %v286_v28  ;;  %v570_v35 = vadd.f32 %v569_v14, %v523_v26  ;;  %433 = vst [vmem:[%s1040_s2 + $0x80] sm:$0xff] %v288_v34 }
 0x10a   :  { %v478_v36 = vadd.f32 %v477_v25, %v288_v34  ;;  %v526_v37 = vmul.f32 %v288_v34, %v288_v34  ;;  %v589_v38 = vadd.f32 %v588_v24, %v527_v31 }
 0x10b   :  { %v553_v39 = vadd.f32 %v552_v30, %v525_v33 }
 0x10c   :  { %v571_v40 = vadd.f32 %v570_v35, %v526_v37 }
 0x10d   :  { %v387_v41 = vpop.f32.mrb[12].mxu1  ;;  %v292_v44 = vpop.f32.mrb[12].mxu0 }
 0x10e   :  { %437 = vst [vmem:[%s1040_s2 + $0xa0] sm:$0xff] %v387_v41  ;;  %v497_v42 = vadd.f32 %v496_v27, %v387_v41  ;;  %v530_v43 = vmul.f32 %v387_v41, %v387_v41  ;;  %v697_v45 = vpop.f32.mrb[13].mxu1  ;;  %435 = vst [vmem:[%s1040_s2 + $0x90] sm:$0xff] %v292_v44  ;;  %v461_v46 = vadd.f32 %v460_v32, %v292_v44  ;;  %v294_v48 = vpop.f32.mrb[13].mxu0 }
 0x10f   :  { %v528_v47 = vmul.f32 %v292_v44, %v292_v44  ;;  %v390_v49 = vpop.f32.mrb[14].mxu1  ;;  %436 = vst [vmem:[%s1040_s2 + $0x98] sm:$0xff] %v294_v48  ;;  %v479_v51 = vadd.f32 %v478_v36, %v294_v48  ;;  %v529_v52 = vmul.f32 %v294_v48, %v294_v48  ;;  %v296_v54 = vpop.f32.mrb[14].mxu0 }
 0x110   :  { %v590_v50 = vadd.f32 %v589_v38, %v530_v43  ;;  %440 = vst [vmem:[%s1040_s2 + $0xb8] sm:$0xff] %v390_v49  ;;  %v498_v53 = vadd.f32 %v497_v42, %v390_v49  ;;  %v698_v55 = vpop.f32.mrb[15].mxu1  ;;  %v533_v57 = vmul.f32 %v390_v49, %v390_v49  ;;  %438 = vst [vmem:[%s1040_s2 + $0xa8] sm:$0xff] %v296_v54  ;;  %v298_v60 = vpop.f32.mrb[15].mxu0 }
 0x111   :  { %v554_v56 = vadd.f32 %v553_v39, %v528_v47  ;;  %v462_v58 = vadd.f32 %v461_v46, %v296_v54  ;;  %v531_v59 = vmul.f32 %v296_v54, %v296_v54  ;;  %v572_v61 = vadd.f32 %v571_v40, %v529_v52  ;;  %439 = vst [vmem:[%s1040_s2 + $0xb0] sm:$0xff] %v298_v60 }
 0x112   :  { %v480_v62 = vadd.f32 %v479_v51, %v298_v60  ;;  %v532_v63 = vmul.f32 %v298_v60, %v298_v60  ;;  %v591_v0 = vadd.f32 %v590_v50, %v533_v57 }
 0x113   :  { %v555_v1 = vadd.f32 %v554_v56, %v531_v59 }
 0x114   :  { %v573_v2 = vadd.f32 %v572_v61, %v532_v63 }
 0x115   :  { %v395_v3 = vpop.f32.mrb[16].mxu1  ;;  %v302_v6 = vpop.f32.mrb[16].mxu0 }
 0x116   :  { %443 = vst [vmem:[%s1040_s2 + $0xd0] sm:$0xff] %v395_v3  ;;  %v499_v4 = vadd.f32 %v498_v53, %v395_v3  ;;  %v536_v5 = vmul.f32 %v395_v3, %v395_v3  ;;  %v701_v7 = vpop.f32.mrb[17].mxu1  ;;  %441 = vst [vmem:[%s1040_s2 + $0xc0] sm:$0xff] %v302_v6  ;;  %v463_v8 = vadd.f32 %v462_v58, %v302_v6  ;;  %v304_v10 = vpop.f32.mrb[17].mxu0 }
 0x117   :  { %v534_v9 = vmul.f32 %v302_v6, %v302_v6  ;;  %v398_v11 = vpop.f32.mrb[18].mxu1  ;;  %442 = vst [vmem:[%s1040_s2 + $0xc8] sm:$0xff] %v304_v10  ;;  %v481_v13 = vadd.f32 %v480_v62, %v304_v10  ;;  %v535_v14 = vmul.f32 %v304_v10, %v304_v10  ;;  %v306_v16 = vpop.f32.mrb[18].mxu0 }
 0x118   :  { %v592_v12 = vadd.f32 %v591_v0, %v536_v5  ;;  %446 = vst [vmem:[%s1040_s2 + $0xe8] sm:$0xff] %v398_v11  ;;  %v500_v15 = vadd.f32 %v499_v4, %v398_v11  ;;  %v702_v17 = vpop.f32.mrb[19].mxu1  ;;  %v539_v19 = vmul.f32 %v398_v11, %v398_v11  ;;  %444 = vst [vmem:[%s1040_s2 + $0xd8] sm:$0xff] %v306_v16  ;;  %v308_v22 = vpop.f32.mrb[19].mxu0 }
 0x119   :  { %v556_v18 = vadd.f32 %v555_v1, %v534_v9  ;;  %v464_v20 = vadd.f32 %v463_v8, %v306_v16  ;;  %v537_v21 = vmul.f32 %v306_v16, %v306_v16  ;;  %v574_v23 = vadd.f32 %v573_v2, %v535_v14  ;;  %445 = vst [vmem:[%s1040_s2 + $0xe0] sm:$0xff] %v308_v22 }
 0x11a   :  { %v482_v24 = vadd.f32 %v481_v13, %v308_v22  ;;  %v538_v25 = vmul.f32 %v308_v22, %v308_v22  ;;  %v593_v26 = vadd.f32 %v592_v12, %v539_v19 }
 0x11b   :  { %v557_v27 = vadd.f32 %v556_v18, %v537_v21 }
 0x11c   :  { %v575_v28 = vadd.f32 %v574_v23, %v538_v25 }
 0x11d   :  { %v403_v29 = vpop.f32.mrb[20].mxu1  ;;  %v312_v32 = vpop.f32.mrb[20].mxu0 }
 0x11e   :  { %449 = vst [vmem:[%s1040_s2 + $0x100] sm:$0xff] %v403_v29  ;;  %v501_v30 = vadd.f32 %v500_v15, %v403_v29  ;;  %v542_v31 = vmul.f32 %v403_v29, %v403_v29  ;;  %v705_v33 = vpop.f32.mrb[21].mxu1  ;;  %447 = vst [vmem:[%s1040_s2 + $0xf0] sm:$0xff] %v312_v32  ;;  %v465_v34 = vadd.f32 %v464_v20, %v312_v32  ;;  %v314_v36 = vpop.f32.mrb[21].mxu0 }
 0x11f   :  { %v540_v35 = vmul.f32 %v312_v32, %v312_v32  ;;  %v406_v37 = vpop.f32.mrb[22].mxu1  ;;  %448 = vst [vmem:[%s1040_s2 + $0xf8] sm:$0xff] %v314_v36  ;;  %v483_v39 = vadd.f32 %v482_v24, %v314_v36  ;;  %v541_v40 = vmul.f32 %v314_v36, %v314_v36  ;;  %v316_v42 = vpop.f32.mrb[22].mxu0 }
 0x120   :  { %v594_v38 = vadd.f32 %v593_v26, %v542_v31  ;;  %452 = vst [vmem:[%s1040_s2 + $0x118] sm:$0xff] %v406_v37  ;;  %v502_v41 = vadd.f32 %v501_v30, %v406_v37  ;;  %v706_v43 = vpop.f32.mrb[23].mxu1  ;;  %v545_v45 = vmul.f32 %v406_v37, %v406_v37  ;;  %450 = vst [vmem:[%s1040_s2 + $0x108] sm:$0xff] %v316_v42  ;;  %v318_v48 = vpop.f32.mrb[23].mxu0 }
 0x121   :  { %v558_v44 = vadd.f32 %v557_v27, %v540_v35  ;;  %v466_v46 = vadd.f32 %v465_v34, %v316_v42  ;;  %v543_v47 = vmul.f32 %v316_v42, %v316_v42  ;;  %v576_v49 = vadd.f32 %v575_v28, %v541_v40  ;;  %451 = vst [vmem:[%s1040_s2 + $0x110] sm:$0xff] %v318_v48 }
 0x122   :  { %v484_v50 = vadd.f32 %v483_v39, %v318_v48  ;;  %v544_v51 = vmul.f32 %v318_v48, %v318_v48  ;;  %v595_v52 = vadd.f32 %v594_v38, %v545_v45 }
 0x123   :  { %v559_v53 = vadd.f32 %v558_v44, %v543_v47 }
 0x124   :  { %v577_v54 = vadd.f32 %v576_v49, %v544_v51 }
 0x125   :  { %v411_v55 = vpop.f32.mrb[24].mxu1  ;;  %v322_v58 = vpop.f32.mrb[24].mxu0 }
 0x126   :  { %455 = vst [vmem:[%s1040_s2 + $0x130] sm:$0xff] %v411_v55  ;;  %v503_v56 = vadd.f32 %v502_v41, %v411_v55  ;;  %v548_v57 = vmul.f32 %v411_v55, %v411_v55  ;;  %v709_v59 = vpop.f32.mrb[25].mxu1  ;;  %453 = vst [vmem:[%s1040_s2 + $0x120] sm:$0xff] %v322_v58  ;;  %v467_v60 = vadd.f32 %v466_v46, %v322_v58  ;;  %v324_v62 = vpop.f32.mrb[25].mxu0 }
 0x127   :  { %v546_v61 = vmul.f32 %v322_v58, %v322_v58  ;;  %v414_v63 = vpop.f32.mrb[26].mxu1  ;;  %454 = vst [vmem:[%s1040_s2 + $0x128] sm:$0xff] %v324_v62  ;;  %v485_v2 = vadd.f32 %v484_v50, %v324_v62  ;;  %v547_v3 = vmul.f32 %v324_v62, %v324_v62  ;;  %v326_v4 = vpop.f32.mrb[26].mxu0 }
 0x128   :  { %v504_v0 = vrot.slane %v503_v56, 4  ;;  %v596_v1 = vadd.f32 %v595_v52, %v548_v57  ;;  %v710_v5 = vpop.f32.mrb[27].mxu1  ;;  %v468_v6 = vrot.slane %v467_v60, 4  ;;  %v327_v8 = vpop.f32.mrb[27].mxu0 }
 0x129   :  { %v560_v7 = vadd.f32 %v559_v53, %v546_v61  ;;  %v486_v11 = vrot.slane %v485_v2, 4  ;;  %v578_v12 = vadd.f32 %v577_v54, %v547_v3 }
 0x12a   :  { %v505_v9 = vadd.f32 %v504_v0, %v503_v56  ;;  %v597_v10 = vrot.slane %v596_v1, 4  ;;  %v469_v13 = vadd.f32 %v468_v6, %v467_v60 }
 0x12b   :  { %v561_v14 = vrot.slane %v560_v7, 4  ;;  %v487_v17 = vadd.f32 %v486_v11, %v485_v2  ;;  %v579_v18 = vrot.slane %v578_v12, 4 }
 0x12c   :  { %v506_v15 = vrot.slane %v505_v9, 2  ;;  %v598_v16 = vadd.f32 %v597_v10, %v596_v1  ;;  %v470_v19 = vrot.slane %v469_v13, 2 }
 0x12d   :  { %v562_v20 = vadd.f32 %v561_v14, %v560_v7  ;;  %v488_v23 = vrot.slane %v487_v17, 2  ;;  %v580_v24 = vadd.f32 %v579_v18, %v578_v12 }
 0x12e   :  { %v507_v21 = vadd.f32 %v506_v15, %v505_v9  ;;  %v599_v22 = vrot.slane %v598_v16, 2  ;;  %v471_v25 = vadd.f32 %v470_v19, %v469_v13 }
 0x12f   :  { %v563_v26 = vrot.slane %v562_v20, 2  ;;  %v489_v29 = vadd.f32 %v488_v23, %v487_v17  ;;  %v581_v30 = vrot.slane %v580_v24, 2 }
 0x130   :  { %v508_v27 = vrot.slane %v507_v21, 1  ;;  %v600_v28 = vadd.f32 %v599_v22, %v598_v16  ;;  %v472_v31 = vrot.slane %v471_v25, 1 }
 0x131   :  { %v564_v32 = vadd.f32 %v563_v26, %v562_v20  ;;  %v490_v35 = vrot.slane %v489_v29, 1  ;;  %v582_v36 = vadd.f32 %v581_v30, %v580_v24 }
 0x132   :  { %v509_v33 = vadd.f32 %v508_v27, %v507_v21  ;;  %v601_v34 = vrot.slane %v600_v28, 1  ;;  %v473_v37 = vadd.f32 %v472_v31, %v471_v25 }
 0x133   :  { %v565_v38 = vrot.slane %v564_v32, 1  ;;  %v491_v40 = vadd.f32 %v490_v35, %v489_v29  ;;  %v583_v41 = vrot.slane %v582_v36, 1 }
 0x134   :  { %v602_v39 = vadd.f32 %v601_v34, %v600_v28  ;;  %605 = vst [vmem:[%s1041_s3 + $0x10] sm:$0xff] %v509_v33  ;;  %603 = vst [vmem:[%s1041_s3] sm:$0xff] %v473_v37 }
 0x135   :  { %v566_v42 = vadd.f32 %v565_v38, %v564_v32  ;;  %v584_v43 = vadd.f32 %v583_v41, %v582_v36  ;;  %604 = vst [vmem:[%s1041_s3 + $0x8] sm:$0xff] %v491_v40 }
 0x136   :  { %608 = vst [vmem:[%s1042_s4 + $0x10] sm:$0xff] %v602_v39 }
 0x137   :  { %606 = vst [vmem:[%s1042_s4] sm:$0xff] %v566_v42  ;;  %607 = vst [vmem:[%s1042_s4 + $0x8] sm:$0xff] %v584_v43 }

// kernel: reduction_a_forward.10
= control target key start
LH: loop header
LB: loop body
LE: loop exit
PB: predicated region body
PF: predicated region fallthrough
CT: control target
= control target key end

     0   :  { %v55_v0 = vlaneseq  ;;  %s597_s1 = inlined_call_operand.vmem [shape: f32[1,384], index: 1, kind: input, shape index: {}]   ;;  %s598_s2 = inlined_call_operand.vmem [shape: f32[1,384], index: 2, kind: input, shape index: {}]   ;;  %s599_s0 = inlined_call_operand.vmem [shape: f32[104,384], index: 0, kind: input, shape index: {}]   ;;  %s600_s3 = inlined_call_operand.vmem [shape: f32[104,384], index: 3, kind: output, shape index: {}]  }
   0x1   :  { %v53_v2 = vld [vmem:[%s597_s1] sm:$0x7]  ;;  %v15_v6 = vld [vmem:[%s599_s0 + $0x8] sm:$0xff]  ;;  %v16_v9 = vld [vmem:[%s599_s0 + $0x10] sm:$0xff] }
   0x2   :  { %v56_v1 = vshrl.u32 %v55_v0, 7  ;;  %v109_v3 = vld [vmem:[%s598_s2] sm:$0x7]  ;;  %v17_v10 = vld [vmem:[%s599_s0 + $0x18] sm:$0xff]  ;;  %v19_v16 = vld [vmem:[%s599_s0 + $0x28] sm:$0xff] }
   0x3   :  { %v14_v4 = vld [vmem:[%s599_s0] sm:$0xff]  ;;  %v20_v17 = vld [vmem:[%s599_s0 + $0x30] sm:$0xff]  ;;  %v21_v18 = vld [vmem:[%s599_s0 + $0x38] sm:$0xff] }
   0x4   :  { %v57_v5 = vsub.s32 0, %v56_v1  ;;  %v61_v7 = vsub.s32 1, %v56_v1  ;;  %v65_v8 = vsub.s32 2, %v56_v1  ;;  %v18_v11 = vld [vmem:[%s599_s0 + $0x20] sm:$0xff]  ;;  %v23_v34 = vld [vmem:[%s599_s0 + $0x48] sm:$0xff]  ;;  %v24_v35 = vld [vmem:[%s599_s0 + $0x50] sm:$0xff] }
   0x5   :  { %v22_v33 = vld [vmem:[%s599_s0 + $0x40] sm:$0xff]  ;;  %v25_v40 = vld [vmem:[%s599_s0 + $0x58] sm:$0xff]  ;;  %v27_v42 = vld [vmem:[%s599_s0 + $0x68] sm:$0xff] }
   0x6   :  { %v288_v12 = vrot.slane %v53_v2, %v57_v5  ;;  %v290_v13 = vrot.slane %v109_v3, %v57_v5  ;;  %v292_v14 = vrot.slane %v53_v2, %v61_v7  ;;  %v294_v15 = vrot.slane %v109_v3, %v61_v7  ;;  %v26_v41 = vld [vmem:[%s599_s0 + $0x60] sm:$0xff]  ;;  %v28_v47 = vld [vmem:[%s599_s0 + $0x70] sm:$0xff]  ;;  %v29_v48 = vld [vmem:[%s599_s0 + $0x78] sm:$0xff] }
   0x7   :  { %v305_v19 = vrot.slane %v53_v2, %v65_v8  ;;  %v307_v20 = vrot.slane %v109_v3, %v65_v8  ;;  %v30_v1 = vld [vmem:[%s599_s0 + $0x80] sm:$0xff]  ;;  %v31_v2 = vld [vmem:[%s599_s0 + $0x88] sm:$0xff]  ;;  %v32_v3 = vld [vmem:[%s599_s0 + $0x90] sm:$0xff] }
   0x8   :  { %v70_v21 = vmul.f32 %v288_v12, %v14_v4  ;;  %v71_v22 = vmul.f32 %v292_v14, %v15_v6  ;;  %v73_v23 = vmul.f32 %v288_v12, %v17_v10  ;;  %v74_v24 = vmul.f32 %v292_v14, %v18_v11  ;;  %v33_v8 = vld [vmem:[%s599_s0 + $0x98] sm:$0xff]  ;;  %v35_v10 = vld [vmem:[%s599_s0 + $0xa8] sm:$0xff] }
   0x9   :  { %v72_v25 = vmul.f32 %v305_v19, %v16_v9  ;;  %v75_v26 = vmul.f32 %v305_v19, %v19_v16  ;;  %v76_v27 = vmul.f32 %v288_v12, %v20_v17  ;;  %v77_v28 = vmul.f32 %v292_v14, %v21_v18  ;;  %v34_v9 = vld [vmem:[%s599_s0 + $0xa0] sm:$0xff] }
   0xa   :  { %v126_v29 = vadd.f32 %v290_v13, %v70_v21  ;;  %v127_v30 = vadd.f32 %v294_v15, %v71_v22  ;;  %v129_v31 = vadd.f32 %v290_v13, %v73_v23  ;;  %v130_v32 = vadd.f32 %v294_v15, %v74_v24  ;;  %v36_v21 = vld [vmem:[%s599_s0 + $0xb0] sm:$0xff]  ;;  %v37_v22 = vld [vmem:[%s599_s0 + $0xb8] sm:$0xff] }
   0xb   :  { %v128_v36 = vadd.f32 %v307_v20, %v72_v25  ;;  %v131_v37 = vadd.f32 %v307_v20, %v75_v26  ;;  %v132_v38 = vadd.f32 %v290_v13, %v76_v27  ;;  %v133_v39 = vadd.f32 %v294_v15, %v77_v28 }
   0xc   :  { %v165_v43 = vmax.f32 %v126_v29, 0.0  ;;  %v166_v44 = vmax.f32 %v127_v30, 0.0  ;;  %v168_v45 = vmax.f32 %v129_v31, 0.0  ;;  %v169_v46 = vmax.f32 %v130_v32, 0.0 }
   0xd   :  { %v167_v49 = vmax.f32 %v128_v36, 0.0  ;;  %v170_v50 = vmax.f32 %v131_v37, 0.0  ;;  %v171_v51 = vmax.f32 %v132_v38, 0.0  ;;  %v172_v52 = vmax.f32 %v133_v39, 0.0  ;;  %v38_v39 = vld [vmem:[%s599_s0 + $0xc0] sm:$0xff] }
   0xe   :  { %204 = vst [vmem:[%s600_s3] sm:$0xff] %v165_v43  ;;  %205 = vst [vmem:[%s600_s3 + $0x8] sm:$0xff] %v166_v44  ;;  %v78_v53 = vmul.f32 %v305_v19, %v22_v33  ;;  %v79_v54 = vmul.f32 %v288_v12, %v23_v34  ;;  %v80_v55 = vmul.f32 %v292_v14, %v24_v35 }
   0xf   :  { %207 = vst [vmem:[%s600_s3 + $0x18] sm:$0xff] %v168_v45  ;;  %208 = vst [vmem:[%s600_s3 + $0x20] sm:$0xff] %v169_v46  ;;  %v81_v56 = vmul.f32 %v305_v19, %v25_v40  ;;  %v82_v57 = vmul.f32 %v288_v12, %v26_v41  ;;  %v83_v58 = vmul.f32 %v292_v14, %v27_v42  ;;  %v39_v40 = vld [vmem:[%s599_s0 + $0xc8] sm:$0xff]  ;;  %v40_v41 = vld [vmem:[%s599_s0 + $0xd0] sm:$0xff] }
  0x10   :  { %206 = vst [vmem:[%s600_s3 + $0x10] sm:$0xff] %v167_v49  ;;  %209 = vst [vmem:[%s600_s3 + $0x28] sm:$0xff] %v170_v50  ;;  %v84_v59 = vmul.f32 %v305_v19, %v28_v47  ;;  %v85_v60 = vmul.f32 %v288_v12, %v29_v48  ;;  %v134_v61 = vadd.f32 %v307_v20, %v78_v53  ;;  %v41_v46 = vld [vmem:[%s599_s0 + $0xd8] sm:$0xff]  ;;  %v42_v47 = vld [vmem:[%s599_s0 + $0xe0] sm:$0xff] }
  0x11   :  { %210 = vst [vmem:[%s600_s3 + $0x30] sm:$0xff] %v171_v51  ;;  %211 = vst [vmem:[%s600_s3 + $0x38] sm:$0xff] %v172_v52  ;;  %v135_v62 = vadd.f32 %v290_v13, %v79_v54  ;;  %v136_v63 = vadd.f32 %v294_v15, %v80_v55  ;;  %v137_v0 = vadd.f32 %v307_v20, %v81_v56  ;;  %v43_v48 = vld [vmem:[%s599_s0 + $0xe8] sm:$0xff]  ;;  %v44_v53 = vld [vmem:[%s599_s0 + $0xf0] sm:$0xff] }
  0x12   :  { %v138_v4 = vadd.f32 %v290_v13, %v82_v57  ;;  %v139_v5 = vadd.f32 %v294_v15, %v83_v58  ;;  %v140_v6 = vadd.f32 %v307_v20, %v84_v59  ;;  %v141_v7 = vadd.f32 %v290_v13, %v85_v60  ;;  %v45_v54 = vld [vmem:[%s599_s0 + $0xf8] sm:$0xff] }
  0x13   :  { %v173_v11 = vmax.f32 %v134_v61, 0.0  ;;  %v174_v16 = vmax.f32 %v135_v62, 0.0  ;;  %v175_v17 = vmax.f32 %v136_v63, 0.0  ;;  %v176_v18 = vmax.f32 %v137_v0, 0.0 }
  0x14   :  { %v177_v23 = vmax.f32 %v138_v4, 0.0  ;;  %v178_v24 = vmax.f32 %v139_v5, 0.0  ;;  %v179_v25 = vmax.f32 %v140_v6, 0.0  ;;  %v180_v26 = vmax.f32 %v141_v7, 0.0  ;;  %v46_v7 = vld [vmem:[%s599_s0 + $0x100] sm:$0xff] }
  0x15   :  { %212 = vst [vmem:[%s600_s3 + $0x40] sm:$0xff] %v173_v11  ;;  %213 = vst [vmem:[%s600_s3 + $0x48] sm:$0xff] %v174_v16  ;;  %v86_v27 = vmul.f32 %v292_v14, %v30_v1  ;;  %v87_v28 = vmul.f32 %v305_v19, %v31_v2  ;;  %v88_v29 = vmul.f32 %v288_v12, %v32_v3 }
  0x16   :  { %214 = vst [vmem:[%s600_s3 + $0x50] sm:$0xff] %v175_v17  ;;  %215 = vst [vmem:[%s600_s3 + $0x58] sm:$0xff] %v176_v18  ;;  %v89_v30 = vmul.f32 %v292_v14, %v33_v8  ;;  %v90_v31 = vmul.f32 %v305_v19, %v34_v9  ;;  %v91_v32 = vmul.f32 %v288_v12, %v35_v10  ;;  %v47_v8 = vld [vmem:[%s599_s0 + $0x108] sm:$0xff]  ;;  %v48_v17 = vld [vmem:[%s599_s0 + $0x110] sm:$0xff] }
  0x17   :  { %216 = vst [vmem:[%s600_s3 + $0x60] sm:$0xff] %v177_v23  ;;  %217 = vst [vmem:[%s600_s3 + $0x68] sm:$0xff] %v178_v24  ;;  %v92_v33 = vmul.f32 %v292_v14, %v36_v21  ;;  %v93_v34 = vmul.f32 %v305_v19, %v37_v22  ;;  %v142_v35 = vadd.f32 %v294_v15, %v86_v27  ;;  %v49_v18 = vld [vmem:[%s599_s0 + $0x118] sm:$0xff]  ;;  %v50_v21 = vld [vmem:[%s599_s0 + $0x120] sm:$0xff] }
  0x18   :  { %218 = vst [vmem:[%s600_s3 + $0x70] sm:$0xff] %v179_v25  ;;  %219 = vst [vmem:[%s600_s3 + $0x78] sm:$0xff] %v180_v26  ;;  %v143_v36 = vadd.f32 %v307_v20, %v87_v28  ;;  %v144_v37 = vadd.f32 %v290_v13, %v88_v29  ;;  %v145_v38 = vadd.f32 %v294_v15, %v89_v30  ;;  %v51_v26 = vld [vmem:[%s599_s0 + $0x128] sm:$0xff]  ;;  %v52_v27 = vld [vmem:[%s599_s0 + $0x130] sm:$0xff] }
  0x19   :  { %v146_v42 = vadd.f32 %v307_v20, %v90_v31  ;;  %v147_v43 = vadd.f32 %v290_v13, %v91_v32  ;;  %v148_v44 = vadd.f32 %v294_v15, %v92_v33  ;;  %v149_v45 = vadd.f32 %v307_v20, %v93_v34 }
  0x1a   :  { %v181_v49 = vmax.f32 %v142_v35, 0.0  ;;  %v182_v50 = vmax.f32 %v143_v36, 0.0  ;;  %v183_v51 = vmax.f32 %v144_v37, 0.0  ;;  %v184_v52 = vmax.f32 %v145_v38, 0.0 }
  0x1b   :  { %v185_v55 = vmax.f32 %v146_v42, 0.0  ;;  %v186_v56 = vmax.f32 %v147_v43, 0.0  ;;  %v187_v57 = vmax.f32 %v148_v44, 0.0  ;;  %v188_v58 = vmax.f32 %v149_v45, 0.0 }
  0x1c   :  { %220 = vst [vmem:[%s600_s3 + $0x80] sm:$0xff] %v181_v49  ;;  %221 = vst [vmem:[%s600_s3 + $0x88] sm:$0xff] %v182_v50  ;;  %v94_v59 = vmul.f32 %v288_v12, %v38_v39  ;;  %v95_v60 = vmul.f32 %v292_v14, %v39_v40  ;;  %v96_v61 = vmul.f32 %v305_v19, %v40_v41 }
  0x1d   :  { %222 = vst [vmem:[%s600_s3 + $0x90] sm:$0xff] %v183_v51  ;;  %223 = vst [vmem:[%s600_s3 + $0x98] sm:$0xff] %v184_v52  ;;  %v97_v62 = vmul.f32 %v288_v12, %v41_v46  ;;  %v98_v63 = vmul.f32 %v292_v14, %v42_v47  ;;  %v99_v0 = vmul.f32 %v305_v19, %v43_v48 }
  0x1e   :  { %224 = vst [vmem:[%s600_s3 + $0xa0] sm:$0xff] %v185_v55  ;;  %225 = vst [vmem:[%s600_s3 + $0xa8] sm:$0xff] %v186_v56  ;;  %v100_v1 = vmul.f32 %v288_v12, %v44_v53  ;;  %v101_v2 = vmul.f32 %v292_v14, %v45_v54  ;;  %v150_v3 = vadd.f32 %v290_v13, %v94_v59 }
  0x1f   :  { %226 = vst [vmem:[%s600_s3 + $0xb0] sm:$0xff] %v187_v57  ;;  %227 = vst [vmem:[%s600_s3 + $0xb8] sm:$0xff] %v188_v58  ;;  %v151_v4 = vadd.f32 %v294_v15, %v95_v60  ;;  %v152_v5 = vadd.f32 %v307_v20, %v96_v61  ;;  %v153_v6 = vadd.f32 %v290_v13, %v97_v62 }
  0x20   :  { %v154_v9 = vadd.f32 %v294_v15, %v98_v63  ;;  %v155_v10 = vadd.f32 %v307_v20, %v99_v0  ;;  %v156_v11 = vadd.f32 %v290_v13, %v100_v1  ;;  %v157_v16 = vadd.f32 %v294_v15, %v101_v2 }
  0x21   :  { %v189_v22 = vmax.f32 %v150_v3, 0.0  ;;  %v190_v23 = vmax.f32 %v151_v4, 0.0  ;;  %v191_v24 = vmax.f32 %v152_v5, 0.0  ;;  %v192_v25 = vmax.f32 %v153_v6, 0.0 }
  0x22   :  { %v193_v28 = vmax.f32 %v154_v9, 0.0  ;;  %v194_v29 = vmax.f32 %v155_v10, 0.0  ;;  %v195_v30 = vmax.f32 %v156_v11, 0.0  ;;  %v196_v31 = vmax.f32 %v157_v16, 0.0 }
  0x23   :  { %228 = vst [vmem:[%s600_s3 + $0xc0] sm:$0xff] %v189_v22  ;;  %229 = vst [vmem:[%s600_s3 + $0xc8] sm:$0xff] %v190_v23  ;;  %v102_v32 = vmul.f32 %v305_v19, %v46_v7  ;;  %v103_v33 = vmul.f32 %v288_v12, %v47_v8  ;;  %v104_v34 = vmul.f32 %v292_v14, %v48_v17 }
  0x24   :  { %230 = vst [vmem:[%s600_s3 + $0xd0] sm:$0xff] %v191_v24  ;;  %231 = vst [vmem:[%s600_s3 + $0xd8] sm:$0xff] %v192_v25  ;;  %v105_v35 = vmul.f32 %v305_v19, %v49_v18  ;;  %v106_v36 = vmul.f32 %v288_v12, %v50_v21  ;;  %v107_v37 = vmul.f32 %v292_v14, %v51_v26 }
  0x25   :  { %232 = vst [vmem:[%s600_s3 + $0xe0] sm:$0xff] %v193_v28  ;;  %233 = vst [vmem:[%s600_s3 + $0xe8] sm:$0xff] %v194_v29  ;;  %v108_v38 = vmul.f32 %v305_v19, %v52_v27  ;;  %v158_v39 = vadd.f32 %v307_v20, %v102_v32  ;;  %v159_v40 = vadd.f32 %v290_v13, %v103_v33 }
  0x26   :  { %234 = vst [vmem:[%s600_s3 + $0xf0] sm:$0xff] %v195_v30  ;;  %235 = vst [vmem:[%s600_s3 + $0xf8] sm:$0xff] %v196_v31  ;;  %v160_v41 = vadd.f32 %v294_v15, %v104_v34  ;;  %v161_v42 = vadd.f32 %v307_v20, %v105_v35  ;;  %v162_v43 = vadd.f32 %v290_v13, %v106_v36 }
  0x27   :  { %v163_v44 = vadd.f32 %v294_v15, %v107_v37  ;;  %v164_v45 = vadd.f32 %v307_v20, %v108_v38  ;;  %v197_v46 = vmax.f32 %v158_v39, 0.0  ;;  %v198_v12 = vmax.f32 %v159_v40, 0.0 }
  0x28   :  { %v199_v47 = vmax.f32 %v160_v41, 0.0  ;;  %v200_v14 = vmax.f32 %v161_v42, 0.0  ;;  %v201_v48 = vmax.f32 %v162_v43, 0.0 }
  0x29   :  { %v202_v19 = vmax.f32 %v163_v44, 0.0  ;;  %v203_v49 = vmax.f32 %v164_v45, 0.0  ;;  %236 = vst [vmem:[%s600_s3 + $0x100] sm:$0xff] %v197_v46  ;;  %237 = vst [vmem:[%s600_s3 + $0x108] sm:$0xff] %v198_v12 }
  0x2a   :  { %238 = vst [vmem:[%s600_s3 + $0x110] sm:$0xff] %v199_v47  ;;  %239 = vst [vmem:[%s600_s3 + $0x118] sm:$0xff] %v200_v14 }
  0x2b   :  { %240 = vst [vmem:[%s600_s3 + $0x120] sm:$0xff] %v201_v48  ;;  %241 = vst [vmem:[%s600_s3 + $0x128] sm:$0xff] %v202_v19 }
  0x2c   :  { %242 = vst [vmem:[%s600_s3 + $0x130] sm:$0xff] %v203_v49 }

// kernel: reduction_a_forward.17
= control target key start
LH: loop header
LB: loop body
LE: loop exit
PB: predicated region body
PF: predicated region fallthrough
CT: control target
= control target key end

     0   :  { %s134_s0 = inlined_call_operand.vmem [shape: f32[8,128], index: 0, kind: input, shape index: {}]   ;;  %s135_s1 = inlined_call_operand.vmem [shape: f32[8,128], index: 1, kind: input, shape index: {}]   ;;  %s136_s2 = inlined_call_operand.vmem [shape: f32[8,128], index: 2, kind: input, shape index: {}]   ;;  %s137_s3 = inlined_call_operand.vmem [shape: f32[8,128], index: 3, kind: input, shape index: {}]   ;;  %s138_s4 = inlined_call_operand.vmem [shape: f32[8,128], index: 4, kind: input, shape index: {}]   ;;  %s139_s5 = inlined_call_operand.vmem [shape: f32[8,128], index: 5, kind: input, shape index: {}]   ;;  %s140_s6 = inlined_call_operand.vmem [shape: f32[8,128], index: 6, kind: input, shape index: {}]   ;;  %s141_s7 = inlined_call_operand.vmem [shape: f32[8,128], index: 7, kind: input, shape index: {}]   ;;  %s142_s8 = inlined_call_operand.vmem [shape: f32[8,128], index: 8, kind: input, shape index: {}]   ;;  %s143_s9 = inlined_call_operand.vmem [shape: f32[8,128], index: 9, kind: output, shape index: {}]  }
   0x1   :  { %v32_v0 = vld [vmem:[%s134_s0] sm:$0xff] }
   0x2   :  { %v33_v1 = vld [vmem:[%s135_s1] sm:$0xff] }
   0x3   :  { %v35_v2 = vld [vmem:[%s136_s2] sm:$0xff]  ;;  %v34_v3 = vmax.f32 %v32_v0, %v33_v1 }
   0x4   :  { %v37_v4 = vld [vmem:[%s137_s3] sm:$0xff] }
   0x5   :  { %v36_v5 = vmax.f32 %v34_v3, %v35_v2  ;;  %v39_v6 = vld [vmem:[%s138_s4] sm:$0xff] }
   0x6   :  { %v41_v8 = vld [vmem:[%s139_s5] sm:$0xff] }
   0x7   :  { %v38_v7 = vmax.f32 %v36_v5, %v37_v4  ;;  %v43_v10 = vld [vmem:[%s140_s6] sm:$0xff] }
   0x8   :  { %v45_v12 = vld [vmem:[%s141_s7] sm:$0xff] }
   0x9   :  { %v40_v9 = vmax.f32 %v38_v7, %v39_v6  ;;  %v47_v14 = vld [vmem:[%s142_s8] sm:$0xff] }
   0xb   :  { %v42_v11 = vmax.f32 %v40_v9, %v41_v8 }
   0xd   :  { %v44_v13 = vmax.f32 %v42_v11, %v43_v10 }
   0xf   :  { %v46_v15 = vmax.f32 %v44_v13, %v45_v12 }
  0x11   :  { %v48_v16 = vmax.f32 %v46_v15, %v47_v14 }
  0x13   :  { %49 = vst [vmem:[%s143_s9] sm:$0xff] %v48_v16 }

</bundles_post_ra>
